<compile_context>
chip_gen: v6e
topology: v6e:2x2x1
jax: 0.10.0
libtpu: 0.0.40
codegen_flags: <defaults>
</compile_context>

<pallas_src>
import functools

import jax
import jax.numpy as jnp
from jax.experimental import pallas as pl
from jax.experimental.pallas import tpu as pltpu

D_IN = 50
D_H = 512
D_OUT = 12001


def _round_up(x, m):
    return ((x + m - 1) // m) * m


def _hidden_kernel(x_ref, w1_ref, b1_ref, w2_ref, b2_ref, h_ref):
    # h = relu(relu(x @ w1 + b1) @ w2 + b2), stored in bf16.
    xb = x_ref[...].astype(jnp.bfloat16)
    h1 = jnp.dot(xb, w1_ref[...], preferred_element_type=jnp.float32) + b1_ref[...]
    h1 = jnp.maximum(h1, 0.0).astype(jnp.bfloat16)
    h2 = jnp.dot(h1, w2_ref[...], preferred_element_type=jnp.float32) + b2_ref[...]
    h_ref[...] = jnp.maximum(h2, 0.0).astype(jnp.bfloat16)


def _out_kernel(h_ref, w3_ref, b3_ref, o_ref):
    # y = h @ w3 + b3 for one (row_block, out_block) tile. Grid is
    # (out_blocks, row_blocks) with the row axis innermost, so w3_ref's block
    # index only changes on the outer axis -> its DMA is not re-issued across
    # row blocks (w3 streams from HBM exactly once per call).
    y = jnp.dot(h_ref[...], w3_ref[...], preferred_element_type=jnp.float32)
    o_ref[...] = (y + b3_ref[...]).astype(o_ref.dtype)


def prepare_params(params, *, tile_out=4096):
    """One-time prep outside the per-call path: cast weights to bf16, reshape
    biases to (1, F) rows, pad w3/b3 columns to a multiple of tile_out and
    pre-tile w3 into (num_out_blocks, 512, tile_out) contiguous tiles."""
    w1, b1, w2, b2, w3, b3 = params
    out_pad = _round_up(D_OUT, tile_out)
    num_out_blocks = out_pad // tile_out

    w3p = jnp.pad(w3, ((0, 0), (0, out_pad - D_OUT))).astype(jnp.bfloat16)
    w3t = w3p.reshape(D_H, num_out_blocks, tile_out).transpose(1, 0, 2)  # contiguous per tile
    b3p = jnp.pad(b3, ((0, out_pad - D_OUT),)).reshape(1, out_pad).astype(jnp.float32)

    return (
        w1.astype(jnp.bfloat16),
        b1.reshape(1, D_H).astype(jnp.float32),
        w2.astype(jnp.bfloat16),
        b2.reshape(1, D_H).astype(jnp.float32),
        w3t,
        b3p,
    )


def mlp_pallas(x, prepared, *, multi_block_tile_n=256, single_block_max=512):
    """x: (B, T, D_IN) float32 -> (B, T, D_OUT) float32."""
    w1, b1, w2, b2, w3t, b3p = prepared
    num_out_blocks, d_h, tile_out = w3t.shape
    assert d_h == D_H and tile_out % 128 == 0
    assert num_out_blocks == (D_OUT + tile_out - 1) // tile_out

    B, T, d_in = x.shape
    assert d_in == D_IN
    n = B * T
    x2 = x.reshape(n, D_IN)

    # Row tile: one block whenever it fits comfortably in VMEM (<= 512 rows),
    # else 256. Multiple of 16 for bf16 sublane packing.
    rounded = _round_up(n, 16)
    tile_n = rounded if rounded <= single_block_max else multi_block_tile_n
    n_pad = _round_up(n, tile_n)
    if n_pad != n:
        x2 = jnp.pad(x2, ((0, n_pad - n), (0, 0)))
    num_row_blocks = n_pad // tile_n

    # ---- Kernel A: hidden layers -> h (n_pad, 512) bf16 (tiny, ~1 KiB/row) ----
    h = pl.pallas_call(
        _hidden_kernel,
        out_shape=jax.ShapeDtypeStruct((n_pad, D_H), jnp.bfloat16),
        grid_spec=pltpu.PrefetchScalarGridSpec(
            num_scalar_prefetch=0,
            grid=(num_row_blocks,),
            in_specs=[
                pl.BlockSpec((tile_n, D_IN), lambda i: (i, 0)),   # x rows
                pl.BlockSpec((D_IN, D_H), lambda i: (0, 0)),      # w1 (bf16)
                pl.BlockSpec((1, D_H), lambda i: (0, 0)),         # b1
                pl.BlockSpec((D_H, D_H), lambda i: (0, 0)),       # w2 (bf16)
                pl.BlockSpec((1, D_H), lambda i: (0, 0)),         # b2
            ],
            out_specs=pl.BlockSpec((tile_n, D_H), lambda i: (i, 0)),
        ),
        compiler_params=pltpu.CompilerParams(
            dimension_semantics=("parallel",),
        ),
    )(x2, w1, b1, w2, b2)

    # ---- Kernel B: y = h @ w3 + b3, unpadded (n, D_OUT) output ----
    # Output array is exactly (n, D_OUT); boundary blocks are partial and their
    # out-of-bounds writes are dropped, so no post-kernel slice copy is needed.
    out = pl.pallas_call(
        _out_kernel,
        out_shape=jax.ShapeDtypeStruct((n, D_OUT), jnp.float32),
        grid_spec=pltpu.PrefetchScalarGridSpec(
            num_scalar_prefetch=0,
            grid=(num_out_blocks, num_row_blocks),        # out axis OUTER, rows INNER
            in_specs=[
                pl.BlockSpec((tile_n, D_H), lambda j, i: (i, 0)),           # h rows (bf16)
                pl.BlockSpec((None, D_H, tile_out), lambda j, i: (j, 0, 0)),  # w3 tile (bf16)
                pl.BlockSpec((1, tile_out), lambda j, i: (0, j)),           # b3 tile
            ],
            out_specs=pl.BlockSpec((tile_n, tile_out), lambda j, i: (i, j)),
        ),
        compiler_params=pltpu.CompilerParams(
            dimension_semantics=("parallel", "parallel"),  # v7x: split out-tiles across TCs
            vmem_limit_bytes=32 * 1024 * 1024,
        ),
    )(h, w3t, b3p)

    return out.reshape(B, T, D_OUT)


def init_params(key):
    """Deterministic init mirroring torch.nn.Linear default U(-1/sqrt(fan_in), ...)."""
    ks = jax.random.split(key, 6)

    def lin(kw, kb, fan_in, fan_out):
        bound = 1.0 / jnp.sqrt(fan_in)
        w = jax.random.uniform(kw, (fan_in, fan_out), jnp.float32, -bound, bound)
        b = jax.random.uniform(kb, (fan_out,), jnp.float32, -bound, bound)
        return w, b

    w1, b1 = lin(ks[0], ks[1], D_IN, D_H)
    w2, b2 = lin(ks[2], ks[3], D_H, D_H)
    w3, b3 = lin(ks[4], ks[5], D_H, D_OUT)
    return (w1, b1, w2, b2, w3, b3)


def mlp_ref_bf16(x, params):
    """Reference mirroring the kernel's numerics: bf16 weights/activations,
    f32 accumulation and bias add."""
    w1, b1, w2, b2, w3, b3 = params
    w1b, w2b, w3b = (w.astype(jnp.bfloat16) for w in (w1, w2, w3))
    h = jnp.dot(x.astype(jnp.bfloat16), w1b, preferred_element_type=jnp.float32) + b1
    h = jnp.maximum(h, 0.0)
    h = jnp.dot(h.astype(jnp.bfloat16), w2b, preferred_element_type=jnp.float32) + b2
    h = jnp.maximum(h, 0.0)
    return jnp.dot(h.astype(jnp.bfloat16), w3b, preferred_element_type=jnp.float32) + b3


if __name__ == "__main__":
    key = jax.random.PRNGKey(0)
    k_x, k_x2, k_p = jax.random.split(key, 3)

    params = init_params(k_p)
    prepared = prepare_params(params, tile_out=4096)   # padding/casts/tiling done ONCE

    run = jax.jit(functools.partial(mlp_pallas))

    # Small shape consistent with the module: (B, T, 50) with features last.
    B, T = 2, 8
    x = jax.random.normal(k_x, (B, T, D_IN), dtype=jnp.float32)
    y = run(x, prepared)
    jax.block_until_ready(y)
    y_ref = mlp_ref_bf16(x, params)
    assert y.shape == (B, T, D_OUT), y.shape
    assert jnp.allclose(y, y_ref, atol=2e-2, rtol=2e-2), "mismatch vs reference"

    # Second shape: N=280 rows -> single 288-row block, ragged output rows.
    B2, T2 = 4, 70
    x2 = jax.random.normal(k_x2, (B2, T2, D_IN), dtype=jnp.float32)
    y2 = run(x2, prepared)
    jax.block_until_ready(y2)
    y2_ref = mlp_ref_bf16(x2, params)
    assert y2.shape == (B2, T2, D_OUT), y2.shape
    assert jnp.allclose(y2, y2_ref, atol=2e-2, rtol=2e-2), "mismatch vs reference (N=280)"

    print("KERNEL_OK")
</pallas_src>

<mosaic_0001>
module attributes {stable_mosaic.version = 11 : i64} {
  func.func @_out_kernel(%arg0: i32, %arg1: i32, %arg2: memref<16x512xbf16, #tpu.memory_space<vmem>>, %arg3: memref<1x512x4096xbf16, #tpu.memory_space<vmem>>, %arg4: memref<1x4096xf32, #tpu.memory_space<vmem>>, %arg5: memref<16x4096xf32, #tpu.memory_space<vmem>>) attributes {dimension_semantics = [#tpu.dimension_semantics<parallel>, #tpu.dimension_semantics<parallel>], iteration_bounds = array<i64: 3, 1>, scalar_prefetch = 0 : i64, scratch_operands = 0 : i64, tpu.core_type = #tpu.core_type<tc>, window_params = [{transform_indices = @transform_0, window_bounds = array<i64: 16, 512>}, {transform_indices = @transform_1, window_bounds = array<i64: 1, 512, 4096>}, {transform_indices = @transform_2, window_bounds = array<i64: 1, 4096>}, {transform_indices = @transform_3, window_bounds = array<i64: 16, 4096>}]} {
    %c0 = arith.constant 0 : index
    %c0_0 = arith.constant 0 : index
    %0 = vector.load %arg2[%c0, %c0_0] : memref<16x512xbf16, #tpu.memory_space<vmem>>, vector<16x512xbf16>
    %c0_1 = arith.constant 0 : index
    %c0_2 = arith.constant 0 : index
    %c0_3 = arith.constant 0 : index
    %1 = vector.load %arg3[%c0_1, %c0_2, %c0_3] : memref<1x512x4096xbf16, #tpu.memory_space<vmem>>, vector<1x512x4096xbf16>
    %2 = vector.shape_cast %1 : vector<1x512x4096xbf16> to vector<512x4096xbf16>
    %cst = arith.constant dense<0.000000e+00> : vector<16x4096xf32>
    %3 = tpu.matmul %0, %2, %cst {dimension_numbers = #tpu.dot_dimension_numbers<[1], [0], [0], [1], [0, 0, 1, 1], [], []>} : vector<16x512xbf16>, vector<512x4096xbf16>, vector<16x4096xf32> -> vector<16x4096xf32>
    %c0_4 = arith.constant 0 : index
    %c0_5 = arith.constant 0 : index
    %4 = vector.load %arg4[%c0_4, %c0_5] : memref<1x4096xf32, #tpu.memory_space<vmem>>, vector<1x4096xf32>
    %5 = vector.broadcast %4 : vector<1x4096xf32> to vector<16x4096xf32>
    %6 = arith.addf %3, %5 : vector<16x4096xf32>
    %c0_6 = arith.constant 0 : index
    %c0_7 = arith.constant 0 : index
    %7 = vector.load %arg5[%c0_6, %c0_7] : memref<16x4096xf32, #tpu.memory_space<vmem>>, vector<16x4096xf32>
    tpu.vector_store %arg5[%c0_6, %c0_7], %6 {strides = array<i32>} : memref<16x4096xf32, #tpu.memory_space<vmem>>, vector<16x4096xf32>,
    return
  }
  func.func @transform_0(%arg0: i32, %arg1: i32) -> (i32, i32) {
    %c0_i32 = arith.constant 0 : i32
    %c0_i32_0 = arith.constant 0 : i32
    return %arg1, %c0_i32 : i32, i32
  }
  func.func @transform_1(%arg0: i32, %arg1: i32) -> (i32, i32, i32) {
    %c0_i32 = arith.constant 0 : i32
    %c0_i32_0 = arith.constant 0 : i32
    %c0_i32_1 = arith.constant 0 : i32
    return %arg0, %c0_i32, %c0_i32_0 : i32, i32, i32
  }
  func.func @transform_2(%arg0: i32, %arg1: i32) -> (i32, i32) {
    %c0_i32 = arith.constant 0 : i32
    %c0_i32_0 = arith.constant 0 : i32
    return %c0_i32, %arg0 : i32, i32
  }
  func.func @transform_3(%arg0: i32, %arg1: i32) -> (i32, i32) {
    %c0_i32 = arith.constant 0 : i32
    return %arg1, %arg0 : i32, i32
  }
}

module attributes {stable_mosaic.version = 11 : i64} {
  func.func @_hidden_kernel(%arg0: i32, %arg1: memref<16x50xf32, #tpu.memory_space<vmem>>, %arg2: memref<50x512xbf16, #tpu.memory_space<vmem>>, %arg3: memref<1x512xf32, #tpu.memory_space<vmem>>, %arg4: memref<512x512xbf16, #tpu.memory_space<vmem>>, %arg5: memref<1x512xf32, #tpu.memory_space<vmem>>, %arg6: memref<16x512xbf16, #tpu.memory_space<vmem>>) attributes {dimension_semantics = [#tpu.dimension_semantics<parallel>], iteration_bounds = array<i64: 1>, scalar_prefetch = 0 : i64, scratch_operands = 0 : i64, tpu.core_type = #tpu.core_type<tc>, window_params = [{transform_indices = @transform_0, window_bounds = array<i64: 16, 50>}, {pipeline_mode = #tpu.pipeline_mode<synchronous>, transform_indices = @transform_1, window_bounds = array<i64: 50, 512>}, {pipeline_mode = #tpu.pipeline_mode<synchronous>, transform_indices = @transform_2, window_bounds = array<i64: 1, 512>}, {pipeline_mode = #tpu.pipeline_mode<synchronous>, transform_indices = @transform_3, window_bounds = array<i64: 512, 512>}, {pipeline_mode = #tpu.pipeline_mode<synchronous>, transform_indices = @transform_4, window_bounds = array<i64: 1, 512>}, {transform_indices = @transform_5, window_bounds = array<i64: 16, 512>}]} {
    %c0 = arith.constant 0 : index
    %c0_0 = arith.constant 0 : index
    %0 = vector.load %arg1[%c0, %c0_0] : memref<16x50xf32, #tpu.memory_space<vmem>>, vector<16x50xf32>
    %1 = arith.truncf %0 : vector<16x50xf32> to vector<16x50xbf16>
    %c0_1 = arith.constant 0 : index
    %c0_2 = arith.constant 0 : index
    %2 = vector.load %arg2[%c0_1, %c0_2] : memref<50x512xbf16, #tpu.memory_space<vmem>>, vector<50x512xbf16>
    %cst = arith.constant dense<0.000000e+00> : vector<16x512xf32>
    %3 = tpu.matmul %1, %2, %cst {dimension_numbers = #tpu.dot_dimension_numbers<[1], [0], [0], [1], [0, 0, 1, 1], [], []>} : vector<16x50xbf16>, vector<50x512xbf16>, vector<16x512xf32> -> vector<16x512xf32>
    %c0_3 = arith.constant 0 : index
    %c0_4 = arith.constant 0 : index
    %4 = vector.load %arg3[%c0_3, %c0_4] : memref<1x512xf32, #tpu.memory_space<vmem>>, vector<1x512xf32>
    %5 = vector.broadcast %4 : vector<1x512xf32> to vector<16x512xf32>
    %6 = arith.addf %3, %5 : vector<16x512xf32>
    %cst_5 = arith.constant 0.000000e+00 : f32
    %7 = vector.broadcast %cst_5 : f32 to vector<16x512xf32>
    %8 = arith.maximumf %6, %7 : vector<16x512xf32>
    %9 = arith.truncf %8 : vector<16x512xf32> to vector<16x512xbf16>
    %c0_6 = arith.constant 0 : index
    %c0_7 = arith.constant 0 : index
    %10 = vector.load %arg4[%c0_6, %c0_7] : memref<512x512xbf16, #tpu.memory_space<vmem>>, vector<512x512xbf16>
    %cst_8 = arith.constant dense<0.000000e+00> : vector<16x512xf32>
    %11 = tpu.matmul %9, %10, %cst_8 {dimension_numbers = #tpu.dot_dimension_numbers<[1], [0], [0], [1], [0, 0, 1, 1], [], []>} : vector<16x512xbf16>, vector<512x512xbf16>, vector<16x512xf32> -> vector<16x512xf32>
    %c0_9 = arith.constant 0 : index
    %c0_10 = arith.constant 0 : index
    %12 = vector.load %arg5[%c0_9, %c0_10] : memref<1x512xf32, #tpu.memory_space<vmem>>, vector<1x512xf32>
    %13 = vector.broadcast %12 : vector<1x512xf32> to vector<16x512xf32>
    %14 = arith.addf %11, %13 : vector<16x512xf32>
    %cst_11 = arith.constant 0.000000e+00 : f32
    %15 = vector.broadcast %cst_11 : f32 to vector<16x512xf32>
    %16 = arith.maximumf %14, %15 : vector<16x512xf32>
    %17 = arith.truncf %16 : vector<16x512xf32> to vector<16x512xbf16>
    %c0_12 = arith.constant 0 : index
    %c0_13 = arith.constant 0 : index
    %18 = vector.load %arg6[%c0_12, %c0_13] : memref<16x512xbf16, #tpu.memory_space<vmem>>, vector<16x512xbf16>
    tpu.vector_store %arg6[%c0_12, %c0_13], %17 {strides = array<i32>} : memref<16x512xbf16, #tpu.memory_space<vmem>>, vector<16x512xbf16>,
    return
  }
  func.func @transform_0(%arg0: i32) -> (i32, i32) {
    %c0_i32 = arith.constant 0 : i32
    %c0_i32_0 = arith.constant 0 : i32
    return %arg0, %c0_i32 : i32, i32
  }
  func.func @transform_1(%arg0: i32) -> (i32, i32) {
    %c0_i32 = arith.constant 0 : i32
    %c0_i32_0 = arith.constant 0 : i32
    %c0_i32_1 = arith.constant 0 : i32
    return %c0_i32, %c0_i32_0 : i32, i32
  }
  func.func @transform_2(%arg0: i32) -> (i32, i32) {
    %c0_i32 = arith.constant 0 : i32
    %c0_i32_0 = arith.constant 0 : i32
    %c0_i32_1 = arith.constant 0 : i32
    return %c0_i32, %c0_i32_0 : i32, i32
  }
  func.func @transform_3(%arg0: i32) -> (i32, i32) {
    %c0_i32 = arith.constant 0 : i32
    %c0_i32_0 = arith.constant 0 : i32
    %c0_i32_1 = arith.constant 0 : i32
    return %c0_i32, %c0_i32_0 : i32, i32
  }
  func.func @transform_4(%arg0: i32) -> (i32, i32) {
    %c0_i32 = arith.constant 0 : i32
    %c0_i32_0 = arith.constant 0 : i32
    %c0_i32_1 = arith.constant 0 : i32
    return %c0_i32, %c0_i32_0 : i32, i32
  }
  func.func @transform_5(%arg0: i32) -> (i32, i32) {
    %c0_i32 = arith.constant 0 : i32
    %c0_i32_0 = arith.constant 0 : i32
    return %arg0, %c0_i32 : i32, i32
  }
}

</mosaic_0001>

<bundles_post_ra>
// kernel: mlp_pallas.2
= control target key start
LH: loop header
LB: loop body
LE: loop exit
PB: predicated region body
PF: predicated region fallthrough
CT: control target
= control target key end

     0   :  { %10 = vsyncpa [#allocation3], 0  ;;  %s1897_s0 = inlined_call_operand.hbm [shape: f32[16,50], index: 0, kind: input, shape index: {}]   ;;  %s1898_s1 = inlined_call_operand.hbm [shape: bf16[50,512], index: 1, kind: input, shape index: {}]   ;;  %s1899_s2 = inlined_call_operand.hbm [shape: f32[1,512], index: 2, kind: input, shape index: {}]   ;;  %s1900_s3 = inlined_call_operand.hbm [shape: bf16[512,512], index: 3, kind: input, shape index: {}]   ;;  %s1901_s4 = inlined_call_operand.hbm [shape: f32[1,512], index: 4, kind: input, shape index: {}]   ;;  %s1902_s5 = inlined_call_operand.vmem [shape: bf16[16,512], index: 5, kind: output, shape index: {}]  }
   0x1   :  { %11 = vsyncpa [#allocation5], 0 }
   0x2   :  { %12 = vsyncpa [#allocation8], 0  ;;  %s1800_s18 = smov [#allocation4]  }
   0x3   :  { %s30_s19 = sshll.u32 %s1800_s18, 4  ;;  %s31_s19 = int_to_ptr.vmem [resolvable:$true] %s30_s19 }
   0x4   :  { %s1702_s20 = scalar_lea.vmem %s31_s19, 1792  ;;  %p1707_p1 = scmp.lt.s32.totalorder %s31_s19, %s31_s19 }
   0x5   :  { %p1703_p0 = scmp.ne.s32.totalorder %s31_s19, %s1702_s20  ;;  %p1708_p2 = scmp.lt.s32.totalorder %s1702_s20, %s1702_s20 }
   0x7   :  { %p1709_p3 = por %p1708_p2, %p1707_p1 }
   0x9   :  { %p1710_p4 = pnand %p1709_p3, %p1703_p0 }
   0xb   :  { %1713 = shalt.err (!%p1710_p4)
}
   0xc   :  { %s1801_s21 = smov 256   ;;  %s1802_s22 = smov 16  }
   0xd   :  { %36 = dma.hbm_to_vmem [thread:$0]  %s1898_s1, 1792, %s31_s19, [#allocation5], %s1801_s21, %s1801_s21, %s1802_s22  }
   0xe   :  { %s1803_s25 = smov [#allocation7]   ;;  %s1804_s27 = smov [#allocation2]  }
   0xf   :  { %s52_s26 = sshll.u32 %s1803_s25, 4  ;;  %s18_s28 = sshll.u32 %s1804_s27, 4  ;;  %s53_s26 = int_to_ptr.vmem [resolvable:$true] %s52_s26  ;;  %s19_s28 = int_to_ptr.vmem [resolvable:$true] %s18_s28 }
  0x10   :  { %s1722_s29 = scalar_lea.vmem %s53_s26, 16384  ;;  %p1727_p6 = scmp.lt.s32.totalorder %s53_s26, %s53_s26 }
  0x11   :  { %p1723_p5 = scmp.ne.s32.totalorder %s53_s26, %s1722_s29  ;;  %p1728_p7 = scmp.lt.s32.totalorder %s1722_s29, %s1722_s29 }
  0x13   :  { %p1729_p8 = por %p1728_p7, %p1727_p6 }
  0x15   :  { %p1730_p9 = pnand %p1729_p8, %p1723_p5 }
  0x17   :  { %1733 = shalt.err (!%p1730_p9)
}
  0x18   :  { %58 = dma.hbm_to_vmem [thread:$0]  %s1900_s3, 16384, %s53_s26, [#allocation8], %s1801_s21, %s1801_s21, %s1802_s22  }
  0x19   :  { %s1742_s7 = scalar_lea.vmem %s19_s28, 256  ;;  %p1747_p11 = scmp.lt.s32.totalorder %s19_s28, %s19_s28 }
  0x1a   :  { %p1743_p10 = scmp.ne.s32.totalorder %s19_s28, %s1742_s7  ;;  %p1748_p12 = scmp.lt.s32.totalorder %s1742_s7, %s1742_s7 }
  0x1c   :  { %p1749_p13 = por %p1748_p12, %p1747_p11 }
  0x1e   :  { %p1750_p0 = pnand %p1749_p13, %p1743_p10 }
  0x20   :  { %1753 = shalt.err (!%p1750_p0)
}
  0x21   :  { %s1805_s1 = smov 128   ;;  %s1806_s8 = smov 8  }
  0x22   :  { %24 = dma.hbm_to_vmem [thread:$0]  %s1897_s0, 256, %s19_s28, [#allocation3], %s1805_s1, %s1805_s1, %s1806_s8  }
  0x23   :  { %s1807_s11 = smov [#allocation6]   ;;  %s1808_s13 = smov [#allocation9]  }
  0x24   :  { %s43_s12 = sshll.u32 %s1807_s11, 4  ;;  %s65_s14 = sshll.u32 %s1808_s13, 4  ;;  %s44_s12 = int_to_ptr.vmem [resolvable:$true] %s43_s12  ;;  %s66_s14 = int_to_ptr.vmem [resolvable:$true] %s65_s14 }
  0x25   :  { %s1762_s3 = scalar_lea.vmem %s44_s12, 64  ;;  %p1767_p2 = scmp.lt.s32.totalorder %s44_s12, %s44_s12 }
  0x26   :  { %p1763_p1 = scmp.ne.s32.totalorder %s44_s12, %s1762_s3  ;;  %p1768_p3 = scmp.lt.s32.totalorder %s1762_s3, %s1762_s3 }
  0x28   :  { %p1769_p4 = por %p1768_p3, %p1767_p2 }
  0x2a   :  { %p1770_p5 = pnand %p1769_p4, %p1763_p1 }
  0x2c   :  { %1773 = shalt.err (!%p1770_p5)
}
  0x2d   :  { %46 = dma.hbm_to_vmem [thread:$0]  %s1899_s2, 64, %s44_s12, [#allocation5]  }
  0x2e   :  { %s1782_s17 = scalar_lea.vmem %s66_s14, 64  ;;  %p1787_p7 = scmp.lt.s32.totalorder %s66_s14, %s66_s14 }
  0x2f   :  { %p1783_p6 = scmp.ne.s32.totalorder %s66_s14, %s1782_s17  ;;  %p1788_p8 = scmp.lt.s32.totalorder %s1782_s17, %s1782_s17 }
  0x31   :  { %p1789_p9 = por %p1788_p8, %p1787_p7 }
  0x33   :  { %p1790_p10 = pnand %p1789_p9, %p1783_p6 }
  0x35   :  { %1793 = shalt.err (!%p1790_p10)
}
  0x36   :  { %68 = dma.hbm_to_vmem [thread:$0]  %s1901_s4, 64, %s66_s14, [#allocation8]  }
  0x37   :  { %1794 = dma.done.wait [#allocation3], 256  }
  0x38   :  { %1795 = vsyncadd [#allocation3], 4294967040 }
  0x39   :  { %1796 = dma.done.wait [#allocation5], 1856  }
  0x3a   :  { %1797 = vsyncadd [#allocation5], 4294965440 }
  0x3b   :  { %1798 = dma.done.wait [#allocation8], 16448  }
  0x3c   :  { %1799 = vsyncadd [#allocation8], 4294950848  ;;  %v1809_v0 = vmov 0   ;;  %v100_v1 = vld [vmem:[#allocation4 + $0x60] sm:$0x11]  ;;  %vm198_vm0 = vcmask 1040384  }
  0x3d   :  { %243 = vmatprep.mubr.bf16.mxu0 %v1809_v0  ;;  %286 = vmatprep.mubr.bf16.mxu1 %v1809_v0  ;;  %v101_v2 = vld [vmem:[#allocation4 + $0x68] sm:$0x11]  ;;  %v1327_v3 = vcombine.high %v100_v1, %v100_v1  ;;  %v1326_v5 = vcombine.low %v100_v1, %v100_v1  ;;  %v1484_v7 = vld [vmem:[#allocation4 + $0x44] ss:$16 sps:$4 sm:$0xff]   ;;  %v1488_v11 = vld [vmem:[#allocation4 + $0x40] ss:$16 sps:$4 sm:$0xff]  }
  0x3e   :  { %v1329_v4 = vcombine.high %v101_v2, %v101_v2  ;;  %v1328_v6 = vcombine.low %v101_v2, %v101_v2  ;;  %v1486_v8 = vld [vmem:[#allocation4 + $0x4c] ss:$16 sps:$4 sm:$0xff]   ;;  %v1489_v12 = vld [vmem:[#allocation4 + $0x48] ss:$16 sps:$4 sm:$0xff]   ;;  %v1490_v13 = vld [vmem:[#allocation4 + $0x24] ss:$16 sps:$4 sm:$0xff]  }
  0x3f   :  { %1330 = vmatprep.subr.msk.bf16.mxu0 %vm198_vm0, %v1327_v3  ;;  %v200_v9 = vsel %vm198_vm0, %v1326_v5, 0  ;;  %v1492_v14 = vld [vmem:[#allocation4 + $0x2c] ss:$16 sps:$4 sm:$0xff]   ;;  %v1494_v15 = vld [vmem:[#allocation4 + $0x20] ss:$16 sps:$4 sm:$0xff]   ;;  %vm194_vm1 = vcmask 408576  }
  0x40   :  { %1332 = vmatprep.subr.msk.bf16.mxu1 %vm198_vm0, %v1329_v4  ;;  %v206_v10 = vsel %vm198_vm0, %v1328_v6, 0  ;;  %220 = vmatpush1.bf16.msra.mxu0 %v200_v9  ;;  %v1495_v16 = vld [vmem:[#allocation4 + $0x28] ss:$16 sps:$4 sm:$0xff]   ;;  %v1496_v17 = vld [vmem:[#allocation4 + $0x4] ss:$16 sps:$4 sm:$0xff]  }
  0x41   :  { %263 = vmatpush1.bf16.msra.mxu1 %v206_v10  ;;  %221 = vmatprep.subr.bf16.mxu0 %v1484_v7  ;;  %v1498_v18 = vld [vmem:[#allocation4 + $0xc] ss:$16 sps:$4 sm:$0xff]   ;;  %v1500_v19 = vld [vmem:[#allocation4] ss:$16 sps:$4 sm:$0xff]   ;;  %v1501_v20 = vld [vmem:[#allocation4 + $0x8] ss:$16 sps:$4 sm:$0xff]  }
  0x42   :  { %264 = vmatprep.subr.bf16.mxu1 %v1486_v8  ;;  %v85_v21 = vld [vmem:[#allocation2] sm:$0xff]  ;;  %v86_v22 = vld [vmem:[#allocation2 + $0x8] sm:$0xff] }
  0x43   :  { %v1504_v23 = vld [vmem:[#allocation7 + $0xe4] ss:$16 sps:$4 sm:$0xff]   ;;  %v87_v25 = vpack.c.bf16 %v86_v22, %v85_v21  ;;  %v1502_v26 = vld [vmem:[#allocation7 + $0xe0] ss:$16 sps:$4 sm:$0xff]  }
  0x44   :  { %222 = vmatpush1.bf16.msra.mxu0 %v1488_v11  ;;  %v1507_v24 = vld [vmem:[#allocation7 + $0x2e4] ss:$16 sps:$4 sm:$0xff]   ;;  %v1505_v27 = vld [vmem:[#allocation7 + $0x2e0] ss:$16 sps:$4 sm:$0xff]  }
  0x45   :  { %265 = vmatpush1.bf16.msra.mxu1 %v1489_v12  ;;  %223 = vmatprep.subr.bf16.mxu0 %v1490_v13  ;;  %v1510_v28 = vld [vmem:[#allocation7 + $0xc4] ss:$16 sps:$4 sm:$0xff]   ;;  %v1508_v30 = vld [vmem:[#allocation7 + $0xc0] ss:$16 sps:$4 sm:$0xff]  }
  0x46   :  { %266 = vmatprep.subr.bf16.mxu1 %v1492_v14  ;;  %v1513_v29 = vld [vmem:[#allocation7 + $0x2c4] ss:$16 sps:$4 sm:$0xff]   ;;  %v1511_v31 = vld [vmem:[#allocation7 + $0x2c0] ss:$16 sps:$4 sm:$0xff]  }
  0x47   :  { %v1516_v32 = vld [vmem:[#allocation7 + $0xa4] ss:$16 sps:$4 sm:$0xff]   ;;  %v1514_v34 = vld [vmem:[#allocation7 + $0xa0] ss:$16 sps:$4 sm:$0xff]  }
  0x48   :  { %224 = vmatpush1.bf16.msra.mxu0 %v1494_v15  ;;  %v1519_v33 = vld [vmem:[#allocation7 + $0x2a4] ss:$16 sps:$4 sm:$0xff]   ;;  %v1517_v35 = vld [vmem:[#allocation7 + $0x2a0] ss:$16 sps:$4 sm:$0xff]  }
  0x49   :  { %267 = vmatpush1.bf16.msra.mxu1 %v1495_v16  ;;  %225 = vmatprep.subr.bf16.mxu0 %v1496_v17  ;;  %v1522_v36 = vld [vmem:[#allocation7 + $0x84] ss:$16 sps:$4 sm:$0xff]   ;;  %v1520_v38 = vld [vmem:[#allocation7 + $0x80] ss:$16 sps:$4 sm:$0xff]  }
  0x4a   :  { %268 = vmatprep.subr.bf16.mxu1 %v1498_v18  ;;  %v1525_v37 = vld [vmem:[#allocation7 + $0x284] ss:$16 sps:$4 sm:$0xff]   ;;  %v1523_v39 = vld [vmem:[#allocation7 + $0x280] ss:$16 sps:$4 sm:$0xff]  }
  0x4b   :  { %v1528_v40 = vld [vmem:[#allocation7 + $0x64] ss:$16 sps:$4 sm:$0xff]   ;;  %v1526_v42 = vld [vmem:[#allocation7 + $0x60] ss:$16 sps:$4 sm:$0xff]  }
  0x4c   :  { %226 = vmatpush1.bf16.msra.mxu0 %v1500_v19  ;;  %v1531_v41 = vld [vmem:[#allocation7 + $0x264] ss:$16 sps:$4 sm:$0xff]   ;;  %v1529_v43 = vld [vmem:[#allocation7 + $0x260] ss:$16 sps:$4 sm:$0xff]  }
  0x4d   :  { %269 = vmatpush1.bf16.msra.mxu1 %v1501_v20  ;;  %1099 = vmatprep.subr.bf16.mxu0 %v1504_v23  ;;  %v1534_v44 = vld [vmem:[#allocation7 + $0x44] ss:$16 sps:$4 sm:$0xff]   ;;  %v1532_v46 = vld [vmem:[#allocation7 + $0x40] ss:$16 sps:$4 sm:$0xff]  }
  0x4e   :  { %1142 = vmatprep.subr.bf16.mxu1 %v1507_v24  ;;  %v1537_v45 = vld [vmem:[#allocation7 + $0x244] ss:$16 sps:$4 sm:$0xff]   ;;  %v1535_v47 = vld [vmem:[#allocation7 + $0x240] ss:$16 sps:$4 sm:$0xff]   ;;  %v1600_v24 = vld [vmem:[#allocation7 + $0xec] ss:$16 sps:$4 sm:$0xff]  }
  0x4f   :  { %1331 = vmatmul.mubr.msk.bf16.vlgmr.msra.gmra.mxu0 %vm194_vm1, %v87_v25  ;;  %v1540_v48 = vld [vmem:[#allocation7 + $0x24] ss:$16 sps:$4 sm:$0xff]   ;;  %v1538_v50 = vld [vmem:[#allocation7 + $0x20] ss:$16 sps:$4 sm:$0xff]  }
  0x50   :  { %1333 = vmatmul.mubr.msk.bf16.vlgmr.msra.gmra.mxu1 %vm194_vm1, %v87_v25  ;;  %1100 = vmatpush1.bf16.msra.mxu0 %v1502_v26  ;;  %v1543_v49 = vld [vmem:[#allocation7 + $0x224] ss:$16 sps:$4 sm:$0xff]   ;;  %v1541_v51 = vld [vmem:[#allocation7 + $0x220] ss:$16 sps:$4 sm:$0xff]   ;;  %v1603_v25 = vld [vmem:[#allocation7 + $0x2ec] ss:$16 sps:$4 sm:$0xff]   ;;  %v104_v26 = vlaneseq }
  0x51   :  { %1143 = vmatpush1.bf16.msra.mxu1 %v1505_v27  ;;  %1101 = vmatprep.subr.bf16.mxu0 %v1510_v28  ;;  %v1546_v52 = vld [vmem:[#allocation7 + $0x4] ss:$16 sps:$4 sm:$0xff]   ;;  %v1544_v54 = vld [vmem:[#allocation7] ss:$16 sps:$4 sm:$0xff]  }
  0x52   :  { %1144 = vmatprep.subr.bf16.mxu1 %v1513_v29  ;;  %v1549_v53 = vld [vmem:[#allocation7 + $0x204] ss:$16 sps:$4 sm:$0xff]   ;;  %v1547_v55 = vld [vmem:[#allocation7 + $0x200] ss:$16 sps:$4 sm:$0xff]   ;;  %v1855_v27 = vshrl.u32 %v104_v26, 7 }
  0x53   :  { %v1552_v56 = vld [vmem:[#allocation7 + $0x1e4] ss:$16 sps:$4 sm:$0xff]   ;;  %v1550_v58 = vld [vmem:[#allocation7 + $0x1e0] ss:$16 sps:$4 sm:$0xff]   ;;  %v1637_v26 = vld [vmem:[#allocation7 + $0x228] ss:$16 sps:$4 sm:$0xff]  }
  0x54   :  { %1102 = vmatpush1.bf16.msra.mxu0 %v1508_v30  ;;  %v1555_v57 = vld [vmem:[#allocation7 + $0x3e4] ss:$16 sps:$4 sm:$0xff]   ;;  %v1553_v59 = vld [vmem:[#allocation7 + $0x3e0] ss:$16 sps:$4 sm:$0xff]   ;;  %v110_v28 = vsub.s32 1, %v1855_v27  ;;  %v118_v29 = vsub.s32 3, %v1855_v27 }
  0x55   :  { %1145 = vmatpush1.bf16.msra.mxu1 %v1511_v31  ;;  %1103 = vmatprep.subr.bf16.mxu0 %v1516_v32  ;;  %v1558_v60 = vld [vmem:[#allocation7 + $0x1c4] ss:$16 sps:$4 sm:$0xff]   ;;  %v1556_v62 = vld [vmem:[#allocation7 + $0x1c0] ss:$16 sps:$4 sm:$0xff]   ;;  %v106_v30 = vsub.s32 0, %v1855_v27  ;;  %v114_v31 = vsub.s32 2, %v1855_v27 }
  0x56   :  { %1146 = vmatprep.subr.bf16.mxu1 %v1519_v33  ;;  %v1561_v61 = vld [vmem:[#allocation7 + $0x3c4] ss:$16 sps:$4 sm:$0xff]   ;;  %v1559_v63 = vld [vmem:[#allocation7 + $0x3c0] ss:$16 sps:$4 sm:$0xff]   ;;  %v102_v32 = vld [vmem:[#allocation6] sm:$0xf] }
  0x57   :  { %v1564_v0 = vld [vmem:[#allocation7 + $0x1a4] ss:$16 sps:$4 sm:$0xff]   ;;  %v1562_v2 = vld [vmem:[#allocation7 + $0x1a0] ss:$16 sps:$4 sm:$0xff]  }
  0x58   :  { %1104 = vmatpush1.bf16.msra.mxu0 %v1514_v34  ;;  %v1567_v1 = vld [vmem:[#allocation7 + $0x3a4] ss:$16 sps:$4 sm:$0xff]   ;;  %v1565_v3 = vld [vmem:[#allocation7 + $0x3a0] ss:$16 sps:$4 sm:$0xff]  }
  0x59   :  { %1147 = vmatpush1.bf16.msra.mxu1 %v1517_v35  ;;  %1105 = vmatprep.subr.bf16.mxu0 %v1522_v36  ;;  %v1570_v4 = vld [vmem:[#allocation7 + $0x184] ss:$16 sps:$4 sm:$0xff]   ;;  %v1568_v6 = vld [vmem:[#allocation7 + $0x180] ss:$16 sps:$4 sm:$0xff]   ;;  %v111_v35 = vrot.slane %v102_v32, %v110_v28  ;;  %v119_v36 = vrot.slane %v102_v32, %v118_v29 }
  0x5a   :  { %1148 = vmatprep.subr.bf16.mxu1 %v1525_v37  ;;  %v1573_v5 = vld [vmem:[#allocation7 + $0x384] ss:$16 sps:$4 sm:$0xff]   ;;  %v1571_v7 = vld [vmem:[#allocation7 + $0x380] ss:$16 sps:$4 sm:$0xff]   ;;  %v107_v37 = vrot.slane %v102_v32, %v106_v30 }
  0x5b   :  { %v1576_v8 = vld [vmem:[#allocation7 + $0x164] ss:$16 sps:$4 sm:$0xff]   ;;  %v1574_v10 = vld [vmem:[#allocation7 + $0x160] ss:$16 sps:$4 sm:$0xff]  }
  0x5c   :  { %1106 = vmatpush1.bf16.msra.mxu0 %v1520_v38  ;;  %v1579_v9 = vld [vmem:[#allocation7 + $0x364] ss:$16 sps:$4 sm:$0xff]   ;;  %v1577_v11 = vld [vmem:[#allocation7 + $0x360] ss:$16 sps:$4 sm:$0xff]   ;;  %v115_v38 = vrot.slane %v102_v32, %v114_v31  ;;  %v1642_v32 = vld [vmem:[#allocation7 + $0xc] ss:$16 sps:$4 sm:$0xff]  }
  0x5d   :  { %1149 = vmatpush1.bf16.msra.mxu1 %v1523_v39  ;;  %1107 = vmatprep.subr.bf16.mxu0 %v1528_v40  ;;  %v1582_v12 = vld [vmem:[#allocation7 + $0x144] ss:$16 sps:$4 sm:$0xff]   ;;  %v1580_v14 = vld [vmem:[#allocation7 + $0x140] ss:$16 sps:$4 sm:$0xff]  }
  0x5e   :  { %1150 = vmatprep.subr.bf16.mxu1 %v1531_v41  ;;  %v1585_v13 = vld [vmem:[#allocation7 + $0x344] ss:$16 sps:$4 sm:$0xff]   ;;  %v1583_v15 = vld [vmem:[#allocation7 + $0x340] ss:$16 sps:$4 sm:$0xff]  }
  0x5f   :  { %v1588_v16 = vld [vmem:[#allocation7 + $0x124] ss:$16 sps:$4 sm:$0xff]   ;;  %v1586_v18 = vld [vmem:[#allocation7 + $0x120] ss:$16 sps:$4 sm:$0xff]  }
  0x60   :  { %1108 = vmatpush1.bf16.msra.mxu0 %v1526_v42  ;;  %v1591_v17 = vld [vmem:[#allocation7 + $0x324] ss:$16 sps:$4 sm:$0xff]   ;;  %v1589_v19 = vld [vmem:[#allocation7 + $0x320] ss:$16 sps:$4 sm:$0xff]  }
  0x61   :  { %1151 = vmatpush1.bf16.msra.mxu1 %v1529_v43  ;;  %1109 = vmatprep.subr.bf16.mxu0 %v1534_v44  ;;  %v1594_v20 = vld [vmem:[#allocation7 + $0x104] ss:$16 sps:$4 sm:$0xff]   ;;  %v1592_v22 = vld [vmem:[#allocation7 + $0x100] ss:$16 sps:$4 sm:$0xff]  }
  0x62   :  { %1152 = vmatprep.subr.bf16.mxu1 %v1537_v45  ;;  %v1597_v21 = vld [vmem:[#allocation7 + $0x304] ss:$16 sps:$4 sm:$0xff]   ;;  %v1595_v23 = vld [vmem:[#allocation7 + $0x300] ss:$16 sps:$4 sm:$0xff]  }
  0x64   :  { %1110 = vmatpush1.bf16.msra.mxu0 %v1532_v46 }
  0x65   :  { %1153 = vmatpush1.bf16.msra.mxu1 %v1535_v47  ;;  %1111 = vmatprep.subr.bf16.mxu0 %v1540_v48 }
  0x66   :  { %1154 = vmatprep.subr.bf16.mxu1 %v1543_v49 }
  0x68   :  { %1112 = vmatpush1.bf16.msra.mxu0 %v1538_v50 }
  0x69   :  { %1155 = vmatpush1.bf16.msra.mxu1 %v1541_v51  ;;  %1113 = vmatprep.subr.bf16.mxu0 %v1546_v52 }
  0x6a   :  { %1156 = vmatprep.subr.bf16.mxu1 %v1549_v53 }
  0x6c   :  { %1114 = vmatpush1.bf16.msra.mxu0 %v1544_v54 }
  0x6d   :  { %1157 = vmatpush1.bf16.msra.mxu1 %v1547_v55  ;;  %1115 = vmatprep.subr.bf16.mxu0 %v1552_v56 }
  0x6e   :  { %1158 = vmatprep.subr.bf16.mxu1 %v1555_v57 }
  0x70   :  { %1116 = vmatpush2.bf16.msra.mxu0 %v1550_v58 }
  0x71   :  { %1159 = vmatpush2.bf16.msra.mxu1 %v1553_v59  ;;  %1117 = vmatprep.subr.bf16.mxu0 %v1558_v60 }
  0x72   :  { %1160 = vmatprep.subr.bf16.mxu1 %v1561_v61 }
  0x74   :  { %1118 = vmatpush2.bf16.msra.mxu0 %v1556_v62 }
  0x75   :  { %1161 = vmatpush2.bf16.msra.mxu1 %v1559_v63  ;;  %1119 = vmatprep.subr.bf16.mxu0 %v1564_v0  ;;  %v1598_v63 = vld [vmem:[#allocation7 + $0xe8] ss:$16 sps:$4 sm:$0xff]  }
  0x76   :  { %1162 = vmatprep.subr.bf16.mxu1 %v1567_v1  ;;  %v1601_v0 = vld [vmem:[#allocation7 + $0x2e8] ss:$16 sps:$4 sm:$0xff]  }
  0x78   :  { %1120 = vmatpush2.bf16.msra.mxu0 %v1562_v2 }
  0x79   :  { %1163 = vmatpush2.bf16.msra.mxu1 %v1565_v3  ;;  %1121 = vmatprep.subr.bf16.mxu0 %v1570_v4  ;;  %v1606_v3 = vld [vmem:[#allocation7 + $0xcc] ss:$16 sps:$4 sm:$0xff]  }
  0x7a   :  { %1164 = vmatprep.subr.bf16.mxu1 %v1573_v5  ;;  %v1609_v4 = vld [vmem:[#allocation7 + $0x2cc] ss:$16 sps:$4 sm:$0xff]   ;;  %v1604_v5 = vld [vmem:[#allocation7 + $0xc8] ss:$16 sps:$4 sm:$0xff]  }
  0x7c   :  { %1122 = vmatpush2.bf16.msra.mxu0 %v1568_v6  ;;  %v1607_v6 = vld [vmem:[#allocation7 + $0x2c8] ss:$16 sps:$4 sm:$0xff]  }
  0x7d   :  { %1165 = vmatpush2.bf16.msra.mxu1 %v1571_v7  ;;  %1123 = vmatprep.subr.bf16.mxu0 %v1576_v8  ;;  %v1612_v7 = vld [vmem:[#allocation7 + $0xac] ss:$16 sps:$4 sm:$0xff]  }
  0x7e   :  { %1166 = vmatprep.subr.bf16.mxu1 %v1579_v9  ;;  %v1615_v8 = vld [vmem:[#allocation7 + $0x2ac] ss:$16 sps:$4 sm:$0xff]   ;;  %v1610_v9 = vld [vmem:[#allocation7 + $0xa8] ss:$16 sps:$4 sm:$0xff]  }
  0x80   :  { %1124 = vmatpush2.bf16.msra.mxu0 %v1574_v10  ;;  %v1613_v10 = vld [vmem:[#allocation7 + $0x2a8] ss:$16 sps:$4 sm:$0xff]  }
  0x81   :  { %1167 = vmatpush2.bf16.msra.mxu1 %v1577_v11  ;;  %1125 = vmatprep.subr.bf16.mxu0 %v1582_v12  ;;  %v1618_v11 = vld [vmem:[#allocation7 + $0x8c] ss:$16 sps:$4 sm:$0xff]  }
  0x82   :  { %1168 = vmatprep.subr.bf16.mxu1 %v1585_v13  ;;  %v1621_v12 = vld [vmem:[#allocation7 + $0x28c] ss:$16 sps:$4 sm:$0xff]   ;;  %v1616_v13 = vld [vmem:[#allocation7 + $0x88] ss:$16 sps:$4 sm:$0xff]  }
  0x84   :  { %1126 = vmatpush2.bf16.msra.mxu0 %v1580_v14  ;;  %v1619_v14 = vld [vmem:[#allocation7 + $0x288] ss:$16 sps:$4 sm:$0xff]  }
  0x85   :  { %1169 = vmatpush2.bf16.msra.mxu1 %v1583_v15  ;;  %1127 = vmatprep.subr.bf16.mxu0 %v1588_v16  ;;  %v1624_v15 = vld [vmem:[#allocation7 + $0x6c] ss:$16 sps:$4 sm:$0xff]  }
  0x86   :  { %1170 = vmatprep.subr.bf16.mxu1 %v1591_v17  ;;  %v1627_v16 = vld [vmem:[#allocation7 + $0x26c] ss:$16 sps:$4 sm:$0xff]   ;;  %v1622_v17 = vld [vmem:[#allocation7 + $0x68] ss:$16 sps:$4 sm:$0xff]  }
  0x88   :  { %1128 = vmatpush2.bf16.msra.mxu0 %v1586_v18  ;;  %v1625_v18 = vld [vmem:[#allocation7 + $0x268] ss:$16 sps:$4 sm:$0xff]  }
  0x89   :  { %1171 = vmatpush2.bf16.msra.mxu1 %v1589_v19  ;;  %1129 = vmatprep.subr.bf16.mxu0 %v1594_v20  ;;  %v1630_v19 = vld [vmem:[#allocation7 + $0x4c] ss:$16 sps:$4 sm:$0xff]  }
  0x8a   :  { %1172 = vmatprep.subr.bf16.mxu1 %v1597_v21  ;;  %v1633_v20 = vld [vmem:[#allocation7 + $0x24c] ss:$16 sps:$4 sm:$0xff]   ;;  %v1628_v21 = vld [vmem:[#allocation7 + $0x48] ss:$16 sps:$4 sm:$0xff]  }
  0x8c   :  { %1130 = vmatpush2.bf16.msra.mxu0 %v1592_v22  ;;  %v1631_v22 = vld [vmem:[#allocation7 + $0x248] ss:$16 sps:$4 sm:$0xff]  }
  0x8d   :  { %1173 = vmatpush2.bf16.msra.mxu1 %v1595_v23  ;;  %1185 = vmatprep.subr.bf16.mxu0 %v1600_v24  ;;  %v1636_v23 = vld [vmem:[#allocation7 + $0x2c] ss:$16 sps:$4 sm:$0xff]  }
  0x8e   :  { %1228 = vmatprep.subr.bf16.mxu1 %v1603_v25  ;;  %v1639_v24 = vld [vmem:[#allocation7 + $0x22c] ss:$16 sps:$4 sm:$0xff]   ;;  %v1634_v25 = vld [vmem:[#allocation7 + $0x28] ss:$16 sps:$4 sm:$0xff]  }
 0x10f   :  { %v245_v33 = vpop.f32.mrf.mxu0 }
 0x110   :  { %v288_v34 = vpop.f32.mrf.mxu1  ;;  %v246_v47 = vadd.f32 %v245_v33, %v107_v37  ;;  %v1645_v33 = vld [vmem:[#allocation7 + $0x20c] ss:$16 sps:$4 sm:$0xff]  }
 0x111   :  { %v247_v39 = vpop.f32.mrf.mxu0  ;;  %v289_v48 = vadd.f32 %v288_v34, %v115_v38  ;;  %v1640_v34 = vld [vmem:[#allocation7 + $0x8] ss:$16 sps:$4 sm:$0xff]  }
 0x112   :  { %v290_v40 = vpop.f32.mrf.mxu1  ;;  %v248_v43 = vadd.f32 %v247_v39, %v111_v35  ;;  %v297_v59 = vmax.f32 %v246_v47, 0.0  ;;  %v1649_v39 = vld [vmem:[#allocation7 + $0x3e8] ss:$16 sps:$4 sm:$0xff]  }
 0x113   :  { %v249_v41 = vpop.f32.mrf.mxu0  ;;  %v291_v44 = vadd.f32 %v290_v40, %v119_v36  ;;  %v299_v60 = vmax.f32 %v289_v48, 0.0  ;;  %v1654_v40 = vld [vmem:[#allocation7 + $0x1cc] ss:$16 sps:$4 sm:$0xff]   ;;  %v1661_v47 = vld [vmem:[#allocation7 + $0x3a8] ss:$16 sps:$4 sm:$0xff]  }
 0x114   :  { %v292_v42 = vpop.f32.mrf.mxu1  ;;  %v250_v45 = vadd.f32 %v249_v41, %v107_v37  ;;  %v298_v55 = vmax.f32 %v248_v43, 0.0  ;;  %v1651_v37 = vld [vmem:[#allocation7 + $0x3ec] ss:$16 sps:$4 sm:$0xff]   ;;  %v1655_v43 = vld [vmem:[#allocation7 + $0x3c8] ss:$16 sps:$4 sm:$0xff]  }
 0x115   :  { %v293_v46 = vadd.f32 %v292_v42, %v115_v38  ;;  %v251_v49 = vpop.f32.mrf.mxu0  ;;  %v300_v56 = vmax.f32 %v291_v44, 0.0  ;;  %v1646_v38 = vld [vmem:[#allocation7 + $0x1e8] ss:$16 sps:$4 sm:$0xff]   ;;  %v1657_v41 = vld [vmem:[#allocation7 + $0x3cc] ss:$16 sps:$4 sm:$0xff]  }
 0x116   :  { %v294_v50 = vpop.f32.mrf.mxu1  ;;  %v252_v51 = vadd.f32 %v251_v49, %v111_v35  ;;  %v301_v53 = vmax.f32 %v250_v45, 0.0  ;;  %v1643_v35 = vld [vmem:[#allocation7 + $0x208] ss:$16 sps:$4 sm:$0xff]   ;;  %v1660_v44 = vld [vmem:[#allocation7 + $0x1ac] ss:$16 sps:$4 sm:$0xff]  }
 0x117   :  { %v295_v52 = vadd.f32 %v294_v50, %v119_v36  ;;  %v303_v54 = vmax.f32 %v293_v46, 0.0  ;;  %v1648_v36 = vld [vmem:[#allocation7 + $0x1ec] ss:$16 sps:$4 sm:$0xff]   ;;  %v1652_v42 = vld [vmem:[#allocation7 + $0x1c8] ss:$16 sps:$4 sm:$0xff]  }
 0x118   :  { %v302_v57 = vmax.f32 %v252_v51, 0.0  ;;  %v1869_v1 = vpack.c.bf16 %v301_v53, %v297_v59  ;;  %v1663_v45 = vld [vmem:[#allocation7 + $0x3ac] ss:$16 sps:$4 sm:$0xff]   ;;  %v1658_v46 = vld [vmem:[#allocation7 + $0x1a8] ss:$16 sps:$4 sm:$0xff]  }
 0x119   :  { %v304_v58 = vmax.f32 %v295_v52, 0.0  ;;  %v1871_v2 = vpack.c.bf16 %v303_v54, %v299_v60  ;;  %v1666_v48 = vld [vmem:[#allocation7 + $0x18c] ss:$16 sps:$4 sm:$0xff]   ;;  %v1664_v50 = vld [vmem:[#allocation7 + $0x188] ss:$16 sps:$4 sm:$0xff]  }
 0x11a   :  { %v306_v61 = vpack.c.bf16 %v302_v57, %v298_v55  ;;  %v1669_v49 = vld [vmem:[#allocation7 + $0x38c] ss:$16 sps:$4 sm:$0xff]   ;;  %v1667_v51 = vld [vmem:[#allocation7 + $0x388] ss:$16 sps:$4 sm:$0xff]  }
 0x11b   :  { %v308_v62 = vpack.c.bf16 %v304_v58, %v300_v56  ;;  %v1672_v52 = vld [vmem:[#allocation7 + $0x16c] ss:$16 sps:$4 sm:$0xff]   ;;  %v1670_v54 = vld [vmem:[#allocation7 + $0x168] ss:$16 sps:$4 sm:$0xff]  }
 0x11c   :  { %1131 = vmatprep.mubr.bf16.mxu0 %v306_v61  ;;  %v1675_v53 = vld [vmem:[#allocation7 + $0x36c] ss:$16 sps:$4 sm:$0xff]   ;;  %v1673_v55 = vld [vmem:[#allocation7 + $0x368] ss:$16 sps:$4 sm:$0xff]  }
 0x11d   :  { %1174 = vmatprep.mubr.bf16.mxu1 %v308_v62  ;;  %1132 = vmatmul.mubr.bf16.vlgmr.msra.gmra.mxu0 %v1869_v1  ;;  %v1678_v56 = vld [vmem:[#allocation7 + $0x14c] ss:$16 sps:$4 sm:$0xff]   ;;  %v1676_v58 = vld [vmem:[#allocation7 + $0x148] ss:$16 sps:$4 sm:$0xff]  }
 0x11e   :  { %1175 = vmatmul.mubr.bf16.vlgmr.msra.gmra.mxu1 %v1871_v2  ;;  %1186 = vmatpush1.bf16.msra.mxu0 %v1598_v63  ;;  %v1681_v57 = vld [vmem:[#allocation7 + $0x34c] ss:$16 sps:$4 sm:$0xff]   ;;  %v1679_v59 = vld [vmem:[#allocation7 + $0x348] ss:$16 sps:$4 sm:$0xff]  }
 0x11f   :  { %1229 = vmatpush1.bf16.msra.mxu1 %v1601_v0  ;;  %1217 = vmatprep.mubr.bf16.mxu0 %v306_v61  ;;  %v1684_v60 = vld [vmem:[#allocation7 + $0x12c] ss:$16 sps:$4 sm:$0xff]   ;;  %v1685_v63 = vld [vmem:[#allocation7 + $0x328] ss:$16 sps:$4 sm:$0xff]  }
 0x120   :  { %1260 = vmatprep.mubr.bf16.mxu1 %v308_v62  ;;  %1187 = vmatprep.subr.bf16.mxu0 %v1606_v3  ;;  %v1687_v61 = vld [vmem:[#allocation7 + $0x32c] ss:$16 sps:$4 sm:$0xff]   ;;  %v1682_v62 = vld [vmem:[#allocation7 + $0x128] ss:$16 sps:$4 sm:$0xff]  }
 0x121   :  { %1230 = vmatprep.subr.bf16.mxu1 %v1609_v4  ;;  %v1690_v0 = vld [vmem:[#allocation7 + $0x10c] ss:$16 sps:$4 sm:$0xff]   ;;  %v1688_v4 = vld [vmem:[#allocation7 + $0x108] ss:$16 sps:$4 sm:$0xff]  }
 0x122   :  { %1188 = vmatpush1.bf16.msra.mxu0 %v1604_v5  ;;  %v1693_v3 = vld [vmem:[#allocation7 + $0x30c] ss:$16 sps:$4 sm:$0xff]   ;;  %v1691_v5 = vld [vmem:[#allocation7 + $0x308] ss:$16 sps:$4 sm:$0xff]  }
 0x123   :  { %1231 = vmatpush1.bf16.msra.mxu1 %v1607_v6  ;;  %1189 = vmatprep.subr.bf16.mxu0 %v1612_v7  ;;  %v437_v6 = vld [vmem:[#allocation9] sm:$0xf] }
 0x124   :  { %1232 = vmatprep.subr.bf16.mxu1 %v1615_v8  ;;  %v442_v7 = vrot.slane %v437_v6, %v106_v30  ;;  %v446_v8 = vrot.slane %v437_v6, %v110_v28 }
 0x126   :  { %1190 = vmatpush1.bf16.msra.mxu0 %v1610_v9 }
 0x127   :  { %1233 = vmatpush1.bf16.msra.mxu1 %v1613_v10  ;;  %1191 = vmatprep.subr.bf16.mxu0 %v1618_v11 }
 0x128   :  { %1234 = vmatprep.subr.bf16.mxu1 %v1621_v12 }
 0x12a   :  { %1192 = vmatpush1.bf16.msra.mxu0 %v1616_v13 }
 0x12b   :  { %1235 = vmatpush1.bf16.msra.mxu1 %v1619_v14  ;;  %1193 = vmatprep.subr.bf16.mxu0 %v1624_v15 }
 0x12c   :  { %1236 = vmatprep.subr.bf16.mxu1 %v1627_v16 }
 0x12e   :  { %1194 = vmatpush1.bf16.msra.mxu0 %v1622_v17 }
 0x12f   :  { %1237 = vmatpush1.bf16.msra.mxu1 %v1625_v18  ;;  %1195 = vmatprep.subr.bf16.mxu0 %v1630_v19 }
 0x130   :  { %1238 = vmatprep.subr.bf16.mxu1 %v1633_v20 }
 0x132   :  { %1196 = vmatpush1.bf16.msra.mxu0 %v1628_v21 }
 0x133   :  { %1239 = vmatpush1.bf16.msra.mxu1 %v1631_v22  ;;  %1197 = vmatprep.subr.bf16.mxu0 %v1636_v23 }
 0x134   :  { %1240 = vmatprep.subr.bf16.mxu1 %v1639_v24 }
 0x136   :  { %1198 = vmatpush1.bf16.msra.mxu0 %v1634_v25 }
 0x137   :  { %1241 = vmatpush1.bf16.msra.mxu1 %v1637_v26  ;;  %1199 = vmatprep.subr.bf16.mxu0 %v1642_v32  ;;  %v450_v32 = vrot.slane %v437_v6, %v114_v31 }
 0x138   :  { %1242 = vmatprep.subr.bf16.mxu1 %v1645_v33  ;;  %v454_v33 = vrot.slane %v437_v6, %v118_v29 }
 0x13a   :  { %1200 = vmatpush1.bf16.msra.mxu0 %v1640_v34 }
 0x13b   :  { %1243 = vmatpush1.bf16.msra.mxu1 %v1643_v35  ;;  %1201 = vmatprep.subr.bf16.mxu0 %v1648_v36 }
 0x13c   :  { %1244 = vmatprep.subr.bf16.mxu1 %v1651_v37 }
 0x13e   :  { %1202 = vmatpush2.bf16.msra.mxu0 %v1646_v38 }
 0x13f   :  { %1245 = vmatpush2.bf16.msra.mxu1 %v1649_v39  ;;  %1203 = vmatprep.subr.bf16.mxu0 %v1654_v40 }
 0x140   :  { %1246 = vmatprep.subr.bf16.mxu1 %v1657_v41 }
 0x142   :  { %1204 = vmatpush2.bf16.msra.mxu0 %v1652_v42 }
 0x143   :  { %1247 = vmatpush2.bf16.msra.mxu1 %v1655_v43  ;;  %1205 = vmatprep.subr.bf16.mxu0 %v1660_v44 }
 0x144   :  { %1248 = vmatprep.subr.bf16.mxu1 %v1663_v45 }
 0x146   :  { %1206 = vmatpush2.bf16.msra.mxu0 %v1658_v46 }
 0x147   :  { %1249 = vmatpush2.bf16.msra.mxu1 %v1661_v47  ;;  %1207 = vmatprep.subr.bf16.mxu0 %v1666_v48 }
 0x148   :  { %1250 = vmatprep.subr.bf16.mxu1 %v1669_v49 }
 0x14a   :  { %1208 = vmatpush2.bf16.msra.mxu0 %v1664_v50 }
 0x14b   :  { %1251 = vmatpush2.bf16.msra.mxu1 %v1667_v51  ;;  %1209 = vmatprep.subr.bf16.mxu0 %v1672_v52 }
 0x14c   :  { %1252 = vmatprep.subr.bf16.mxu1 %v1675_v53 }
 0x14e   :  { %1210 = vmatpush2.bf16.msra.mxu0 %v1670_v54 }
 0x14f   :  { %1253 = vmatpush2.bf16.msra.mxu1 %v1673_v55  ;;  %1211 = vmatprep.subr.bf16.mxu0 %v1678_v56 }
 0x150   :  { %1254 = vmatprep.subr.bf16.mxu1 %v1681_v57 }
 0x152   :  { %1212 = vmatpush2.bf16.msra.mxu0 %v1676_v58 }
 0x153   :  { %1255 = vmatpush2.bf16.msra.mxu1 %v1679_v59  ;;  %1213 = vmatprep.subr.bf16.mxu0 %v1684_v60 }
 0x154   :  { %1256 = vmatprep.subr.bf16.mxu1 %v1687_v61 }
 0x156   :  { %1214 = vmatpush2.bf16.msra.mxu0 %v1682_v62 }
 0x157   :  { %1257 = vmatpush2.bf16.msra.mxu1 %v1685_v63  ;;  %1215 = vmatprep.subr.bf16.mxu0 %v1690_v0 }
 0x158   :  { %1258 = vmatprep.subr.bf16.mxu1 %v1693_v3 }
 0x15a   :  { %1216 = vmatpush2.bf16.msra.mxu0 %v1688_v4 }
 0x15b   :  { %1259 = vmatpush2.bf16.msra.mxu1 %v1691_v5 }
 0x15d   :  { %1218 = vmatmul.mubr.bf16.vlgmr.msra.gmra.mxu0 %v1869_v1 }
 0x15e   :  { %1261 = vmatmul.mubr.bf16.vlgmr.msra.gmra.mxu1 %v1871_v2 }
 0x1dd   :  { %v1133_v9 = vpop.f32.mrf.mxu0 }
 0x1de   :  { %v1176_v10 = vpop.f32.mrf.mxu1  ;;  %v1134_v11 = vadd.f32 %v1133_v9, %v442_v7 }
 0x1df   :  { %v1135_v12 = vpop.f32.mrf.mxu0 }
 0x1e0   :  { %v1178_v13 = vpop.f32.mrf.mxu1  ;;  %v1177_v14 = vadd.f32 %v1176_v10, %v1134_v11  ;;  %v1136_v15 = vadd.f32 %v1135_v12, %v446_v8 }
 0x1e1   :  { %v1137_v16 = vpop.f32.mrf.mxu0 }
 0x1e2   :  { %v1180_v17 = vpop.f32.mrf.mxu1  ;;  %v1179_v18 = vadd.f32 %v1178_v13, %v1136_v15  ;;  %v1138_v1 = vadd.f32 %v1137_v16, %v442_v7  ;;  %v1271_v2 = vmax.f32 %v1177_v14, 0.0 }
 0x1e3   :  { %v1139_v19 = vpop.f32.mrf.mxu0 }
 0x1e4   :  { %v1272_v20 = vmax.f32 %v1179_v18, 0.0  ;;  %v1181_v21 = vadd.f32 %v1180_v17, %v1138_v1  ;;  %v1140_v22 = vadd.f32 %v1139_v19, %v446_v8  ;;  %v1182_v30 = vpop.f32.mrf.mxu1 }
 0x1e6   :  { %v1466_v23 = vpack.c.bf16 %v1272_v20, %v1271_v2  ;;  %v1183_v24 = vadd.f32 %v1182_v30, %v1140_v22  ;;  %v1275_v28 = vmax.f32 %v1181_v21, 0.0 }
 0x1e8   :  { %1303 = vst [vmem:[%s1902_s5] sm:$0xff] %v1466_v23  ;;  %v1276_v25 = vmax.f32 %v1183_v24, 0.0 }
 0x1ea   :  { %v1468_v26 = vpack.c.bf16 %v1276_v25, %v1275_v28 }
 0x1ec   :  { %1305 = vst [vmem:[%s1902_s5 + $0x10] sm:$0xff] %v1468_v26 }
 0x21d   :  { %v1219_v34 = vpop.f32.mrf.mxu0 }
 0x21e   :  { %v1262_v35 = vpop.f32.mrf.mxu1  ;;  %v1220_v36 = vadd.f32 %v1219_v34, %v450_v32 }
 0x21f   :  { %v1221_v37 = vpop.f32.mrf.mxu0 }
 0x220   :  { %v1264_v38 = vpop.f32.mrf.mxu1  ;;  %v1263_v39 = vadd.f32 %v1262_v35, %v1220_v36  ;;  %v1222_v40 = vadd.f32 %v1221_v37, %v454_v33 }
 0x221   :  { %v1223_v41 = vpop.f32.mrf.mxu0 }
 0x222   :  { %v1266_v42 = vpop.f32.mrf.mxu1  ;;  %v1265_v43 = vadd.f32 %v1264_v38, %v1222_v40  ;;  %v1224_v44 = vadd.f32 %v1223_v41, %v450_v32  ;;  %v1273_v46 = vmax.f32 %v1263_v39, 0.0 }
 0x223   :  { %v1225_v45 = vpop.f32.mrf.mxu0 }
 0x224   :  { %v1274_v47 = vmax.f32 %v1265_v43, 0.0  ;;  %v1267_v48 = vadd.f32 %v1266_v42, %v1224_v44  ;;  %v1226_v49 = vadd.f32 %v1225_v45, %v454_v33  ;;  %v1268_v31 = vpop.f32.mrf.mxu1 }
 0x226   :  { %v1467_v50 = vpack.c.bf16 %v1274_v47, %v1273_v46  ;;  %v1269_v27 = vadd.f32 %v1268_v31, %v1226_v49  ;;  %v1277_v29 = vmax.f32 %v1267_v48, 0.0 }
 0x228   :  { %1304 = vst [vmem:[%s1902_s5 + $0x8] sm:$0xff] %v1467_v50  ;;  %v1278_v51 = vmax.f32 %v1269_v27, 0.0 }
 0x22a   :  { %v1469_v52 = vpack.c.bf16 %v1278_v51, %v1277_v29 }
 0x22c   :  { %1306 = vst [vmem:[%s1902_s5 + $0x18] sm:$0xff] %v1469_v52 }
 0x22d   :  { %1311 = vsyncpa [#allocation3], 1 }
 0x22e   :  { %1312 = vsyncpa [#allocation5], 1 }
 0x22f   :  { %1313 = vsyncpa [#allocation8], 1 }

// kernel: mlp_pallas.3
= control target key start
LH: loop header
LB: loop body
LE: loop exit
PB: predicated region body
PF: predicated region fallthrough
CT: control target
= control target key end

     0   :  { %s11082_s0 = inlined_call_operand.vmem [shape: bf16[16,512], index: 0, kind: input, shape index: {}]   ;;  %s11083_s1 = inlined_call_operand.hbm [shape: bf16[3,512,4096], index: 1, kind: input, shape index: {}]   ;;  %s11084_s2 = inlined_call_operand.hbm [shape: f32[1,12288], index: 2, kind: input, shape index: {}]   ;;  %s11085_s3 = inlined_call_operand.hbm [shape: f32[16,12001], index: 3, kind: output, shape index: {}]  }
   0x1   :  { %11086 = sst [smem:[#allocation11_spill]] %s11083_s1 }
   0x2   :  { %8 = vsyncpa [#allocation3], 0 }
   0x3   :  { %10 = vsyncpa [#allocation3 + $0x1], 0 }
   0x4   :  { %11 = vsyncpa [#allocation6], 0 }
   0x5   :  { %13 = vsyncpa [#allocation6 + $0x1], 0 }
   0x6   :  { %14 = vsyncpa [#allocation4], 0 }
   0x7   :  { %16 = vsyncpa [#allocation4 + $0x1], 0  ;;  %s9521_s12 = smov 0   ;;  %s9523_s13 = smov 0  }
   0x8   :  { %s9525_s14 = smov 0   ;;  %s9527_s15 = smov 0  }
   0x9   :  { %s9529_s16 = smov 0   ;;  %s9531_s17 = smov 0  }
   0xa LB: > { %s8195_s18 = sadd.s32 4294967295, %s9492_s17   ;;  %s8196_s19 = sadd.s32 4294967294, %s9492_s17   ;;  %s9492_s17 = sphi %s9531_s17, %s22_s17   ;;  %s9488_s16 = sphi %s9529_s16, %s11098_s16   ;;  %s9484_s15 = sphi %s9527_s15, %s11097_s15   ;;  %s9480_s14 = sphi %s9525_s14, %s11096_s14   ;;  %s9476_s13 = sphi %s9523_s13, %s11095_s13   ;;  %s9472_s12 = sphi %s9521_s12, %s11094_s12  }
   0xb   : > { %s34_s20 = sadd.s32 1, %s9488_s16  ;;  %s67_s21 = sadd.s32 1, %s9480_s14 }
   0xc   : > { %p36_p0 = scmp.ge.s32.totalorder %s34_s20, 3  ;;  %p74_p1 = scmp.ne.s32.totalorder %s9480_s14, %s9476_s13 }
   0xd   : > { %p75_p2 = scmp.eq.s32.totalorder %s9492_s17, 0  ;;  %p80_p3 = scmp.ne.s32.totalorder %s9476_s13, %s9472_s12 }
   0xe   : > { %s11100_s20 = smov (%p36_p0, %s34_s20), 0  ;;  %p81_p5 = scmp.eq.s32.totalorder %s8195_s18, 0 }
   0xf   : > { %p9562_p4 = por %p75_p2, %p74_p1  ;;  %s64_s23 = ssub.s32 %s9488_s16, %s11100_s20 }
  0x10   : > { %p132_p6 = scmp.eq.s32.totalorder %s8195_s18, 2  ;;  %p65_p7 = scmp.eq.s32.totalorder %s64_s23, 0 }
  0x11   : > { %p9568_p8 = por %p81_p5, %p80_p3  ;;  %p138_p10 = scmp.eq.s32.totalorder %s8196_s19, 2 }
  0x12   : > { %p9572_p9 = por %p132_p6, %p74_p1  ;;  %p9269_p12 = scmp.lt.s32.totalorder %s9492_s17, 3 }
  0x13   : > { %s9577_s26 = scalar_select %p65_p7, %s9480_s14, %s67_s21  }
  0x14   : > { %p9579_p11 = por %p138_p10, %p80_p3  ;;  %s9585_s28 = sand.u32 1, %s9480_s14  }
  0x15   : > { %s8200_s29 = sshll.u32 %s9585_s28, 13  ;;  %s9248_s30 = sshll.u32 %s9488_s16, 17 }
  0x16   : > { %s11091_s1 = sld [smem:[#allocation11_spill]]  ;;  %s172_s7 = scalar_lea.vmem [#allocation2], %s8200_s29 }
  0x17   : > { %s179_s8 = sshll.u32 %s172_s7, 4  ;;  %p9594_p13 = pnand %p9269_p12, %p9562_p4  ;;  %s180_s8 = int_to_ptr.vmem [resolvable:$true] %s179_s8 }
  0x18   : > { %p8206_p0 = scmp.ge.s32.totalorder %s9492_s17, 1  ;;  %s169_s10 = scalar_lea.sflag [#allocation3], %s9585_s28 }
  0x19   : > { %p9354_p1 = pneg %p9594_p13  ;;  %s9365_s11 = scalar_lea.vmem %s180_s8, 131072 }
  0x1a   : > { %p9366_p2 = scmp.ne.s32.totalorder %s180_s8, %s9365_s11  ;;  %s9494_s18 = smov [#allocation2]  }
  0x1b   : > { %s9370_s19 = sshll.u32 %s9494_s18, 4  ;;  %s9371_s19 = int_to_ptr.vmem [resolvable:$false] %s9370_s19 }
  0x1c   : > { %s178_s6 = scalar_lea.hbm %s11091_s1, %s9248_s30  ;;  %p9368_p3 = pnand %p9366_p2, %p9354_p1 }
  0x1d   : > { %s9372_s21 = scalar_lea.vmem %s9371_s19, 262144  ;;  %p9373_p4 = scmp.lt.s32.totalorder %s180_s8, %s9371_s19 }
  0x1e   : > { %p9369_p5 = pneg %p9368_p3  ;;  %p9374_p6 = scmp.lt.s32.totalorder %s9372_s21, %s9365_s11 }
  0x20   : > { %p9375_p7 = por %p9374_p6, %p9373_p4 }
  0x22   : > { %p9376_p10 = pnand %p9375_p7, %p9369_p5 }
  0x24   : > { %9379 = shalt.err (!%p9376_p10)
}
  0x25   : > { %s9495_s22 = smov 2048   ;;  %s9496_s23 = smov 128  }
  0x26   : > { %9261 = dma.hbm_to_vmem [thread:$0]  (!%p9594_p13), %s178_s6, 131072, %s180_s8, %s169_s10, %s9495_s22, %s9495_s22, %s9496_s23  }
  0x27   : > { %p206_p12 = scmp.lt.s32.totalorder %s9492_s17, 4  ;;  %s8203_s29 = sshll.u32 %s9585_s28, 5 }
  0x28   : > { %s9249_s30 = sshll.u32 %s9488_s16, 9  ;;  %s193_s18 = scalar_lea.vmem [#allocation5], %s8203_s29 }
  0x29   : > { %p9612_p2 = pnand %p8206_p0, %p206_p12  ;;  %s199_s11 = scalar_lea.hbm %s11084_s2, %s9249_s30 }
  0x2a   : > { %s201_s19 = sshll.u32 %s193_s18, 4  ;;  %s190_s21 = scalar_lea.sflag [#allocation6], %s9585_s28  ;;  %s202_s19 = int_to_ptr.vmem [resolvable:$true] %s201_s19 }
  0x2b   : > { %s9393_s1 = scalar_lea.vmem %s202_s19, 512  ;;  %s9497_s6 = smov [#allocation5]  }
  0x2c   : > { %p9394_p3 = scmp.ne.s32.totalorder %s202_s19, %s9393_s1  ;;  %s9398_s8 = sshll.u32 %s9497_s6, 4  ;;  %s9399_s8 = int_to_ptr.vmem [resolvable:$false] %s9398_s8 }
  0x2d   : > { %s9400_s10 = scalar_lea.vmem %s9399_s8, 1024  ;;  %p9401_p0 = scmp.lt.s32.totalorder %s202_s19, %s9399_s8 }
  0x2e   : > { %p9396_p5 = pnand %p9394_p3, %p9354_p1  ;;  %p9402_p6 = scmp.lt.s32.totalorder %s9400_s10, %s9393_s1 }
  0x30   : > { %p9397_p4 = pneg %p9396_p5  ;;  %p9403_p7 = por %p9402_p6, %p9401_p0 }
  0x32   : > { %p9404_p10 = pnand %p9403_p7, %p9397_p4 }
  0x34   : > { %9407 = shalt.err (!%p9404_p10)
}
  0x35   : > { %9264 = dma.hbm_to_vmem [thread:$0]  (!%p9594_p13), %s199_s11, 512, %s202_s19, %s190_s21  }
  0x36   : > { %210 = sbr.rel (%p9612_p2) target bundleno = 1324 (0x52c), region = 32  ;;  %s9628_s28 = sand.u32 (!%p9612_p2), 1, %s9476_s13  }
  0x37   : > { %s8207_s22 = sshll.u32 (!%p9612_p2), %s9628_s28, 13  ;;  %s213_s23 = scalar_lea.sflag (!%p9612_p2), [#allocation3], %s9628_s28 }
  0x38   : > { %s9632_s29 = scalar_lea.vmem (!%p9612_p2), [#allocation2], %s8207_s22 }
  0x3b   : > { %9459 = dma.done.wait (%p9568_p8), %s213_s23, 131072  }
  0x3c   : > { %9461 = vsyncadd (%p9568_p8), %s213_s23, 4294836224  ;;  %s8208_s1 = sshll.u32 %s9628_s28, 5  ;;  %s222_s9 = scalar_lea.sflag [#allocation6], %s9628_s28 }
  0x3d   : > { %s9640_s30 = scalar_lea.vmem [#allocation5], %s8208_s1 }
  0x3e   : > { %9463 = dma.done.wait (%p9568_p8), %s222_s9, 512  }
  0x3f   : > { %9465 = vsyncadd (%p9568_p8), %s222_s9, 4294966784  ;;  %v501_v0 = vld [vmem:[%s9632_s29 + $0x700] sm:$0xff]  ;;  %v9686_v59 = vld [vmem:[%s11082_s0 + $0xc] ss:$16 sps:$4 sm:$0xff]   ;;  %s8209_s23 = sshll.u32 %s9628_s28, 9  ;;  %s8050_s18 = scalar_lea.sflag [#allocation4], %s9628_s28 }
  0x40   : > { %v517_v1 = vld [vmem:[%s9632_s29 + $0x780] sm:$0xff]  ;;  %6684 = vmatprep.mubr.bf16.mxu1 %v9686_v59  ;;  %s9994_s5 = scalar_lea.vmem [#allocation7], %s8209_s23  ;;  %s9239_s19 = sshll.u32 (%p9572_p9), %s9484_s15, 5 }
  0x41   : > { %v1013_v2 = vld [vmem:[%s9632_s29 + $0x1700] sm:$0xff]  ;;  %v8439_v3 = vcombine.high %v501_v0, %v517_v1  ;;  %v8438_v5 = vcombine.low %v501_v0, %v517_v1  ;;  %s8059_s21 = ssub.s32 (%p9572_p9), 94, %s9239_s19 }
  0x42   : > { %v1029_v4 = vld [vmem:[%s9632_s29 + $0x1780] sm:$0xff]  ;;  %p8060_p8 = scmp.lt.s32.totalorder (%p9572_p9), %s8059_s21, 32 }
  0x43   : > { %v469_v6 = vld [vmem:[%s9632_s29 + $0x600] sm:$0xff]  ;;  %v8951_v8 = vcombine.high %v1013_v2, %v1029_v4  ;;  %v8950_v9 = vcombine.low %v1013_v2, %v1029_v4  ;;  %6609 = vmatprep.subr.bf16.mxu0 %v8439_v3 }
  0x44   : > { %v485_v7 = vld [vmem:[%s9632_s29 + $0x680] sm:$0xff]  ;;  %6610 = vmatpush1.bf16.msra.mxu0 %v8438_v5 }
  0x45   : > { %v8407_v10 = vcombine.high %v469_v6, %v485_v7  ;;  %v981_v11 = vld [vmem:[%s9632_s29 + $0x1600] sm:$0xff]  ;;  %6652 = vmatprep.subr.bf16.mxu1 %v8951_v8  ;;  %v8406_v18 = vcombine.low %v469_v6, %v485_v7 }
  0x46   : > { %v997_v12 = vld [vmem:[%s9632_s29 + $0x1680] sm:$0xff]  ;;  %6653 = vmatpush1.bf16.msra.mxu1 %v8950_v9 }
  0x47   : > { %v437_v13 = vld [vmem:[%s9632_s29 + $0x500] sm:$0xff]  ;;  %v8919_v14 = vcombine.high %v981_v11, %v997_v12  ;;  %6611 = vmatprep.subr.bf16.mxu0 %v8407_v10  ;;  %v8918_v19 = vcombine.low %v981_v11, %v997_v12 }
  0x48   : > { %v453_v15 = vld [vmem:[%s9632_s29 + $0x580] sm:$0xff]  ;;  %6612 = vmatpush1.bf16.msra.mxu0 %v8406_v18 }
  0x49   : > { %v949_v16 = vld [vmem:[%s9632_s29 + $0x1500] sm:$0xff]  ;;  %v8375_v20 = vcombine.high %v437_v13, %v453_v15  ;;  %6654 = vmatprep.subr.bf16.mxu1 %v8919_v14  ;;  %v8374_v26 = vcombine.low %v437_v13, %v453_v15 }
  0x4a   : > { %v965_v17 = vld [vmem:[%s9632_s29 + $0x1580] sm:$0xff]  ;;  %6655 = vmatpush1.bf16.msra.mxu1 %v8918_v19 }
  0x4b   : > { %v8887_v21 = vcombine.high %v949_v16, %v965_v17  ;;  %v405_v22 = vld [vmem:[%s9632_s29 + $0x400] sm:$0xff]  ;;  %6613 = vmatprep.subr.bf16.mxu0 %v8375_v20  ;;  %v8886_v27 = vcombine.low %v949_v16, %v965_v17 }
  0x4c   : > { %v421_v23 = vld [vmem:[%s9632_s29 + $0x480] sm:$0xff]  ;;  %6614 = vmatpush1.bf16.msra.mxu0 %v8374_v26 }
  0x4d   : > { %v917_v24 = vld [vmem:[%s9632_s29 + $0x1400] sm:$0xff]  ;;  %v8343_v28 = vcombine.high %v405_v22, %v421_v23  ;;  %6656 = vmatprep.subr.bf16.mxu1 %v8887_v21  ;;  %v8342_v34 = vcombine.low %v405_v22, %v421_v23 }
  0x4e   : > { %v933_v25 = vld [vmem:[%s9632_s29 + $0x1480] sm:$0xff]  ;;  %6657 = vmatpush1.bf16.msra.mxu1 %v8886_v27 }
  0x4f   : > { %v8855_v29 = vcombine.high %v917_v24, %v933_v25  ;;  %v373_v30 = vld [vmem:[%s9632_s29 + $0x300] sm:$0xff]  ;;  %6615 = vmatprep.subr.bf16.mxu0 %v8343_v28  ;;  %v8854_v35 = vcombine.low %v917_v24, %v933_v25 }
  0x50   : > { %v389_v31 = vld [vmem:[%s9632_s29 + $0x380] sm:$0xff]  ;;  %6616 = vmatpush1.bf16.msra.mxu0 %v8342_v34 }
  0x51   : > { %v885_v32 = vld [vmem:[%s9632_s29 + $0x1300] sm:$0xff]  ;;  %v8311_v36 = vcombine.high %v373_v30, %v389_v31  ;;  %6658 = vmatprep.subr.bf16.mxu1 %v8855_v29  ;;  %v8310_v42 = vcombine.low %v373_v30, %v389_v31 }
  0x52   : > { %v901_v33 = vld [vmem:[%s9632_s29 + $0x1380] sm:$0xff]  ;;  %6659 = vmatpush1.bf16.msra.mxu1 %v8854_v35 }
  0x53   : > { %v8823_v37 = vcombine.high %v885_v32, %v901_v33  ;;  %v341_v38 = vld [vmem:[%s9632_s29 + $0x200] sm:$0xff]  ;;  %6617 = vmatprep.subr.bf16.mxu0 %v8311_v36  ;;  %v8822_v43 = vcombine.low %v885_v32, %v901_v33 }
  0x54   : > { %v357_v39 = vld [vmem:[%s9632_s29 + $0x280] sm:$0xff]  ;;  %6618 = vmatpush1.bf16.msra.mxu0 %v8310_v42 }
  0x55   : > { %v853_v40 = vld [vmem:[%s9632_s29 + $0x1200] sm:$0xff]  ;;  %v8279_v44 = vcombine.high %v341_v38, %v357_v39  ;;  %6660 = vmatprep.subr.bf16.mxu1 %v8823_v37  ;;  %v8278_v50 = vcombine.low %v341_v38, %v357_v39 }
  0x56   : > { %v869_v41 = vld [vmem:[%s9632_s29 + $0x1280] sm:$0xff]  ;;  %6661 = vmatpush1.bf16.msra.mxu1 %v8822_v43 }
  0x57   : > { %v8791_v45 = vcombine.high %v853_v40, %v869_v41  ;;  %v309_v46 = vld [vmem:[%s9632_s29 + $0x100] sm:$0xff]  ;;  %6619 = vmatprep.subr.bf16.mxu0 %v8279_v44  ;;  %v8790_v52 = vcombine.low %v853_v40, %v869_v41 }
  0x58   : > { %v325_v47 = vld [vmem:[%s9632_s29 + $0x180] sm:$0xff]  ;;  %6620 = vmatpush1.bf16.msra.mxu0 %v8278_v50 }
  0x59   : > { %v821_v48 = vld [vmem:[%s9632_s29 + $0x1100] sm:$0xff]  ;;  %v8247_v53 = vcombine.high %v309_v46, %v325_v47  ;;  %6662 = vmatprep.subr.bf16.mxu1 %v8791_v45  ;;  %v8246_v60 = vcombine.low %v309_v46, %v325_v47 }
  0x5a   : > { %v837_v49 = vld [vmem:[%s9632_s29 + $0x1180] sm:$0xff]  ;;  %6663 = vmatpush1.bf16.msra.mxu1 %v8790_v52 }
  0x5b   : > { %v277_v51 = vld [vmem:[%s9632_s29] sm:$0xff]  ;;  %v8759_v55 = vcombine.high %v821_v48, %v837_v49  ;;  %6621 = vmatprep.subr.bf16.mxu0 %v8247_v53  ;;  %v8758_v61 = vcombine.low %v821_v48, %v837_v49 }
  0x5c   : > { %v293_v54 = vld [vmem:[%s9632_s29 + $0x80] sm:$0xff]  ;;  %6622 = vmatpush1.bf16.msra.mxu0 %v8246_v60 }
  0x5d   : > { %v9679_v56 = vld [vmem:[%s11082_s0 + $0x4] ss:$16 sps:$4 sm:$0xff]   ;;  %v8215_v62 = vcombine.high %v277_v51, %v293_v54  ;;  %6664 = vmatprep.subr.bf16.mxu1 %v8759_v55  ;;  %v8214_v4 = vcombine.low %v277_v51, %v293_v54 }
  0x5e   : > { %v789_v57 = vld [vmem:[%s9632_s29 + $0x1000] sm:$0xff]  ;;  %6641 = vmatprep.mubr.bf16.mxu0 %v9679_v56  ;;  %6665 = vmatpush1.bf16.msra.mxu1 %v8758_v61 }
  0x5f   : > { %v805_v58 = vld [vmem:[%s9632_s29 + $0x1080] sm:$0xff]  ;;  %6623 = vmatprep.subr.bf16.mxu0 %v8215_v62 }
  0x60   : > { %v8727_v63 = vcombine.high %v789_v57, %v805_v58  ;;  %v757_v0 = vld [vmem:[%s9632_s29 + $0xf00] sm:$0xff]  ;;  %v8726_v5 = vcombine.low %v789_v57, %v805_v58  ;;  %6624 = vmatpush1.bf16.msra.mxu0 %v8214_v4  ;;  %v1014_v4 = vld [vmem:[%s9632_s29 + $0x1708] sm:$0xff] }
  0x61   : > { %v773_v1 = vld [vmem:[%s9632_s29 + $0xf80] sm:$0xff] }
  0x62   : > { %v1269_v2 = vld [vmem:[%s9632_s29 + $0x1f00] sm:$0xff]  ;;  %v8695_v6 = vcombine.high %v757_v0, %v773_v1  ;;  %6666 = vmatprep.subr.bf16.mxu1 %v8727_v63  ;;  %v8694_v12 = vcombine.low %v757_v0, %v773_v1 }
  0x63   : > { %v1285_v3 = vld [vmem:[%s9632_s29 + $0x1f80] sm:$0xff]  ;;  %6667 = vmatpush1.bf16.msra.mxu1 %v8726_v5  ;;  %v1030_v5 = vld [vmem:[%s9632_s29 + $0x1788] sm:$0xff] }
  0x64   : > { %v9207_v7 = vcombine.high %v1269_v2, %v1285_v3  ;;  %v725_v8 = vld [vmem:[%s9632_s29 + $0xe00] sm:$0xff]  ;;  %6625 = vmatprep.subr.bf16.mxu0 %v8695_v6  ;;  %v9206_v13 = vcombine.low %v1269_v2, %v1285_v3  ;;  %v502_v2 = vld [vmem:[%s9632_s29 + $0x708] sm:$0xff] }
  0x65   : > { %v741_v9 = vld [vmem:[%s9632_s29 + $0xe80] sm:$0xff]  ;;  %6626 = vmatpush2.bf16.msra.mxu0 %v8694_v12  ;;  %v518_v3 = vld [vmem:[%s9632_s29 + $0x788] sm:$0xff] }
  0x66   : > { %v1237_v10 = vld [vmem:[%s9632_s29 + $0x1e00] sm:$0xff]  ;;  %v8663_v14 = vcombine.high %v725_v8, %v741_v9  ;;  %6668 = vmatprep.subr.bf16.mxu1 %v9207_v7  ;;  %v8662_v20 = vcombine.low %v725_v8, %v741_v9  ;;  %v8441_v8 = vcombine.high %v502_v2, %v518_v3  ;;  %v8953_v9 = vcombine.high %v1014_v4, %v1030_v5 }
  0x67   : > { %v1253_v11 = vld [vmem:[%s9632_s29 + $0x1e80] sm:$0xff]  ;;  %6669 = vmatpush2.bf16.msra.mxu1 %v9206_v13  ;;  %v982_v13 = vld [vmem:[%s9632_s29 + $0x1608] sm:$0xff] }
  0x68   : > { %v9175_v15 = vcombine.high %v1237_v10, %v1253_v11  ;;  %v693_v16 = vld [vmem:[%s9632_s29 + $0xd00] sm:$0xff]  ;;  %6627 = vmatprep.subr.bf16.mxu0 %v8663_v14  ;;  %v9174_v21 = vcombine.low %v1237_v10, %v1253_v11  ;;  %v470_v10 = vld [vmem:[%s9632_s29 + $0x608] sm:$0xff] }
  0x69   : > { %v709_v17 = vld [vmem:[%s9632_s29 + $0xd80] sm:$0xff]  ;;  %6628 = vmatpush2.bf16.msra.mxu0 %v8662_v20  ;;  %v486_v11 = vld [vmem:[%s9632_s29 + $0x688] sm:$0xff] }
  0x6a   : > { %v1205_v18 = vld [vmem:[%s9632_s29 + $0x1d00] sm:$0xff]  ;;  %v8631_v22 = vcombine.high %v693_v16, %v709_v17  ;;  %6670 = vmatprep.subr.bf16.mxu1 %v9175_v15  ;;  %v8630_v28 = vcombine.low %v693_v16, %v709_v17  ;;  %v998_v14 = vld [vmem:[%s9632_s29 + $0x1688] sm:$0xff]  ;;  %v8440_v16 = vcombine.low %v502_v2, %v518_v3  ;;  %v8952_v17 = vcombine.low %v1014_v4, %v1030_v5 }
  0x6b   : > { %v1221_v19 = vld [vmem:[%s9632_s29 + $0x1d80] sm:$0xff]  ;;  %6671 = vmatpush2.bf16.msra.mxu1 %v9174_v21  ;;  %v9738_v15 = vld [vmem:[%s11082_s0 + $0x8] ss:$16 sps:$4 sm:$0xff]  }
  0x6c   : > { %v9143_v23 = vcombine.high %v1205_v18, %v1221_v19  ;;  %v661_v24 = vld [vmem:[%s9632_s29 + $0xc00] sm:$0xff]  ;;  %6629 = vmatprep.subr.bf16.mxu0 %v8631_v22  ;;  %v9142_v29 = vcombine.low %v1205_v18, %v1221_v19  ;;  %v8409_v18 = vcombine.high %v470_v10, %v486_v11  ;;  %v8921_v19 = vcombine.high %v982_v13, %v998_v14  ;;  %v438_v20 = vld [vmem:[%s9632_s29 + $0x508] sm:$0xff] }
  0x6d   : > { %v677_v25 = vld [vmem:[%s9632_s29 + $0xc80] sm:$0xff]  ;;  %6630 = vmatpush2.bf16.msra.mxu0 %v8630_v28  ;;  %v454_v21 = vld [vmem:[%s9632_s29 + $0x588] sm:$0xff] }
  0x6e   : > { %v1173_v26 = vld [vmem:[%s9632_s29 + $0x1c00] sm:$0xff]  ;;  %v8599_v30 = vcombine.high %v661_v24, %v677_v25  ;;  %6672 = vmatprep.subr.bf16.mxu1 %v9143_v23  ;;  %v8598_v36 = vcombine.low %v661_v24, %v677_v25  ;;  %v950_v22 = vld [vmem:[%s9632_s29 + $0x1508] sm:$0xff]  ;;  %v8408_v24 = vcombine.low %v470_v10, %v486_v11  ;;  %v8920_v25 = vcombine.low %v982_v13, %v998_v14 }
  0x6f   : > { %v1189_v27 = vld [vmem:[%s9632_s29 + $0x1c80] sm:$0xff]  ;;  %6673 = vmatpush2.bf16.msra.mxu1 %v9142_v29  ;;  %v966_v23 = vld [vmem:[%s9632_s29 + $0x1588] sm:$0xff] }
  0x70   : > { %v9111_v31 = vcombine.high %v1173_v26, %v1189_v27  ;;  %v629_v32 = vld [vmem:[%s9632_s29 + $0xb00] sm:$0xff]  ;;  %6631 = vmatprep.subr.bf16.mxu0 %v8599_v30  ;;  %v9110_v37 = vcombine.low %v1173_v26, %v1189_v27  ;;  %v8377_v26 = vcombine.high %v438_v20, %v454_v21  ;;  %v8889_v27 = vcombine.high %v950_v22, %v966_v23  ;;  %v406_v28 = vld [vmem:[%s9632_s29 + $0x408] sm:$0xff] }
  0x71   : > { %v645_v33 = vld [vmem:[%s9632_s29 + $0xb80] sm:$0xff]  ;;  %6632 = vmatpush2.bf16.msra.mxu0 %v8598_v36  ;;  %v422_v29 = vld [vmem:[%s9632_s29 + $0x488] sm:$0xff] }
  0x72   : > { %v1141_v34 = vld [vmem:[%s9632_s29 + $0x1b00] sm:$0xff]  ;;  %v8567_v38 = vcombine.high %v629_v32, %v645_v33  ;;  %6674 = vmatprep.subr.bf16.mxu1 %v9111_v31  ;;  %v8566_v44 = vcombine.low %v629_v32, %v645_v33  ;;  %v918_v30 = vld [vmem:[%s9632_s29 + $0x1408] sm:$0xff]  ;;  %v8376_v32 = vcombine.low %v438_v20, %v454_v21  ;;  %v8888_v33 = vcombine.low %v950_v22, %v966_v23 }
  0x73   : > { %v1157_v35 = vld [vmem:[%s9632_s29 + $0x1b80] sm:$0xff]  ;;  %6675 = vmatpush2.bf16.msra.mxu1 %v9110_v37  ;;  %v934_v31 = vld [vmem:[%s9632_s29 + $0x1488] sm:$0xff] }
  0x74   : > { %v9079_v39 = vcombine.high %v1141_v34, %v1157_v35  ;;  %v597_v40 = vld [vmem:[%s9632_s29 + $0xa00] sm:$0xff]  ;;  %6633 = vmatprep.subr.bf16.mxu0 %v8567_v38  ;;  %v9078_v45 = vcombine.low %v1141_v34, %v1157_v35  ;;  %v8345_v34 = vcombine.high %v406_v28, %v422_v29  ;;  %v8857_v35 = vcombine.high %v918_v30, %v934_v31  ;;  %v374_v36 = vld [vmem:[%s9632_s29 + $0x308] sm:$0xff] }
  0x75   : > { %v613_v41 = vld [vmem:[%s9632_s29 + $0xa80] sm:$0xff]  ;;  %6634 = vmatpush2.bf16.msra.mxu0 %v8566_v44  ;;  %v390_v37 = vld [vmem:[%s9632_s29 + $0x388] sm:$0xff] }
  0x76   : > { %v1109_v42 = vld [vmem:[%s9632_s29 + $0x1a00] sm:$0xff]  ;;  %v8535_v46 = vcombine.high %v597_v40, %v613_v41  ;;  %6676 = vmatprep.subr.bf16.mxu1 %v9079_v39  ;;  %v8534_v52 = vcombine.low %v597_v40, %v613_v41  ;;  %v886_v38 = vld [vmem:[%s9632_s29 + $0x1308] sm:$0xff]  ;;  %v8344_v40 = vcombine.low %v406_v28, %v422_v29  ;;  %v8856_v41 = vcombine.low %v918_v30, %v934_v31 }
  0x77   : > { %v1125_v43 = vld [vmem:[%s9632_s29 + $0x1a80] sm:$0xff]  ;;  %6677 = vmatpush2.bf16.msra.mxu1 %v9078_v45  ;;  %v902_v39 = vld [vmem:[%s9632_s29 + $0x1388] sm:$0xff] }
  0x78   : > { %v9047_v47 = vcombine.high %v1109_v42, %v1125_v43  ;;  %v565_v48 = vld [vmem:[%s9632_s29 + $0x900] sm:$0xff]  ;;  %6635 = vmatprep.subr.bf16.mxu0 %v8535_v46  ;;  %v9046_v53 = vcombine.low %v1109_v42, %v1125_v43  ;;  %v8313_v42 = vcombine.high %v374_v36, %v390_v37  ;;  %v8825_v43 = vcombine.high %v886_v38, %v902_v39  ;;  %v342_v44 = vld [vmem:[%s9632_s29 + $0x208] sm:$0xff] }
  0x79   : > { %v581_v49 = vld [vmem:[%s9632_s29 + $0x980] sm:$0xff]  ;;  %6636 = vmatpush2.bf16.msra.mxu0 %v8534_v52  ;;  %v358_v45 = vld [vmem:[%s9632_s29 + $0x288] sm:$0xff] }
  0x7a   : > { %v1077_v50 = vld [vmem:[%s9632_s29 + $0x1900] sm:$0xff]  ;;  %v8503_v54 = vcombine.high %v565_v48, %v581_v49  ;;  %6678 = vmatprep.subr.bf16.mxu1 %v9047_v47  ;;  %v8502_v62 = vcombine.low %v565_v48, %v581_v49  ;;  %v854_v46 = vld [vmem:[%s9632_s29 + $0x1208] sm:$0xff]  ;;  %v8312_v48 = vcombine.low %v374_v36, %v390_v37  ;;  %v8824_v49 = vcombine.low %v886_v38, %v902_v39 }
  0x7b   : > { %v1093_v51 = vld [vmem:[%s9632_s29 + $0x1980] sm:$0xff]  ;;  %6679 = vmatpush2.bf16.msra.mxu1 %v9046_v53  ;;  %v870_v47 = vld [vmem:[%s9632_s29 + $0x1288] sm:$0xff] }
  0x7c   : > { %v9015_v55 = vcombine.high %v1077_v50, %v1093_v51  ;;  %v533_v57 = vld [vmem:[%s9632_s29 + $0x800] sm:$0xff]  ;;  %6637 = vmatprep.subr.bf16.mxu0 %v8503_v54  ;;  %v9014_v63 = vcombine.low %v1077_v50, %v1093_v51  ;;  %v8281_v50 = vcombine.high %v342_v44, %v358_v45  ;;  %v8793_v51 = vcombine.high %v854_v46, %v870_v47  ;;  %v310_v52 = vld [vmem:[%s9632_s29 + $0x108] sm:$0xff] }
  0x7d   : > { %v549_v58 = vld [vmem:[%s9632_s29 + $0x880] sm:$0xff]  ;;  %6638 = vmatpush2.bf16.msra.mxu0 %v8502_v62  ;;  %v326_v53 = vld [vmem:[%s9632_s29 + $0x188] sm:$0xff] }
  0x7e   : > { %v1045_v60 = vld [vmem:[%s9632_s29 + $0x1800] sm:$0xff]  ;;  %v8471_v0 = vcombine.high %v533_v57, %v549_v58  ;;  %6680 = vmatprep.subr.bf16.mxu1 %v9015_v55  ;;  %v8470_v6 = vcombine.low %v533_v57, %v549_v58  ;;  %v822_v54 = vld [vmem:[%s9632_s29 + $0x1108] sm:$0xff]  ;;  %v8280_v57 = vcombine.low %v342_v44, %v358_v45  ;;  %v8792_v58 = vcombine.low %v854_v46, %v870_v47 }
  0x7f   : > { %v1061_v61 = vld [vmem:[%s9632_s29 + $0x1880] sm:$0xff]  ;;  %6681 = vmatpush2.bf16.msra.mxu1 %v9014_v63  ;;  %v838_v55 = vld [vmem:[%s9632_s29 + $0x1188] sm:$0xff]  ;;  %v8248_v2 = vcombine.low %v310_v52, %v326_v53 }
  0x80   : > { %v8983_v1 = vcombine.high %v1045_v60, %v1061_v61  ;;  %6639 = vmatprep.subr.bf16.mxu0 %v8471_v0  ;;  %v8982_v7 = vcombine.low %v1045_v60, %v1061_v61  ;;  %v9731_v12 = vld [vmem:[%s11082_s0] ss:$16 sps:$4 sm:$0xff]   ;;  %v8249_v60 = vcombine.high %v310_v52, %v326_v53  ;;  %v8761_v61 = vcombine.high %v822_v54, %v838_v55  ;;  %v278_v62 = vld [vmem:[%s9632_s29 + $0x8] sm:$0xff] }
  0x81   : > { %6640 = vmatpush2.bf16.msra.mxu0 %v8470_v6  ;;  %v294_v63 = vld [vmem:[%s9632_s29 + $0x88] sm:$0xff]  ;;  %v8760_v3 = vcombine.low %v822_v54, %v838_v55 }
  0x82   : > { %6682 = vmatprep.subr.bf16.mxu1 %v8983_v1  ;;  %6695 = vmatprep.subr.bf16.mxu0 %v8441_v8  ;;  %v790_v0 = vld [vmem:[%s9632_s29 + $0x1008] sm:$0xff]  ;;  %v8217_v4 = vcombine.high %v278_v62, %v294_v63  ;;  %v8216_v10 = vcombine.low %v278_v62, %v294_v63 }
  0x83   : > { %6683 = vmatpush2.bf16.msra.mxu1 %v8982_v7  ;;  %v806_v1 = vld [vmem:[%s9632_s29 + $0x1088] sm:$0xff] }
  0x84   : > { %6738 = vmatprep.subr.bf16.mxu1 %v8953_v9  ;;  %6642 = vmatmul.mubr.bf16.vlgmr.msra.gmra.mxu0 %v9731_v12  ;;  %v8729_v5 = vcombine.high %v790_v0, %v806_v1  ;;  %v758_v6 = vld [vmem:[%s9632_s29 + $0xf08] sm:$0xff]  ;;  %v8728_v11 = vcombine.low %v790_v0, %v806_v1 }
  0x85   : > { %6696 = vmatpush1.bf16.msra.mxu0 %v8440_v16  ;;  %6727 = vmatprep.mubr.bf16.mxu0 %v9679_v56  ;;  %v774_v7 = vld [vmem:[%s9632_s29 + $0xf88] sm:$0xff] }
  0x86   : > { %6685 = vmatmul.mubr.bf16.vlgmr.msra.gmra.mxu1 %v9738_v15  ;;  %6697 = vmatprep.subr.bf16.mxu0 %v8409_v18  ;;  %v1270_v8 = vld [vmem:[%s9632_s29 + $0x1f08] sm:$0xff]  ;;  %v8697_v13 = vcombine.high %v758_v6, %v774_v7  ;;  %v8696_v20 = vcombine.low %v758_v6, %v774_v7 }
  0x87   : > { %6739 = vmatpush1.bf16.msra.mxu1 %v8952_v17  ;;  %6770 = vmatprep.mubr.bf16.mxu1 %v9686_v59  ;;  %v1286_v9 = vld [vmem:[%s9632_s29 + $0x1f88] sm:$0xff] }
  0x88   : > { %6740 = vmatprep.subr.bf16.mxu1 %v8921_v19  ;;  %v9209_v14 = vcombine.high %v1270_v8, %v1286_v9  ;;  %v726_v16 = vld [vmem:[%s9632_s29 + $0xe08] sm:$0xff]  ;;  %v9208_v21 = vcombine.low %v1270_v8, %v1286_v9 }
  0x89   : > { %6698 = vmatpush1.bf16.msra.mxu0 %v8408_v24  ;;  %v742_v17 = vld [vmem:[%s9632_s29 + $0xe88] sm:$0xff] }
  0x8a   : > { %6699 = vmatprep.subr.bf16.mxu0 %v8377_v26  ;;  %v1238_v18 = vld [vmem:[%s9632_s29 + $0x1e08] sm:$0xff]  ;;  %v8665_v22 = vcombine.high %v726_v16, %v742_v17  ;;  %v8664_v28 = vcombine.low %v726_v16, %v742_v17 }
  0x8b   : > { %6741 = vmatpush1.bf16.msra.mxu1 %v8920_v25  ;;  %v1254_v19 = vld [vmem:[%s9632_s29 + $0x1e88] sm:$0xff] }
  0x8c   : > { %6742 = vmatprep.subr.bf16.mxu1 %v8889_v27  ;;  %v9177_v23 = vcombine.high %v1238_v18, %v1254_v19  ;;  %v694_v24 = vld [vmem:[%s9632_s29 + $0xd08] sm:$0xff]  ;;  %v9176_v29 = vcombine.low %v1238_v18, %v1254_v19 }
  0x8d   : > { %6700 = vmatpush1.bf16.msra.mxu0 %v8376_v32  ;;  %v710_v25 = vld [vmem:[%s9632_s29 + $0xd88] sm:$0xff] }
  0x8e   : > { %6701 = vmatprep.subr.bf16.mxu0 %v8345_v34  ;;  %v1206_v26 = vld [vmem:[%s9632_s29 + $0x1d08] sm:$0xff]  ;;  %v8633_v30 = vcombine.high %v694_v24, %v710_v25  ;;  %v8632_v36 = vcombine.low %v694_v24, %v710_v25 }
  0x8f   : > { %6743 = vmatpush1.bf16.msra.mxu1 %v8888_v33  ;;  %v1222_v27 = vld [vmem:[%s9632_s29 + $0x1d88] sm:$0xff] }
  0x90   : > { %6744 = vmatprep.subr.bf16.mxu1 %v8857_v35  ;;  %v9145_v31 = vcombine.high %v1206_v26, %v1222_v27  ;;  %v662_v32 = vld [vmem:[%s9632_s29 + $0xc08] sm:$0xff]  ;;  %v9144_v37 = vcombine.low %v1206_v26, %v1222_v27 }
  0x91   : > { %6702 = vmatpush1.bf16.msra.mxu0 %v8344_v40  ;;  %v678_v33 = vld [vmem:[%s9632_s29 + $0xc88] sm:$0xff] }
  0x92   : > { %6703 = vmatprep.subr.bf16.mxu0 %v8313_v42  ;;  %v1174_v34 = vld [vmem:[%s9632_s29 + $0x1c08] sm:$0xff]  ;;  %v8601_v38 = vcombine.high %v662_v32, %v678_v33  ;;  %v8600_v44 = vcombine.low %v662_v32, %v678_v33 }
  0x93   : > { %6745 = vmatpush1.bf16.msra.mxu1 %v8856_v41  ;;  %v1190_v35 = vld [vmem:[%s9632_s29 + $0x1c88] sm:$0xff] }
  0x94   : > { %6746 = vmatprep.subr.bf16.mxu1 %v8825_v43  ;;  %v9113_v39 = vcombine.high %v1174_v34, %v1190_v35  ;;  %v630_v40 = vld [vmem:[%s9632_s29 + $0xb08] sm:$0xff]  ;;  %v9112_v45 = vcombine.low %v1174_v34, %v1190_v35 }
  0x95   : > { %6704 = vmatpush1.bf16.msra.mxu0 %v8312_v48  ;;  %v646_v41 = vld [vmem:[%s9632_s29 + $0xb88] sm:$0xff] }
  0x96   : > { %6705 = vmatprep.subr.bf16.mxu0 %v8281_v50  ;;  %v1142_v42 = vld [vmem:[%s9632_s29 + $0x1b08] sm:$0xff]  ;;  %v8569_v46 = vcombine.high %v630_v40, %v646_v41  ;;  %v8568_v52 = vcombine.low %v630_v40, %v646_v41 }
  0x97   : > { %6747 = vmatpush1.bf16.msra.mxu1 %v8824_v49  ;;  %v1158_v43 = vld [vmem:[%s9632_s29 + $0x1b88] sm:$0xff] }
  0x98   : > { %6748 = vmatprep.subr.bf16.mxu1 %v8793_v51  ;;  %v9081_v47 = vcombine.high %v1142_v42, %v1158_v43  ;;  %v598_v48 = vld [vmem:[%s9632_s29 + $0xa08] sm:$0xff]  ;;  %v9080_v53 = vcombine.low %v1142_v42, %v1158_v43 }
  0x99   : > { %6706 = vmatpush1.bf16.msra.mxu0 %v8280_v57  ;;  %v614_v49 = vld [vmem:[%s9632_s29 + $0xa88] sm:$0xff] }
  0x9a   : > { %6707 = vmatprep.subr.bf16.mxu0 %v8249_v60  ;;  %v1110_v50 = vld [vmem:[%s9632_s29 + $0x1a08] sm:$0xff]  ;;  %v8537_v54 = vcombine.high %v598_v48, %v614_v49  ;;  %v8536_v62 = vcombine.low %v598_v48, %v614_v49 }
  0x9b   : > { %6749 = vmatpush1.bf16.msra.mxu1 %v8792_v58  ;;  %v1126_v51 = vld [vmem:[%s9632_s29 + $0x1a88] sm:$0xff] }
  0x9c   : > { %6750 = vmatprep.subr.bf16.mxu1 %v8761_v61  ;;  %v9049_v55 = vcombine.high %v1110_v50, %v1126_v51  ;;  %v566_v57 = vld [vmem:[%s9632_s29 + $0x908] sm:$0xff]  ;;  %v9048_v63 = vcombine.low %v1110_v50, %v1126_v51  ;;  %v343_v50 = vld [vmem:[%s9632_s29 + $0x210] sm:$0xff] }
  0x9d   : > { %6708 = vmatpush1.bf16.msra.mxu0 %v8248_v2  ;;  %v582_v58 = vld [vmem:[%s9632_s29 + $0x988] sm:$0xff]  ;;  %v359_v51 = vld [vmem:[%s9632_s29 + $0x290] sm:$0xff] }
  0x9e   : > { %6709 = vmatprep.subr.bf16.mxu0 %v8217_v4  ;;  %v1078_v60 = vld [vmem:[%s9632_s29 + $0x1908] sm:$0xff]  ;;  %v8505_v0 = vcombine.high %v566_v57, %v582_v58  ;;  %v8504_v6 = vcombine.low %v566_v57, %v582_v58  ;;  %v8283_v57 = vcombine.high %v343_v50, %v359_v51 }
  0x9f   : > { %6751 = vmatpush1.bf16.msra.mxu1 %v8760_v3  ;;  %v1094_v61 = vld [vmem:[%s9632_s29 + $0x1988] sm:$0xff] }
  0xa0   : > { %6752 = vmatprep.subr.bf16.mxu1 %v8729_v5  ;;  %v9017_v1 = vcombine.high %v1078_v60, %v1094_v61  ;;  %v534_v2 = vld [vmem:[%s9632_s29 + $0x808] sm:$0xff]  ;;  %v9016_v7 = vcombine.low %v1078_v60, %v1094_v61  ;;  %v311_v60 = vld [vmem:[%s9632_s29 + $0x110] sm:$0xff] }
  0xa1   : > { %6710 = vmatpush1.bf16.msra.mxu0 %v8216_v10  ;;  %v550_v3 = vld [vmem:[%s9632_s29 + $0x888] sm:$0xff]  ;;  %v503_v10 = vld [vmem:[%s9632_s29 + $0x710] sm:$0xff] }
  0xa2   : > { %6711 = vmatprep.subr.bf16.mxu0 %v8697_v13  ;;  %v1046_v4 = vld [vmem:[%s9632_s29 + $0x1808] sm:$0xff]  ;;  %v8473_v8 = vcombine.high %v534_v2, %v550_v3  ;;  %v1015_v13 = vld [vmem:[%s9632_s29 + $0x1710] sm:$0xff]  ;;  %v8472_v16 = vcombine.low %v534_v2, %v550_v3 }
  0xa3   : > { %6753 = vmatpush1.bf16.msra.mxu1 %v8728_v11  ;;  %v1062_v5 = vld [vmem:[%s9632_s29 + $0x1888] sm:$0xff]  ;;  %v519_v11 = vld [vmem:[%s9632_s29 + $0x790] sm:$0xff] }
  0xa4   : > { %6754 = vmatprep.subr.bf16.mxu1 %v9209_v14  ;;  %v8985_v9 = vcombine.high %v1046_v4, %v1062_v5  ;;  %v1031_v14 = vld [vmem:[%s9632_s29 + $0x1790] sm:$0xff]  ;;  %v8984_v17 = vcombine.low %v1046_v4, %v1062_v5  ;;  %v8443_v18 = vcombine.high %v503_v10, %v519_v11  ;;  %v8442_v24 = vcombine.low %v503_v10, %v519_v11 }
  0xa5   : > { %6712 = vmatpush2.bf16.msra.mxu0 %v8696_v20  ;;  %v8955_v19 = vcombine.high %v1015_v13, %v1031_v14  ;;  %v471_v20 = vld [vmem:[%s9632_s29 + $0x610] sm:$0xff]  ;;  %v8954_v25 = vcombine.low %v1015_v13, %v1031_v14 }
  0xa6   : > { %6713 = vmatprep.subr.bf16.mxu0 %v8665_v22  ;;  %v983_v22 = vld [vmem:[%s9632_s29 + $0x1610] sm:$0xff] }
  0xa7   : > { %6755 = vmatpush2.bf16.msra.mxu1 %v9208_v21  ;;  %v487_v21 = vld [vmem:[%s9632_s29 + $0x690] sm:$0xff] }
  0xa8   : > { %6756 = vmatprep.subr.bf16.mxu1 %v9177_v23  ;;  %v999_v23 = vld [vmem:[%s9632_s29 + $0x1690] sm:$0xff]  ;;  %v8411_v26 = vcombine.high %v471_v20, %v487_v21  ;;  %v8410_v32 = vcombine.low %v471_v20, %v487_v21 }
  0xa9   : > { %6714 = vmatpush2.bf16.msra.mxu0 %v8664_v28  ;;  %v8923_v27 = vcombine.high %v983_v22, %v999_v23  ;;  %v439_v28 = vld [vmem:[%s9632_s29 + $0x510] sm:$0xff]  ;;  %v8922_v33 = vcombine.low %v983_v22, %v999_v23 }
  0xaa   : > { %6715 = vmatprep.subr.bf16.mxu0 %v8633_v30  ;;  %v951_v30 = vld [vmem:[%s9632_s29 + $0x1510] sm:$0xff] }
  0xab   : > { %6757 = vmatpush2.bf16.msra.mxu1 %v9176_v29  ;;  %v455_v29 = vld [vmem:[%s9632_s29 + $0x590] sm:$0xff] }
  0xac   : > { %6758 = vmatprep.subr.bf16.mxu1 %v9145_v31  ;;  %v967_v31 = vld [vmem:[%s9632_s29 + $0x1590] sm:$0xff]  ;;  %v8379_v34 = vcombine.high %v439_v28, %v455_v29  ;;  %v8378_v40 = vcombine.low %v439_v28, %v455_v29 }
  0xad   : > { %6716 = vmatpush2.bf16.msra.mxu0 %v8632_v36  ;;  %v8891_v35 = vcombine.high %v951_v30, %v967_v31  ;;  %v407_v36 = vld [vmem:[%s9632_s29 + $0x410] sm:$0xff]  ;;  %v8890_v41 = vcombine.low %v951_v30, %v967_v31 }
  0xae   : > { %6717 = vmatprep.subr.bf16.mxu0 %v8601_v38  ;;  %v919_v38 = vld [vmem:[%s9632_s29 + $0x1410] sm:$0xff] }
  0xaf   : > { %6759 = vmatpush2.bf16.msra.mxu1 %v9144_v37  ;;  %v423_v37 = vld [vmem:[%s9632_s29 + $0x490] sm:$0xff] }
  0xb0   : > { %6760 = vmatprep.subr.bf16.mxu1 %v9113_v39  ;;  %v935_v39 = vld [vmem:[%s9632_s29 + $0x1490] sm:$0xff]  ;;  %v8347_v42 = vcombine.high %v407_v36, %v423_v37 }
  0xb1   : > { %6718 = vmatpush2.bf16.msra.mxu0 %v8600_v44  ;;  %v8859_v43 = vcombine.high %v919_v38, %v935_v39  ;;  %v375_v44 = vld [vmem:[%s9632_s29 + $0x310] sm:$0xff] }
  0xb2   : > { %6719 = vmatprep.subr.bf16.mxu0 %v8569_v46  ;;  %v887_v46 = vld [vmem:[%s9632_s29 + $0x1310] sm:$0xff] }
  0xb3   : > { %6761 = vmatpush2.bf16.msra.mxu1 %v9112_v45  ;;  %v391_v45 = vld [vmem:[%s9632_s29 + $0x390] sm:$0xff] }
  0xb4   : > { %6762 = vmatprep.subr.bf16.mxu1 %v9081_v47  ;;  %v8346_v47 = vcombine.low %v407_v36, %v423_v37  ;;  %v8315_v48 = vcombine.high %v375_v44, %v391_v45  ;;  %v327_v61 = vld [vmem:[%s9632_s29 + $0x190] sm:$0xff] }
  0xb5   : > { %6720 = vmatpush2.bf16.msra.mxu0 %v8568_v52  ;;  %v855_v52 = vld [vmem:[%s9632_s29 + $0x1210] sm:$0xff]  ;;  %v8251_v2 = vcombine.high %v311_v60, %v327_v61 }
  0xb6   : > { %6721 = vmatprep.subr.bf16.mxu0 %v8537_v54  ;;  %v8314_v54 = vcombine.low %v375_v44, %v391_v45  ;;  %v279_v4 = vld [vmem:[%s9632_s29 + $0x10] sm:$0xff] }
  0xb7   : > { %6763 = vmatpush2.bf16.msra.mxu1 %v9080_v53  ;;  %v871_v53 = vld [vmem:[%s9632_s29 + $0x1290] sm:$0xff] }
  0xb8   : > { %6764 = vmatprep.subr.bf16.mxu1 %v9049_v55  ;;  %v8795_v58 = vcombine.high %v855_v52, %v871_v53  ;;  %v295_v5 = vld [vmem:[%s9632_s29 + $0x90] sm:$0xff] }
  0xb9   : > { %6722 = vmatpush2.bf16.msra.mxu0 %v8536_v62  ;;  %v823_v62 = vld [vmem:[%s9632_s29 + $0x1110] sm:$0xff]  ;;  %v8219_v10 = vcombine.high %v279_v4, %v295_v5 }
  0xba   : > { %6723 = vmatprep.subr.bf16.mxu0 %v8505_v0  ;;  %v8282_v0 = vcombine.low %v343_v50, %v359_v51  ;;  %v759_v13 = vld [vmem:[%s9632_s29 + $0xf10] sm:$0xff] }
  0xbb   : > { %6765 = vmatpush2.bf16.msra.mxu1 %v9048_v63  ;;  %v839_v63 = vld [vmem:[%s9632_s29 + $0x1190] sm:$0xff] }
  0xbc   : > { %6766 = vmatprep.subr.bf16.mxu1 %v9017_v1  ;;  %v8794_v1 = vcombine.low %v855_v52, %v871_v53  ;;  %v8763_v3 = vcombine.high %v823_v62, %v839_v63  ;;  %v775_v14 = vld [vmem:[%s9632_s29 + $0xf90] sm:$0xff] }
  0xbd   : > { %6724 = vmatpush2.bf16.msra.mxu0 %v8504_v6  ;;  %v791_v6 = vld [vmem:[%s9632_s29 + $0x1010] sm:$0xff]  ;;  %v8699_v20 = vcombine.high %v759_v13, %v775_v14 }
  0xbe   : > { %6725 = vmatprep.subr.bf16.mxu0 %v8473_v8  ;;  %v8250_v8 = vcombine.low %v311_v60, %v327_v61  ;;  %v727_v22 = vld [vmem:[%s9632_s29 + $0xe10] sm:$0xff] }
  0xbf   : > { %6767 = vmatpush2.bf16.msra.mxu1 %v9016_v7  ;;  %v807_v7 = vld [vmem:[%s9632_s29 + $0x1090] sm:$0xff] }
  0xc0   : > { %6768 = vmatprep.subr.bf16.mxu1 %v8985_v9  ;;  %v8762_v9 = vcombine.low %v823_v62, %v839_v63  ;;  %v8731_v11 = vcombine.high %v791_v6, %v807_v7  ;;  %v743_v23 = vld [vmem:[%s9632_s29 + $0xe90] sm:$0xff] }
  0xc1   : > { %6726 = vmatpush2.bf16.msra.mxu0 %v8472_v16  ;;  %v1271_v16 = vld [vmem:[%s9632_s29 + $0x1f10] sm:$0xff]  ;;  %v8667_v28 = vcombine.high %v727_v22, %v743_v23 }
  0xc2   : > { %6781 = vmatprep.subr.bf16.mxu0 %v8443_v18  ;;  %v8218_v18 = vcombine.low %v279_v4, %v295_v5  ;;  %v695_v30 = vld [vmem:[%s9632_s29 + $0xd10] sm:$0xff] }
  0xc3   : > { %6769 = vmatpush2.bf16.msra.mxu1 %v8984_v17  ;;  %v1287_v17 = vld [vmem:[%s9632_s29 + $0x1f90] sm:$0xff] }
  0xc4   : > { %6824 = vmatprep.subr.bf16.mxu1 %v8955_v19  ;;  %6728 = vmatmul.mubr.bf16.vlgmr.msra.gmra.mxu0 %v9731_v12  ;;  %v8730_v19 = vcombine.low %v791_v6, %v807_v7  ;;  %v9211_v21 = vcombine.high %v1271_v16, %v1287_v17  ;;  %v711_v31 = vld [vmem:[%s9632_s29 + $0xd90] sm:$0xff] }
  0xc5   : > { %6782 = vmatpush1.bf16.msra.mxu0 %v8442_v24  ;;  %6813 = vmatprep.mubr.bf16.mxu0 %v9679_v56  ;;  %v903_v56 = vld [vmem:[%s9632_s29 + $0x1390] sm:$0xff]  ;;  %v8635_v36 = vcombine.high %v695_v30, %v711_v31 }
  0xc6   : > { %6771 = vmatmul.mubr.bf16.vlgmr.msra.gmra.mxu1 %v9738_v15  ;;  %6783 = vmatprep.subr.bf16.mxu0 %v8411_v26  ;;  %v8827_v49 = vcombine.high %v887_v46, %v903_v56  ;;  %v8826_v55 = vcombine.low %v887_v46, %v903_v56  ;;  %v1239_v24 = vld [vmem:[%s9632_s29 + $0x1e10] sm:$0xff]  ;;  %v8698_v26 = vcombine.low %v759_v13, %v775_v14 }
  0xc7   : > { %6825 = vmatpush1.bf16.msra.mxu1 %v8954_v25  ;;  %6856 = vmatprep.mubr.bf16.mxu1 %v9686_v59  ;;  %v8858_v59 = vcombine.low %v919_v38, %v935_v39  ;;  %v1255_v25 = vld [vmem:[%s9632_s29 + $0x1e90] sm:$0xff] }
  0xc8   : > { %6826 = vmatprep.subr.bf16.mxu1 %v8923_v27  ;;  %v9210_v27 = vcombine.low %v1271_v16, %v1287_v17  ;;  %v9179_v29 = vcombine.high %v1239_v24, %v1255_v25  ;;  %v663_v38 = vld [vmem:[%s9632_s29 + $0xc10] sm:$0xff]  ;;  %v504_v16 = vld [vmem:[%s9632_s29 + $0x718] sm:$0xff] }
  0xc9   : > { %6784 = vmatpush1.bf16.msra.mxu0 %v8410_v32  ;;  %v1207_v32 = vld [vmem:[%s9632_s29 + $0x1d10] sm:$0xff]  ;;  %v520_v17 = vld [vmem:[%s9632_s29 + $0x798] sm:$0xff] }
  0xca   : > { %6785 = vmatprep.subr.bf16.mxu0 %v8379_v34  ;;  %v8666_v34 = vcombine.low %v727_v22, %v743_v23  ;;  %v679_v39 = vld [vmem:[%s9632_s29 + $0xc90] sm:$0xff]  ;;  %v8445_v22 = vcombine.high %v504_v16, %v520_v17 }
  0xcb   : > { %6827 = vmatpush1.bf16.msra.mxu1 %v8922_v33  ;;  %v1223_v33 = vld [vmem:[%s9632_s29 + $0x1d90] sm:$0xff]  ;;  %v8603_v44 = vcombine.high %v663_v38, %v679_v39 }
  0xcc   : > { %6828 = vmatprep.subr.bf16.mxu1 %v8891_v35  ;;  %v9178_v35 = vcombine.low %v1239_v24, %v1255_v25  ;;  %v9147_v37 = vcombine.high %v1207_v32, %v1223_v33  ;;  %v631_v46 = vld [vmem:[%s9632_s29 + $0xb10] sm:$0xff]  ;;  %v472_v24 = vld [vmem:[%s9632_s29 + $0x618] sm:$0xff] }
  0xcd   : > { %6786 = vmatpush1.bf16.msra.mxu0 %v8378_v40  ;;  %v1175_v40 = vld [vmem:[%s9632_s29 + $0x1c10] sm:$0xff]  ;;  %v488_v25 = vld [vmem:[%s9632_s29 + $0x698] sm:$0xff] }
  0xce   : > { %6787 = vmatprep.subr.bf16.mxu0 %v8347_v42  ;;  %v8634_v42 = vcombine.low %v695_v30, %v711_v31  ;;  %v647_v56 = vld [vmem:[%s9632_s29 + $0xb90] sm:$0xff]  ;;  %v8413_v30 = vcombine.high %v472_v24, %v488_v25 }
  0xcf   : > { %6829 = vmatpush1.bf16.msra.mxu1 %v8890_v41  ;;  %v1191_v41 = vld [vmem:[%s9632_s29 + $0x1c90] sm:$0xff]  ;;  %v8571_v50 = vcombine.high %v631_v46, %v647_v56 }
  0xd0   : > { %6830 = vmatprep.subr.bf16.mxu1 %v8859_v43  ;;  %v9146_v43 = vcombine.low %v1207_v32, %v1223_v33  ;;  %v9115_v45 = vcombine.high %v1175_v40, %v1191_v41  ;;  %v599_v52 = vld [vmem:[%s9632_s29 + $0xa10] sm:$0xff]  ;;  %v440_v32 = vld [vmem:[%s9632_s29 + $0x518] sm:$0xff] }
  0xd1   : > { %6788 = vmatpush1.bf16.msra.mxu0 %v8346_v47  ;;  %v1143_v47 = vld [vmem:[%s9632_s29 + $0x1b10] sm:$0xff]  ;;  %v456_v33 = vld [vmem:[%s9632_s29 + $0x598] sm:$0xff] }
  0xd2   : > { %6789 = vmatprep.subr.bf16.mxu0 %v8315_v48  ;;  %v8602_v48 = vcombine.low %v663_v38, %v679_v39  ;;  %v615_v53 = vld [vmem:[%s9632_s29 + $0xa90] sm:$0xff]  ;;  %v8381_v38 = vcombine.high %v440_v32, %v456_v33 }
  0xd3   : > { %6831 = vmatpush1.bf16.msra.mxu1 %v8858_v59  ;;  %v1159_v59 = vld [vmem:[%s9632_s29 + $0x1b90] sm:$0xff]  ;;  %v8539_v60 = vcombine.high %v599_v52, %v615_v53 }
  0xd4   : > { %6832 = vmatprep.subr.bf16.mxu1 %v8827_v49  ;;  %v9114_v49 = vcombine.low %v1175_v40, %v1191_v41  ;;  %v9083_v51 = vcombine.high %v1143_v47, %v1159_v59  ;;  %v567_v62 = vld [vmem:[%s9632_s29 + $0x910] sm:$0xff]  ;;  %v408_v40 = vld [vmem:[%s9632_s29 + $0x418] sm:$0xff] }
  0xd5   : > { %6790 = vmatpush1.bf16.msra.mxu0 %v8314_v54  ;;  %v1111_v54 = vld [vmem:[%s9632_s29 + $0x1a10] sm:$0xff]  ;;  %v424_v41 = vld [vmem:[%s9632_s29 + $0x498] sm:$0xff] }
  0xd6   : > { %6791 = vmatprep.subr.bf16.mxu0 %v8283_v57  ;;  %v8570_v57 = vcombine.low %v631_v46, %v647_v56  ;;  %v583_v63 = vld [vmem:[%s9632_s29 + $0x990] sm:$0xff]  ;;  %v8349_v46 = vcombine.high %v408_v40, %v424_v41 }
  0xd7   : > { %6833 = vmatpush1.bf16.msra.mxu1 %v8826_v55  ;;  %v1127_v55 = vld [vmem:[%s9632_s29 + $0x1a90] sm:$0xff]  ;;  %v8507_v4 = vcombine.high %v567_v62, %v583_v63 }
  0xd8   : > { %6834 = vmatprep.subr.bf16.mxu1 %v8795_v58  ;;  %v9082_v58 = vcombine.low %v1143_v47, %v1159_v59  ;;  %v9051_v61 = vcombine.high %v1111_v54, %v1127_v55  ;;  %v535_v6 = vld [vmem:[%s9632_s29 + $0x810] sm:$0xff]  ;;  %v376_v47 = vld [vmem:[%s9632_s29 + $0x318] sm:$0xff] }
  0xd9   : > { %6792 = vmatpush1.bf16.msra.mxu0 %v8282_v0  ;;  %v1079_v0 = vld [vmem:[%s9632_s29 + $0x1910] sm:$0xff]  ;;  %v392_v59 = vld [vmem:[%s9632_s29 + $0x398] sm:$0xff] }
  0xda   : > { %6793 = vmatprep.subr.bf16.mxu0 %v8251_v2  ;;  %v8538_v2 = vcombine.low %v599_v52, %v615_v53  ;;  %v551_v7 = vld [vmem:[%s9632_s29 + $0x890] sm:$0xff]  ;;  %v8317_v52 = vcombine.high %v376_v47, %v392_v59 }
  0xdb   : > { %6835 = vmatpush1.bf16.msra.mxu1 %v8794_v1  ;;  %v1095_v1 = vld [vmem:[%s9632_s29 + $0x1990] sm:$0xff]  ;;  %v8475_v13 = vcombine.high %v535_v6, %v551_v7 }
  0xdc   : > { %6836 = vmatprep.subr.bf16.mxu1 %v8763_v3  ;;  %v9050_v3 = vcombine.low %v1111_v54, %v1127_v55  ;;  %v9019_v5 = vcombine.high %v1079_v0, %v1095_v1  ;;  %v344_v54 = vld [vmem:[%s9632_s29 + $0x218] sm:$0xff] }
  0xdd   : > { %6794 = vmatpush1.bf16.msra.mxu0 %v8250_v8  ;;  %v1047_v8 = vld [vmem:[%s9632_s29 + $0x1810] sm:$0xff]  ;;  %v360_v55 = vld [vmem:[%s9632_s29 + $0x298] sm:$0xff] }
  0xde   : > { %6795 = vmatprep.subr.bf16.mxu0 %v8219_v10  ;;  %v8506_v10 = vcombine.low %v567_v62, %v583_v63  ;;  %v8285_v62 = vcombine.high %v344_v54, %v360_v55 }
  0xdf   : > { %6837 = vmatpush1.bf16.msra.mxu1 %v8762_v9  ;;  %v1063_v9 = vld [vmem:[%s9632_s29 + $0x1890] sm:$0xff] }
  0xe0   : > { %6838 = vmatprep.subr.bf16.mxu1 %v8731_v11  ;;  %v9018_v11 = vcombine.low %v1079_v0, %v1095_v1  ;;  %v8987_v14 = vcombine.high %v1047_v8, %v1063_v9  ;;  %v312_v0 = vld [vmem:[%s9632_s29 + $0x118] sm:$0xff] }
  0xe1   : > { %6796 = vmatpush1.bf16.msra.mxu0 %v8218_v18  ;;  %v1016_v18 = vld [vmem:[%s9632_s29 + $0x1718] sm:$0xff] }
  0xe2   : > { %6797 = vmatprep.subr.bf16.mxu0 %v8699_v20  ;;  %v8474_v20 = vcombine.low %v535_v6, %v551_v7  ;;  %v328_v1 = vld [vmem:[%s9632_s29 + $0x198] sm:$0xff] }
  0xe3   : > { %6839 = vmatpush1.bf16.msra.mxu1 %v8730_v19  ;;  %v1032_v19 = vld [vmem:[%s9632_s29 + $0x1798] sm:$0xff]  ;;  %v8253_v6 = vcombine.high %v312_v0, %v328_v1 }
  0xe4   : > { %6840 = vmatprep.subr.bf16.mxu1 %v9211_v21  ;;  %v8986_v21 = vcombine.low %v1047_v8, %v1063_v9  ;;  %v8957_v23 = vcombine.high %v1016_v18, %v1032_v19  ;;  %v280_v8 = vld [vmem:[%s9632_s29 + $0x18] sm:$0xff] }
  0xe5   : > { %6798 = vmatpush2.bf16.msra.mxu0 %v8698_v26  ;;  %v984_v26 = vld [vmem:[%s9632_s29 + $0x1618] sm:$0xff] }
  0xe6   : > { %6799 = vmatprep.subr.bf16.mxu0 %v8667_v28  ;;  %v8444_v28 = vcombine.low %v504_v16, %v520_v17  ;;  %v296_v9 = vld [vmem:[%s9632_s29 + $0x98] sm:$0xff] }
  0xe7   : > { %6841 = vmatpush2.bf16.msra.mxu1 %v9210_v27  ;;  %v1000_v27 = vld [vmem:[%s9632_s29 + $0x1698] sm:$0xff]  ;;  %v8221_v16 = vcombine.high %v280_v8, %v296_v9 }
  0xe8   : > { %6842 = vmatprep.subr.bf16.mxu1 %v9179_v29  ;;  %v8956_v29 = vcombine.low %v1016_v18, %v1032_v19  ;;  %v8925_v31 = vcombine.high %v984_v26, %v1000_v27  ;;  %v760_v18 = vld [vmem:[%s9632_s29 + $0xf18] sm:$0xff] }
  0xe9   : > { %6800 = vmatpush2.bf16.msra.mxu0 %v8666_v34  ;;  %v952_v34 = vld [vmem:[%s9632_s29 + $0x1518] sm:$0xff] }
  0xea   : > { %6801 = vmatprep.subr.bf16.mxu0 %v8635_v36  ;;  %v8412_v36 = vcombine.low %v472_v24, %v488_v25  ;;  %v776_v19 = vld [vmem:[%s9632_s29 + $0xf98] sm:$0xff] }
  0xeb   : > { %6843 = vmatpush2.bf16.msra.mxu1 %v9178_v35  ;;  %v968_v35 = vld [vmem:[%s9632_s29 + $0x1598] sm:$0xff]  ;;  %v8701_v24 = vcombine.high %v760_v18, %v776_v19 }
  0xec   : > { %6844 = vmatprep.subr.bf16.mxu1 %v9147_v37  ;;  %v8924_v37 = vcombine.low %v984_v26, %v1000_v27  ;;  %v8893_v39 = vcombine.high %v952_v34, %v968_v35  ;;  %v728_v26 = vld [vmem:[%s9632_s29 + $0xe18] sm:$0xff] }
  0xed   : > { %6802 = vmatpush2.bf16.msra.mxu0 %v8634_v42  ;;  %v936_v42 = vld [vmem:[%s9632_s29 + $0x1498] sm:$0xff] }
  0xee   : > { %6803 = vmatprep.subr.bf16.mxu0 %v8603_v44  ;;  %v8380_v44 = vcombine.low %v440_v32, %v456_v33  ;;  %v744_v27 = vld [vmem:[%s9632_s29 + $0xe98] sm:$0xff] }
  0xef   : > { %6845 = vmatpush2.bf16.msra.mxu1 %v9146_v43  ;;  %v9895_v43 = vld [vmem:[%s11082_s0 + $0xc] ss:$16 sps:$4 sm:$0xff]   ;;  %v8669_v32 = vcombine.high %v728_v26, %v744_v27 }
  0xf0   : > { %6846 = vmatprep.subr.bf16.mxu1 %v9115_v45  ;;  %v8892_v45 = vcombine.low %v952_v34, %v968_v35  ;;  %v696_v34 = vld [vmem:[%s9632_s29 + $0xd18] sm:$0xff] }
  0xf1   : > { %6804 = vmatpush2.bf16.msra.mxu0 %v8602_v48  ;;  %v888_v48 = vld [vmem:[%s9632_s29 + $0x1318] sm:$0xff] }
  0xf2   : > { %6805 = vmatprep.subr.bf16.mxu0 %v8571_v50  ;;  %v8348_v50 = vcombine.low %v408_v40, %v424_v41  ;;  %v712_v35 = vld [vmem:[%s9632_s29 + $0xd98] sm:$0xff] }
  0xf3   : > { %6847 = vmatpush2.bf16.msra.mxu1 %v9114_v49  ;;  %v904_v49 = vld [vmem:[%s9632_s29 + $0x1398] sm:$0xff]  ;;  %v8637_v40 = vcombine.high %v696_v34, %v712_v35 }
  0xf4   : > { %6848 = vmatprep.subr.bf16.mxu1 %v9083_v51  ;;  %v8829_v53 = vcombine.high %v888_v48, %v904_v49 }
  0xf5   : > { %6806 = vmatpush2.bf16.msra.mxu0 %v8570_v57  ;;  %v856_v57 = vld [vmem:[%s9632_s29 + $0x1218] sm:$0xff] }
  0xf6   : > { %6807 = vmatprep.subr.bf16.mxu0 %v8539_v60  ;;  %v8316_v60 = vcombine.low %v376_v47, %v392_v59 }
  0xf7   : > { %6849 = vmatpush2.bf16.msra.mxu1 %v9082_v58  ;;  %v872_v58 = vld [vmem:[%s9632_s29 + $0x1298] sm:$0xff] }
  0xf8   : > { %6850 = vmatprep.subr.bf16.mxu1 %v9051_v61  ;;  %v8828_v61 = vcombine.low %v888_v48, %v904_v49  ;;  %v8797_v63 = vcombine.high %v856_v57, %v872_v58  ;;  %v632_v48 = vld [vmem:[%s9632_s29 + $0xb18] sm:$0xff] }
  0xf9   : > { %6808 = vmatpush2.bf16.msra.mxu0 %v8538_v2  ;;  %v824_v2 = vld [vmem:[%s9632_s29 + $0x1118] sm:$0xff] }
  0xfa   : > { %6809 = vmatprep.subr.bf16.mxu0 %v8507_v4  ;;  %v8284_v4 = vcombine.low %v344_v54, %v360_v55  ;;  %v648_v49 = vld [vmem:[%s9632_s29 + $0xb98] sm:$0xff] }
  0xfb   : > { %6851 = vmatpush2.bf16.msra.mxu1 %v9050_v3  ;;  %v840_v3 = vld [vmem:[%s9632_s29 + $0x1198] sm:$0xff]  ;;  %v8573_v54 = vcombine.high %v632_v48, %v648_v49 }
  0xfc   : > { %6852 = vmatprep.subr.bf16.mxu1 %v9019_v5  ;;  %v8796_v5 = vcombine.low %v856_v57, %v872_v58  ;;  %v8765_v7 = vcombine.high %v824_v2, %v840_v3  ;;  %v600_v57 = vld [vmem:[%s9632_s29 + $0xa18] sm:$0xff] }
  0xfd   : > { %6810 = vmatpush2.bf16.msra.mxu0 %v8506_v10  ;;  %v792_v10 = vld [vmem:[%s9632_s29 + $0x1018] sm:$0xff] }
  0xfe   : > { %6811 = vmatprep.subr.bf16.mxu0 %v8475_v13  ;;  %v8252_v13 = vcombine.low %v312_v0, %v328_v1  ;;  %v616_v58 = vld [vmem:[%s9632_s29 + $0xa98] sm:$0xff] }
  0xff   : > { %6853 = vmatpush2.bf16.msra.mxu1 %v9018_v11  ;;  %v808_v11 = vld [vmem:[%s9632_s29 + $0x1098] sm:$0xff]  ;;  %v8541_v0 = vcombine.high %v600_v57, %v616_v58 }
 0x100   : > { %6854 = vmatprep.subr.bf16.mxu1 %v8987_v14  ;;  %v8764_v14 = vcombine.low %v824_v2, %v840_v3  ;;  %v8733_v17 = vcombine.high %v792_v10, %v808_v11  ;;  %v568_v2 = vld [vmem:[%s9632_s29 + $0x918] sm:$0xff] }
 0x101   : > { %6812 = vmatpush2.bf16.msra.mxu0 %v8474_v20  ;;  %v1272_v20 = vld [vmem:[%s9632_s29 + $0x1f18] sm:$0xff] }
 0x102   : > { %6867 = vmatprep.subr.bf16.mxu0 %v8445_v22  ;;  %v8220_v22 = vcombine.low %v280_v8, %v296_v9  ;;  %v584_v3 = vld [vmem:[%s9632_s29 + $0x998] sm:$0xff] }
 0x103   : > { %6855 = vmatpush2.bf16.msra.mxu1 %v8986_v21  ;;  %v1288_v21 = vld [vmem:[%s9632_s29 + $0x1f98] sm:$0xff]  ;;  %v8509_v9 = vcombine.high %v568_v2, %v584_v3 }
 0x104   : > { %6910 = vmatprep.subr.bf16.mxu1 %v8957_v23  ;;  %6814 = vmatmul.mubr.bf16.vlgmr.msra.gmra.mxu0 %v9731_v12  ;;  %v9887_v12 = vld [vmem:[%s11082_s0 + $0x4] ss:$16 sps:$4 sm:$0xff]   ;;  %v8732_v23 = vcombine.low %v792_v10, %v808_v11  ;;  %v9213_v25 = vcombine.high %v1272_v20, %v1288_v21  ;;  %v536_v11 = vld [vmem:[%s9632_s29 + $0x818] sm:$0xff] }
 0x105   : > { %6868 = vmatpush1.bf16.msra.mxu0 %v8444_v28  ;;  %6899 = vmatprep.mubr.bf16.mxu0 %v9887_v12  ;;  %v1240_v28 = vld [vmem:[%s9632_s29 + $0x1e18] sm:$0xff] }
 0x106   : > { %6857 = vmatmul.mubr.bf16.vlgmr.msra.gmra.mxu1 %v9738_v15  ;;  %6869 = vmatprep.subr.bf16.mxu0 %v8413_v30  ;;  %v920_v15 = vld [vmem:[%s9632_s29 + $0x1418] sm:$0xff]  ;;  %v8700_v30 = vcombine.low %v760_v18, %v776_v19 }
 0x107   : > { %6911 = vmatpush1.bf16.msra.mxu1 %v8956_v29  ;;  %6942 = vmatprep.mubr.bf16.mxu1 %v9895_v43  ;;  %v8861_v56 = vcombine.high %v920_v15, %v936_v42  ;;  %v8860_v51 = vcombine.low %v920_v15, %v936_v42  ;;  %v1256_v29 = vld [vmem:[%s9632_s29 + $0x1e98] sm:$0xff] }
 0x108   : > { %6912 = vmatprep.subr.bf16.mxu1 %v8925_v31  ;;  %v9212_v31 = vcombine.low %v1272_v20, %v1288_v21  ;;  %v9181_v33 = vcombine.high %v1240_v28, %v1256_v29  ;;  %v664_v15 = vld [vmem:[%s9632_s29 + $0xc18] sm:$0xff] }
 0x109   : > { %6870 = vmatpush1.bf16.msra.mxu0 %v8412_v36  ;;  %v1208_v36 = vld [vmem:[%s9632_s29 + $0x1d18] sm:$0xff] }
 0x10a   : > { %6871 = vmatprep.subr.bf16.mxu0 %v8381_v38  ;;  %v8668_v38 = vcombine.low %v728_v26, %v744_v27  ;;  %v680_v42 = vld [vmem:[%s9632_s29 + $0xc98] sm:$0xff] }
 0x10b   : > { %6913 = vmatpush1.bf16.msra.mxu1 %v8924_v37  ;;  %v1224_v37 = vld [vmem:[%s9632_s29 + $0x1d98] sm:$0xff]  ;;  %v8605_v47 = vcombine.high %v664_v15, %v680_v42 }
 0x10c   : > { %6914 = vmatprep.subr.bf16.mxu1 %v8893_v39  ;;  %v9180_v39 = vcombine.low %v1240_v28, %v1256_v29  ;;  %v9149_v41 = vcombine.high %v1208_v36, %v1224_v37  ;;  %v9956_v29 = vld [vmem:[%s9640_s30] sm:$0xff] }
 0x10d   : > { %6872 = vmatpush1.bf16.msra.mxu0 %v8380_v44  ;;  %v1176_v44 = vld [vmem:[%s9632_s29 + $0x1c18] sm:$0xff] }
 0x10e   : > { %6873 = vmatprep.subr.bf16.mxu0 %v8349_v46  ;;  %v8636_v46 = vcombine.low %v696_v34, %v712_v35  ;;  %v489_v34 = vld [vmem:[%s9632_s29 + $0x6a0] sm:$0xff] }
 0x10f   : > { %6915 = vmatpush1.bf16.msra.mxu1 %v8892_v45  ;;  %v1192_v45 = vld [vmem:[%s9632_s29 + $0x1c98] sm:$0xff]  ;;  %v985_v35 = vld [vmem:[%s9632_s29 + $0x1620] sm:$0xff] }
 0x110   : > { %6916 = vmatprep.subr.bf16.mxu1 %v8861_v56  ;;  %v9148_v56 = vcombine.low %v1208_v36, %v1224_v37  ;;  %v9117_v59 = vcombine.high %v1176_v44, %v1192_v45  ;;  %v1001_v36 = vld [vmem:[%s9632_s29 + $0x16a0] sm:$0xff] }
 0x111   : > { %6874 = vmatpush1.bf16.msra.mxu0 %v8348_v50  ;;  %v1144_v50 = vld [vmem:[%s9632_s29 + $0x1b18] sm:$0xff] }
 0x112   : > { %6875 = vmatprep.subr.bf16.mxu0 %v8317_v52  ;;  %v8604_v52 = vcombine.low %v664_v15, %v680_v42  ;;  %v8927_v15 = vcombine.high %v985_v35, %v1001_v36  ;;  %v441_v42 = vld [vmem:[%s9632_s29 + $0x520] sm:$0xff] }
 0x113   : > { %6917 = vmatpush1.bf16.msra.mxu1 %v8860_v51  ;;  %v1160_v51 = vld [vmem:[%s9632_s29 + $0x1b98] sm:$0xff] }
 0x114   : > { %6918 = vmatprep.subr.bf16.mxu1 %v8829_v53  ;;  %v9116_v53 = vcombine.low %v1176_v44, %v1192_v45  ;;  %v9085_v55 = vcombine.high %v1144_v50, %v1160_v51  ;;  %v457_v44 = vld [vmem:[%s9632_s29 + $0x5a0] sm:$0xff] }
 0x115   : > { %6876 = vmatpush1.bf16.msra.mxu0 %v8316_v60  ;;  %v1112_v60 = vld [vmem:[%s9632_s29 + $0x1a18] sm:$0xff] }
 0x116   : > { %6877 = vmatprep.subr.bf16.mxu0 %v8285_v62  ;;  %v8572_v62 = vcombine.low %v632_v48, %v648_v49  ;;  %v9983_v49 = vld [vmem:[%s11082_s0 + $0x8] ss:$16 sps:$4 sm:$0xff]  }
 0x117   : > { %6919 = vmatpush1.bf16.msra.mxu1 %v8828_v61  ;;  %v1128_v61 = vld [vmem:[%s9632_s29 + $0x1a98] sm:$0xff] }
 0x118   : > { %6920 = vmatprep.subr.bf16.mxu1 %v8797_v63  ;;  %v9084_v63 = vcombine.low %v1144_v50, %v1160_v51  ;;  %v9053_v1 = vcombine.high %v1112_v60, %v1128_v61  ;;  %v9052_v8 = vcombine.low %v1112_v60, %v1128_v61  ;;  %v409_v60 = vld [vmem:[%s9632_s29 + $0x420] sm:$0xff] }
 0x119   : > { %6878 = vmatpush1.bf16.msra.mxu0 %v8284_v4  ;;  %v1080_v4 = vld [vmem:[%s9632_s29 + $0x1918] sm:$0xff]  ;;  %v425_v61 = vld [vmem:[%s9632_s29 + $0x4a0] sm:$0xff] }
 0x11a   : > { %6879 = vmatprep.subr.bf16.mxu0 %v8253_v6  ;;  %v8540_v6 = vcombine.low %v600_v57, %v616_v58 }
 0x11b   : > { %6921 = vmatpush1.bf16.msra.mxu1 %v8796_v5  ;;  %v1096_v5 = vld [vmem:[%s9632_s29 + $0x1998] sm:$0xff] }
 0x11c   : > { %6922 = vmatprep.subr.bf16.mxu1 %v8765_v7  ;;  %v1309_v7 = vlaneseq  ;;  %v9021_v10 = vcombine.high %v1080_v4, %v1096_v5  ;;  %v9020_v19 = vcombine.low %v1080_v4, %v1096_v5  ;;  %v8382_v4 = vcombine.low %v441_v42, %v457_v44 }
 0x11d   : > { %6880 = vmatpush1.bf16.msra.mxu0 %v8252_v13  ;;  %v552_v13 = vld [vmem:[%s9632_s29 + $0x898] sm:$0xff] }
 0x11e   : > { %6881 = vmatprep.subr.bf16.mxu0 %v8221_v16  ;;  %v1064_v16 = vld [vmem:[%s9632_s29 + $0x1898] sm:$0xff]  ;;  %v9946_v18 = vshrl.u32 %v1309_v7, 7  ;;  %v8477_v20 = vcombine.high %v536_v11, %v552_v13  ;;  %v8476_v26 = vcombine.low %v536_v11, %v552_v13  ;;  %v8351_v7 = vcombine.high %v409_v60, %v425_v61  ;;  %v377_v11 = vld [vmem:[%s9632_s29 + $0x320] sm:$0xff] }
 0x11f   : > { %6923 = vmatpush1.bf16.msra.mxu1 %v8764_v14  ;;  %v1048_v14 = vld [vmem:[%s9632_s29 + $0x1818] sm:$0xff]  ;;  %v393_v13 = vld [vmem:[%s9632_s29 + $0x3a0] sm:$0xff] }
 0x120   : > { %6924 = vmatprep.subr.bf16.mxu1 %v8733_v17  ;;  %v8508_v17 = vcombine.low %v568_v2, %v584_v3  ;;  %v8989_v21 = vcombine.high %v1048_v14, %v1064_v16  ;;  %v9953_v27 = vsub.s32 0, %v9946_v18  ;;  %v8988_v28 = vcombine.low %v1048_v14, %v1064_v16  ;;  %v889_v16 = vld [vmem:[%s9632_s29 + $0x1320] sm:$0xff] }
 0x121   : > { %6882 = vmatpush1.bf16.msra.mxu0 %v8220_v22  ;;  %v505_v22 = vld [vmem:[%s9632_s29 + $0x720] sm:$0xff] }
 0x122   : > { %6883 = vmatprep.subr.bf16.mxu0 %v8701_v24  ;;  %v1017_v24 = vld [vmem:[%s9632_s29 + $0x1720] sm:$0xff]  ;;  %v1312_v37 = vrot.slane %v9956_v29, %v9953_v27 }
 0x123   : > { %6925 = vmatpush1.bf16.msra.mxu1 %v8732_v23  ;;  %v521_v23 = vld [vmem:[%s9632_s29 + $0x7a0] sm:$0xff] }
 0x124   : > { %6926 = vmatprep.subr.bf16.mxu1 %v9213_v25  ;;  %v1033_v25 = vld [vmem:[%s9632_s29 + $0x17a0] sm:$0xff] }
 0x125   : > { %6884 = vmatpush2.bf16.msra.mxu0 %v8700_v30  ;;  %v8447_v30 = vcombine.high %v505_v22, %v521_v23 }
 0x126   : > { %6885 = vmatprep.subr.bf16.mxu0 %v8669_v32  ;;  %v9959_v32 = vsub.s32 1, %v9946_v18 }
 0x127   : > { %6927 = vmatpush2.bf16.msra.mxu1 %v9212_v31  ;;  %v8959_v31 = vcombine.high %v1017_v24, %v1033_v25 }
 0x128   : > { %6928 = vmatprep.subr.bf16.mxu1 %v9181_v33  ;;  %v473_v33 = vld [vmem:[%s9632_s29 + $0x620] sm:$0xff] }
 0x129   : > { %6886 = vmatpush2.bf16.msra.mxu0 %v8668_v38  ;;  %v8446_v38 = vcombine.low %v505_v22, %v521_v23  ;;  %v8414_v50 = vcombine.low %v473_v33, %v489_v34  ;;  %v8319_v22 = vcombine.high %v377_v11, %v393_v13 }
 0x12a   : > { %6887 = vmatprep.subr.bf16.mxu0 %v8637_v40  ;;  %v8415_v40 = vcombine.high %v473_v33, %v489_v34 }
 0x12b   : > { %6929 = vmatpush2.bf16.msra.mxu1 %v9180_v39  ;;  %v8958_v39 = vcombine.low %v1017_v24, %v1033_v25  ;;  %v345_v24 = vld [vmem:[%s9632_s29 + $0x220] sm:$0xff] }
 0x12c   : > { %6930 = vmatprep.subr.bf16.mxu1 %v9149_v41  ;;  %v1316_v41 = vrot.slane %v9956_v29, %v9959_v32  ;;  %v361_v25 = vld [vmem:[%s9632_s29 + $0x2a0] sm:$0xff] }
 0x12d   : > { %6888 = vmatpush2.bf16.msra.mxu0 %v8636_v46  ;;  %v9975_v46 = vld [vmem:[%s11082_s0] ss:$16 sps:$4 sm:$0xff]   ;;  %v8287_v33 = vcombine.high %v345_v24, %v361_v25 }
 0x12e   : > { %6889 = vmatprep.subr.bf16.mxu0 %v8605_v47  ;;  %v969_v47 = vld [vmem:[%s9632_s29 + $0x15a0] sm:$0xff] }
 0x12f   : > { %6931 = vmatpush2.bf16.msra.mxu1 %v9148_v56  ;;  %v953_v56 = vld [vmem:[%s9632_s29 + $0x1520] sm:$0xff] }
 0x130   : > { %6932 = vmatprep.subr.bf16.mxu1 %v9117_v59  ;;  %v8895_v58 = vcombine.high %v953_v56, %v969_v47 }
 0x131   : > { %6890 = vmatpush2.bf16.msra.mxu0 %v8604_v52  ;;  %v8926_v52 = vcombine.low %v985_v35, %v1001_v36  ;;  %v313_v35 = vld [vmem:[%s9632_s29 + $0x120] sm:$0xff] }
 0x132   : > { %6891 = vmatprep.subr.bf16.mxu0 %v8573_v54  ;;  %v329_v36 = vld [vmem:[%s9632_s29 + $0x1a0] sm:$0xff] }
 0x133   : > { %6933 = vmatpush2.bf16.msra.mxu1 %v9116_v53  ;;  %v8383_v53 = vcombine.high %v441_v42, %v457_v44  ;;  %v281_v42 = vld [vmem:[%s9632_s29 + $0x20] sm:$0xff] }
 0x134   : > { %6934 = vmatprep.subr.bf16.mxu1 %v9085_v55  ;;  %v297_v44 = vld [vmem:[%s9632_s29 + $0xa0] sm:$0xff] }
 0x135   : > { %6892 = vmatpush2.bf16.msra.mxu0 %v8572_v62 }
 0x136   : > { %6893 = vmatprep.subr.bf16.mxu0 %v8541_v0  ;;  %v937_v0 = vld [vmem:[%s9632_s29 + $0x14a0] sm:$0xff] }
 0x137   : > { %6935 = vmatpush2.bf16.msra.mxu1 %v9084_v63  ;;  %v921_v63 = vld [vmem:[%s9632_s29 + $0x1420] sm:$0xff] }
 0x138   : > { %6936 = vmatprep.subr.bf16.mxu1 %v9053_v1 }
 0x139   : > { %6894 = vmatpush2.bf16.msra.mxu0 %v8540_v6  ;;  %v8894_v6 = vcombine.low %v953_v56, %v969_v47  ;;  %v809_v56 = vld [vmem:[%s9632_s29 + $0x10a0] sm:$0xff]  ;;  %v8254_v47 = vcombine.low %v313_v35, %v329_v36 }
 0x13a   : > { %6895 = vmatprep.subr.bf16.mxu0 %v8509_v9 }
 0x13b   : > { %6937 = vmatpush2.bf16.msra.mxu1 %v9052_v8 }
 0x13c   : > { %6938 = vmatprep.subr.bf16.mxu1 %v9021_v10  ;;  %v8863_v10 = vcombine.high %v921_v63, %v937_v0 }
 0x13d   : > { %6896 = vmatpush2.bf16.msra.mxu0 %v8508_v17  ;;  %v905_v17 = vld [vmem:[%s9632_s29 + $0x13a0] sm:$0xff] }
 0x13e   : > { %6897 = vmatprep.subr.bf16.mxu0 %v8477_v20  ;;  %v8350_v20 = vcombine.low %v409_v60, %v425_v61  ;;  %v8831_v23 = vcombine.high %v889_v16, %v905_v17  ;;  %v729_v61 = vld [vmem:[%s9632_s29 + $0xe20] sm:$0xff] }
 0x13f   : > { %6939 = vmatpush2.bf16.msra.mxu1 %v9020_v19 }
 0x140   : > { %6940 = vmatprep.subr.bf16.mxu1 %v8989_v21  ;;  %v8862_v21 = vcombine.low %v921_v63, %v937_v0  ;;  %v1241_v63 = vld [vmem:[%s9632_s29 + $0x1e20] sm:$0xff] }
 0x141   : > { %6898 = vmatpush2.bf16.msra.mxu0 %v8476_v26  ;;  %v857_v26 = vld [vmem:[%s9632_s29 + $0x1220] sm:$0xff] }
 0x142   : > { %6953 = vmatprep.subr.bf16.mxu0 %v8447_v30  ;;  %v8318_v30 = vcombine.low %v377_v11, %v393_v13  ;;  %v1257_v0 = vld [vmem:[%s9632_s29 + $0x1ea0] sm:$0xff] }
 0x143   : > { %6941 = vmatpush2.bf16.msra.mxu1 %v8988_v28  ;;  %v873_v28 = vld [vmem:[%s9632_s29 + $0x12a0] sm:$0xff] }
 0x144   : > { %6996 = vmatprep.subr.bf16.mxu1 %v8959_v31  ;;  %v6643_v45 = vpop.f32.mrf.mxu0  ;;  %6900 = vmatmul.mubr.bf16.vlgmr.msra.gmra.mxu0 %v9975_v46  ;;  %v8830_v31 = vcombine.low %v889_v16, %v905_v17  ;;  %v8799_v34 = vcombine.high %v857_v26, %v873_v28  ;;  %v681_v16 = vld [vmem:[%s9632_s29 + $0xca0] sm:$0xff] }
 0x145   : > { %v6644_v59 = vadd.f32 %v6643_v45, %v1312_v37  ;;  %6954 = vmatpush1.bf16.msra.mxu0 %v8446_v38  ;;  %6985 = vmatprep.mubr.bf16.mxu0 %v9887_v12  ;;  %v841_v38 = vld [vmem:[%s9632_s29 + $0x11a0] sm:$0xff] }
 0x146   : > { %v6686_v48 = vpop.f32.mrf.mxu1  ;;  %6943 = vmatmul.mubr.bf16.vlgmr.msra.gmra.mxu1 %v9983_v49  ;;  %v6645_v51 = vpop.f32.mrf.mxu0  ;;  %6955 = vmatprep.subr.bf16.mxu0 %v8415_v40  ;;  %v8798_v40 = vcombine.low %v857_v26, %v873_v28  ;;  %v793_v45 = vld [vmem:[%s9632_s29 + $0x1020] sm:$0xff] }
 0x147   : > { %6997 = vmatpush1.bf16.msra.mxu1 %v8958_v39  ;;  %v6687_v54 = vadd.f32 %v6686_v48, %v6644_v59  ;;  %v6646_v55 = vadd.f32 %v6645_v51, %v1316_v41  ;;  %7028 = vmatprep.mubr.bf16.mxu1 %v9895_v43  ;;  %v8286_v39 = vcombine.low %v345_v24, %v361_v25  ;;  %v761_v51 = vld [vmem:[%s9632_s29 + $0xf20] sm:$0xff] }
 0x148   : > { %v6688_v57 = vpop.f32.mrf.mxu1  ;;  %6998 = vmatprep.subr.bf16.mxu1 %v8927_v15  ;;  %v6647_v62 = vpop.f32.mrf.mxu0  ;;  %v8223_v48 = vcombine.high %v281_v42, %v297_v44  ;;  %v1177_v17 = vld [vmem:[%s9632_s29 + $0x1c20] sm:$0xff] }
 0x149   : > { %7985 = vst [vmem:[%s9994_s5] sm:$0xff] %v6687_v54  ;;  %v6689_v1 = vadd.f32 %v6688_v57, %v6646_v55  ;;  %v6648_v2 = vadd.f32 %v6647_v62, %v1312_v37  ;;  %6956 = vmatpush1.bf16.msra.mxu0 %v8414_v50  ;;  %v825_v37 = vld [vmem:[%s9632_s29 + $0x1120] sm:$0xff]  ;;  %v8735_v50 = vcombine.high %v793_v45, %v809_v56 }
 0x14a   : > { %v6690_v3 = vpop.f32.mrf.mxu1  ;;  %v6649_v5 = vpop.f32.mrf.mxu0  ;;  %6957 = vmatprep.subr.bf16.mxu0 %v8383_v53  ;;  %v8767_v15 = vcombine.high %v825_v37, %v841_v38  ;;  %v8766_v59 = vcombine.low %v825_v37, %v841_v38  ;;  %v1273_v53 = vld [vmem:[%s9632_s29 + $0x1f20] sm:$0xff]  ;;  %v8222_v55 = vcombine.low %v281_v42, %v297_v44  ;;  %v8734_v57 = vcombine.low %v793_v45, %v809_v56 }
 0x14b   : > { %6999 = vmatpush1.bf16.msra.mxu1 %v8926_v52  ;;  %7986 = vst [vmem:[%s9994_s5 + $0x8] sm:$0xff] %v6689_v1  ;;  %v6691_v8 = vadd.f32 %v6690_v3, %v6648_v2  ;;  %v6650_v9 = vadd.f32 %v6649_v5, %v1316_v41  ;;  %v8255_v41 = vcombine.high %v313_v35, %v329_v36  ;;  %v777_v52 = vld [vmem:[%s9632_s29 + $0xfa0] sm:$0xff] }
 0x14c   : > { %7000 = vmatprep.subr.bf16.mxu1 %v8895_v58  ;;  %v6692_v14 = vpop.f32.mrf.mxu1  ;;  %v1289_v54 = vld [vmem:[%s9632_s29 + $0x1fa0] sm:$0xff]  ;;  %v8703_v58 = vcombine.high %v761_v51, %v777_v52  ;;  %v8702_v1 = vcombine.low %v761_v51, %v777_v52 }
 0x14d   : > { %8017 = vst [vmem:[%s9994_s5 + $0x100] sm:$0xff] %v6691_v8  ;;  %v6693_v19 = vadd.f32 %v6692_v14, %v6650_v9  ;;  %6958 = vmatpush1.bf16.msra.mxu0 %v8382_v4  ;;  %v9215_v60 = vcombine.high %v1273_v53, %v1289_v54  ;;  %v745_v62 = vld [vmem:[%s9632_s29 + $0xea0] sm:$0xff]  ;;  %v9214_v2 = vcombine.low %v1273_v53, %v1289_v54 }
 0x14e   : > { %6959 = vmatprep.subr.bf16.mxu0 %v8351_v7  ;;  %v8671_v3 = vcombine.high %v729_v61, %v745_v62  ;;  %v9183_v4 = vcombine.high %v1241_v63, %v1257_v0  ;;  %v697_v5 = vld [vmem:[%s9632_s29 + $0xd20] sm:$0xff]  ;;  %v8670_v9 = vcombine.low %v729_v61, %v745_v62  ;;  %v506_v61 = vld [vmem:[%s9632_s29 + $0x728] sm:$0xff] }
 0x14f   : > { %7001 = vmatpush1.bf16.msra.mxu1 %v8894_v6  ;;  %8018 = vst [vmem:[%s9994_s5 + $0x108] sm:$0xff] %v6693_v19  ;;  %v713_v6 = vld [vmem:[%s9632_s29 + $0xda0] sm:$0xff]  ;;  %v522_v62 = vld [vmem:[%s9632_s29 + $0x7a8] sm:$0xff] }
 0x150   : > { %7002 = vmatprep.subr.bf16.mxu1 %v8863_v10  ;;  %v1209_v7 = vld [vmem:[%s9632_s29 + $0x1d20] sm:$0xff]  ;;  %v9182_v10 = vcombine.low %v1241_v63, %v1257_v0  ;;  %v8639_v11 = vcombine.high %v697_v5, %v713_v6  ;;  %v1018_v63 = vld [vmem:[%s9632_s29 + $0x1728] sm:$0xff] }
 0x151   : > { %6960 = vmatpush1.bf16.msra.mxu0 %v8350_v20  ;;  %v1225_v8 = vld [vmem:[%s9632_s29 + $0x1da0] sm:$0xff]  ;;  %v8638_v20 = vcombine.low %v697_v5, %v713_v6  ;;  %v1034_v0 = vld [vmem:[%s9632_s29 + $0x17a8] sm:$0xff]  ;;  %v10056_v6 = vsub.s32 3, %v9946_v18 }
 0x152   : > { %6961 = vmatprep.subr.bf16.mxu0 %v8319_v22  ;;  %v9151_v13 = vcombine.high %v1209_v7, %v1225_v8  ;;  %v665_v14 = vld [vmem:[%s9632_s29 + $0xc20] sm:$0xff]  ;;  %v8961_v5 = vcombine.high %v1018_v63, %v1034_v0 }
 0x153   : > { %7003 = vmatpush1.bf16.msra.mxu1 %v8862_v21  ;;  %v1193_v19 = vld [vmem:[%s9632_s29 + $0x1ca0] sm:$0xff]  ;;  %v9150_v21 = vcombine.low %v1209_v7, %v1225_v8  ;;  %v8607_v22 = vcombine.high %v665_v14, %v681_v16  ;;  %v474_v7 = vld [vmem:[%s9632_s29 + $0x628] sm:$0xff] }
 0x154   : > { %7004 = vmatprep.subr.bf16.mxu1 %v8831_v23  ;;  %v9119_v23 = vcombine.high %v1177_v17, %v1193_v19  ;;  %v633_v24 = vld [vmem:[%s9632_s29 + $0xb20] sm:$0xff]  ;;  %v490_v8 = vld [vmem:[%s9632_s29 + $0x6a8] sm:$0xff] }
 0x155   : > { %6962 = vmatpush1.bf16.msra.mxu0 %v8318_v30  ;;  %v649_v25 = vld [vmem:[%s9632_s29 + $0xba0] sm:$0xff]  ;;  %v8606_v30 = vcombine.low %v665_v14, %v681_v16  ;;  %v8960_v14 = vcombine.low %v1018_v63, %v1034_v0  ;;  %v8417_v16 = vcombine.high %v474_v7, %v490_v8  ;;  %v346_v63 = vld [vmem:[%s9632_s29 + $0x228] sm:$0xff] }
 0x156   : > { %6963 = vmatprep.subr.bf16.mxu0 %v8287_v33  ;;  %v1145_v26 = vld [vmem:[%s9632_s29 + $0x1b20] sm:$0xff]  ;;  %v8575_v33 = vcombine.high %v633_v24, %v649_v25  ;;  %v362_v0 = vld [vmem:[%s9632_s29 + $0x2a8] sm:$0xff] }
 0x157   : > { %7005 = vmatpush1.bf16.msra.mxu1 %v8830_v31  ;;  %v1161_v28 = vld [vmem:[%s9632_s29 + $0x1ba0] sm:$0xff]  ;;  %v9118_v31 = vcombine.low %v1177_v17, %v1193_v19  ;;  %v1324_v17 = vrot.slane %v9956_v29, %v10056_v6 }
 0x158   : > { %7006 = vmatprep.subr.bf16.mxu1 %v8799_v34  ;;  %v9087_v34 = vcombine.high %v1145_v26, %v1161_v28  ;;  %v601_v35 = vld [vmem:[%s9632_s29 + $0xa20] sm:$0xff] }
 0x159   : > { %6964 = vmatpush1.bf16.msra.mxu0 %v8286_v39  ;;  %v617_v36 = vld [vmem:[%s9632_s29 + $0xaa0] sm:$0xff]  ;;  %v8574_v39 = vcombine.low %v633_v24, %v649_v25  ;;  %v970_v24 = vld [vmem:[%s9632_s29 + $0x15a8] sm:$0xff] }
 0x15a   : > { %6965 = vmatprep.subr.bf16.mxu0 %v8255_v41  ;;  %v1113_v37 = vld [vmem:[%s9632_s29 + $0x1a20] sm:$0xff]  ;;  %v8543_v41 = vcombine.high %v601_v35, %v617_v36 }
 0x15b   : > { %7007 = vmatpush1.bf16.msra.mxu1 %v8798_v40  ;;  %v1129_v38 = vld [vmem:[%s9632_s29 + $0x1aa0] sm:$0xff]  ;;  %v9086_v40 = vcombine.low %v1145_v26, %v1161_v28  ;;  %v8416_v28 = vcombine.low %v474_v7, %v490_v8  ;;  %v8289_v7 = vcombine.high %v346_v63, %v362_v0 }
 0x15c   : > { %7008 = vmatprep.subr.bf16.mxu1 %v8767_v15  ;;  %v9055_v15 = vcombine.high %v1113_v37, %v1129_v38  ;;  %v569_v42 = vld [vmem:[%s9632_s29 + $0x920] sm:$0xff] }
 0x15d   : > { %6966 = vmatpush1.bf16.msra.mxu0 %v8254_v47  ;;  %v585_v44 = vld [vmem:[%s9632_s29 + $0x9a0] sm:$0xff]  ;;  %v8542_v47 = vcombine.low %v601_v35, %v617_v36 }
 0x15e   : > { %6967 = vmatprep.subr.bf16.mxu0 %v8223_v48  ;;  %v1081_v45 = vld [vmem:[%s9632_s29 + $0x1920] sm:$0xff]  ;;  %v8511_v48 = vcombine.high %v569_v42, %v585_v44 }
 0x15f   : > { %7009 = vmatpush1.bf16.msra.mxu1 %v8766_v59  ;;  %v1097_v56 = vld [vmem:[%s9632_s29 + $0x19a0] sm:$0xff]  ;;  %v9054_v59 = vcombine.low %v1113_v37, %v1129_v38  ;;  %v410_v38 = vld [vmem:[%s9632_s29 + $0x428] sm:$0xff] }
 0x160   : > { %7010 = vmatprep.subr.bf16.mxu1 %v8735_v50  ;;  %v9023_v50 = vcombine.high %v1081_v45, %v1097_v56  ;;  %v537_v51 = vld [vmem:[%s9632_s29 + $0x820] sm:$0xff] }
 0x161   : > { %6968 = vmatpush1.bf16.msra.mxu0 %v8222_v55  ;;  %v553_v52 = vld [vmem:[%s9632_s29 + $0x8a0] sm:$0xff]  ;;  %v8510_v55 = vcombine.low %v569_v42, %v585_v44 }
 0x162   : > { %6969 = vmatprep.subr.bf16.mxu0 %v8703_v58  ;;  %v1049_v53 = vld [vmem:[%s9632_s29 + $0x1820] sm:$0xff]  ;;  %v8479_v58 = vcombine.high %v537_v51, %v553_v52 }
 0x163   : > { %7011 = vmatpush1.bf16.msra.mxu1 %v8734_v57  ;;  %v1065_v54 = vld [vmem:[%s9632_s29 + $0x18a0] sm:$0xff]  ;;  %v9022_v57 = vcombine.low %v1081_v45, %v1097_v56 }
 0x164   : > { %7012 = vmatprep.subr.bf16.mxu1 %v9215_v60  ;;  %v8991_v60 = vcombine.high %v1049_v53, %v1065_v54 }
 0x165   : > { %6970 = vmatpush2.bf16.msra.mxu0 %v8702_v1  ;;  %v8478_v1 = vcombine.low %v537_v51, %v553_v52  ;;  %v378_v51 = vld [vmem:[%s9632_s29 + $0x328] sm:$0xff] }
 0x166   : > { %6971 = vmatprep.subr.bf16.mxu0 %v8671_v3  ;;  %v8990_v3 = vcombine.low %v1049_v53, %v1065_v54  ;;  %v394_v52 = vld [vmem:[%s9632_s29 + $0x3a8] sm:$0xff] }
 0x167   : > { %7013 = vmatpush2.bf16.msra.mxu1 %v9214_v2  ;;  %v10053_v2 = vsub.s32 2, %v9946_v18  ;;  %v890_v54 = vld [vmem:[%s9632_s29 + $0x1328] sm:$0xff] }
 0x168   : > { %7014 = vmatprep.subr.bf16.mxu1 %v9183_v4  ;;  %v8449_v4 = vcombine.high %v506_v61, %v522_v62 }
 0x169   : > { %6972 = vmatpush2.bf16.msra.mxu0 %v8670_v9  ;;  %v986_v9 = vld [vmem:[%s9632_s29 + $0x1628] sm:$0xff] }
 0x16a   : > { %6973 = vmatprep.subr.bf16.mxu0 %v8639_v11  ;;  %v1320_v11 = vrot.slane %v9956_v29, %v10053_v2 }
 0x16b   : > { %7015 = vmatpush2.bf16.msra.mxu1 %v9182_v10  ;;  %v1002_v10 = vld [vmem:[%s9632_s29 + $0x16a8] sm:$0xff] }
 0x16c   : > { %7016 = vmatprep.subr.bf16.mxu1 %v9151_v13  ;;  %v8448_v13 = vcombine.low %v506_v61, %v522_v62  ;;  %v8929_v19 = vcombine.high %v986_v9, %v1002_v10  ;;  %v8321_v61 = vcombine.high %v378_v51, %v394_v52 }
 0x16d   : > { %6974 = vmatpush2.bf16.msra.mxu0 %v8638_v20  ;;  %v442_v20 = vld [vmem:[%s9632_s29 + $0x528] sm:$0xff] }
 0x16e   : > { %6975 = vmatprep.subr.bf16.mxu0 %v8607_v22 }
 0x16f   : > { %7017 = vmatpush2.bf16.msra.mxu1 %v9150_v21  ;;  %v458_v21 = vld [vmem:[%s9632_s29 + $0x5a8] sm:$0xff] }
 0x170   : > { %7018 = vmatprep.subr.bf16.mxu1 %v9119_v23  ;;  %v954_v23 = vld [vmem:[%s9632_s29 + $0x1528] sm:$0xff]  ;;  %v8384_v56 = vcombine.low %v442_v20, %v458_v21 }
 0x171   : > { %6976 = vmatpush2.bf16.msra.mxu0 %v8606_v30  ;;  %v8897_v37 = vcombine.high %v954_v23, %v970_v24 }
 0x172   : > { %6977 = vmatprep.subr.bf16.mxu0 %v8575_v33  ;;  %v8385_v33 = vcombine.high %v442_v20, %v458_v21  ;;  %v282_v20 = vld [vmem:[%s9632_s29 + $0x28] sm:$0xff] }
 0x173   : > { %7019 = vmatpush2.bf16.msra.mxu1 %v9118_v31  ;;  %v8928_v31 = vcombine.low %v986_v9, %v1002_v10  ;;  %v314_v9 = vld [vmem:[%s9632_s29 + $0x128] sm:$0xff] }
 0x174   : > { %7020 = vmatprep.subr.bf16.mxu1 %v9087_v34  ;;  %v330_v10 = vld [vmem:[%s9632_s29 + $0x1a8] sm:$0xff] }
 0x175   : > { %6978 = vmatpush2.bf16.msra.mxu0 %v8574_v39  ;;  %v426_v39 = vld [vmem:[%s9632_s29 + $0x4a8] sm:$0xff] }
 0x176   : > { %6979 = vmatprep.subr.bf16.mxu0 %v8543_v41  ;;  %v922_v41 = vld [vmem:[%s9632_s29 + $0x1428] sm:$0xff] }
 0x177   : > { %7021 = vmatpush2.bf16.msra.mxu1 %v9086_v40  ;;  %v298_v21 = vld [vmem:[%s9632_s29 + $0xa8] sm:$0xff] }
 0x178   : > { %7022 = vmatprep.subr.bf16.mxu1 %v9055_v15  ;;  %v938_v15 = vld [vmem:[%s9632_s29 + $0x14a8] sm:$0xff] }
 0x179   : > { %6980 = vmatpush2.bf16.msra.mxu0 %v8542_v47 }
 0x17a   : > { %6981 = vmatprep.subr.bf16.mxu0 %v8511_v48 }
 0x17b   : > { %7023 = vmatpush2.bf16.msra.mxu1 %v9054_v59  ;;  %v8353_v59 = vcombine.high %v410_v38, %v426_v39 }
 0x17c   : > { %7024 = vmatprep.subr.bf16.mxu1 %v9023_v50 }
 0x17d   : > { %6982 = vmatpush2.bf16.msra.mxu0 %v8510_v55  ;;  %v906_v55 = vld [vmem:[%s9632_s29 + $0x13a8] sm:$0xff] }
 0x17e   : > { %6983 = vmatprep.subr.bf16.mxu0 %v8479_v58  ;;  %v8352_v58 = vcombine.low %v410_v38, %v426_v39  ;;  %v8833_v62 = vcombine.high %v890_v54, %v906_v55  ;;  %v730_v39 = vld [vmem:[%s9632_s29 + $0xe28] sm:$0xff] }
 0x17f   : > { %7025 = vmatpush2.bf16.msra.mxu1 %v9022_v57 }
 0x180   : > { %7026 = vmatprep.subr.bf16.mxu1 %v8991_v60  ;;  %v8864_v60 = vcombine.low %v922_v41, %v938_v15 }
 0x181   : > { %6984 = vmatpush2.bf16.msra.mxu0 %v8478_v1  ;;  %v858_v1 = vld [vmem:[%s9632_s29 + $0x1228] sm:$0xff] }
 0x182   : > { %7039 = vmatprep.subr.bf16.mxu0 %v8449_v4  ;;  %v8320_v4 = vcombine.low %v378_v51, %v394_v52 }
 0x183   : > { %7027 = vmatpush2.bf16.msra.mxu1 %v8990_v3  ;;  %v874_v3 = vld [vmem:[%s9632_s29 + $0x12a8] sm:$0xff] }
 0x184   : > { %7082 = vmatprep.subr.bf16.mxu1 %v8961_v5  ;;  %v6729_v22 = vpop.f32.mrf.mxu0  ;;  %6986 = vmatmul.mubr.bf16.vlgmr.msra.gmra.mxu0 %v9975_v46  ;;  %v8832_v5 = vcombine.low %v890_v54, %v906_v55  ;;  %v8801_v8 = vcombine.high %v858_v1, %v874_v3  ;;  %v682_v54 = vld [vmem:[%s9632_s29 + $0xca8] sm:$0xff] }
 0x185   : > { %v6730_v25 = vadd.f32 %v6729_v22, %v1320_v11  ;;  %7040 = vmatpush1.bf16.msra.mxu0 %v8448_v13  ;;  %7071 = vmatprep.mubr.bf16.mxu0 %v9887_v12  ;;  %v8896_v12 = vcombine.low %v954_v23, %v970_v24  ;;  %v842_v13 = vld [vmem:[%s9632_s29 + $0x11a8] sm:$0xff]  ;;  %v8256_v24 = vcombine.low %v314_v9, %v330_v10 }
 0x186   : > { %v6772_v26 = vpop.f32.mrf.mxu1  ;;  %7029 = vmatmul.mubr.bf16.vlgmr.msra.gmra.mxu1 %v9983_v49  ;;  %v6731_v30 = vpop.f32.mrf.mxu0  ;;  %7041 = vmatprep.subr.bf16.mxu0 %v8417_v16  ;;  %v8800_v16 = vcombine.low %v858_v1, %v874_v3  ;;  %v794_v22 = vld [vmem:[%s9632_s29 + $0x1028] sm:$0xff] }
 0x187   : > { %7083 = vmatpush1.bf16.msra.mxu1 %v8960_v14  ;;  %v6773_v34 = vadd.f32 %v6772_v26, %v6730_v25  ;;  %v6732_v35 = vadd.f32 %v6731_v30, %v1324_v17  ;;  %7114 = vmatprep.mubr.bf16.mxu1 %v9895_v43  ;;  %v8865_v43 = vcombine.high %v922_v41, %v938_v15  ;;  %v810_v23 = vld [vmem:[%s9632_s29 + $0x10a8] sm:$0xff] }
 0x188   : > { %v6774_v36 = vpop.f32.mrf.mxu1  ;;  %7084 = vmatprep.subr.bf16.mxu1 %v8929_v19  ;;  %v6733_v40 = vpop.f32.mrf.mxu0  ;;  %v8288_v14 = vcombine.low %v346_v63, %v362_v0  ;;  %v8225_v26 = vcombine.high %v282_v20, %v298_v21  ;;  %v762_v30 = vld [vmem:[%s9632_s29 + $0xf28] sm:$0xff] }
 0x189   : > { %7987 = vst [vmem:[%s9994_s5 + $0x10] sm:$0xff] %v6773_v34  ;;  %v6775_v42 = vadd.f32 %v6774_v36, %v6732_v35  ;;  %v6734_v44 = vadd.f32 %v6733_v40, %v1320_v11  ;;  %7042 = vmatpush1.bf16.msra.mxu0 %v8416_v28  ;;  %v826_v11 = vld [vmem:[%s9632_s29 + $0x1128] sm:$0xff]  ;;  %v8737_v28 = vcombine.high %v794_v22, %v810_v23 }
 0x18a   : > { %v6776_v45 = vpop.f32.mrf.mxu1  ;;  %v6735_v47 = vpop.f32.mrf.mxu0  ;;  %7043 = vmatprep.subr.bf16.mxu0 %v8385_v33  ;;  %v8769_v19 = vcombine.high %v826_v11, %v842_v13  ;;  %v8768_v25 = vcombine.low %v826_v11, %v842_v13  ;;  %v1274_v33 = vld [vmem:[%s9632_s29 + $0x1f28] sm:$0xff]  ;;  %v8224_v35 = vcombine.low %v282_v20, %v298_v21  ;;  %v8736_v36 = vcombine.low %v794_v22, %v810_v23 }
 0x18b   : > { %7085 = vmatpush1.bf16.msra.mxu1 %v8928_v31  ;;  %7988 = vst [vmem:[%s9994_s5 + $0x18] sm:$0xff] %v6775_v42  ;;  %v6777_v48 = vadd.f32 %v6776_v45, %v6734_v44  ;;  %v6736_v50 = vadd.f32 %v6735_v47, %v1324_v17  ;;  %v8257_v17 = vcombine.high %v314_v9, %v330_v10  ;;  %v778_v31 = vld [vmem:[%s9632_s29 + $0xfa8] sm:$0xff] }
 0x18c   : > { %7086 = vmatprep.subr.bf16.mxu1 %v8897_v37  ;;  %v6778_v53 = vpop.f32.mrf.mxu1  ;;  %v1290_v34 = vld [vmem:[%s9632_s29 + $0x1fa8] sm:$0xff]  ;;  %v8705_v37 = vcombine.high %v762_v30, %v778_v31  ;;  %v8704_v42 = vcombine.low %v762_v30, %v778_v31 }
 0x18d   : > { %8019 = vst [vmem:[%s9994_s5 + $0x110] sm:$0xff] %v6777_v48  ;;  %v6779_v57 = vadd.f32 %v6778_v53, %v6736_v50  ;;  %7044 = vmatpush1.bf16.msra.mxu0 %v8384_v56  ;;  %v9217_v38 = vcombine.high %v1274_v33, %v1290_v34  ;;  %v746_v40 = vld [vmem:[%s9632_s29 + $0xea8] sm:$0xff]  ;;  %v9216_v44 = vcombine.low %v1274_v33, %v1290_v34 }
 0x18e   : > { %7045 = vmatprep.subr.bf16.mxu0 %v8353_v59  ;;  %v1242_v41 = vld [vmem:[%s9632_s29 + $0x1e28] sm:$0xff]  ;;  %v8673_v45 = vcombine.high %v730_v39, %v746_v40  ;;  %v8672_v50 = vcombine.low %v730_v39, %v746_v40  ;;  %v507_v39 = vld [vmem:[%s9632_s29 + $0x730] sm:$0xff] }
 0x18f   : > { %7087 = vmatpush1.bf16.msra.mxu1 %v8896_v12  ;;  %8020 = vst [vmem:[%s9994_s5 + $0x118] sm:$0xff] %v6779_v57  ;;  %v1258_v15 = vld [vmem:[%s9632_s29 + $0x1ea8] sm:$0xff]  ;;  %v523_v40 = vld [vmem:[%s9632_s29 + $0x7b0] sm:$0xff] }
 0x190   : > { %7088 = vmatprep.subr.bf16.mxu1 %v8865_v43  ;;  %v9185_v56 = vcombine.high %v1242_v41, %v1258_v15  ;;  %v698_v47 = vld [vmem:[%s9632_s29 + $0xd28] sm:$0xff]  ;;  %v9184_v43 = vcombine.low %v1242_v41, %v1258_v15  ;;  %v1019_v41 = vld [vmem:[%s9632_s29 + $0x1730] sm:$0xff] }
 0x191   : > { %7046 = vmatpush1.bf16.msra.mxu0 %v8352_v58  ;;  %v714_v12 = vld [vmem:[%s9632_s29 + $0xda8] sm:$0xff]  ;;  %v1035_v15 = vld [vmem:[%s9632_s29 + $0x17b0] sm:$0xff] }
 0x192   : > { %7047 = vmatprep.subr.bf16.mxu0 %v8321_v61  ;;  %v1210_v59 = vld [vmem:[%s9632_s29 + $0x1d28] sm:$0xff]  ;;  %v8641_v51 = vcombine.high %v698_v47, %v714_v12  ;;  %v8640_v58 = vcombine.low %v698_v47, %v714_v12  ;;  %v8963_v47 = vcombine.high %v1019_v41, %v1035_v15  ;;  %v10138_v12 = vsub.s32 5, %v9946_v18 }
 0x193   : > { %7089 = vmatpush1.bf16.msra.mxu1 %v8864_v60  ;;  %v1226_v48 = vld [vmem:[%s9632_s29 + $0x1da8] sm:$0xff] }
 0x194   : > { %7090 = vmatprep.subr.bf16.mxu1 %v8833_v62  ;;  %v9153_v52 = vcombine.high %v1210_v59, %v1226_v48  ;;  %v666_v53 = vld [vmem:[%s9632_s29 + $0xc28] sm:$0xff]  ;;  %v9152_v60 = vcombine.low %v1210_v59, %v1226_v48  ;;  %v475_v59 = vld [vmem:[%s9632_s29 + $0x630] sm:$0xff] }
 0x195   : > { %7048 = vmatpush1.bf16.msra.mxu0 %v8320_v4  ;;  %v1178_v55 = vld [vmem:[%s9632_s29 + $0x1c28] sm:$0xff]  ;;  %v8609_v61 = vcombine.high %v666_v53, %v682_v54  ;;  %v8608_v4 = vcombine.low %v666_v53, %v682_v54  ;;  %v491_v48 = vld [vmem:[%s9632_s29 + $0x6b0] sm:$0xff]  ;;  %v8962_v53 = vcombine.low %v1019_v41, %v1035_v15 }
 0x196   : > { %7049 = vmatprep.subr.bf16.mxu0 %v8289_v7  ;;  %v1194_v57 = vld [vmem:[%s9632_s29 + $0x1ca8] sm:$0xff]  ;;  %v8419_v54 = vcombine.high %v475_v59, %v491_v48  ;;  %v347_v15 = vld [vmem:[%s9632_s29 + $0x230] sm:$0xff] }
 0x197   : > { %7091 = vmatpush1.bf16.msra.mxu1 %v8832_v5  ;;  %v9121_v62 = vcombine.high %v1178_v55, %v1194_v57  ;;  %v634_v63 = vld [vmem:[%s9632_s29 + $0xb28] sm:$0xff]  ;;  %v9120_v5 = vcombine.low %v1178_v55, %v1194_v57  ;;  %v1332_v55 = vrot.slane %v9956_v29, %v10138_v12 }
 0x198   : > { %7092 = vmatprep.subr.bf16.mxu1 %v8801_v8  ;;  %v650_v0 = vld [vmem:[%s9632_s29 + $0xba8] sm:$0xff] }
 0x199   : > { %7050 = vmatpush1.bf16.msra.mxu0 %v8288_v14  ;;  %v1146_v1 = vld [vmem:[%s9632_s29 + $0x1b28] sm:$0xff]  ;;  %v8577_v7 = vcombine.high %v634_v63, %v650_v0  ;;  %v8576_v14 = vcombine.low %v634_v63, %v650_v0  ;;  %v971_v63 = vld [vmem:[%s9632_s29 + $0x15b0] sm:$0xff] }
 0x19a   : > { %7051 = vmatprep.subr.bf16.mxu0 %v8257_v17  ;;  %v1162_v3 = vld [vmem:[%s9632_s29 + $0x1ba8] sm:$0xff] }
 0x19b   : > { %7093 = vmatpush1.bf16.msra.mxu1 %v8800_v16  ;;  %v9089_v8 = vcombine.high %v1146_v1, %v1162_v3  ;;  %v602_v9 = vld [vmem:[%s9632_s29 + $0xa28] sm:$0xff]  ;;  %v9088_v16 = vcombine.low %v1146_v1, %v1162_v3  ;;  %v8418_v3 = vcombine.low %v475_v59, %v491_v48 }
 0x19c   : > { %7094 = vmatprep.subr.bf16.mxu1 %v8769_v19  ;;  %v618_v10 = vld [vmem:[%s9632_s29 + $0xaa8] sm:$0xff] }
 0x19d   : > { %7052 = vmatpush1.bf16.msra.mxu0 %v8256_v24  ;;  %v1114_v11 = vld [vmem:[%s9632_s29 + $0x1a28] sm:$0xff]  ;;  %v8545_v17 = vcombine.high %v602_v9, %v618_v10  ;;  %v8544_v24 = vcombine.low %v602_v9, %v618_v10  ;;  %v411_v10 = vld [vmem:[%s9632_s29 + $0x430] sm:$0xff] }
 0x19e   : > { %7053 = vmatprep.subr.bf16.mxu0 %v8225_v26  ;;  %v1130_v13 = vld [vmem:[%s9632_s29 + $0x1aa8] sm:$0xff] }
 0x19f   : > { %7095 = vmatpush1.bf16.msra.mxu1 %v8768_v25  ;;  %v9057_v19 = vcombine.high %v1114_v11, %v1130_v13  ;;  %v570_v20 = vld [vmem:[%s9632_s29 + $0x928] sm:$0xff]  ;;  %v9056_v25 = vcombine.low %v1114_v11, %v1130_v13  ;;  %v427_v11 = vld [vmem:[%s9632_s29 + $0x4b0] sm:$0xff] }
 0x1a0   : > { %7096 = vmatprep.subr.bf16.mxu1 %v8737_v28  ;;  %v586_v21 = vld [vmem:[%s9632_s29 + $0x9a8] sm:$0xff] }
 0x1a1   : > { %7054 = vmatpush1.bf16.msra.mxu0 %v8224_v35  ;;  %v1082_v22 = vld [vmem:[%s9632_s29 + $0x1928] sm:$0xff]  ;;  %v8513_v26 = vcombine.high %v570_v20, %v586_v21  ;;  %v8512_v35 = vcombine.low %v570_v20, %v586_v21 }
 0x1a2   : > { %7055 = vmatprep.subr.bf16.mxu0 %v8705_v37  ;;  %v1098_v23 = vld [vmem:[%s9632_s29 + $0x19a8] sm:$0xff] }
 0x1a3   : > { %7097 = vmatpush1.bf16.msra.mxu1 %v8736_v36  ;;  %v9025_v28 = vcombine.high %v1082_v22, %v1098_v23  ;;  %v538_v30 = vld [vmem:[%s9632_s29 + $0x828] sm:$0xff]  ;;  %v9024_v36 = vcombine.low %v1082_v22, %v1098_v23 }
 0x1a4   : > { %7098 = vmatprep.subr.bf16.mxu1 %v9217_v38  ;;  %v554_v31 = vld [vmem:[%s9632_s29 + $0x8a8] sm:$0xff] }
 0x1a5   : > { %7056 = vmatpush2.bf16.msra.mxu0 %v8704_v42  ;;  %v1050_v33 = vld [vmem:[%s9632_s29 + $0x1828] sm:$0xff]  ;;  %v8481_v37 = vcombine.high %v538_v30, %v554_v31  ;;  %v8480_v42 = vcombine.low %v538_v30, %v554_v31  ;;  %v379_v31 = vld [vmem:[%s9632_s29 + $0x330] sm:$0xff] }
 0x1a6   : > { %7057 = vmatprep.subr.bf16.mxu0 %v8673_v45  ;;  %v1066_v34 = vld [vmem:[%s9632_s29 + $0x18a8] sm:$0xff] }
 0x1a7   : > { %7099 = vmatpush2.bf16.msra.mxu1 %v9216_v44  ;;  %v8993_v38 = vcombine.high %v1050_v33, %v1066_v34  ;;  %v10135_v44 = vsub.s32 4, %v9946_v18  ;;  %v8992_v45 = vcombine.low %v1050_v33, %v1066_v34  ;;  %v395_v33 = vld [vmem:[%s9632_s29 + $0x3b0] sm:$0xff] }
 0x1a8   : > { %7100 = vmatprep.subr.bf16.mxu1 %v9185_v56  ;;  %v8451_v56 = vcombine.high %v507_v39, %v523_v40 }
 0x1a9   : > { %7058 = vmatpush2.bf16.msra.mxu0 %v8672_v50  ;;  %v987_v50 = vld [vmem:[%s9632_s29 + $0x1630] sm:$0xff] }
 0x1aa   : > { %7059 = vmatprep.subr.bf16.mxu0 %v8641_v51  ;;  %v1328_v51 = vrot.slane %v9956_v29, %v10135_v44 }
 0x1ab   : > { %7101 = vmatpush2.bf16.msra.mxu1 %v9184_v43  ;;  %v1003_v43 = vld [vmem:[%s9632_s29 + $0x16b0] sm:$0xff] }
 0x1ac   : > { %7102 = vmatprep.subr.bf16.mxu1 %v9153_v52  ;;  %v8450_v52 = vcombine.low %v507_v39, %v523_v40  ;;  %v8931_v57 = vcombine.high %v987_v50, %v1003_v43  ;;  %v8323_v40 = vcombine.high %v379_v31, %v395_v33 }
 0x1ad   : > { %7060 = vmatpush2.bf16.msra.mxu0 %v8640_v58  ;;  %v443_v58 = vld [vmem:[%s9632_s29 + $0x530] sm:$0xff] }
 0x1ae   : > { %7061 = vmatprep.subr.bf16.mxu0 %v8609_v61 }
 0x1af   : > { %7103 = vmatpush2.bf16.msra.mxu1 %v9152_v60  ;;  %v459_v60 = vld [vmem:[%s9632_s29 + $0x5b0] sm:$0xff] }
 0x1b0   : > { %7104 = vmatprep.subr.bf16.mxu1 %v9121_v62  ;;  %v955_v62 = vld [vmem:[%s9632_s29 + $0x1530] sm:$0xff]  ;;  %v8386_v22 = vcombine.low %v443_v58, %v459_v60 }
 0x1b1   : > { %7062 = vmatpush2.bf16.msra.mxu0 %v8608_v4  ;;  %v8930_v4 = vcombine.low %v987_v50, %v1003_v43  ;;  %v8899_v9 = vcombine.high %v955_v62, %v971_v63  ;;  %v315_v43 = vld [vmem:[%s9632_s29 + $0x130] sm:$0xff] }
 0x1b2   : > { %7063 = vmatprep.subr.bf16.mxu0 %v8577_v7 }
 0x1b3   : > { %7105 = vmatpush2.bf16.msra.mxu1 %v9120_v5  ;;  %v8387_v5 = vcombine.high %v443_v58, %v459_v60  ;;  %v283_v60 = vld [vmem:[%s9632_s29 + $0x30] sm:$0xff] }
 0x1b4   : > { %7106 = vmatprep.subr.bf16.mxu1 %v9089_v8 }
 0x1b5   : > { %7064 = vmatpush2.bf16.msra.mxu0 %v8576_v14  ;;  %v923_v14 = vld [vmem:[%s9632_s29 + $0x1430] sm:$0xff] }
 0x1b6   : > { %7065 = vmatprep.subr.bf16.mxu0 %v8545_v17  ;;  %v10167_v17 = vld [vmem:[%s11082_s0 + $0xc] ss:$16 sps:$4 sm:$0xff]  }
 0x1b7   : > { %7107 = vmatpush2.bf16.msra.mxu1 %v9088_v16  ;;  %v939_v16 = vld [vmem:[%s9632_s29 + $0x14b0] sm:$0xff] }
 0x1b8   : > { %7108 = vmatprep.subr.bf16.mxu1 %v9057_v19  ;;  %v8867_v30 = vcombine.high %v923_v14, %v939_v16  ;;  %v8866_v39 = vcombine.low %v923_v14, %v939_v16  ;;  %v747_v14 = vld [vmem:[%s9632_s29 + $0xeb0] sm:$0xff] }
 0x1b9   : > { %7066 = vmatpush2.bf16.msra.mxu0 %v8544_v24  ;;  %v8898_v24 = vcombine.low %v955_v62, %v971_v63  ;;  %v795_v62 = vld [vmem:[%s9632_s29 + $0x1030] sm:$0xff] }
 0x1ba   : > { %7067 = vmatprep.subr.bf16.mxu0 %v8513_v26  ;;  %v811_v63 = vld [vmem:[%s9632_s29 + $0x10b0] sm:$0xff] }
 0x1bb   : > { %7109 = vmatpush2.bf16.msra.mxu1 %v9056_v25  ;;  %v8355_v25 = vcombine.high %v411_v10, %v427_v11  ;;  %v1243_v16 = vld [vmem:[%s9632_s29 + $0x1e30] sm:$0xff] }
 0x1bc   : > { %7110 = vmatprep.subr.bf16.mxu1 %v9025_v28 }
 0x1bd   : > { %7068 = vmatpush2.bf16.msra.mxu0 %v8512_v35  ;;  %v891_v35 = vld [vmem:[%s9632_s29 + $0x1330] sm:$0xff] }
 0x1be   : > { %7069 = vmatprep.subr.bf16.mxu0 %v8481_v37 }
 0x1bf   : > { %7111 = vmatpush2.bf16.msra.mxu1 %v9024_v36  ;;  %v907_v36 = vld [vmem:[%s9632_s29 + $0x13b0] sm:$0xff] }
 0x1c0   : > { %7112 = vmatprep.subr.bf16.mxu1 %v8993_v38  ;;  %v8354_v38 = vcombine.low %v411_v10, %v427_v11  ;;  %v8835_v41 = vcombine.high %v891_v35, %v907_v36  ;;  %v8834_v59 = vcombine.low %v891_v35, %v907_v36  ;;  %v667_v35 = vld [vmem:[%s9632_s29 + $0xc30] sm:$0xff] }
 0x1c1   : > { %7070 = vmatpush2.bf16.msra.mxu0 %v8480_v42  ;;  %v363_v42 = vld [vmem:[%s9632_s29 + $0x2b0] sm:$0xff] }
 0x1c2   : > { %7125 = vmatprep.subr.bf16.mxu0 %v8451_v56  ;;  %v875_v56 = vld [vmem:[%s9632_s29 + $0x12b0] sm:$0xff]  ;;  %v8291_v48 = vcombine.high %v347_v15, %v363_v42 }
 0x1c3   : > { %7113 = vmatpush2.bf16.msra.mxu1 %v8992_v45  ;;  %v859_v45 = vld [vmem:[%s9632_s29 + $0x1230] sm:$0xff] }
 0x1c4   : > { %7168 = vmatprep.subr.bf16.mxu1 %v8963_v47  ;;  %v6815_v61 = vpop.f32.mrf.mxu0  ;;  %7072 = vmatmul.mubr.bf16.vlgmr.msra.gmra.mxu0 %v9975_v46  ;;  %v8322_v47 = vcombine.low %v379_v31, %v395_v33  ;;  %v8803_v50 = vcombine.high %v859_v45, %v875_v56  ;;  %v683_v36 = vld [vmem:[%s9632_s29 + $0xcb0] sm:$0xff] }
 0x1c5   : > { %v6816_v0 = vadd.f32 %v6815_v61, %v1328_v51  ;;  %7126 = vmatpush1.bf16.msra.mxu0 %v8450_v52  ;;  %v827_v52 = vld [vmem:[%s9632_s29 + $0x1130] sm:$0xff] }
 0x1c6   : > { %v6858_v1 = vpop.f32.mrf.mxu1  ;;  %7115 = vmatmul.mubr.bf16.vlgmr.msra.gmra.mxu1 %v9983_v49  ;;  %v6817_v29 = vpop.f32.mrf.mxu0  ;;  %7127 = vmatprep.subr.bf16.mxu0 %v8419_v54  ;;  %v10159_v49 = vld [vmem:[%s11082_s0 + $0x4] ss:$16 sps:$4 sm:$0xff]   ;;  %v8290_v54 = vcombine.low %v347_v15, %v363_v42 }
 0x1c7   : > { %7169 = vmatpush1.bf16.msra.mxu1 %v8962_v53  ;;  %v6859_v7 = vadd.f32 %v6858_v1, %v6816_v0  ;;  %v6818_v46 = vadd.f32 %v6817_v29, %v1332_v55  ;;  %7157 = vmatprep.mubr.bf16.mxu0 %v10159_v49  ;;  %v843_v53 = vld [vmem:[%s9632_s29 + $0x11b0] sm:$0xff]  ;;  %v8739_v29 = vcombine.high %v795_v62, %v811_v63 }
 0x1c8   : > { %v6860_v8 = vpop.f32.mrf.mxu1  ;;  %7170 = vmatprep.subr.bf16.mxu1 %v8931_v57  ;;  %v6819_v13 = vpop.f32.mrf.mxu0  ;;  %7200 = vmatprep.mubr.bf16.mxu1 %v10167_v17  ;;  %v8771_v58 = vcombine.high %v827_v52, %v843_v53  ;;  %v299_v61 = vld [vmem:[%s9632_s29 + $0xb0] sm:$0xff]  ;;  %v8770_v1 = vcombine.low %v827_v52, %v843_v53 }
 0x1c9   : > { %7989 = vst [vmem:[%s9994_s5 + $0x20] sm:$0xff] %v6859_v7  ;;  %v6861_v19 = vadd.f32 %v6860_v8, %v6818_v46  ;;  %v6820_v20 = vadd.f32 %v6819_v13, %v1328_v51  ;;  %7128 = vmatpush1.bf16.msra.mxu0 %v8418_v3  ;;  %v331_v51 = vld [vmem:[%s9632_s29 + $0x1b0] sm:$0xff]  ;;  %v8227_v3 = vcombine.high %v283_v60, %v299_v61 }
 0x1ca   : > { %v6862_v21 = vpop.f32.mrf.mxu1  ;;  %v6821_v23 = vpop.f32.mrf.mxu0  ;;  %7129 = vmatprep.subr.bf16.mxu0 %v8387_v5  ;;  %v8259_v57 = vcombine.high %v315_v43, %v331_v51  ;;  %v8258_v0 = vcombine.low %v315_v43, %v331_v51  ;;  %v779_v5 = vld [vmem:[%s9632_s29 + $0xfb0] sm:$0xff]  ;;  %v8226_v8 = vcombine.low %v283_v60, %v299_v61 }
 0x1cb   : > { %7171 = vmatpush1.bf16.msra.mxu1 %v8930_v4  ;;  %7990 = vst [vmem:[%s9994_s5 + $0x28] sm:$0xff] %v6861_v19  ;;  %v6863_v26 = vadd.f32 %v6862_v21, %v6820_v20  ;;  %v6822_v28 = vadd.f32 %v6821_v23, %v1332_v55  ;;  %v8802_v55 = vcombine.low %v859_v45, %v875_v56  ;;  %v763_v4 = vld [vmem:[%s9632_s29 + $0xf30] sm:$0xff] }
 0x1cc   : > { %7172 = vmatprep.subr.bf16.mxu1 %v8899_v9  ;;  %v6864_v34 = vpop.f32.mrf.mxu1  ;;  %v1275_v7 = vld [vmem:[%s9632_s29 + $0x1f30] sm:$0xff]  ;;  %v8738_v9 = vcombine.low %v795_v62, %v811_v63  ;;  %v8707_v10 = vcombine.high %v763_v4, %v779_v5  ;;  %v8706_v20 = vcombine.low %v763_v4, %v779_v5 }
 0x1cd   : > { %8021 = vst [vmem:[%s9994_s5 + $0x120] sm:$0xff] %v6863_v26  ;;  %v6865_v37 = vadd.f32 %v6864_v34, %v6822_v28  ;;  %7130 = vmatpush1.bf16.msra.mxu0 %v8386_v22  ;;  %v1291_v46 = vld [vmem:[%s9632_s29 + $0x1fb0] sm:$0xff] }
 0x1ce   : > { %7131 = vmatprep.subr.bf16.mxu0 %v8355_v25  ;;  %v9219_v11 = vcombine.high %v1275_v7, %v1291_v46  ;;  %v731_v13 = vld [vmem:[%s9632_s29 + $0xe30] sm:$0xff]  ;;  %v9218_v21 = vcombine.low %v1275_v7, %v1291_v46 }
 0x1cf   : > { %7173 = vmatpush1.bf16.msra.mxu1 %v8898_v24  ;;  %8022 = vst [vmem:[%s9994_s5 + $0x128] sm:$0xff] %v6865_v37  ;;  %v1259_v19 = vld [vmem:[%s9632_s29 + $0x1eb0] sm:$0xff]  ;;  %v8675_v22 = vcombine.high %v731_v13, %v747_v14 }
 0x1d0   : > { %7174 = vmatprep.subr.bf16.mxu1 %v8867_v30  ;;  %v9187_v23 = vcombine.high %v1243_v16, %v1259_v19  ;;  %v699_v24 = vld [vmem:[%s9632_s29 + $0xd30] sm:$0xff]  ;;  %v8674_v30 = vcombine.low %v731_v13, %v747_v14  ;;  %v9186_v31 = vcombine.low %v1243_v16, %v1259_v19  ;;  %v508_v14 = vld [vmem:[%s9632_s29 + $0x738] sm:$0xff] }
 0x1d1   : > { %7132 = vmatpush1.bf16.msra.mxu0 %v8354_v38  ;;  %v715_v25 = vld [vmem:[%s9632_s29 + $0xdb0] sm:$0xff]  ;;  %v524_v16 = vld [vmem:[%s9632_s29 + $0x7b8] sm:$0xff] }
 0x1d2   : > { %7133 = vmatprep.subr.bf16.mxu0 %v8323_v40  ;;  %v1211_v26 = vld [vmem:[%s9632_s29 + $0x1d30] sm:$0xff]  ;;  %v8643_v33 = vcombine.high %v699_v24, %v715_v25  ;;  %v1020_v19 = vld [vmem:[%s9632_s29 + $0x1738] sm:$0xff] }
 0x1d3   : > { %7175 = vmatpush1.bf16.msra.mxu1 %v8866_v39  ;;  %v1227_v28 = vld [vmem:[%s9632_s29 + $0x1db0] sm:$0xff]  ;;  %v8642_v39 = vcombine.low %v699_v24, %v715_v25  ;;  %v8453_v24 = vcombine.high %v508_v14, %v524_v16 }
 0x1d4   : > { %7176 = vmatprep.subr.bf16.mxu1 %v8835_v41  ;;  %v9155_v34 = vcombine.high %v1211_v26, %v1227_v28  ;;  %v1179_v37 = vld [vmem:[%s9632_s29 + $0x1c30] sm:$0xff]  ;;  %v9154_v40 = vcombine.low %v1211_v26, %v1227_v28  ;;  %v8611_v41 = vcombine.high %v667_v35, %v683_v36  ;;  %v10230_v26 = vsub.s32 7, %v9946_v18  ;;  %v476_v28 = vld [vmem:[%s9632_s29 + $0x638] sm:$0xff] }
 0x1d5   : > { %7134 = vmatpush1.bf16.msra.mxu0 %v8322_v47  ;;  %v1195_v38 = vld [vmem:[%s9632_s29 + $0x1cb0] sm:$0xff] }
 0x1d6   : > { %7135 = vmatprep.subr.bf16.mxu0 %v8291_v48  ;;  %v9123_v15 = vcombine.high %v1179_v37, %v1195_v38  ;;  %v635_v42 = vld [vmem:[%s9632_s29 + $0xb30] sm:$0xff]  ;;  %v9122_v48 = vcombine.low %v1179_v37, %v1195_v38 }
 0x1d7   : > { %7177 = vmatpush1.bf16.msra.mxu1 %v8834_v59  ;;  %v651_v45 = vld [vmem:[%s9632_s29 + $0xbb0] sm:$0xff]  ;;  %v8610_v59 = vcombine.low %v667_v35, %v683_v36  ;;  %v8452_v36 = vcombine.low %v508_v14, %v524_v16  ;;  %v892_v14 = vld [vmem:[%s9632_s29 + $0x1338] sm:$0xff] }
 0x1d8   : > { %7178 = vmatprep.subr.bf16.mxu1 %v8803_v50  ;;  %v1147_v56 = vld [vmem:[%s9632_s29 + $0x1b30] sm:$0xff]  ;;  %v8579_v50 = vcombine.high %v635_v42, %v651_v45  ;;  %v908_v16 = vld [vmem:[%s9632_s29 + $0x13b8] sm:$0xff] }
 0x1d9   : > { %7136 = vmatpush1.bf16.msra.mxu0 %v8290_v54  ;;  %v1163_v47 = vld [vmem:[%s9632_s29 + $0x1bb0] sm:$0xff] }
 0x1da   : > { %7137 = vmatprep.subr.bf16.mxu0 %v8259_v57  ;;  %v9091_v43 = vcombine.high %v1147_v56, %v1163_v47  ;;  %v603_v51 = vld [vmem:[%s9632_s29 + $0xa30] sm:$0xff]  ;;  %v9090_v57 = vcombine.low %v1147_v56, %v1163_v47  ;;  %v972_v56 = vld [vmem:[%s9632_s29 + $0x15b8] sm:$0xff] }
 0x1db   : > { %7179 = vmatpush1.bf16.msra.mxu1 %v8802_v55  ;;  %v619_v52 = vld [vmem:[%s9632_s29 + $0xab0] sm:$0xff]  ;;  %v8578_v55 = vcombine.low %v635_v42, %v651_v45  ;;  %v956_v45 = vld [vmem:[%s9632_s29 + $0x1538] sm:$0xff] }
 0x1dc   : > { %7180 = vmatprep.subr.bf16.mxu1 %v8771_v58  ;;  %v1115_v53 = vld [vmem:[%s9632_s29 + $0x1a30] sm:$0xff]  ;;  %v8547_v58 = vcombine.high %v603_v51, %v619_v52 }
 0x1dd   : > { %7138 = vmatpush1.bf16.msra.mxu0 %v8258_v0  ;;  %v1131_v54 = vld [vmem:[%s9632_s29 + $0x1ab0] sm:$0xff] }
 0x1de   : > { %7139 = vmatprep.subr.bf16.mxu0 %v8227_v3  ;;  %v9059_v60 = vcombine.high %v1115_v53, %v1131_v54  ;;  %v571_v61 = vld [vmem:[%s9632_s29 + $0x930] sm:$0xff]  ;;  %v9058_v3 = vcombine.low %v1115_v53, %v1131_v54 }
 0x1df   : > { %7181 = vmatpush1.bf16.msra.mxu1 %v8770_v1  ;;  %v587_v62 = vld [vmem:[%s9632_s29 + $0x9b0] sm:$0xff]  ;;  %v8546_v1 = vcombine.low %v603_v51, %v619_v52 }
 0x1e0   : > { %7182 = vmatprep.subr.bf16.mxu1 %v8739_v29  ;;  %v1083_v63 = vld [vmem:[%s9632_s29 + $0x1930] sm:$0xff]  ;;  %v8515_v29 = vcombine.high %v571_v61, %v587_v62 }
 0x1e1   : > { %7140 = vmatpush1.bf16.msra.mxu0 %v8226_v8  ;;  %v1099_v0 = vld [vmem:[%s9632_s29 + $0x19b0] sm:$0xff] }
 0x1e2   : > { %7141 = vmatprep.subr.bf16.mxu0 %v8707_v10  ;;  %v9027_v4 = vcombine.high %v1083_v63, %v1099_v0  ;;  %v539_v5 = vld [vmem:[%s9632_s29 + $0x830] sm:$0xff]  ;;  %v9026_v10 = vcombine.low %v1083_v63, %v1099_v0  ;;  %v940_v63 = vld [vmem:[%s9632_s29 + $0x14b8] sm:$0xff] }
 0x1e3   : > { %7183 = vmatpush1.bf16.msra.mxu1 %v8738_v9  ;;  %v555_v7 = vld [vmem:[%s9632_s29 + $0x8b0] sm:$0xff]  ;;  %v8514_v9 = vcombine.low %v571_v61, %v587_v62  ;;  %v924_v62 = vld [vmem:[%s9632_s29 + $0x1438] sm:$0xff] }
 0x1e4   : > { %7184 = vmatprep.subr.bf16.mxu1 %v9219_v11  ;;  %v1051_v46 = vld [vmem:[%s9632_s29 + $0x1830] sm:$0xff]  ;;  %v8483_v11 = vcombine.high %v539_v5, %v555_v7 }
 0x1e5   : > { %7142 = vmatpush2.bf16.msra.mxu0 %v8706_v20  ;;  %v1067_v8 = vld [vmem:[%s9632_s29 + $0x18b0] sm:$0xff]  ;;  %v1036_v20 = vld [vmem:[%s9632_s29 + $0x17b8] sm:$0xff] }
 0x1e6   : > { %7143 = vmatprep.subr.bf16.mxu0 %v8675_v22  ;;  %v8995_v13 = vcombine.high %v1051_v46, %v1067_v8  ;;  %v10227_v22 = vsub.s32 6, %v9946_v18  ;;  %v8965_v25 = vcombine.high %v1020_v19, %v1036_v20  ;;  %v8964_v37 = vcombine.low %v1020_v19, %v1036_v20  ;;  %v10244_v42 = vld [vmem:[%s11082_s0] ss:$16 sps:$4 sm:$0xff]  }
 0x1e7   : > { %7185 = vmatpush2.bf16.msra.mxu1 %v9218_v21  ;;  %v8482_v21 = vcombine.low %v539_v5, %v555_v7  ;;  %v8900_v5 = vcombine.low %v956_v45, %v972_v56 }
 0x1e8   : > { %7186 = vmatprep.subr.bf16.mxu1 %v9187_v23  ;;  %v8994_v23 = vcombine.low %v1051_v46, %v1067_v8 }
 0x1e9   : > { %7144 = vmatpush2.bf16.msra.mxu0 %v8674_v30  ;;  %v492_v30 = vld [vmem:[%s9632_s29 + $0x6b8] sm:$0xff] }
 0x1ea   : > { %7145 = vmatprep.subr.bf16.mxu0 %v8643_v33  ;;  %v1004_v33 = vld [vmem:[%s9632_s29 + $0x16b8] sm:$0xff]  ;;  %v8421_v38 = vcombine.high %v476_v28, %v492_v30 }
 0x1eb   : > { %7187 = vmatpush2.bf16.msra.mxu1 %v9186_v31  ;;  %v988_v31 = vld [vmem:[%s9632_s29 + $0x1638] sm:$0xff] }
 0x1ec   : > { %7188 = vmatprep.subr.bf16.mxu1 %v9155_v34  ;;  %v9335_v34 = vld [vmem:[%s9640_s30] sm:$0xff]  ;;  %v8932_v51 = vcombine.low %v988_v31, %v1004_v33 }
 0x1ed   : > { %7146 = vmatpush2.bf16.msra.mxu0 %v8642_v39  ;;  %v1336_v35 = vrot.slane %v9335_v34, %v10227_v22  ;;  %v1340_v18 = vrot.slane %v9335_v34, %v10230_v26  ;;  %v8933_v39 = vcombine.high %v988_v31, %v1004_v33  ;;  %v876_v31 = vld [vmem:[%s9632_s29 + $0x12b8] sm:$0xff]  ;;  %v8836_v34 = vcombine.low %v892_v14, %v908_v16 }
 0x1ee   : > { %7147 = vmatprep.subr.bf16.mxu0 %v8611_v41  ;;  %v460_v41 = vld [vmem:[%s9632_s29 + $0x5b8] sm:$0xff] }
 0x1ef   : > { %7189 = vmatpush2.bf16.msra.mxu1 %v9154_v40  ;;  %v444_v40 = vld [vmem:[%s9632_s29 + $0x538] sm:$0xff] }
 0x1f0   : > { %7190 = vmatprep.subr.bf16.mxu1 %v9123_v15  ;;  %v8389_v52 = vcombine.high %v444_v40, %v460_v41 }
 0x1f1   : > { %7148 = vmatpush2.bf16.msra.mxu0 %v8610_v59 }
 0x1f2   : > { %7149 = vmatprep.subr.bf16.mxu0 %v8579_v50  ;;  %v8420_v50 = vcombine.low %v476_v28, %v492_v30  ;;  %v364_v28 = vld [vmem:[%s9632_s29 + $0x2b8] sm:$0xff] }
 0x1f3   : > { %7191 = vmatpush2.bf16.msra.mxu1 %v9122_v48  ;;  %v10252_v48 = vld [vmem:[%s11082_s0 + $0x8] ss:$16 sps:$4 sm:$0xff]  }
 0x1f4   : > { %7192 = vmatprep.subr.bf16.mxu1 %v9091_v43  ;;  %v860_v30 = vld [vmem:[%s9632_s29 + $0x1238] sm:$0xff] }
 0x1f5   : > { %7150 = vmatpush2.bf16.msra.mxu0 %v8578_v55 }
 0x1f6   : > { %7151 = vmatprep.subr.bf16.mxu0 %v8547_v58  ;;  %v412_v58 = vld [vmem:[%s9632_s29 + $0x438] sm:$0xff] }
 0x1f7   : > { %7193 = vmatpush2.bf16.msra.mxu1 %v9090_v57  ;;  %v8901_v57 = vcombine.high %v956_v45, %v972_v56  ;;  %v284_v56 = vld [vmem:[%s9632_s29 + $0x38] sm:$0xff] }
 0x1f8   : > { %7194 = vmatprep.subr.bf16.mxu1 %v9059_v60  ;;  %v428_v60 = vld [vmem:[%s9632_s29 + $0x4b8] sm:$0xff] }
 0x1f9   : > { %7152 = vmatpush2.bf16.msra.mxu0 %v8546_v1  ;;  %v8357_v7 = vcombine.high %v412_v58, %v428_v60  ;;  %v8356_v20 = vcombine.low %v412_v58, %v428_v60  ;;  %v1292_v58 = vld [vmem:[%s9632_s29 + $0x1fb8] sm:$0xff] }
 0x1fa   : > { %7153 = vmatprep.subr.bf16.mxu0 %v8515_v29  ;;  %v8388_v29 = vcombine.low %v444_v40, %v460_v41  ;;  %v8804_v41 = vcombine.low %v860_v30, %v876_v31 }
 0x1fb   : > { %7195 = vmatpush2.bf16.msra.mxu1 %v9058_v3 }
 0x1fc   : > { %7196 = vmatprep.subr.bf16.mxu1 %v9027_v4 }
 0x1fd   : > { %7154 = vmatpush2.bf16.msra.mxu0 %v8514_v9  ;;  %v8869_v9 = vcombine.high %v924_v62, %v940_v63 }
 0x1fe   : > { %7155 = vmatprep.subr.bf16.mxu0 %v8483_v11  ;;  %v396_v11 = vld [vmem:[%s9632_s29 + $0x3b8] sm:$0xff] }
 0x1ff   : > { %7197 = vmatpush2.bf16.msra.mxu1 %v9026_v10  ;;  %v380_v10 = vld [vmem:[%s9632_s29 + $0x338] sm:$0xff] }
 0x200   : > { %7198 = vmatprep.subr.bf16.mxu1 %v8995_v13  ;;  %v8324_v33 = vcombine.low %v380_v10, %v396_v11 }
 0x201   : > { %7156 = vmatpush2.bf16.msra.mxu0 %v8482_v21  ;;  %v8868_v21 = vcombine.low %v924_v62, %v940_v63 }
 0x202   : > { %7211 = vmatprep.subr.bf16.mxu0 %v8453_v24  ;;  %v8837_v24 = vcombine.high %v892_v14, %v908_v16 }
 0x203   : > { %7199 = vmatpush2.bf16.msra.mxu1 %v8994_v23  ;;  %v8325_v23 = vcombine.high %v380_v10, %v396_v11  ;;  %v1212_v10 = vld [vmem:[%s9632_s29 + $0x1d38] sm:$0xff] }
 0x204   : > { %7254 = vmatprep.subr.bf16.mxu1 %v8965_v25  ;;  %v6901_v15 = vpop.f32.mrf.mxu0  ;;  %7158 = vmatmul.mubr.bf16.vlgmr.msra.gmra.mxu0 %v10244_v42  ;;  %v348_v25 = vld [vmem:[%s9632_s29 + $0x238] sm:$0xff] }
 0x205   : > { %v6902_v47 = vadd.f32 %v6901_v15, %v1336_v35  ;;  %7212 = vmatpush1.bf16.msra.mxu0 %v8452_v36  ;;  %7243 = vmatprep.mubr.bf16.mxu0 %v10159_v49  ;;  %v8805_v36 = vcombine.high %v860_v30, %v876_v31  ;;  %v8292_v40 = vcombine.low %v348_v25, %v364_v28  ;;  %v1228_v11 = vld [vmem:[%s9632_s29 + $0x1db8] sm:$0xff] }
 0x206   : > { %v6944_v59 = vpop.f32.mrf.mxu1  ;;  %7201 = vmatmul.mubr.bf16.vlgmr.msra.gmra.mxu1 %v10252_v48  ;;  %v6903_v43 = vpop.f32.mrf.mxu0  ;;  %7213 = vmatprep.subr.bf16.mxu0 %v8421_v38  ;;  %v332_v38 = vld [vmem:[%s9632_s29 + $0x1b8] sm:$0xff] }
 0x207   : > { %7255 = vmatpush1.bf16.msra.mxu1 %v8964_v37  ;;  %v6945_v53 = vadd.f32 %v6944_v59, %v6902_v47  ;;  %v6904_v54 = vadd.f32 %v6903_v43, %v1340_v18  ;;  %7286 = vmatprep.mubr.bf16.mxu1 %v10167_v17  ;;  %v316_v37 = vld [vmem:[%s9632_s29 + $0x138] sm:$0xff] }
 0x208   : > { %v6946_v55 = vpop.f32.mrf.mxu1  ;;  %7256 = vmatprep.subr.bf16.mxu1 %v8933_v39  ;;  %v6905_v61 = vpop.f32.mrf.mxu0  ;;  %v844_v39 = vld [vmem:[%s9632_s29 + $0x11b8] sm:$0xff]  ;;  %v8261_v15 = vcombine.high %v316_v37, %v332_v38  ;;  %v8260_v43 = vcombine.low %v316_v37, %v332_v38 }
 0x209   : > { %7991 = vst [vmem:[%s9994_s5 + $0x30] sm:$0xff] %v6945_v53  ;;  %v6947_v0 = vadd.f32 %v6946_v55, %v6904_v54  ;;  %v6906_v1 = vadd.f32 %v6905_v61, %v1336_v35  ;;  %7214 = vmatpush1.bf16.msra.mxu0 %v8420_v50  ;;  %v8293_v35 = vcombine.high %v348_v25, %v364_v28  ;;  %v300_v47 = vld [vmem:[%s9632_s29 + $0xb8] sm:$0xff] }
 0x20a   : > { %v6948_v3 = vpop.f32.mrf.mxu1  ;;  %v6907_v4 = vpop.f32.mrf.mxu0  ;;  %7215 = vmatprep.subr.bf16.mxu0 %v8389_v52  ;;  %v796_v59 = vld [vmem:[%s9632_s29 + $0x1038] sm:$0xff]  ;;  %v8229_v52 = vcombine.high %v284_v56, %v300_v47  ;;  %v8228_v60 = vcombine.low %v284_v56, %v300_v47  ;;  %v9156_v28 = vcombine.low %v1212_v10, %v1228_v11 }
 0x20b   : > { %7257 = vmatpush1.bf16.msra.mxu1 %v8932_v51  ;;  %7992 = vst [vmem:[%s9994_s5 + $0x38] sm:$0xff] %v6947_v0  ;;  %v6949_v46 = vadd.f32 %v6948_v3, %v6906_v1  ;;  %v6908_v8 = vadd.f32 %v6907_v4, %v1340_v18  ;;  %v828_v18 = vld [vmem:[%s9632_s29 + $0x1138] sm:$0xff] }
 0x20c   : > { %7258 = vmatprep.subr.bf16.mxu1 %v8901_v57  ;;  %v6950_v13 = vpop.f32.mrf.mxu1  ;;  %v8773_v45 = vcombine.high %v828_v18, %v844_v39  ;;  %v812_v50 = vld [vmem:[%s9632_s29 + $0x10b8] sm:$0xff]  ;;  %v8772_v51 = vcombine.low %v828_v18, %v844_v39 }
 0x20d   : > { %8023 = vst [vmem:[%s9994_s5 + $0x130] sm:$0xff] %v6949_v46  ;;  %v6951_v19 = vadd.f32 %v6950_v13, %v6908_v8  ;;  %7216 = vmatpush1.bf16.msra.mxu0 %v8388_v29  ;;  %v8741_v53 = vcombine.high %v796_v59, %v812_v50  ;;  %v764_v54 = vld [vmem:[%s9632_s29 + $0xf38] sm:$0xff]  ;;  %v8740_v61 = vcombine.low %v796_v59, %v812_v50 }
 0x20e   : > { %7217 = vmatprep.subr.bf16.mxu0 %v8357_v7  ;;  %v780_v55 = vld [vmem:[%s9632_s29 + $0xfb8] sm:$0xff] }
 0x20f   : > { %7259 = vmatpush1.bf16.msra.mxu1 %v8900_v5  ;;  %8024 = vst [vmem:[%s9994_s5 + $0x138] sm:$0xff] %v6951_v19  ;;  %v1276_v57 = vld [vmem:[%s9632_s29 + $0x1f38] sm:$0xff]  ;;  %v8709_v62 = vcombine.high %v764_v54, %v780_v55  ;;  %v8708_v4 = vcombine.low %v764_v54, %v780_v55  ;;  %v9157_v19 = vcombine.high %v1212_v10, %v1228_v11  ;;  %v10318_v10 = vld [vmem:[%s9640_s30 + $0x8] sm:$0xff] }
 0x210   : > { %7260 = vmatprep.subr.bf16.mxu1 %v8869_v9  ;;  %v9221_v63 = vcombine.high %v1276_v57, %v1292_v58  ;;  %v732_v0 = vld [vmem:[%s9632_s29 + $0xe38] sm:$0xff]  ;;  %v9220_v5 = vcombine.low %v1276_v57, %v1292_v58 }
 0x211   : > { %7218 = vmatpush1.bf16.msra.mxu0 %v8356_v20  ;;  %v748_v1 = vld [vmem:[%s9632_s29 + $0xeb8] sm:$0xff] }
 0x212   : > { %7219 = vmatprep.subr.bf16.mxu0 %v8325_v23  ;;  %v1244_v3 = vld [vmem:[%s9632_s29 + $0x1e38] sm:$0xff]  ;;  %v8677_v7 = vcombine.high %v732_v0, %v748_v1  ;;  %v8676_v13 = vcombine.low %v732_v0, %v748_v1 }
 0x213   : > { %7261 = vmatpush1.bf16.msra.mxu1 %v8868_v21  ;;  %v1260_v29 = vld [vmem:[%s9632_s29 + $0x1eb8] sm:$0xff] }
 0x214   : > { %7262 = vmatprep.subr.bf16.mxu1 %v8837_v24  ;;  %v9189_v46 = vcombine.high %v1244_v3, %v1260_v29  ;;  %v700_v8 = vld [vmem:[%s9632_s29 + $0xd38] sm:$0xff]  ;;  %v9188_v14 = vcombine.low %v1244_v3, %v1260_v29 }
 0x215   : > { %7220 = vmatpush1.bf16.msra.mxu0 %v8324_v33  ;;  %v716_v9 = vld [vmem:[%s9632_s29 + $0xdb8] sm:$0xff] }
 0x216   : > { %7221 = vmatprep.subr.bf16.mxu0 %v8293_v35  ;;  %v8645_v16 = vcombine.high %v700_v8, %v716_v9  ;;  %v668_v20 = vld [vmem:[%s9632_s29 + $0xc38] sm:$0xff]  ;;  %v8644_v25 = vcombine.low %v700_v8, %v716_v9 }
 0x217   : > { %7263 = vmatpush1.bf16.msra.mxu1 %v8836_v34  ;;  %v684_v21 = vld [vmem:[%s9632_s29 + $0xcb8] sm:$0xff] }
 0x218   : > { %7264 = vmatprep.subr.bf16.mxu1 %v8805_v36  ;;  %v1180_v23 = vld [vmem:[%s9632_s29 + $0x1c38] sm:$0xff]  ;;  %v8613_v30 = vcombine.high %v668_v20, %v684_v21  ;;  %v8612_v37 = vcombine.low %v668_v20, %v684_v21  ;;  %v1005_v20 = vld [vmem:[%s9632_s29 + $0x16c0] sm:$0xff]  ;;  %v1344_v21 = vrot.slane %v10318_v10, %v9953_v27 }
 0x219   : > { %7222 = vmatpush1.bf16.msra.mxu0 %v8292_v40  ;;  %v1196_v24 = vld [vmem:[%s9632_s29 + $0x1cb8] sm:$0xff] }
 0x21a   : > { %7223 = vmatprep.subr.bf16.mxu0 %v8261_v15  ;;  %v9125_v31 = vcombine.high %v1180_v23, %v1196_v24  ;;  %v636_v33 = vld [vmem:[%s9632_s29 + $0xb38] sm:$0xff]  ;;  %v9124_v38 = vcombine.low %v1180_v23, %v1196_v24 }
 0x21b   : > { %7265 = vmatpush1.bf16.msra.mxu1 %v8804_v41  ;;  %v652_v34 = vld [vmem:[%s9632_s29 + $0xbb8] sm:$0xff] }
 0x21c   : > { %7266 = vmatprep.subr.bf16.mxu1 %v8773_v45  ;;  %v1148_v35 = vld [vmem:[%s9632_s29 + $0x1b38] sm:$0xff]  ;;  %v8581_v18 = vcombine.high %v636_v33, %v652_v34  ;;  %v8580_v56 = vcombine.low %v636_v33, %v652_v34  ;;  %v461_v33 = vld [vmem:[%s9632_s29 + $0x5c0] sm:$0xff] }
 0x21d   : > { %7224 = vmatpush1.bf16.msra.mxu0 %v8260_v43  ;;  %v1164_v36 = vld [vmem:[%s9632_s29 + $0x1bb8] sm:$0xff] }
 0x21e   : > { %7225 = vmatprep.subr.bf16.mxu0 %v8229_v52  ;;  %v9093_v39 = vcombine.high %v1148_v35, %v1164_v36  ;;  %v604_v40 = vld [vmem:[%s9632_s29 + $0xa38] sm:$0xff]  ;;  %v9092_v47 = vcombine.low %v1148_v35, %v1164_v36  ;;  %v957_v35 = vld [vmem:[%s9632_s29 + $0x1540] sm:$0xff] }
 0x21f   : > { %7267 = vmatpush1.bf16.msra.mxu1 %v8772_v51  ;;  %v620_v41 = vld [vmem:[%s9632_s29 + $0xab8] sm:$0xff]  ;;  %v973_v36 = vld [vmem:[%s9632_s29 + $0x15c0] sm:$0xff] }
 0x220   : > { %7268 = vmatprep.subr.bf16.mxu1 %v8741_v53  ;;  %v1116_v15 = vld [vmem:[%s9632_s29 + $0x1a38] sm:$0xff]  ;;  %v8549_v59 = vcombine.high %v604_v40, %v620_v41  ;;  %v8548_v54 = vcombine.low %v604_v40, %v620_v41 }
 0x221   : > { %7226 = vmatpush1.bf16.msra.mxu0 %v8228_v60  ;;  %v1132_v45 = vld [vmem:[%s9632_s29 + $0x1ab8] sm:$0xff] }
 0x222   : > { %7227 = vmatprep.subr.bf16.mxu0 %v8709_v62  ;;  %v9061_v50 = vcombine.high %v1116_v15, %v1132_v45  ;;  %v572_v43 = vld [vmem:[%s9632_s29 + $0x938] sm:$0xff]  ;;  %v9060_v55 = vcombine.low %v1116_v15, %v1132_v45 }
 0x223   : > { %7269 = vmatpush1.bf16.msra.mxu1 %v8740_v61  ;;  %v588_v51 = vld [vmem:[%s9632_s29 + $0x9b8] sm:$0xff] }
 0x224   : > { %7270 = vmatprep.subr.bf16.mxu1 %v9221_v63  ;;  %v1084_v52 = vld [vmem:[%s9632_s29 + $0x1938] sm:$0xff]  ;;  %v8517_v57 = vcombine.high %v572_v43, %v588_v51  ;;  %v8516_v0 = vcombine.low %v572_v43, %v588_v51  ;;  %v925_v51 = vld [vmem:[%s9632_s29 + $0x1440] sm:$0xff] }
 0x225   : > { %7228 = vmatpush2.bf16.msra.mxu0 %v8708_v4  ;;  %v1100_v53 = vld [vmem:[%s9632_s29 + $0x19b8] sm:$0xff]  ;;  %v509_v4 = vld [vmem:[%s9632_s29 + $0x740] sm:$0xff] }
 0x226   : > { %7229 = vmatprep.subr.bf16.mxu0 %v8677_v7  ;;  %v9029_v58 = vcombine.high %v1084_v52, %v1100_v53  ;;  %v540_v60 = vld [vmem:[%s9632_s29 + $0x838] sm:$0xff]  ;;  %v9028_v1 = vcombine.low %v1084_v52, %v1100_v53  ;;  %v1021_v7 = vld [vmem:[%s9632_s29 + $0x1740] sm:$0xff] }
 0x227   : > { %7271 = vmatpush2.bf16.msra.mxu1 %v9220_v5  ;;  %v556_v61 = vld [vmem:[%s9632_s29 + $0x8b8] sm:$0xff]  ;;  %v525_v5 = vld [vmem:[%s9632_s29 + $0x7c0] sm:$0xff] }
 0x228   : > { %7272 = vmatprep.subr.bf16.mxu1 %v9189_v46  ;;  %v1052_v62 = vld [vmem:[%s9632_s29 + $0x1838] sm:$0xff]  ;;  %v8485_v3 = vcombine.high %v540_v60, %v556_v61  ;;  %v1037_v46 = vld [vmem:[%s9632_s29 + $0x17c0] sm:$0xff]  ;;  %v8484_v8 = vcombine.low %v540_v60, %v556_v61  ;;  %v8455_v11 = vcombine.high %v509_v4, %v525_v5  ;;  %v8454_v23 = vcombine.low %v509_v4, %v525_v5 }
 0x229   : > { %7230 = vmatpush2.bf16.msra.mxu0 %v8676_v13  ;;  %v1068_v63 = vld [vmem:[%s9632_s29 + $0x18b8] sm:$0xff]  ;;  %v8967_v13 = vcombine.high %v1021_v7, %v1037_v46  ;;  %v8966_v24 = vcombine.low %v1021_v7, %v1037_v46  ;;  %v941_v52 = vld [vmem:[%s9632_s29 + $0x14c0] sm:$0xff] }
 0x22a   : > { %7231 = vmatprep.subr.bf16.mxu0 %v8645_v16  ;;  %v8997_v29 = vcombine.high %v1052_v62, %v1068_v63  ;;  %v8996_v9 = vcombine.low %v1052_v62, %v1068_v63  ;;  %v493_v16 = vld [vmem:[%s9632_s29 + $0x6c0] sm:$0xff]  ;;  %v8870_v7 = vcombine.low %v925_v51, %v941_v52 }
 0x22b   : > { %7273 = vmatpush2.bf16.msra.mxu1 %v9188_v14  ;;  %v477_v14 = vld [vmem:[%s9632_s29 + $0x640] sm:$0xff] }
 0x22c   : > { %7274 = vmatprep.subr.bf16.mxu1 %v9157_v19  ;;  %v989_v19 = vld [vmem:[%s9632_s29 + $0x1640] sm:$0xff] }
 0x22d   : > { %7232 = vmatpush2.bf16.msra.mxu0 %v8644_v25  ;;  %v8423_v25 = vcombine.high %v477_v14, %v493_v16  ;;  %v8934_v40 = vcombine.low %v989_v19, %v1005_v20  ;;  %v381_v63 = vld [vmem:[%s9632_s29 + $0x340] sm:$0xff] }
 0x22e   : > { %7233 = vmatprep.subr.bf16.mxu0 %v8613_v30  ;;  %v8935_v30 = vcombine.high %v989_v19, %v1005_v20 }
 0x22f   : > { %7275 = vmatpush2.bf16.msra.mxu1 %v9156_v28  ;;  %v1348_v28 = vrot.slane %v10318_v10, %v9959_v32 }
 0x230   : > { %7276 = vmatprep.subr.bf16.mxu1 %v9125_v31  ;;  %v445_v31 = vld [vmem:[%s9632_s29 + $0x540] sm:$0xff] }
 0x231   : > { %7234 = vmatpush2.bf16.msra.mxu0 %v8612_v37  ;;  %v8391_v41 = vcombine.high %v445_v31, %v461_v33 }
 0x232   : > { %7235 = vmatprep.subr.bf16.mxu0 %v8581_v18  ;;  %v8422_v18 = vcombine.low %v477_v14, %v493_v16  ;;  %v877_v14 = vld [vmem:[%s9632_s29 + $0x12c0] sm:$0xff] }
 0x233   : > { %7277 = vmatpush2.bf16.msra.mxu1 %v9124_v38 }
 0x234   : > { %7278 = vmatprep.subr.bf16.mxu1 %v9093_v39 }
 0x235   : > { %7236 = vmatpush2.bf16.msra.mxu0 %v8580_v56 }
 0x236   : > { %7237 = vmatprep.subr.bf16.mxu0 %v8549_v59  ;;  %v413_v59 = vld [vmem:[%s9632_s29 + $0x440] sm:$0xff] }
 0x237   : > { %7279 = vmatpush2.bf16.msra.mxu1 %v9092_v47  ;;  %v8903_v47 = vcombine.high %v957_v35, %v973_v36 }
 0x238   : > { %7280 = vmatprep.subr.bf16.mxu1 %v9061_v50  ;;  %v429_v50 = vld [vmem:[%s9632_s29 + $0x4c0] sm:$0xff] }
 0x239   : > { %7238 = vmatpush2.bf16.msra.mxu0 %v8548_v54  ;;  %v8359_v60 = vcombine.high %v413_v59, %v429_v50  ;;  %v8358_v5 = vcombine.low %v413_v59, %v429_v50 }
 0x23a   : > { %7239 = vmatprep.subr.bf16.mxu0 %v8517_v57  ;;  %v8390_v57 = vcombine.low %v445_v31, %v461_v33 }
 0x23b   : > { %7281 = vmatpush2.bf16.msra.mxu1 %v9060_v55 }
 0x23c   : > { %7282 = vmatprep.subr.bf16.mxu1 %v9029_v58 }
 0x23d   : > { %7240 = vmatpush2.bf16.msra.mxu0 %v8516_v0  ;;  %v397_v0 = vld [vmem:[%s9632_s29 + $0x3c0] sm:$0xff] }
 0x23e   : > { %7241 = vmatprep.subr.bf16.mxu0 %v8485_v3  ;;  %v893_v3 = vld [vmem:[%s9632_s29 + $0x1340] sm:$0xff]  ;;  %v8327_v46 = vcombine.high %v381_v63, %v397_v0  ;;  %v8326_v16 = vcombine.low %v381_v63, %v397_v0 }
 0x23f   : > { %7283 = vmatpush2.bf16.msra.mxu1 %v9028_v1  ;;  %v1229_v63 = vld [vmem:[%s9632_s29 + $0x1dc0] sm:$0xff] }
 0x240   : > { %7284 = vmatprep.subr.bf16.mxu1 %v8997_v29  ;;  %v909_v29 = vld [vmem:[%s9632_s29 + $0x13c0] sm:$0xff] }
 0x241   : > { %7242 = vmatpush2.bf16.msra.mxu0 %v8484_v8  ;;  %v8839_v8 = vcombine.high %v893_v3, %v909_v29  ;;  %v8838_v19 = vcombine.low %v893_v3, %v909_v29 }
 0x242   : > { %7297 = vmatprep.subr.bf16.mxu0 %v8455_v11  ;;  %v365_v11 = vld [vmem:[%s9632_s29 + $0x2c0] sm:$0xff] }
 0x243   : > { %7285 = vmatpush2.bf16.msra.mxu1 %v8996_v9  ;;  %v349_v9 = vld [vmem:[%s9632_s29 + $0x240] sm:$0xff] }
 0x244   : > { %7340 = vmatprep.subr.bf16.mxu1 %v8967_v13  ;;  %v6987_v34 = vpop.f32.mrf.mxu0  ;;  %7244 = vmatmul.mubr.bf16.vlgmr.msra.gmra.mxu0 %v10244_v42  ;;  %v861_v13 = vld [vmem:[%s9632_s29 + $0x1240] sm:$0xff]  ;;  %v8295_v20 = vcombine.high %v349_v9, %v365_v11 }
 0x245   : > { %v6988_v37 = vadd.f32 %v6987_v34, %v1344_v21  ;;  %7298 = vmatpush1.bf16.msra.mxu0 %v8454_v23  ;;  %7329 = vmatprep.mubr.bf16.mxu0 %v10159_v49  ;;  %v8902_v49 = vcombine.low %v957_v35, %v973_v36  ;;  %v317_v23 = vld [vmem:[%s9632_s29 + $0x140] sm:$0xff]  ;;  %v8806_v31 = vcombine.low %v861_v13, %v877_v14 }
 0x246   : > { %v7030_v38 = vpop.f32.mrf.mxu1  ;;  %7287 = vmatmul.mubr.bf16.vlgmr.msra.gmra.mxu1 %v10252_v48  ;;  %v6989_v39 = vpop.f32.mrf.mxu0  ;;  %7299 = vmatprep.subr.bf16.mxu0 %v8423_v25  ;;  %v829_v25 = vld [vmem:[%s9632_s29 + $0x1140] sm:$0xff] }
 0x247   : > { %7341 = vmatpush1.bf16.msra.mxu1 %v8966_v24  ;;  %v7031_v15 = vadd.f32 %v7030_v38, %v6988_v37  ;;  %v6990_v45 = vadd.f32 %v6989_v39, %v1348_v28  ;;  %7372 = vmatprep.mubr.bf16.mxu1 %v10167_v17  ;;  %v8871_v17 = vcombine.high %v925_v51, %v941_v52  ;;  %v333_v24 = vld [vmem:[%s9632_s29 + $0x1c0] sm:$0xff] }
 0x248   : > { %v7032_v56 = vpop.f32.mrf.mxu1  ;;  %7342 = vmatprep.subr.bf16.mxu1 %v8935_v30  ;;  %v6991_v43 = vpop.f32.mrf.mxu0  ;;  %v8294_v30 = vcombine.low %v349_v9, %v365_v11  ;;  %v8263_v33 = vcombine.high %v317_v23, %v333_v24  ;;  %v285_v35 = vld [vmem:[%s9632_s29 + $0x40] sm:$0xff] }
 0x249   : > { %7993 = vst [vmem:[%s9994_s5 + $0x40] sm:$0xff] %v7031_v15  ;;  %v7033_v53 = vadd.f32 %v7032_v56, %v6990_v45  ;;  %v6992_v54 = vadd.f32 %v6991_v43, %v1344_v21  ;;  %7300 = vmatpush1.bf16.msra.mxu0 %v8422_v18  ;;  %v8807_v21 = vcombine.high %v861_v13, %v877_v14  ;;  %v301_v36 = vld [vmem:[%s9632_s29 + $0xc0] sm:$0xff] }
 0x24a   : > { %v7034_v55 = vpop.f32.mrf.mxu1  ;;  %v6993_v58 = vpop.f32.mrf.mxu0  ;;  %7301 = vmatprep.subr.bf16.mxu0 %v8391_v41  ;;  %v797_v37 = vld [vmem:[%s9632_s29 + $0x1040] sm:$0xff]  ;;  %v8262_v18 = vcombine.low %v317_v23, %v333_v24  ;;  %v8230_v59 = vcombine.low %v285_v35, %v301_v36 }
 0x24b   : > { %7343 = vmatpush1.bf16.msra.mxu1 %v8934_v40  ;;  %7994 = vst [vmem:[%s9994_s5 + $0x48] sm:$0xff] %v7033_v53  ;;  %v7035_v61 = vadd.f32 %v7034_v55, %v6992_v54  ;;  %v6994_v62 = vadd.f32 %v6993_v58, %v1348_v28  ;;  %v845_v28 = vld [vmem:[%s9632_s29 + $0x11c0] sm:$0xff]  ;;  %v8231_v40 = vcombine.high %v285_v35, %v301_v36 }
 0x24c   : > { %7344 = vmatprep.subr.bf16.mxu1 %v8903_v47  ;;  %v7036_v1 = vpop.f32.mrf.mxu1  ;;  %v8775_v34 = vcombine.high %v829_v25, %v845_v28  ;;  %v813_v38 = vld [vmem:[%s9632_s29 + $0x10c0] sm:$0xff]  ;;  %v8774_v39 = vcombine.low %v829_v25, %v845_v28 }
 0x24d   : > { %8025 = vst [vmem:[%s9994_s5 + $0x140] sm:$0xff] %v7035_v61  ;;  %v7037_v4 = vadd.f32 %v7036_v1, %v6994_v62  ;;  %7302 = vmatpush1.bf16.msra.mxu0 %v8390_v57  ;;  %v8743_v41 = vcombine.high %v797_v37, %v813_v38  ;;  %v765_v15 = vld [vmem:[%s9632_s29 + $0xf40] sm:$0xff]  ;;  %v8742_v50 = vcombine.low %v797_v37, %v813_v38 }
 0x24e   : > { %7303 = vmatprep.subr.bf16.mxu0 %v8359_v60  ;;  %v781_v45 = vld [vmem:[%s9632_s29 + $0xfc0] sm:$0xff] }
 0x24f   : > { %7345 = vmatpush1.bf16.msra.mxu1 %v8902_v49  ;;  %8026 = vst [vmem:[%s9994_s5 + $0x148] sm:$0xff] %v7037_v4  ;;  %v1277_v56 = vld [vmem:[%s9632_s29 + $0x1f40] sm:$0xff]  ;;  %v8711_v43 = vcombine.high %v765_v15, %v781_v45  ;;  %v8710_v57 = vcombine.low %v765_v15, %v781_v45 }
 0x250   : > { %7346 = vmatprep.subr.bf16.mxu1 %v8871_v17  ;;  %v1293_v47 = vld [vmem:[%s9632_s29 + $0x1fc0] sm:$0xff] }
 0x251   : > { %7304 = vmatpush1.bf16.msra.mxu0 %v8358_v5  ;;  %v9223_v51 = vcombine.high %v1277_v56, %v1293_v47  ;;  %v733_v52 = vld [vmem:[%s9632_s29 + $0xe40] sm:$0xff]  ;;  %v9222_v58 = vcombine.low %v1277_v56, %v1293_v47 }
 0x252   : > { %7305 = vmatprep.subr.bf16.mxu0 %v8327_v46  ;;  %v749_v53 = vld [vmem:[%s9632_s29 + $0xec0] sm:$0xff] }
 0x253   : > { %7347 = vmatpush1.bf16.msra.mxu1 %v8870_v7  ;;  %v1245_v54 = vld [vmem:[%s9632_s29 + $0x1e40] sm:$0xff]  ;;  %v8679_v49 = vcombine.high %v733_v52, %v749_v53  ;;  %v8678_v0 = vcombine.low %v733_v52, %v749_v53 }
 0x254   : > { %7348 = vmatprep.subr.bf16.mxu1 %v8839_v8  ;;  %v1261_v55 = vld [vmem:[%s9632_s29 + $0x1ec0] sm:$0xff] }
 0x255   : > { %7306 = vmatpush1.bf16.msra.mxu0 %v8326_v16  ;;  %v9191_v60 = vcombine.high %v1245_v54, %v1261_v55  ;;  %v701_v61 = vld [vmem:[%s9632_s29 + $0xd40] sm:$0xff]  ;;  %v9190_v1 = vcombine.low %v1245_v54, %v1261_v55  ;;  %v510_v55 = vld [vmem:[%s9632_s29 + $0x748] sm:$0xff] }
 0x256   : > { %7307 = vmatprep.subr.bf16.mxu0 %v8295_v20  ;;  %v717_v62 = vld [vmem:[%s9632_s29 + $0xdc0] sm:$0xff] }
 0x257   : > { %7349 = vmatpush1.bf16.msra.mxu1 %v8838_v19  ;;  %v1213_v17 = vld [vmem:[%s9632_s29 + $0x1d40] sm:$0xff]  ;;  %v8647_v3 = vcombine.high %v701_v61, %v717_v62  ;;  %v8646_v8 = vcombine.low %v701_v61, %v717_v62 }
 0x258   : > { %7350 = vmatprep.subr.bf16.mxu1 %v8807_v21  ;;  %v9159_v29 = vcombine.high %v1213_v17, %v1229_v63  ;;  %v669_v4 = vld [vmem:[%s9632_s29 + $0xc40] sm:$0xff]  ;;  %v9158_v9 = vcombine.low %v1213_v17, %v1229_v63  ;;  %v478_v63 = vld [vmem:[%s9632_s29 + $0x648] sm:$0xff] }
 0x259   : > { %7308 = vmatpush1.bf16.msra.mxu0 %v8294_v30  ;;  %v685_v5 = vld [vmem:[%s9632_s29 + $0xcc0] sm:$0xff] }
 0x25a   : > { %7309 = vmatprep.subr.bf16.mxu0 %v8263_v33  ;;  %v1181_v7 = vld [vmem:[%s9632_s29 + $0x1c40] sm:$0xff]  ;;  %v8615_v11 = vcombine.high %v669_v4, %v685_v5  ;;  %v8614_v21 = vcombine.low %v669_v4, %v685_v5 }
 0x25b   : > { %7351 = vmatpush1.bf16.msra.mxu1 %v8806_v31  ;;  %v1197_v46 = vld [vmem:[%s9632_s29 + $0x1cc0] sm:$0xff] }
 0x25c   : > { %7352 = vmatprep.subr.bf16.mxu1 %v8775_v34  ;;  %v9127_v13 = vcombine.high %v1181_v7, %v1197_v46  ;;  %v637_v14 = vld [vmem:[%s9632_s29 + $0xb40] sm:$0xff]  ;;  %v9126_v23 = vcombine.low %v1181_v7, %v1197_v46  ;;  %v1356_v46 = vrot.slane %v10318_v10, %v10056_v6 }
 0x25d   : > { %7310 = vmatpush1.bf16.msra.mxu0 %v8262_v18  ;;  %v653_v16 = vld [vmem:[%s9632_s29 + $0xbc0] sm:$0xff] }
 0x25e   : > { %7311 = vmatprep.subr.bf16.mxu0 %v8231_v40  ;;  %v1149_v19 = vld [vmem:[%s9632_s29 + $0x1b40] sm:$0xff]  ;;  %v8583_v24 = vcombine.high %v637_v14, %v653_v16  ;;  %v8582_v34 = vcombine.low %v637_v14, %v653_v16  ;;  %v958_v14 = vld [vmem:[%s9632_s29 + $0x1548] sm:$0xff] }
 0x25f   : > { %7353 = vmatpush1.bf16.msra.mxu1 %v8774_v39  ;;  %v1165_v20 = vld [vmem:[%s9632_s29 + $0x1bc0] sm:$0xff]  ;;  %v974_v16 = vld [vmem:[%s9632_s29 + $0x15c8] sm:$0xff] }
 0x260   : > { %7354 = vmatprep.subr.bf16.mxu1 %v8743_v41  ;;  %v9095_v25 = vcombine.high %v1149_v19, %v1165_v20  ;;  %v605_v28 = vld [vmem:[%s9632_s29 + $0xa40] sm:$0xff]  ;;  %v9094_v35 = vcombine.low %v1149_v19, %v1165_v20 }
 0x261   : > { %7312 = vmatpush1.bf16.msra.mxu0 %v8230_v59  ;;  %v621_v30 = vld [vmem:[%s9632_s29 + $0xac0] sm:$0xff] }
 0x262   : > { %7313 = vmatprep.subr.bf16.mxu0 %v8711_v43  ;;  %v1117_v31 = vld [vmem:[%s9632_s29 + $0x1a40] sm:$0xff]  ;;  %v8551_v36 = vcombine.high %v605_v28, %v621_v30  ;;  %v8550_v41 = vcombine.low %v605_v28, %v621_v30 }
 0x263   : > { %7355 = vmatpush1.bf16.msra.mxu1 %v8742_v50  ;;  %v1133_v33 = vld [vmem:[%s9632_s29 + $0x1ac0] sm:$0xff] }
 0x264   : > { %7356 = vmatprep.subr.bf16.mxu1 %v9223_v51  ;;  %v9063_v37 = vcombine.high %v1117_v31, %v1133_v33  ;;  %v573_v38 = vld [vmem:[%s9632_s29 + $0x940] sm:$0xff]  ;;  %v9062_v15 = vcombine.low %v1117_v31, %v1133_v33  ;;  %v8905_v31 = vcombine.high %v958_v14, %v974_v16  ;;  %v414_v33 = vld [vmem:[%s9632_s29 + $0x448] sm:$0xff] }
 0x265   : > { %7314 = vmatpush2.bf16.msra.mxu0 %v8710_v57  ;;  %v589_v18 = vld [vmem:[%s9632_s29 + $0x9c0] sm:$0xff]  ;;  %v526_v57 = vld [vmem:[%s9632_s29 + $0x7c8] sm:$0xff] }
 0x266   : > { %7315 = vmatprep.subr.bf16.mxu0 %v8679_v49  ;;  %v1085_v39 = vld [vmem:[%s9632_s29 + $0x1940] sm:$0xff]  ;;  %v8519_v45 = vcombine.high %v573_v38, %v589_v18  ;;  %v8518_v51 = vcombine.low %v573_v38, %v589_v18  ;;  %v1038_v49 = vld [vmem:[%s9632_s29 + $0x17c8] sm:$0xff]  ;;  %v8457_v62 = vcombine.high %v510_v55, %v526_v57  ;;  %v8456_v4 = vcombine.low %v510_v55, %v526_v57 }
 0x267   : > { %7357 = vmatpush2.bf16.msra.mxu1 %v9222_v58  ;;  %v1101_v40 = vld [vmem:[%s9632_s29 + $0x19c0] sm:$0xff]  ;;  %v1022_v58 = vld [vmem:[%s9632_s29 + $0x1748] sm:$0xff] }
 0x268   : > { %7358 = vmatprep.subr.bf16.mxu1 %v9191_v60  ;;  %v9031_v56 = vcombine.high %v1085_v39, %v1101_v40  ;;  %v541_v47 = vld [vmem:[%s9632_s29 + $0x840] sm:$0xff]  ;;  %v9030_v52 = vcombine.low %v1085_v39, %v1101_v40  ;;  %v8969_v17 = vcombine.high %v1022_v58, %v1038_v49  ;;  %v8968_v5 = vcombine.low %v1022_v58, %v1038_v49  ;;  %v10423_v38 = vld [vmem:[%s11082_s0 + $0xc] ss:$16 sps:$4 sm:$0xff]  }
 0x269   : > { %7316 = vmatpush2.bf16.msra.mxu0 %v8678_v0  ;;  %v557_v59 = vld [vmem:[%s9632_s29 + $0x8c0] sm:$0xff]  ;;  %v494_v0 = vld [vmem:[%s9632_s29 + $0x6c8] sm:$0xff] }
 0x26a   : > { %7317 = vmatprep.subr.bf16.mxu0 %v8647_v3  ;;  %v1053_v50 = vld [vmem:[%s9632_s29 + $0x1840] sm:$0xff]  ;;  %v8487_v53 = vcombine.high %v541_v47, %v557_v59  ;;  %v8486_v60 = vcombine.low %v541_v47, %v557_v59  ;;  %v1006_v3 = vld [vmem:[%s9632_s29 + $0x16c8] sm:$0xff]  ;;  %v8425_v7 = vcombine.high %v478_v63, %v494_v0 }
 0x26b   : > { %7359 = vmatpush2.bf16.msra.mxu1 %v9190_v1  ;;  %v1069_v43 = vld [vmem:[%s9632_s29 + $0x18c0] sm:$0xff]  ;;  %v990_v1 = vld [vmem:[%s9632_s29 + $0x1648] sm:$0xff] }
 0x26c   : > { %7360 = vmatprep.subr.bf16.mxu1 %v9159_v29  ;;  %v8999_v54 = vcombine.high %v1053_v50, %v1069_v43  ;;  %v8998_v61 = vcombine.low %v1053_v50, %v1069_v43  ;;  %v1352_v29 = vrot.slane %v10318_v10, %v10053_v2  ;;  %v382_v43 = vld [vmem:[%s9632_s29 + $0x348] sm:$0xff] }
 0x26d   : > { %7318 = vmatpush2.bf16.msra.mxu0 %v8646_v8  ;;  %v8937_v8 = vcombine.high %v990_v1, %v1006_v3 }
 0x26e   : > { %7319 = vmatprep.subr.bf16.mxu0 %v8615_v11  ;;  %v462_v11 = vld [vmem:[%s9632_s29 + $0x5c8] sm:$0xff] }
 0x26f   : > { %7361 = vmatpush2.bf16.msra.mxu1 %v9158_v9  ;;  %v446_v9 = vld [vmem:[%s9632_s29 + $0x548] sm:$0xff] }
 0x270   : > { %7362 = vmatprep.subr.bf16.mxu1 %v9127_v13 }
 0x271   : > { %7320 = vmatpush2.bf16.msra.mxu0 %v8614_v21  ;;  %v8424_v21 = vcombine.low %v478_v63, %v494_v0  ;;  %v878_v63 = vld [vmem:[%s9632_s29 + $0x12c8] sm:$0xff] }
 0x272   : > { %7321 = vmatprep.subr.bf16.mxu0 %v8583_v24  ;;  %v8936_v24 = vcombine.low %v990_v1, %v1006_v3 }
 0x273   : > { %7363 = vmatpush2.bf16.msra.mxu1 %v9126_v23 }
 0x274   : > { %7364 = vmatprep.subr.bf16.mxu1 %v9095_v25  ;;  %v8393_v25 = vcombine.high %v446_v9, %v462_v11 }
 0x275   : > { %7322 = vmatpush2.bf16.msra.mxu0 %v8582_v34  ;;  %v430_v34 = vld [vmem:[%s9632_s29 + $0x4c8] sm:$0xff] }
 0x276   : > { %7323 = vmatprep.subr.bf16.mxu0 %v8551_v36  ;;  %v926_v36 = vld [vmem:[%s9632_s29 + $0x1448] sm:$0xff]  ;;  %v8360_v57 = vcombine.low %v414_v33, %v430_v34 }
 0x277   : > { %7365 = vmatpush2.bf16.msra.mxu1 %v9094_v35 }
 0x278   : > { %7366 = vmatprep.subr.bf16.mxu1 %v9063_v37  ;;  %v942_v37 = vld [vmem:[%s9632_s29 + $0x14c8] sm:$0xff] }
 0x279   : > { %7324 = vmatpush2.bf16.msra.mxu0 %v8550_v41  ;;  %v8392_v41 = vcombine.low %v446_v9, %v462_v11  ;;  %v8873_v50 = vcombine.high %v926_v36, %v942_v37  ;;  %v8872_v58 = vcombine.low %v926_v36, %v942_v37  ;;  %v734_v37 = vld [vmem:[%s9632_s29 + $0xe48] sm:$0xff] }
 0x27a   : > { %7325 = vmatprep.subr.bf16.mxu0 %v8519_v45  ;;  %v8904_v45 = vcombine.low %v958_v14, %v974_v16  ;;  %v286_v14 = vld [vmem:[%s9632_s29 + $0x48] sm:$0xff] }
 0x27b   : > { %7367 = vmatpush2.bf16.msra.mxu1 %v9062_v15  ;;  %v302_v16 = vld [vmem:[%s9632_s29 + $0xc8] sm:$0xff] }
 0x27c   : > { %7368 = vmatprep.subr.bf16.mxu1 %v9031_v56  ;;  %v8361_v56 = vcombine.high %v414_v33, %v430_v34  ;;  %v8232_v33 = vcombine.low %v286_v14, %v302_v16 }
 0x27d   : > { %7326 = vmatpush2.bf16.msra.mxu0 %v8518_v51  ;;  %v398_v51 = vld [vmem:[%s9632_s29 + $0x3c8] sm:$0xff] }
 0x27e   : > { %7327 = vmatprep.subr.bf16.mxu0 %v8487_v53  ;;  %v894_v53 = vld [vmem:[%s9632_s29 + $0x1348] sm:$0xff]  ;;  %v8329_v49 = vcombine.high %v382_v43, %v398_v51  ;;  %v8328_v0 = vcombine.low %v382_v43, %v398_v51 }
 0x27f   : > { %7369 = vmatpush2.bf16.msra.mxu1 %v9030_v52  ;;  %v1230_v43 = vld [vmem:[%s9632_s29 + $0x1dc8] sm:$0xff] }
 0x280   : > { %7370 = vmatprep.subr.bf16.mxu1 %v8999_v54  ;;  %v910_v54 = vld [vmem:[%s9632_s29 + $0x13c8] sm:$0xff] }
 0x281   : > { %7328 = vmatpush2.bf16.msra.mxu0 %v8486_v60  ;;  %v8841_v60 = vcombine.high %v894_v53, %v910_v54  ;;  %v8840_v1 = vcombine.low %v894_v53, %v910_v54 }
 0x282   : > { %7383 = vmatprep.subr.bf16.mxu0 %v8457_v62  ;;  %v366_v62 = vld [vmem:[%s9632_s29 + $0x2c8] sm:$0xff] }
 0x283   : > { %7371 = vmatpush2.bf16.msra.mxu1 %v8998_v61  ;;  %v350_v61 = vld [vmem:[%s9632_s29 + $0x248] sm:$0xff] }
 0x284   : > { %7426 = vmatprep.subr.bf16.mxu1 %v8969_v17  ;;  %v7073_v13 = vpop.f32.mrf.mxu0  ;;  %7330 = vmatmul.mubr.bf16.vlgmr.msra.gmra.mxu0 %v10244_v42  ;;  %v862_v17 = vld [vmem:[%s9632_s29 + $0x1248] sm:$0xff]  ;;  %v8297_v3 = vcombine.high %v350_v61, %v366_v62 }
 0x285   : > { %v7074_v19 = vadd.f32 %v7073_v13, %v1352_v29  ;;  %7384 = vmatpush1.bf16.msra.mxu0 %v8456_v4  ;;  %v318_v4 = vld [vmem:[%s9632_s29 + $0x148] sm:$0xff]  ;;  %v8808_v9 = vcombine.low %v862_v17, %v878_v63 }
 0x286   : > { %v7116_v20 = vpop.f32.mrf.mxu1  ;;  %7373 = vmatmul.mubr.bf16.vlgmr.msra.gmra.mxu1 %v10252_v48  ;;  %v7075_v23 = vpop.f32.mrf.mxu0  ;;  %7385 = vmatprep.subr.bf16.mxu0 %v8425_v7  ;;  %v10415_v48 = vld [vmem:[%s11082_s0 + $0x4] ss:$16 sps:$4 sm:$0xff]   ;;  %v830_v7 = vld [vmem:[%s9632_s29 + $0x1148] sm:$0xff] }
 0x287   : > { %7427 = vmatpush1.bf16.msra.mxu1 %v8968_v5  ;;  %v7117_v28 = vadd.f32 %v7116_v20, %v7074_v19  ;;  %v7076_v42 = vadd.f32 %v7075_v23, %v1356_v46  ;;  %7415 = vmatprep.mubr.bf16.mxu0 %v10415_v48  ;;  %v334_v5 = vld [vmem:[%s9632_s29 + $0x1c8] sm:$0xff] }
 0x288   : > { %v7118_v30 = vpop.f32.mrf.mxu1  ;;  %7428 = vmatprep.subr.bf16.mxu1 %v8937_v8  ;;  %v7077_v35 = vpop.f32.mrf.mxu0  ;;  %7458 = vmatprep.mubr.bf16.mxu1 %v10423_v38  ;;  %v8296_v8 = vcombine.low %v350_v61, %v366_v62  ;;  %v8265_v11 = vcombine.high %v318_v4, %v334_v5  ;;  %v798_v19 = vld [vmem:[%s9632_s29 + $0x1048] sm:$0xff] }
 0x289   : > { %7995 = vst [vmem:[%s9994_s5 + $0x50] sm:$0xff] %v7117_v28  ;;  %v7119_v18 = vadd.f32 %v7118_v30, %v7076_v42  ;;  %v7078_v39 = vadd.f32 %v7077_v35, %v1352_v29  ;;  %7386 = vmatpush1.bf16.msra.mxu0 %v8424_v21  ;;  %v8809_v29 = vcombine.high %v862_v17, %v878_v63  ;;  %v814_v20 = vld [vmem:[%s9632_s29 + $0x10c8] sm:$0xff] }
 0x28a   : > { %v7120_v40 = vpop.f32.mrf.mxu1  ;;  %v7079_v15 = vpop.f32.mrf.mxu0  ;;  %7387 = vmatprep.subr.bf16.mxu0 %v8393_v25  ;;  %v8264_v21 = vcombine.low %v318_v4, %v334_v5  ;;  %v8745_v25 = vcombine.high %v798_v19, %v814_v20  ;;  %v766_v28 = vld [vmem:[%s9632_s29 + $0xf48] sm:$0xff]  ;;  %v8744_v34 = vcombine.low %v798_v19, %v814_v20 }
 0x28b   : > { %7429 = vmatpush1.bf16.msra.mxu1 %v8936_v24  ;;  %7996 = vst [vmem:[%s9994_s5 + $0x58] sm:$0xff] %v7119_v18  ;;  %v7121_v47 = vadd.f32 %v7120_v40, %v7078_v39  ;;  %v7080_v59 = vadd.f32 %v7079_v15, %v1356_v46  ;;  %v846_v46 = vld [vmem:[%s9632_s29 + $0x11c8] sm:$0xff]  ;;  %v8233_v24 = vcombine.high %v286_v14, %v302_v16 }
 0x28c   : > { %7430 = vmatprep.subr.bf16.mxu1 %v8905_v31  ;;  %v7122_v52 = vpop.f32.mrf.mxu1  ;;  %v8777_v13 = vcombine.high %v830_v7, %v846_v46  ;;  %v8776_v23 = vcombine.low %v830_v7, %v846_v46  ;;  %v782_v42 = vld [vmem:[%s9632_s29 + $0xfc8] sm:$0xff] }
 0x28d   : > { %8027 = vst [vmem:[%s9994_s5 + $0x150] sm:$0xff] %v7121_v47  ;;  %v7123_v55 = vadd.f32 %v7122_v52, %v7080_v59  ;;  %7388 = vmatpush1.bf16.msra.mxu0 %v8392_v41  ;;  %v1278_v30 = vld [vmem:[%s9632_s29 + $0x1f48] sm:$0xff]  ;;  %v8713_v35 = vcombine.high %v766_v28, %v782_v42  ;;  %v8712_v41 = vcombine.low %v766_v28, %v782_v42 }
 0x28e   : > { %7389 = vmatprep.subr.bf16.mxu0 %v8361_v56  ;;  %v1294_v31 = vld [vmem:[%s9632_s29 + $0x1fc8] sm:$0xff] }
 0x28f   : > { %7431 = vmatpush1.bf16.msra.mxu1 %v8904_v45  ;;  %8028 = vst [vmem:[%s9994_s5 + $0x158] sm:$0xff] %v7123_v55  ;;  %v9225_v36 = vcombine.high %v1278_v30, %v1294_v31  ;;  %v750_v18 = vld [vmem:[%s9632_s29 + $0xec8] sm:$0xff]  ;;  %v9224_v15 = vcombine.low %v1278_v30, %v1294_v31 }
 0x290   : > { %7432 = vmatprep.subr.bf16.mxu1 %v8873_v50  ;;  %v1246_v39 = vld [vmem:[%s9632_s29 + $0x1e48] sm:$0xff]  ;;  %v8681_v45 = vcombine.high %v734_v37, %v750_v18  ;;  %v8680_v51 = vcombine.low %v734_v37, %v750_v18 }
 0x291   : > { %7390 = vmatpush1.bf16.msra.mxu0 %v8360_v57  ;;  %v1262_v40 = vld [vmem:[%s9632_s29 + $0x1ec8] sm:$0xff] }
 0x292   : > { %7391 = vmatprep.subr.bf16.mxu0 %v8329_v49  ;;  %v9193_v56 = vcombine.high %v1246_v39, %v1262_v40  ;;  %v702_v47 = vld [vmem:[%s9632_s29 + $0xd48] sm:$0xff]  ;;  %v9192_v52 = vcombine.low %v1246_v39, %v1262_v40  ;;  %v511_v40 = vld [vmem:[%s9632_s29 + $0x750] sm:$0xff] }
 0x293   : > { %7433 = vmatpush1.bf16.msra.mxu1 %v8872_v58  ;;  %v718_v59 = vld [vmem:[%s9632_s29 + $0xdc8] sm:$0xff] }
 0x294   : > { %7434 = vmatprep.subr.bf16.mxu1 %v8841_v60  ;;  %v1214_v50 = vld [vmem:[%s9632_s29 + $0x1d48] sm:$0xff]  ;;  %v8649_v53 = vcombine.high %v702_v47, %v718_v59  ;;  %v8648_v60 = vcombine.low %v702_v47, %v718_v59 }
 0x295   : > { %7392 = vmatpush1.bf16.msra.mxu0 %v8328_v0  ;;  %v9161_v54 = vcombine.high %v1214_v50, %v1230_v43  ;;  %v670_v55 = vld [vmem:[%s9632_s29 + $0xc48] sm:$0xff]  ;;  %v9160_v61 = vcombine.low %v1214_v50, %v1230_v43  ;;  %v479_v43 = vld [vmem:[%s9632_s29 + $0x650] sm:$0xff] }
 0x296   : > { %7393 = vmatprep.subr.bf16.mxu0 %v8297_v3  ;;  %v686_v57 = vld [vmem:[%s9632_s29 + $0xcc8] sm:$0xff] }
 0x297   : > { %7435 = vmatpush1.bf16.msra.mxu1 %v8840_v1  ;;  %v1182_v58 = vld [vmem:[%s9632_s29 + $0x1c48] sm:$0xff]  ;;  %v8617_v62 = vcombine.high %v670_v55, %v686_v57 }
 0x298   : > { %7436 = vmatprep.subr.bf16.mxu1 %v8809_v29  ;;  %v1198_v49 = vld [vmem:[%s9632_s29 + $0x1cc8] sm:$0xff]  ;;  %v8616_v29 = vcombine.low %v670_v55, %v686_v57 }
 0x299   : > { %7394 = vmatpush1.bf16.msra.mxu0 %v8296_v8  ;;  %v9129_v17 = vcombine.high %v1182_v58, %v1198_v49  ;;  %v638_v63 = vld [vmem:[%s9632_s29 + $0xb48] sm:$0xff]  ;;  %v9128_v4 = vcombine.low %v1182_v58, %v1198_v49  ;;  %v1364_v49 = vrot.slane %v10318_v10, %v10138_v12 }
 0x29a   : > { %7395 = vmatprep.subr.bf16.mxu0 %v8265_v11  ;;  %v654_v0 = vld [vmem:[%s9632_s29 + $0xbc8] sm:$0xff] }
 0x29b   : > { %7437 = vmatpush1.bf16.msra.mxu1 %v8808_v9  ;;  %v1150_v1 = vld [vmem:[%s9632_s29 + $0x1b48] sm:$0xff]  ;;  %v8585_v5 = vcombine.high %v638_v63, %v654_v0 }
 0x29c   : > { %7438 = vmatprep.subr.bf16.mxu1 %v8777_v13  ;;  %v1166_v3 = vld [vmem:[%s9632_s29 + $0x1bc8] sm:$0xff]  ;;  %v8584_v13 = vcombine.low %v638_v63, %v654_v0  ;;  %v10495_v63 = vld [vmem:[%s11082_s0] ss:$16 sps:$4 sm:$0xff]  }
 0x29d   : > { %7396 = vmatpush1.bf16.msra.mxu0 %v8264_v21  ;;  %v9097_v7 = vcombine.high %v1150_v1, %v1166_v3  ;;  %v606_v46 = vld [vmem:[%s9632_s29 + $0xa48] sm:$0xff]  ;;  %v9096_v14 = vcombine.low %v1150_v1, %v1166_v3  ;;  %v959_v0 = vld [vmem:[%s9632_s29 + $0x1550] sm:$0xff] }
 0x29e   : > { %7397 = vmatprep.subr.bf16.mxu0 %v8233_v24  ;;  %v622_v8 = vld [vmem:[%s9632_s29 + $0xac8] sm:$0xff]  ;;  %v975_v1 = vld [vmem:[%s9632_s29 + $0x15d0] sm:$0xff] }
 0x29f   : > { %7439 = vmatpush1.bf16.msra.mxu1 %v8776_v23  ;;  %v1118_v9 = vld [vmem:[%s9632_s29 + $0x1a48] sm:$0xff]  ;;  %v8553_v16 = vcombine.high %v606_v46, %v622_v8 }
 0x2a0   : > { %7440 = vmatprep.subr.bf16.mxu1 %v8745_v25  ;;  %v1134_v11 = vld [vmem:[%s9632_s29 + $0x1ac8] sm:$0xff]  ;;  %v8552_v25 = vcombine.low %v606_v46, %v622_v8 }
 0x2a1   : > { %7398 = vmatpush1.bf16.msra.mxu0 %v8232_v33  ;;  %v9065_v19 = vcombine.high %v1118_v9, %v1134_v11  ;;  %v574_v20 = vld [vmem:[%s9632_s29 + $0x948] sm:$0xff]  ;;  %v9064_v28 = vcombine.low %v1118_v9, %v1134_v11 }
 0x2a2   : > { %7399 = vmatprep.subr.bf16.mxu0 %v8713_v35  ;;  %v590_v21 = vld [vmem:[%s9632_s29 + $0x9c8] sm:$0xff] }
 0x2a3   : > { %7441 = vmatpush1.bf16.msra.mxu1 %v8744_v34  ;;  %v1086_v23 = vld [vmem:[%s9632_s29 + $0x1948] sm:$0xff]  ;;  %v8521_v42 = vcombine.high %v574_v20, %v590_v21 }
 0x2a4   : > { %7442 = vmatprep.subr.bf16.mxu1 %v9225_v36  ;;  %v1102_v24 = vld [vmem:[%s9632_s29 + $0x19c8] sm:$0xff]  ;;  %v8520_v36 = vcombine.low %v574_v20, %v590_v21  ;;  %v927_v20 = vld [vmem:[%s9632_s29 + $0x1450] sm:$0xff] }
 0x2a5   : > { %7400 = vmatpush2.bf16.msra.mxu0 %v8712_v41  ;;  %v9033_v30 = vcombine.high %v1086_v23, %v1102_v24  ;;  %v542_v31 = vld [vmem:[%s9632_s29 + $0x848] sm:$0xff]  ;;  %v9032_v37 = vcombine.low %v1086_v23, %v1102_v24  ;;  %v527_v41 = vld [vmem:[%s9632_s29 + $0x7d0] sm:$0xff] }
 0x2a6   : > { %7401 = vmatprep.subr.bf16.mxu0 %v8681_v45  ;;  %v558_v33 = vld [vmem:[%s9632_s29 + $0x8c8] sm:$0xff]  ;;  %v1039_v45 = vld [vmem:[%s9632_s29 + $0x17d0] sm:$0xff]  ;;  %v8459_v59 = vcombine.high %v511_v40, %v527_v41  ;;  %v8458_v55 = vcombine.low %v511_v40, %v527_v41 }
 0x2a7   : > { %7443 = vmatpush2.bf16.msra.mxu1 %v9224_v15  ;;  %v1054_v34 = vld [vmem:[%s9632_s29 + $0x1848] sm:$0xff]  ;;  %v8489_v18 = vcombine.high %v542_v31, %v558_v33  ;;  %v1023_v15 = vld [vmem:[%s9632_s29 + $0x1750] sm:$0xff] }
 0x2a8   : > { %7444 = vmatprep.subr.bf16.mxu1 %v9193_v56  ;;  %v1070_v35 = vld [vmem:[%s9632_s29 + $0x18c8] sm:$0xff]  ;;  %v8488_v56 = vcombine.low %v542_v31, %v558_v33  ;;  %v8971_v50 = vcombine.high %v1023_v15, %v1039_v45  ;;  %v8970_v57 = vcombine.low %v1023_v15, %v1039_v45  ;;  %v943_v21 = vld [vmem:[%s9632_s29 + $0x14d0] sm:$0xff] }
 0x2a9   : > { %7402 = vmatpush2.bf16.msra.mxu0 %v8680_v51  ;;  %v9001_v39 = vcombine.high %v1054_v34, %v1070_v35  ;;  %v9000_v47 = vcombine.low %v1054_v34, %v1070_v35  ;;  %v495_v51 = vld [vmem:[%s9632_s29 + $0x6d0] sm:$0xff]  ;;  %v8875_v35 = vcombine.high %v927_v20, %v943_v21  ;;  %v8874_v45 = vcombine.low %v927_v20, %v943_v21 }
 0x2aa   : > { %7403 = vmatprep.subr.bf16.mxu0 %v8649_v53  ;;  %v1007_v53 = vld [vmem:[%s9632_s29 + $0x16d0] sm:$0xff]  ;;  %v8427_v58 = vcombine.high %v479_v43, %v495_v51 }
 0x2ab   : > { %7445 = vmatpush2.bf16.msra.mxu1 %v9192_v52  ;;  %v991_v52 = vld [vmem:[%s9632_s29 + $0x1650] sm:$0xff] }
 0x2ac   : > { %7446 = vmatprep.subr.bf16.mxu1 %v9161_v54  ;;  %v1360_v54 = vrot.slane %v10318_v10, %v10135_v44  ;;  %v10503_v10 = vld [vmem:[%s11082_s0 + $0x8] ss:$16 sps:$4 sm:$0xff]   ;;  %v911_v40 = vld [vmem:[%s9632_s29 + $0x13d0] sm:$0xff] }
 0x2ad   : > { %7404 = vmatpush2.bf16.msra.mxu0 %v8648_v60  ;;  %v8939_v60 = vcombine.high %v991_v52, %v1007_v53 }
 0x2ae   : > { %7405 = vmatprep.subr.bf16.mxu0 %v8617_v62  ;;  %v463_v62 = vld [vmem:[%s9632_s29 + $0x5d0] sm:$0xff] }
 0x2af   : > { %7447 = vmatpush2.bf16.msra.mxu1 %v9160_v61  ;;  %v447_v61 = vld [vmem:[%s9632_s29 + $0x550] sm:$0xff] }
 0x2b0   : > { %7448 = vmatprep.subr.bf16.mxu1 %v9129_v17  ;;  %v8395_v46 = vcombine.high %v447_v61, %v463_v62 }
 0x2b1   : > { %7406 = vmatpush2.bf16.msra.mxu0 %v8616_v29 }
 0x2b2   : > { %7407 = vmatprep.subr.bf16.mxu0 %v8585_v5 }
 0x2b3   : > { %7449 = vmatpush2.bf16.msra.mxu1 %v9128_v4  ;;  %v8426_v4 = vcombine.low %v479_v43, %v495_v51  ;;  %v863_v43 = vld [vmem:[%s9632_s29 + $0x1250] sm:$0xff] }
 0x2b4   : > { %7450 = vmatprep.subr.bf16.mxu1 %v9097_v7  ;;  %v8938_v7 = vcombine.low %v991_v52, %v1007_v53  ;;  %v879_v51 = vld [vmem:[%s9632_s29 + $0x12d0] sm:$0xff] }
 0x2b5   : > { %7408 = vmatpush2.bf16.msra.mxu0 %v8584_v13  ;;  %v8907_v13 = vcombine.high %v959_v0, %v975_v1 }
 0x2b6   : > { %7409 = vmatprep.subr.bf16.mxu0 %v8553_v16  ;;  %v431_v16 = vld [vmem:[%s9632_s29 + $0x4d0] sm:$0xff] }
 0x2b7   : > { %7451 = vmatpush2.bf16.msra.mxu1 %v9096_v14  ;;  %v415_v14 = vld [vmem:[%s9632_s29 + $0x450] sm:$0xff] }
 0x2b8   : > { %7452 = vmatprep.subr.bf16.mxu1 %v9065_v19  ;;  %v8363_v31 = vcombine.high %v415_v14, %v431_v16  ;;  %v8362_v15 = vcombine.low %v415_v14, %v431_v16  ;;  %v1295_v14 = vld [vmem:[%s9632_s29 + $0x1fd0] sm:$0xff] }
 0x2b9   : > { %7410 = vmatpush2.bf16.msra.mxu0 %v8552_v25 }
 0x2ba   : > { %7411 = vmatprep.subr.bf16.mxu0 %v8521_v42 }
 0x2bb   : > { %7453 = vmatpush2.bf16.msra.mxu1 %v9064_v28  ;;  %v8394_v28 = vcombine.low %v447_v61, %v463_v62  ;;  %v8810_v62 = vcombine.low %v863_v43, %v879_v51 }
 0x2bc   : > { %7454 = vmatprep.subr.bf16.mxu1 %v9033_v30  ;;  %v8906_v30 = vcombine.low %v959_v0, %v975_v1  ;;  %v287_v1 = vld [vmem:[%s9632_s29 + $0x50] sm:$0xff] }
 0x2bd   : > { %7412 = vmatpush2.bf16.msra.mxu0 %v8520_v36  ;;  %v383_v36 = vld [vmem:[%s9632_s29 + $0x350] sm:$0xff] }
 0x2be   : > { %7413 = vmatprep.subr.bf16.mxu0 %v8489_v18 }
 0x2bf   : > { %7455 = vmatpush2.bf16.msra.mxu1 %v9032_v37  ;;  %v399_v37 = vld [vmem:[%s9632_s29 + $0x3d0] sm:$0xff] }
 0x2c0   : > { %7456 = vmatprep.subr.bf16.mxu1 %v9001_v39  ;;  %v895_v39 = vld [vmem:[%s9632_s29 + $0x1350] sm:$0xff]  ;;  %v8330_v52 = vcombine.low %v383_v36, %v399_v37 }
 0x2c1   : > { %7414 = vmatpush2.bf16.msra.mxu0 %v8488_v56  ;;  %v8331_v56 = vcombine.high %v383_v36, %v399_v37  ;;  %v8842_v53 = vcombine.low %v895_v39, %v911_v40  ;;  %v1215_v36 = vld [vmem:[%s9632_s29 + $0x1d50] sm:$0xff] }
 0x2c2   : > { %7469 = vmatprep.subr.bf16.mxu0 %v8459_v59  ;;  %v351_v59 = vld [vmem:[%s9632_s29 + $0x250] sm:$0xff] }
 0x2c3   : > { %7457 = vmatpush2.bf16.msra.mxu1 %v9000_v47  ;;  %v8843_v47 = vcombine.high %v895_v39, %v911_v40  ;;  %v1231_v37 = vld [vmem:[%s9632_s29 + $0x1dd0] sm:$0xff] }
 0x2c4   : > { %7512 = vmatprep.subr.bf16.mxu1 %v8971_v50  ;;  %v7159_v17 = vpop.f32.mrf.mxu0  ;;  %7416 = vmatmul.mubr.bf16.vlgmr.msra.gmra.mxu0 %v10495_v63  ;;  %v367_v50 = vld [vmem:[%s9632_s29 + $0x2d0] sm:$0xff] }
 0x2c5   : > { %v7160_v3 = vadd.f32 %v7159_v17, %v1360_v54  ;;  %7470 = vmatpush1.bf16.msra.mxu0 %v8458_v55  ;;  %7501 = vmatprep.mubr.bf16.mxu0 %v10415_v48  ;;  %v8811_v55 = vcombine.high %v863_v43, %v879_v51  ;;  %v8298_v61 = vcombine.low %v351_v59, %v367_v50 }
 0x2c6   : > { %v7202_v29 = vpop.f32.mrf.mxu1  ;;  %7459 = vmatmul.mubr.bf16.vlgmr.msra.gmra.mxu1 %v10503_v10  ;;  %v7161_v5 = vpop.f32.mrf.mxu0  ;;  %7471 = vmatprep.subr.bf16.mxu0 %v8427_v58  ;;  %v335_v58 = vld [vmem:[%s9632_s29 + $0x1d0] sm:$0xff] }
 0x2c7   : > { %7513 = vmatpush1.bf16.msra.mxu1 %v8970_v57  ;;  %v7203_v8 = vadd.f32 %v7202_v29, %v7160_v3  ;;  %v7162_v9 = vadd.f32 %v7161_v5, %v1364_v49  ;;  %7544 = vmatprep.mubr.bf16.mxu1 %v10423_v38  ;;  %v319_v57 = vld [vmem:[%s9632_s29 + $0x150] sm:$0xff] }
 0x2c8   : > { %v7204_v11 = vpop.f32.mrf.mxu1  ;;  %7514 = vmatprep.subr.bf16.mxu1 %v8939_v60  ;;  %v7163_v19 = vpop.f32.mrf.mxu0  ;;  %v847_v60 = vld [vmem:[%s9632_s29 + $0x11d0] sm:$0xff]  ;;  %v8267_v17 = vcombine.high %v319_v57, %v335_v58  ;;  %v8266_v5 = vcombine.low %v319_v57, %v335_v58 }
 0x2c9   : > { %7997 = vst [vmem:[%s9994_s5 + $0x60] sm:$0xff] %v7203_v8  ;;  %v7205_v23 = vadd.f32 %v7204_v11, %v7162_v9  ;;  %v7164_v24 = vadd.f32 %v7163_v19, %v1360_v54  ;;  %7472 = vmatpush1.bf16.msra.mxu0 %v8426_v4  ;;  %v8299_v54 = vcombine.high %v351_v59, %v367_v50  ;;  %v303_v3 = vld [vmem:[%s9632_s29 + $0xd0] sm:$0xff] }
 0x2ca   : > { %v7206_v25 = vpop.f32.mrf.mxu1  ;;  %v7165_v42 = vpop.f32.mrf.mxu0  ;;  %7473 = vmatprep.subr.bf16.mxu0 %v8395_v46  ;;  %v799_v29 = vld [vmem:[%s9632_s29 + $0x1050] sm:$0xff]  ;;  %v8235_v46 = vcombine.high %v287_v1, %v303_v3  ;;  %v8234_v16 = vcombine.low %v287_v1, %v303_v3  ;;  %v9162_v50 = vcombine.low %v1215_v36, %v1231_v37 }
 0x2cb   : > { %7515 = vmatpush1.bf16.msra.mxu1 %v8938_v7  ;;  %7998 = vst [vmem:[%s9994_s5 + $0x68] sm:$0xff] %v7205_v23  ;;  %v7207_v33 = vadd.f32 %v7206_v25, %v7164_v24  ;;  %v7166_v34 = vadd.f32 %v7165_v42, %v1364_v49  ;;  %v831_v49 = vld [vmem:[%s9632_s29 + $0x1150] sm:$0xff] }
 0x2cc   : > { %7516 = vmatprep.subr.bf16.mxu1 %v8907_v13  ;;  %v7208_v18 = vpop.f32.mrf.mxu1  ;;  %v8779_v0 = vcombine.high %v831_v49, %v847_v60  ;;  %v815_v4 = vld [vmem:[%s9632_s29 + $0x10d0] sm:$0xff]  ;;  %v8778_v7 = vcombine.low %v831_v49, %v847_v60 }
 0x2cd   : > { %8029 = vst [vmem:[%s9994_s5 + $0x160] sm:$0xff] %v7207_v33  ;;  %v7209_v41 = vadd.f32 %v7208_v18, %v7166_v34  ;;  %7474 = vmatpush1.bf16.msra.mxu0 %v8394_v28  ;;  %v8747_v8 = vcombine.high %v799_v29, %v815_v4  ;;  %v767_v9 = vld [vmem:[%s9632_s29 + $0xf50] sm:$0xff]  ;;  %v8746_v19 = vcombine.low %v799_v29, %v815_v4 }
 0x2ce   : > { %7475 = vmatprep.subr.bf16.mxu0 %v8363_v31  ;;  %v783_v11 = vld [vmem:[%s9632_s29 + $0xfd0] sm:$0xff] }
 0x2cf   : > { %7517 = vmatpush1.bf16.msra.mxu1 %v8906_v30  ;;  %8030 = vst [vmem:[%s9994_s5 + $0x168] sm:$0xff] %v7209_v41  ;;  %v1279_v13 = vld [vmem:[%s9632_s29 + $0x1f50] sm:$0xff]  ;;  %v8715_v20 = vcombine.high %v767_v9, %v783_v11  ;;  %v8714_v42 = vcombine.low %v767_v9, %v783_v11  ;;  %v9163_v41 = vcombine.high %v1215_v36, %v1231_v37 }
 0x2d0   : > { %7518 = vmatprep.subr.bf16.mxu1 %v8875_v35  ;;  %v9227_v21 = vcombine.high %v1279_v13, %v1295_v14  ;;  %v735_v23 = vld [vmem:[%s9632_s29 + $0xe50] sm:$0xff]  ;;  %v9226_v30 = vcombine.low %v1279_v13, %v1295_v14 }
 0x2d1   : > { %7476 = vmatpush1.bf16.msra.mxu0 %v8362_v15  ;;  %v751_v24 = vld [vmem:[%s9632_s29 + $0xed0] sm:$0xff] }
 0x2d2   : > { %7477 = vmatprep.subr.bf16.mxu0 %v8331_v56  ;;  %v1247_v25 = vld [vmem:[%s9632_s29 + $0x1e50] sm:$0xff]  ;;  %v8683_v31 = vcombine.high %v735_v23, %v751_v24  ;;  %v8682_v18 = vcombine.low %v735_v23, %v751_v24 }
 0x2d3   : > { %7519 = vmatpush1.bf16.msra.mxu1 %v8874_v45  ;;  %v1263_v28 = vld [vmem:[%s9632_s29 + $0x1ed0] sm:$0xff] }
 0x2d4   : > { %7520 = vmatprep.subr.bf16.mxu1 %v8843_v47  ;;  %v9195_v33 = vcombine.high %v1247_v25, %v1263_v28  ;;  %v703_v34 = vld [vmem:[%s9632_s29 + $0xd50] sm:$0xff]  ;;  %v9194_v39 = vcombine.low %v1247_v25, %v1263_v28 }
 0x2d5   : > { %7478 = vmatpush1.bf16.msra.mxu0 %v8330_v52  ;;  %v719_v35 = vld [vmem:[%s9632_s29 + $0xdd0] sm:$0xff] }
 0x2d6   : > { %7479 = vmatprep.subr.bf16.mxu0 %v8299_v54  ;;  %v8651_v40 = vcombine.high %v703_v34, %v719_v35  ;;  %v671_v15 = vld [vmem:[%s9632_s29 + $0xc50] sm:$0xff]  ;;  %v8650_v59 = vcombine.low %v703_v34, %v719_v35 }
 0x2d7   : > { %7521 = vmatpush1.bf16.msra.mxu1 %v8842_v53  ;;  %v687_v45 = vld [vmem:[%s9632_s29 + $0xcd0] sm:$0xff] }
 0x2d8   : > { %7522 = vmatprep.subr.bf16.mxu1 %v8811_v55  ;;  %v1183_v56 = vld [vmem:[%s9632_s29 + $0x1c50] sm:$0xff]  ;;  %v8619_v43 = vcombine.high %v671_v15, %v687_v45  ;;  %v8618_v57 = vcombine.low %v671_v15, %v687_v45  ;;  %v9342_v15 = vld [vmem:[%s9640_s30 + $0x8] sm:$0xff] }
 0x2d9   : > { %7480 = vmatpush1.bf16.msra.mxu0 %v8298_v61  ;;  %v1199_v47 = vld [vmem:[%s9632_s29 + $0x1cd0] sm:$0xff]  ;;  %v1368_v45 = vrot.slane %v9342_v15, %v10227_v22 }
 0x2da   : > { %7481 = vmatprep.subr.bf16.mxu0 %v8267_v17  ;;  %v9131_v51 = vcombine.high %v1183_v56, %v1199_v47  ;;  %v639_v52 = vld [vmem:[%s9632_s29 + $0xb50] sm:$0xff]  ;;  %v9130_v58 = vcombine.low %v1183_v56, %v1199_v47 }
 0x2db   : > { %7523 = vmatpush1.bf16.msra.mxu1 %v8810_v62  ;;  %v655_v53 = vld [vmem:[%s9632_s29 + $0xbd0] sm:$0xff] }
 0x2dc   : > { %7524 = vmatprep.subr.bf16.mxu1 %v8779_v0  ;;  %v1151_v54 = vld [vmem:[%s9632_s29 + $0x1b50] sm:$0xff]  ;;  %v8587_v49 = vcombine.high %v639_v52, %v655_v53  ;;  %v8586_v1 = vcombine.low %v639_v52, %v655_v53  ;;  %v464_v52 = vld [vmem:[%s9632_s29 + $0x5d8] sm:$0xff] }
 0x2dd   : > { %7482 = vmatpush1.bf16.msra.mxu0 %v8266_v5  ;;  %v1167_v55 = vld [vmem:[%s9632_s29 + $0x1bd0] sm:$0xff] }
 0x2de   : > { %7483 = vmatprep.subr.bf16.mxu0 %v8235_v46  ;;  %v9099_v60 = vcombine.high %v1151_v54, %v1167_v55  ;;  %v607_v61 = vld [vmem:[%s9632_s29 + $0xa50] sm:$0xff]  ;;  %v9098_v3 = vcombine.low %v1151_v54, %v1167_v55  ;;  %v960_v54 = vld [vmem:[%s9632_s29 + $0x1558] sm:$0xff] }
 0x2df   : > { %7525 = vmatpush1.bf16.msra.mxu1 %v8778_v7  ;;  %v623_v62 = vld [vmem:[%s9632_s29 + $0xad0] sm:$0xff]  ;;  %v976_v55 = vld [vmem:[%s9632_s29 + $0x15d8] sm:$0xff] }
 0x2e0   : > { %7526 = vmatprep.subr.bf16.mxu1 %v8747_v8  ;;  %v1119_v17 = vld [vmem:[%s9632_s29 + $0x1a50] sm:$0xff]  ;;  %v8555_v29 = vcombine.high %v607_v61, %v623_v62  ;;  %v8554_v9 = vcombine.low %v607_v61, %v623_v62 }
 0x2e1   : > { %7484 = vmatpush1.bf16.msra.mxu0 %v8234_v16  ;;  %v1135_v0 = vld [vmem:[%s9632_s29 + $0x1ad0] sm:$0xff] }
 0x2e2   : > { %7485 = vmatprep.subr.bf16.mxu0 %v8715_v20  ;;  %v9067_v4 = vcombine.high %v1119_v17, %v1135_v0  ;;  %v575_v5 = vld [vmem:[%s9632_s29 + $0x950] sm:$0xff]  ;;  %v9066_v11 = vcombine.low %v1119_v17, %v1135_v0 }
 0x2e3   : > { %7527 = vmatpush1.bf16.msra.mxu1 %v8746_v19  ;;  %v591_v7 = vld [vmem:[%s9632_s29 + $0x9d0] sm:$0xff] }
 0x2e4   : > { %7528 = vmatprep.subr.bf16.mxu1 %v9227_v21  ;;  %v1087_v46 = vld [vmem:[%s9632_s29 + $0x1950] sm:$0xff]  ;;  %v8523_v13 = vcombine.high %v575_v5, %v591_v7  ;;  %v8522_v23 = vcombine.low %v575_v5, %v591_v7  ;;  %v928_v7 = vld [vmem:[%s9632_s29 + $0x1458] sm:$0xff] }
 0x2e5   : > { %7486 = vmatpush2.bf16.msra.mxu0 %v8714_v42  ;;  %v1103_v8 = vld [vmem:[%s9632_s29 + $0x19d0] sm:$0xff]  ;;  %v512_v42 = vld [vmem:[%s9632_s29 + $0x758] sm:$0xff] }
 0x2e6   : > { %7487 = vmatprep.subr.bf16.mxu0 %v8683_v31  ;;  %v9035_v14 = vcombine.high %v1087_v46, %v1103_v8  ;;  %v543_v16 = vld [vmem:[%s9632_s29 + $0x850] sm:$0xff]  ;;  %v9034_v24 = vcombine.low %v1087_v46, %v1103_v8  ;;  %v1024_v31 = vld [vmem:[%s9632_s29 + $0x1758] sm:$0xff] }
 0x2e7   : > { %7529 = vmatpush2.bf16.msra.mxu1 %v9226_v30  ;;  %v559_v19 = vld [vmem:[%s9632_s29 + $0x8d0] sm:$0xff]  ;;  %v528_v30 = vld [vmem:[%s9632_s29 + $0x7d8] sm:$0xff] }
 0x2e8   : > { %7530 = vmatprep.subr.bf16.mxu1 %v9195_v33  ;;  %v1055_v20 = vld [vmem:[%s9632_s29 + $0x1850] sm:$0xff]  ;;  %v8491_v25 = vcombine.high %v543_v16, %v559_v19  ;;  %v1040_v33 = vld [vmem:[%s9632_s29 + $0x17d8] sm:$0xff]  ;;  %v8490_v34 = vcombine.low %v543_v16, %v559_v19  ;;  %v8461_v36 = vcombine.high %v512_v42, %v528_v30  ;;  %v8460_v56 = vcombine.low %v512_v42, %v528_v30 }
 0x2e9   : > { %7488 = vmatpush2.bf16.msra.mxu0 %v8682_v18  ;;  %v1071_v21 = vld [vmem:[%s9632_s29 + $0x18d0] sm:$0xff]  ;;  %v8973_v37 = vcombine.high %v1024_v31, %v1040_v33  ;;  %v480_v18 = vld [vmem:[%s9632_s29 + $0x658] sm:$0xff]  ;;  %v8972_v47 = vcombine.low %v1024_v31, %v1040_v33 }
 0x2ea   : > { %7489 = vmatprep.subr.bf16.mxu0 %v8651_v40  ;;  %v9003_v28 = vcombine.high %v1055_v20, %v1071_v21  ;;  %v9002_v35 = vcombine.low %v1055_v20, %v1071_v21  ;;  %v992_v40 = vld [vmem:[%s9632_s29 + $0x1658] sm:$0xff] }
 0x2eb   : > { %7531 = vmatpush2.bf16.msra.mxu1 %v9194_v39  ;;  %v496_v39 = vld [vmem:[%s9632_s29 + $0x6d8] sm:$0xff] }
 0x2ec   : > { %7532 = vmatprep.subr.bf16.mxu1 %v9163_v41  ;;  %v1008_v41 = vld [vmem:[%s9632_s29 + $0x16d8] sm:$0xff] }
 0x2ed   : > { %7490 = vmatpush2.bf16.msra.mxu0 %v8650_v59  ;;  %v8429_v59 = vcombine.high %v480_v18, %v496_v39  ;;  %v8940_v61 = vcombine.low %v992_v40, %v1008_v41  ;;  %v944_v46 = vld [vmem:[%s9632_s29 + $0x14d8] sm:$0xff] }
 0x2ee   : > { %7491 = vmatprep.subr.bf16.mxu0 %v8619_v43  ;;  %v8941_v43 = vcombine.high %v992_v40, %v1008_v41  ;;  %v384_v21 = vld [vmem:[%s9632_s29 + $0x358] sm:$0xff]  ;;  %v8876_v31 = vcombine.low %v928_v7, %v944_v46 }
 0x2ef   : > { %7533 = vmatpush2.bf16.msra.mxu1 %v9162_v50  ;;  %v1372_v50 = vrot.slane %v9342_v15, %v10230_v26 }
 0x2f0   : > { %7534 = vmatprep.subr.bf16.mxu1 %v9131_v51  ;;  %v448_v51 = vld [vmem:[%s9632_s29 + $0x558] sm:$0xff] }
 0x2f1   : > { %7492 = vmatpush2.bf16.msra.mxu0 %v8618_v57  ;;  %v8397_v62 = vcombine.high %v448_v51, %v464_v52 }
 0x2f2   : > { %7493 = vmatprep.subr.bf16.mxu0 %v8587_v49  ;;  %v8428_v49 = vcombine.low %v480_v18, %v496_v39  ;;  %v880_v18 = vld [vmem:[%s9632_s29 + $0x12d8] sm:$0xff] }
 0x2f3   : > { %7535 = vmatpush2.bf16.msra.mxu1 %v9130_v58 }
 0x2f4   : > { %7536 = vmatprep.subr.bf16.mxu1 %v9099_v60 }
 0x2f5   : > { %7494 = vmatpush2.bf16.msra.mxu0 %v8586_v1 }
 0x2f6   : > { %7495 = vmatprep.subr.bf16.mxu0 %v8555_v29  ;;  %v416_v29 = vld [vmem:[%s9632_s29 + $0x458] sm:$0xff] }
 0x2f7   : > { %7537 = vmatpush2.bf16.msra.mxu1 %v9098_v3  ;;  %v8909_v3 = vcombine.high %v960_v54, %v976_v55 }
 0x2f8   : > { %7538 = vmatprep.subr.bf16.mxu1 %v9067_v4  ;;  %v432_v4 = vld [vmem:[%s9632_s29 + $0x4d8] sm:$0xff] }
 0x2f9   : > { %7496 = vmatpush2.bf16.msra.mxu0 %v8554_v9  ;;  %v8365_v16 = vcombine.high %v416_v29, %v432_v4  ;;  %v8364_v30 = vcombine.low %v416_v29, %v432_v4 }
 0x2fa   : > { %7497 = vmatprep.subr.bf16.mxu0 %v8523_v13  ;;  %v8396_v13 = vcombine.low %v448_v51, %v464_v52 }
 0x2fb   : > { %7539 = vmatpush2.bf16.msra.mxu1 %v9066_v11 }
 0x2fc   : > { %7540 = vmatprep.subr.bf16.mxu1 %v9035_v14 }
 0x2fd   : > { %7498 = vmatpush2.bf16.msra.mxu0 %v8522_v23  ;;  %v400_v23 = vld [vmem:[%s9632_s29 + $0x3d8] sm:$0xff] }
 0x2fe   : > { %7499 = vmatprep.subr.bf16.mxu0 %v8491_v25  ;;  %v896_v25 = vld [vmem:[%s9632_s29 + $0x1358] sm:$0xff]  ;;  %v8333_v33 = vcombine.high %v384_v21, %v400_v23  ;;  %v8332_v39 = vcombine.low %v384_v21, %v400_v23 }
 0x2ff   : > { %7541 = vmatpush2.bf16.msra.mxu1 %v9034_v24 }
 0x300   : > { %7542 = vmatprep.subr.bf16.mxu1 %v9003_v28  ;;  %v912_v28 = vld [vmem:[%s9632_s29 + $0x13d8] sm:$0xff] }
 0x301   : > { %7500 = vmatpush2.bf16.msra.mxu0 %v8490_v34  ;;  %v8845_v34 = vcombine.high %v896_v25, %v912_v28  ;;  %v8844_v40 = vcombine.low %v896_v25, %v912_v28  ;;  %v672_v28 = vld [vmem:[%s9632_s29 + $0xc58] sm:$0xff] }
 0x302   : > { %7555 = vmatprep.subr.bf16.mxu0 %v8461_v36  ;;  %v368_v36 = vld [vmem:[%s9632_s29 + $0x2d8] sm:$0xff] }
 0x303   : > { %7543 = vmatpush2.bf16.msra.mxu1 %v9002_v35  ;;  %v352_v35 = vld [vmem:[%s9632_s29 + $0x258] sm:$0xff] }
 0x304   : > { %7598 = vmatprep.subr.bf16.mxu1 %v8973_v37  ;;  %v7245_v53 = vpop.f32.mrf.mxu0  ;;  %7502 = vmatmul.mubr.bf16.vlgmr.msra.gmra.mxu0 %v10495_v63  ;;  %v864_v37 = vld [vmem:[%s9632_s29 + $0x1258] sm:$0xff]  ;;  %v8301_v41 = vcombine.high %v352_v35, %v368_v36 }
 0x305   : > { %v7246_v57 = vadd.f32 %v7245_v53, %v1368_v45  ;;  %7556 = vmatpush1.bf16.msra.mxu0 %v8460_v56  ;;  %7587 = vmatprep.mubr.bf16.mxu0 %v10415_v48  ;;  %v8908_v48 = vcombine.low %v960_v54, %v976_v55  ;;  %v8813_v15 = vcombine.high %v864_v37, %v880_v18  ;;  %v336_v56 = vld [vmem:[%s9632_s29 + $0x1d8] sm:$0xff] }
 0x306   : > { %v7288_v58 = vpop.f32.mrf.mxu1  ;;  %7545 = vmatmul.mubr.bf16.vlgmr.msra.gmra.mxu1 %v10503_v10  ;;  %v7247_v60 = vpop.f32.mrf.mxu0  ;;  %7557 = vmatprep.subr.bf16.mxu0 %v8429_v59  ;;  %v848_v59 = vld [vmem:[%s9632_s29 + $0x11d8] sm:$0xff] }
 0x307   : > { %7599 = vmatpush1.bf16.msra.mxu1 %v8972_v47  ;;  %v7289_v17 = vadd.f32 %v7288_v58, %v7246_v57  ;;  %v7248_v0 = vadd.f32 %v7247_v60, %v1372_v50  ;;  %7630 = vmatprep.mubr.bf16.mxu1 %v10423_v38  ;;  %v8877_v38 = vcombine.high %v928_v7, %v944_v46  ;;  %v832_v47 = vld [vmem:[%s9632_s29 + $0x1158] sm:$0xff] }
 0x308   : > { %v7290_v1 = vpop.f32.mrf.mxu1  ;;  %7600 = vmatprep.subr.bf16.mxu1 %v8941_v43  ;;  %v7249_v5 = vpop.f32.mrf.mxu0  ;;  %v8812_v43 = vcombine.low %v864_v37, %v880_v18  ;;  %v8781_v52 = vcombine.high %v832_v47, %v848_v59  ;;  %v288_v53 = vld [vmem:[%s9632_s29 + $0x58] sm:$0xff] }
 0x309   : > { %7999 = vst [vmem:[%s9994_s5 + $0x70] sm:$0xff] %v7289_v17  ;;  %v7291_v8 = vadd.f32 %v7290_v1, %v7248_v0  ;;  %v7250_v9 = vadd.f32 %v7249_v5, %v1368_v45  ;;  %7558 = vmatpush1.bf16.msra.mxu0 %v8428_v49  ;;  %v320_v45 = vld [vmem:[%s9632_s29 + $0x158] sm:$0xff]  ;;  %v8780_v49 = vcombine.low %v832_v47, %v848_v59 }
 0x30a   : > { %v7292_v11 = vpop.f32.mrf.mxu1  ;;  %v7251_v14 = vpop.f32.mrf.mxu0  ;;  %7559 = vmatprep.subr.bf16.mxu0 %v8397_v62  ;;  %v8269_v51 = vcombine.high %v320_v45, %v336_v56  ;;  %v304_v54 = vld [vmem:[%s9632_s29 + $0xd8] sm:$0xff]  ;;  %v8268_v58 = vcombine.low %v320_v45, %v336_v56 }
 0x30b   : > { %7601 = vmatpush1.bf16.msra.mxu1 %v8940_v61  ;;  %8000 = vst [vmem:[%s9994_s5 + $0x78] sm:$0xff] %v7291_v8  ;;  %v7293_v19 = vadd.f32 %v7292_v11, %v7250_v9  ;;  %v7252_v20 = vadd.f32 %v7251_v14, %v1372_v50  ;;  %v8300_v50 = vcombine.low %v352_v35, %v368_v36  ;;  %v800_v55 = vld [vmem:[%s9632_s29 + $0x1058] sm:$0xff] }
 0x30c   : > { %7602 = vmatprep.subr.bf16.mxu1 %v8909_v3  ;;  %v7294_v24 = vpop.f32.mrf.mxu1  ;;  %v816_v57 = vld [vmem:[%s9632_s29 + $0x10d8] sm:$0xff]  ;;  %v8237_v60 = vcombine.high %v288_v53, %v304_v54  ;;  %v8236_v3 = vcombine.low %v288_v53, %v304_v54 }
 0x30d   : > { %8031 = vst [vmem:[%s9994_s5 + $0x170] sm:$0xff] %v7293_v19  ;;  %v7295_v42 = vadd.f32 %v7294_v24, %v7252_v20  ;;  %7560 = vmatpush1.bf16.msra.mxu0 %v8396_v13  ;;  %v8749_v61 = vcombine.high %v800_v55, %v816_v57  ;;  %v768_v62 = vld [vmem:[%s9632_s29 + $0xf58] sm:$0xff]  ;;  %v8748_v29 = vcombine.low %v800_v55, %v816_v57 }
 0x30e   : > { %7561 = vmatprep.subr.bf16.mxu0 %v8365_v16  ;;  %v784_v17 = vld [vmem:[%s9632_s29 + $0xfd8] sm:$0xff] }
 0x30f   : > { %7603 = vmatpush1.bf16.msra.mxu1 %v8908_v48  ;;  %8032 = vst [vmem:[%s9994_s5 + $0x178] sm:$0xff] %v7295_v42  ;;  %v1280_v0 = vld [vmem:[%s9632_s29 + $0x1f58] sm:$0xff]  ;;  %v8717_v4 = vcombine.high %v768_v62, %v784_v17  ;;  %v8716_v11 = vcombine.low %v768_v62, %v784_v17 }
 0x310   : > { %7604 = vmatprep.subr.bf16.mxu1 %v8877_v38  ;;  %v1296_v1 = vld [vmem:[%s9632_s29 + $0x1fd8] sm:$0xff] }
 0x311   : > { %7562 = vmatpush1.bf16.msra.mxu0 %v8364_v30  ;;  %v9229_v5 = vcombine.high %v1280_v0, %v1296_v1  ;;  %v736_v7 = vld [vmem:[%s9632_s29 + $0xe58] sm:$0xff]  ;;  %v9228_v13 = vcombine.low %v1280_v0, %v1296_v1 }
 0x312   : > { %7563 = vmatprep.subr.bf16.mxu0 %v8333_v33  ;;  %v752_v46 = vld [vmem:[%s9632_s29 + $0xed8] sm:$0xff] }
 0x313   : > { %7605 = vmatpush1.bf16.msra.mxu1 %v8876_v31  ;;  %v1248_v8 = vld [vmem:[%s9632_s29 + $0x1e58] sm:$0xff]  ;;  %v8685_v14 = vcombine.high %v736_v7, %v752_v46  ;;  %v8684_v21 = vcombine.low %v736_v7, %v752_v46 }
 0x314   : > { %7606 = vmatprep.subr.bf16.mxu1 %v8845_v34  ;;  %v1264_v9 = vld [vmem:[%s9632_s29 + $0x1ed8] sm:$0xff] }
 0x315   : > { %7564 = vmatpush1.bf16.msra.mxu0 %v8332_v39  ;;  %v9197_v48 = vcombine.high %v1248_v8, %v1264_v9  ;;  %v704_v16 = vld [vmem:[%s9632_s29 + $0xd58] sm:$0xff]  ;;  %v9196_v23 = vcombine.low %v1248_v8, %v1264_v9  ;;  %v513_v8 = vld [vmem:[%s9632_s29 + $0x760] sm:$0xff] }
 0x316   : > { %7565 = vmatprep.subr.bf16.mxu0 %v8301_v41  ;;  %v720_v19 = vld [vmem:[%s9632_s29 + $0xdd8] sm:$0xff]  ;;  %v529_v9 = vld [vmem:[%s9632_s29 + $0x7e0] sm:$0xff] }
 0x317   : > { %7607 = vmatpush1.bf16.msra.mxu1 %v8844_v40  ;;  %v1216_v20 = vld [vmem:[%s9632_s29 + $0x1d58] sm:$0xff]  ;;  %v8653_v24 = vcombine.high %v704_v16, %v720_v19  ;;  %v8652_v33 = vcombine.low %v704_v16, %v720_v19  ;;  %v10644_v16 = vld [vmem:[%s9640_s30 + $0x10] sm:$0xff]  ;;  %v8463_v19 = vcombine.high %v513_v8, %v529_v9 }
 0x318   : > { %7608 = vmatprep.subr.bf16.mxu1 %v8813_v15  ;;  %v1232_v38 = vld [vmem:[%s9632_s29 + $0x1dd8] sm:$0xff] }
 0x319   : > { %7566 = vmatpush1.bf16.msra.mxu0 %v8300_v50  ;;  %v9165_v25 = vcombine.high %v1216_v20, %v1232_v38  ;;  %v688_v42 = vld [vmem:[%s9632_s29 + $0xcd8] sm:$0xff]  ;;  %v9164_v34 = vcombine.low %v1216_v20, %v1232_v38  ;;  %v481_v38 = vld [vmem:[%s9632_s29 + $0x660] sm:$0xff] }
 0x31a   : > { %7567 = vmatprep.subr.bf16.mxu0 %v8269_v51  ;;  %v1184_v30 = vld [vmem:[%s9632_s29 + $0x1c58] sm:$0xff]  ;;  %v8621_v35 = vcombine.high %v672_v28, %v688_v42  ;;  %v8620_v41 = vcombine.low %v672_v28, %v688_v42  ;;  %v8462_v28 = vcombine.low %v513_v8, %v529_v9 }
 0x31b   : > { %7609 = vmatpush1.bf16.msra.mxu1 %v8812_v43  ;;  %v1200_v31 = vld [vmem:[%s9632_s29 + $0x1cd8] sm:$0xff] }
 0x31c   : > { %7610 = vmatprep.subr.bf16.mxu1 %v8781_v52  ;;  %v9133_v36 = vcombine.high %v1184_v30, %v1200_v31  ;;  %v640_v37 = vld [vmem:[%s9632_s29 + $0xb58] sm:$0xff]  ;;  %v9132_v15 = vcombine.low %v1184_v30, %v1200_v31  ;;  %v1380_v31 = vrot.slane %v10644_v16, %v9959_v32 }
 0x31d   : > { %7568 = vmatpush1.bf16.msra.mxu0 %v8268_v58  ;;  %v656_v18 = vld [vmem:[%s9632_s29 + $0xbd8] sm:$0xff] }
 0x31e   : > { %7569 = vmatprep.subr.bf16.mxu0 %v8237_v60  ;;  %v1152_v39 = vld [vmem:[%s9632_s29 + $0x1b58] sm:$0xff]  ;;  %v8589_v45 = vcombine.high %v640_v37, %v656_v18  ;;  %v8588_v51 = vcombine.low %v640_v37, %v656_v18  ;;  %v961_v37 = vld [vmem:[%s9632_s29 + $0x1560] sm:$0xff] }
 0x31f   : > { %7611 = vmatpush1.bf16.msra.mxu1 %v8780_v49  ;;  %v1168_v40 = vld [vmem:[%s9632_s29 + $0x1bd8] sm:$0xff]  ;;  %v977_v18 = vld [vmem:[%s9632_s29 + $0x15e0] sm:$0xff] }
 0x320   : > { %7612 = vmatprep.subr.bf16.mxu1 %v8749_v61  ;;  %v9101_v56 = vcombine.high %v1152_v39, %v1168_v40  ;;  %v608_v47 = vld [vmem:[%s9632_s29 + $0xa58] sm:$0xff]  ;;  %v9100_v52 = vcombine.low %v1152_v39, %v1168_v40 }
 0x321   : > { %7570 = vmatpush1.bf16.msra.mxu0 %v8236_v3  ;;  %v624_v59 = vld [vmem:[%s9632_s29 + $0xad8] sm:$0xff] }
 0x322   : > { %7571 = vmatprep.subr.bf16.mxu0 %v8717_v4  ;;  %v1120_v50 = vld [vmem:[%s9632_s29 + $0x1a58] sm:$0xff]  ;;  %v8557_v53 = vcombine.high %v608_v47, %v624_v59  ;;  %v8556_v60 = vcombine.low %v608_v47, %v624_v59 }
 0x323   : > { %7613 = vmatpush1.bf16.msra.mxu1 %v8748_v29  ;;  %v1136_v43 = vld [vmem:[%s9632_s29 + $0x1ad8] sm:$0xff] }
 0x324   : > { %7614 = vmatprep.subr.bf16.mxu1 %v9229_v5  ;;  %v9069_v54 = vcombine.high %v1120_v50, %v1136_v43  ;;  %v576_v55 = vld [vmem:[%s9632_s29 + $0x958] sm:$0xff]  ;;  %v9068_v61 = vcombine.low %v1120_v50, %v1136_v43  ;;  %v8911_v50 = vcombine.high %v961_v37, %v977_v18  ;;  %v417_v43 = vld [vmem:[%s9632_s29 + $0x460] sm:$0xff] }
 0x325   : > { %7572 = vmatpush2.bf16.msra.mxu0 %v8716_v11  ;;  %v592_v57 = vld [vmem:[%s9632_s29 + $0x9d8] sm:$0xff]  ;;  %v1025_v11 = vld [vmem:[%s9632_s29 + $0x1760] sm:$0xff] }
 0x326   : > { %7573 = vmatprep.subr.bf16.mxu0 %v8685_v14  ;;  %v1088_v58 = vld [vmem:[%s9632_s29 + $0x1958] sm:$0xff]  ;;  %v8525_v62 = vcombine.high %v576_v55, %v592_v57  ;;  %v8524_v4 = vcombine.low %v576_v55, %v592_v57 }
 0x327   : > { %7615 = vmatpush2.bf16.msra.mxu1 %v9228_v13  ;;  %v1104_v49 = vld [vmem:[%s9632_s29 + $0x19d8] sm:$0xff]  ;;  %v1041_v13 = vld [vmem:[%s9632_s29 + $0x17e0] sm:$0xff] }
 0x328   : > { %7616 = vmatprep.subr.bf16.mxu1 %v9197_v48  ;;  %v9037_v17 = vcombine.high %v1088_v58, %v1104_v49  ;;  %v544_v0 = vld [vmem:[%s9632_s29 + $0x858] sm:$0xff]  ;;  %v9036_v5 = vcombine.low %v1088_v58, %v1104_v49  ;;  %v8975_v20 = vcombine.high %v1025_v11, %v1041_v13  ;;  %v8974_v42 = vcombine.low %v1025_v11, %v1041_v13 }
 0x329   : > { %7574 = vmatpush2.bf16.msra.mxu0 %v8684_v21  ;;  %v560_v1 = vld [vmem:[%s9632_s29 + $0x8d8] sm:$0xff]  ;;  %v497_v21 = vld [vmem:[%s9632_s29 + $0x6e0] sm:$0xff] }
 0x32a   : > { %7575 = vmatprep.subr.bf16.mxu0 %v8653_v24  ;;  %v1056_v3 = vld [vmem:[%s9632_s29 + $0x1858] sm:$0xff]  ;;  %v8493_v7 = vcombine.high %v544_v0, %v560_v1  ;;  %v8492_v14 = vcombine.low %v544_v0, %v560_v1  ;;  %v1009_v24 = vld [vmem:[%s9632_s29 + $0x16e0] sm:$0xff]  ;;  %v8431_v30 = vcombine.high %v481_v38, %v497_v21 }
 0x32b   : > { %7617 = vmatpush2.bf16.msra.mxu1 %v9196_v23  ;;  %v1072_v29 = vld [vmem:[%s9632_s29 + $0x18d8] sm:$0xff]  ;;  %v993_v23 = vld [vmem:[%s9632_s29 + $0x1660] sm:$0xff] }
 0x32c   : > { %7618 = vmatprep.subr.bf16.mxu1 %v9165_v25  ;;  %v9005_v46 = vcombine.high %v1056_v3, %v1072_v29  ;;  %v9004_v48 = vcombine.low %v1056_v3, %v1072_v29  ;;  %v1376_v25 = vrot.slane %v10644_v16, %v9953_v27  ;;  %v10673_v55 = vld [vmem:[%s11082_s0 + $0xc] ss:$16 sps:$4 sm:$0xff]   ;;  %v385_v29 = vld [vmem:[%s9632_s29 + $0x360] sm:$0xff] }
 0x32d   : > { %7576 = vmatpush2.bf16.msra.mxu0 %v8652_v33  ;;  %v8943_v33 = vcombine.high %v993_v23, %v1009_v24 }
 0x32e   : > { %7577 = vmatprep.subr.bf16.mxu0 %v8621_v35  ;;  %v465_v35 = vld [vmem:[%s9632_s29 + $0x5e0] sm:$0xff] }
 0x32f   : > { %7619 = vmatpush2.bf16.msra.mxu1 %v9164_v34  ;;  %v449_v34 = vld [vmem:[%s9632_s29 + $0x560] sm:$0xff] }
 0x330   : > { %7620 = vmatprep.subr.bf16.mxu1 %v9133_v36 }
 0x331   : > { %7578 = vmatpush2.bf16.msra.mxu0 %v8620_v41  ;;  %v8430_v41 = vcombine.low %v481_v38, %v497_v21  ;;  %v881_v38 = vld [vmem:[%s9632_s29 + $0x12e0] sm:$0xff] }
 0x332   : > { %7579 = vmatprep.subr.bf16.mxu0 %v8589_v45  ;;  %v8942_v45 = vcombine.low %v993_v23, %v1009_v24 }
 0x333   : > { %7621 = vmatpush2.bf16.msra.mxu1 %v9132_v15 }
 0x334   : > { %7622 = vmatprep.subr.bf16.mxu1 %v9101_v56  ;;  %v8399_v56 = vcombine.high %v449_v34, %v465_v35 }
 0x335   : > { %7580 = vmatpush2.bf16.msra.mxu0 %v8588_v51  ;;  %v433_v51 = vld [vmem:[%s9632_s29 + $0x4e0] sm:$0xff] }
 0x336   : > { %7581 = vmatprep.subr.bf16.mxu0 %v8557_v53  ;;  %v929_v53 = vld [vmem:[%s9632_s29 + $0x1460] sm:$0xff]  ;;  %v8366_v9 = vcombine.low %v417_v43, %v433_v51 }
 0x337   : > { %7623 = vmatpush2.bf16.msra.mxu1 %v9100_v52 }
 0x338   : > { %7624 = vmatprep.subr.bf16.mxu1 %v9069_v54  ;;  %v945_v54 = vld [vmem:[%s9632_s29 + $0x14e0] sm:$0xff] }
 0x339   : > { %7582 = vmatpush2.bf16.msra.mxu0 %v8556_v60  ;;  %v8398_v60 = vcombine.low %v449_v34, %v465_v35  ;;  %v8879_v3 = vcombine.high %v929_v53, %v945_v54  ;;  %v8878_v11 = vcombine.low %v929_v53, %v945_v54  ;;  %v737_v54 = vld [vmem:[%s9632_s29 + $0xe60] sm:$0xff] }
 0x33a   : > { %7583 = vmatprep.subr.bf16.mxu0 %v8525_v62  ;;  %v8910_v62 = vcombine.low %v961_v37, %v977_v18  ;;  %v289_v37 = vld [vmem:[%s9632_s29 + $0x60] sm:$0xff] }
 0x33b   : > { %7625 = vmatpush2.bf16.msra.mxu1 %v9068_v61  ;;  %v305_v18 = vld [vmem:[%s9632_s29 + $0xe0] sm:$0xff] }
 0x33c   : > { %7626 = vmatprep.subr.bf16.mxu1 %v9037_v17  ;;  %v8367_v17 = vcombine.high %v417_v43, %v433_v51  ;;  %v8238_v43 = vcombine.low %v289_v37, %v305_v18 }
 0x33d   : > { %7584 = vmatpush2.bf16.msra.mxu0 %v8524_v4  ;;  %v401_v4 = vld [vmem:[%s9632_s29 + $0x3e0] sm:$0xff] }
 0x33e   : > { %7585 = vmatprep.subr.bf16.mxu0 %v8493_v7  ;;  %v897_v7 = vld [vmem:[%s9632_s29 + $0x1360] sm:$0xff]  ;;  %v8335_v13 = vcombine.high %v385_v29, %v401_v4  ;;  %v8334_v21 = vcombine.low %v385_v29, %v401_v4 }
 0x33f   : > { %7627 = vmatpush2.bf16.msra.mxu1 %v9036_v5  ;;  %v1233_v29 = vld [vmem:[%s9632_s29 + $0x1de0] sm:$0xff] }
 0x340   : > { %7628 = vmatprep.subr.bf16.mxu1 %v9005_v46  ;;  %v913_v46 = vld [vmem:[%s9632_s29 + $0x13e0] sm:$0xff] }
 0x341   : > { %7586 = vmatpush2.bf16.msra.mxu0 %v8492_v14  ;;  %v8847_v14 = vcombine.high %v897_v7, %v913_v46  ;;  %v8846_v23 = vcombine.low %v897_v7, %v913_v46 }
 0x342   : > { %7641 = vmatprep.subr.bf16.mxu0 %v8463_v19  ;;  %v369_v19 = vld [vmem:[%s9632_s29 + $0x2e0] sm:$0xff] }
 0x343   : > { %7629 = vmatpush2.bf16.msra.mxu1 %v9004_v48  ;;  %v353_v48 = vld [vmem:[%s9632_s29 + $0x260] sm:$0xff] }
 0x344   : > { %7684 = vmatprep.subr.bf16.mxu1 %v8975_v20  ;;  %v7331_v36 = vpop.f32.mrf.mxu0  ;;  %7588 = vmatmul.mubr.bf16.vlgmr.msra.gmra.mxu0 %v10495_v63  ;;  %v865_v20 = vld [vmem:[%s9632_s29 + $0x1260] sm:$0xff]  ;;  %v8303_v24 = vcombine.high %v353_v48, %v369_v19 }
 0x345   : > { %v7332_v39 = vadd.f32 %v7331_v36, %v1376_v25  ;;  %7642 = vmatpush1.bf16.msra.mxu0 %v8462_v28  ;;  %v321_v28 = vld [vmem:[%s9632_s29 + $0x160] sm:$0xff]  ;;  %v8814_v34 = vcombine.low %v865_v20, %v881_v38 }
 0x346   : > { %v7374_v40 = vpop.f32.mrf.mxu1  ;;  %7631 = vmatmul.mubr.bf16.vlgmr.msra.gmra.mxu1 %v10503_v10  ;;  %v7333_v15 = vpop.f32.mrf.mxu0  ;;  %7643 = vmatprep.subr.bf16.mxu0 %v8431_v30  ;;  %v10665_v10 = vld [vmem:[%s11082_s0 + $0x4] ss:$16 sps:$4 sm:$0xff]  }
 0x347   : > { %7685 = vmatpush1.bf16.msra.mxu1 %v8974_v42  ;;  %v7375_v47 = vadd.f32 %v7374_v40, %v7332_v39  ;;  %v7334_v63 = vadd.f32 %v7333_v15, %v1380_v31  ;;  %7673 = vmatprep.mubr.bf16.mxu0 %v10665_v10  ;;  %v337_v42 = vld [vmem:[%s9632_s29 + $0x1e0] sm:$0xff] }
 0x348   : > { %v7376_v59 = vpop.f32.mrf.mxu1  ;;  %7686 = vmatprep.subr.bf16.mxu1 %v8943_v33  ;;  %v7335_v52 = vpop.f32.mrf.mxu0  ;;  %7716 = vmatprep.mubr.bf16.mxu1 %v10673_v55  ;;  %v833_v30 = vld [vmem:[%s9632_s29 + $0x1160] sm:$0xff]  ;;  %v8302_v33 = vcombine.low %v353_v48, %v369_v19  ;;  %v8271_v35 = vcombine.high %v321_v28, %v337_v42 }
 0x349   : > { %8001 = vst [vmem:[%s9994_s5 + $0x80] sm:$0xff] %v7375_v47  ;;  %v7377_v57 = vadd.f32 %v7376_v59, %v7334_v63  ;;  %v7336_v58 = vadd.f32 %v7335_v52, %v1376_v25  ;;  %7644 = vmatpush1.bf16.msra.mxu0 %v8430_v41  ;;  %v8815_v25 = vcombine.high %v865_v20, %v881_v38  ;;  %v801_v39 = vld [vmem:[%s9632_s29 + $0x1060] sm:$0xff] }
 0x34a   : > { %v7378_v49 = vpop.f32.mrf.mxu1  ;;  %v7337_v61 = vpop.f32.mrf.mxu0  ;;  %7645 = vmatprep.subr.bf16.mxu0 %v8399_v56  ;;  %v817_v40 = vld [vmem:[%s9632_s29 + $0x10e0] sm:$0xff]  ;;  %v8270_v41 = vcombine.low %v321_v28, %v337_v42 }
 0x34b   : > { %7687 = vmatpush1.bf16.msra.mxu1 %v8942_v45  ;;  %8002 = vst [vmem:[%s9994_s5 + $0x88] sm:$0xff] %v7377_v57  ;;  %v7379_v0 = vadd.f32 %v7378_v49, %v7336_v58  ;;  %v7338_v1 = vadd.f32 %v7337_v61, %v1380_v31  ;;  %v849_v31 = vld [vmem:[%s9632_s29 + $0x11e0] sm:$0xff]  ;;  %v8239_v45 = vcombine.high %v289_v37, %v305_v18 }
 0x34c   : > { %7688 = vmatprep.subr.bf16.mxu1 %v8911_v50  ;;  %v7380_v5 = vpop.f32.mrf.mxu1  ;;  %v8783_v36 = vcombine.high %v833_v30, %v849_v31  ;;  %v8782_v15 = vcombine.low %v833_v30, %v849_v31  ;;  %v8751_v56 = vcombine.high %v801_v39, %v817_v40  ;;  %v769_v47 = vld [vmem:[%s9632_s29 + $0xf60] sm:$0xff]  ;;  %v8750_v51 = vcombine.low %v801_v39, %v817_v40 }
 0x34d   : > { %8033 = vst [vmem:[%s9994_s5 + $0x180] sm:$0xff] %v7379_v0  ;;  %v7381_v8 = vadd.f32 %v7380_v5, %v7338_v1  ;;  %7646 = vmatpush1.bf16.msra.mxu0 %v8398_v60  ;;  %v785_v63 = vld [vmem:[%s9632_s29 + $0xfe0] sm:$0xff] }
 0x34e   : > { %7647 = vmatprep.subr.bf16.mxu0 %v8367_v17  ;;  %v1281_v59 = vld [vmem:[%s9632_s29 + $0x1f60] sm:$0xff]  ;;  %v8719_v52 = vcombine.high %v769_v47, %v785_v63  ;;  %v8718_v60 = vcombine.low %v769_v47, %v785_v63 }
 0x34f   : > { %7689 = vmatpush1.bf16.msra.mxu1 %v8910_v62  ;;  %8034 = vst [vmem:[%s9994_s5 + $0x188] sm:$0xff] %v7381_v8  ;;  %v1297_v50 = vld [vmem:[%s9632_s29 + $0x1fe0] sm:$0xff] }
 0x350   : > { %7690 = vmatprep.subr.bf16.mxu1 %v8879_v3  ;;  %v9231_v53 = vcombine.high %v1281_v59, %v1297_v50  ;;  %v753_v57 = vld [vmem:[%s9632_s29 + $0xee0] sm:$0xff]  ;;  %v9230_v61 = vcombine.low %v1281_v59, %v1297_v50 }
 0x351   : > { %7648 = vmatpush1.bf16.msra.mxu0 %v8366_v9  ;;  %v1249_v58 = vld [vmem:[%s9632_s29 + $0x1e60] sm:$0xff]  ;;  %v8687_v62 = vcombine.high %v737_v54, %v753_v57  ;;  %v8686_v4 = vcombine.low %v737_v54, %v753_v57 }
 0x352   : > { %7649 = vmatprep.subr.bf16.mxu0 %v8335_v13  ;;  %v1265_v49 = vld [vmem:[%s9632_s29 + $0x1ee0] sm:$0xff] }
 0x353   : > { %7691 = vmatpush1.bf16.msra.mxu1 %v8878_v11  ;;  %v9199_v17 = vcombine.high %v1249_v58, %v1265_v49  ;;  %v705_v0 = vld [vmem:[%s9632_s29 + $0xd60] sm:$0xff]  ;;  %v9198_v5 = vcombine.low %v1249_v58, %v1265_v49  ;;  %v514_v49 = vld [vmem:[%s9632_s29 + $0x768] sm:$0xff] }
 0x354   : > { %7692 = vmatprep.subr.bf16.mxu1 %v8847_v14  ;;  %v721_v1 = vld [vmem:[%s9632_s29 + $0xde0] sm:$0xff] }
 0x355   : > { %7650 = vmatpush1.bf16.msra.mxu0 %v8334_v21  ;;  %v1217_v3 = vld [vmem:[%s9632_s29 + $0x1d60] sm:$0xff]  ;;  %v8655_v7 = vcombine.high %v705_v0, %v721_v1  ;;  %v8654_v14 = vcombine.low %v705_v0, %v721_v1 }
 0x356   : > { %7651 = vmatprep.subr.bf16.mxu0 %v8303_v24  ;;  %v9167_v46 = vcombine.high %v1217_v3, %v1233_v29  ;;  %v673_v8 = vld [vmem:[%s9632_s29 + $0xc60] sm:$0xff]  ;;  %v9166_v48 = vcombine.low %v1217_v3, %v1233_v29  ;;  %v482_v29 = vld [vmem:[%s9632_s29 + $0x668] sm:$0xff] }
 0x357   : > { %7693 = vmatpush1.bf16.msra.mxu1 %v8846_v23  ;;  %v689_v9 = vld [vmem:[%s9632_s29 + $0xce0] sm:$0xff] }
 0x358   : > { %7694 = vmatprep.subr.bf16.mxu1 %v8815_v25  ;;  %v1185_v11 = vld [vmem:[%s9632_s29 + $0x1c60] sm:$0xff]  ;;  %v8623_v19 = vcombine.high %v673_v8, %v689_v9  ;;  %v8622_v25 = vcombine.low %v673_v8, %v689_v9 }
 0x359   : > { %7652 = vmatpush1.bf16.msra.mxu0 %v8302_v33  ;;  %v1201_v13 = vld [vmem:[%s9632_s29 + $0x1ce0] sm:$0xff] }
 0x35a   : > { %7653 = vmatprep.subr.bf16.mxu0 %v8271_v35  ;;  %v9135_v20 = vcombine.high %v1185_v11, %v1201_v13  ;;  %v641_v38 = vld [vmem:[%s9632_s29 + $0xb60] sm:$0xff]  ;;  %v9134_v28 = vcombine.low %v1185_v11, %v1201_v13  ;;  %v1388_v13 = vrot.slane %v10644_v16, %v10056_v6 }
 0x35b   : > { %7695 = vmatpush1.bf16.msra.mxu1 %v8814_v34  ;;  %v657_v21 = vld [vmem:[%s9632_s29 + $0xbe0] sm:$0xff] }
 0x35c   : > { %7696 = vmatprep.subr.bf16.mxu1 %v8783_v36  ;;  %v1153_v23 = vld [vmem:[%s9632_s29 + $0x1b60] sm:$0xff]  ;;  %v8591_v42 = vcombine.high %v641_v38, %v657_v21  ;;  %v8590_v36 = vcombine.low %v641_v38, %v657_v21  ;;  %v962_v21 = vld [vmem:[%s9632_s29 + $0x1568] sm:$0xff] }
 0x35d   : > { %7654 = vmatpush1.bf16.msra.mxu0 %v8270_v41  ;;  %v1169_v24 = vld [vmem:[%s9632_s29 + $0x1be0] sm:$0xff] }
 0x35e   : > { %7655 = vmatprep.subr.bf16.mxu0 %v8239_v45  ;;  %v9103_v30 = vcombine.high %v1153_v23, %v1169_v24  ;;  %v609_v31 = vld [vmem:[%s9632_s29 + $0xa60] sm:$0xff]  ;;  %v9102_v37 = vcombine.low %v1153_v23, %v1169_v24  ;;  %v978_v23 = vld [vmem:[%s9632_s29 + $0x15e8] sm:$0xff] }
 0x35f   : > { %7697 = vmatpush1.bf16.msra.mxu1 %v8782_v15  ;;  %v625_v33 = vld [vmem:[%s9632_s29 + $0xae0] sm:$0xff] }
 0x360   : > { %7698 = vmatprep.subr.bf16.mxu1 %v8751_v56  ;;  %v1121_v34 = vld [vmem:[%s9632_s29 + $0x1a60] sm:$0xff]  ;;  %v8559_v18 = vcombine.high %v609_v31, %v625_v33  ;;  %v8558_v56 = vcombine.low %v609_v31, %v625_v33 }
 0x361   : > { %7656 = vmatpush1.bf16.msra.mxu0 %v8238_v43  ;;  %v1137_v35 = vld [vmem:[%s9632_s29 + $0x1ae0] sm:$0xff] }
 0x362   : > { %7657 = vmatprep.subr.bf16.mxu0 %v8719_v52  ;;  %v9071_v39 = vcombine.high %v1121_v34, %v1137_v35  ;;  %v577_v40 = vld [vmem:[%s9632_s29 + $0x960] sm:$0xff]  ;;  %v9070_v47 = vcombine.low %v1121_v34, %v1137_v35 }
 0x363   : > { %7699 = vmatpush1.bf16.msra.mxu1 %v8750_v51  ;;  %v593_v41 = vld [vmem:[%s9632_s29 + $0x9e0] sm:$0xff] }
 0x364   : > { %7700 = vmatprep.subr.bf16.mxu1 %v9231_v53  ;;  %v1089_v15 = vld [vmem:[%s9632_s29 + $0x1960] sm:$0xff]  ;;  %v8527_v63 = vcombine.high %v577_v40, %v593_v41  ;;  %v8526_v53 = vcombine.low %v577_v40, %v593_v41  ;;  %v930_v41 = vld [vmem:[%s9632_s29 + $0x1468] sm:$0xff] }
 0x365   : > { %7658 = vmatpush2.bf16.msra.mxu0 %v8718_v60  ;;  %v1105_v45 = vld [vmem:[%s9632_s29 + $0x19e0] sm:$0xff]  ;;  %v530_v60 = vld [vmem:[%s9632_s29 + $0x7e8] sm:$0xff] }
 0x366   : > { %7659 = vmatprep.subr.bf16.mxu0 %v8687_v62  ;;  %v9039_v59 = vcombine.high %v1089_v15, %v1105_v45  ;;  %v545_v50 = vld [vmem:[%s9632_s29 + $0x860] sm:$0xff]  ;;  %v9038_v54 = vcombine.low %v1089_v15, %v1105_v45  ;;  %v1042_v62 = vld [vmem:[%s9632_s29 + $0x17e8] sm:$0xff]  ;;  %v8465_v1 = vcombine.high %v514_v49, %v530_v60  ;;  %v8464_v8 = vcombine.low %v514_v49, %v530_v60 }
 0x367   : > { %7701 = vmatpush2.bf16.msra.mxu1 %v9230_v61  ;;  %v561_v43 = vld [vmem:[%s9632_s29 + $0x8e0] sm:$0xff]  ;;  %v1026_v61 = vld [vmem:[%s9632_s29 + $0x1768] sm:$0xff] }
 0x368   : > { %7702 = vmatprep.subr.bf16.mxu1 %v9199_v17  ;;  %v1057_v51 = vld [vmem:[%s9632_s29 + $0x1860] sm:$0xff]  ;;  %v8495_v57 = vcombine.high %v545_v50, %v561_v43  ;;  %v8494_v17 = vcombine.low %v545_v50, %v561_v43  ;;  %v8977_v3 = vcombine.high %v1026_v61, %v1042_v62  ;;  %v8976_v9 = vcombine.low %v1026_v61, %v1042_v62  ;;  %v946_v15 = vld [vmem:[%s9632_s29 + $0x14e8] sm:$0xff] }
 0x369   : > { %7660 = vmatpush2.bf16.msra.mxu0 %v8686_v4  ;;  %v1073_v52 = vld [vmem:[%s9632_s29 + $0x18e0] sm:$0xff]  ;;  %v498_v4 = vld [vmem:[%s9632_s29 + $0x6e8] sm:$0xff]  ;;  %v8912_v50 = vcombine.low %v962_v21, %v978_v23 }
 0x36a   : > { %7661 = vmatprep.subr.bf16.mxu0 %v8655_v7  ;;  %v9007_v58 = vcombine.high %v1057_v51, %v1073_v52  ;;  %v9006_v0 = vcombine.low %v1057_v51, %v1073_v52  ;;  %v1010_v7 = vld [vmem:[%s9632_s29 + $0x16e8] sm:$0xff]  ;;  %v8433_v11 = vcombine.high %v482_v29, %v498_v4  ;;  %v10745_v38 = vld [vmem:[%s11082_s0] ss:$16 sps:$4 sm:$0xff]  }
 0x36b   : > { %7703 = vmatpush2.bf16.msra.mxu1 %v9198_v5  ;;  %v994_v5 = vld [vmem:[%s9632_s29 + $0x1668] sm:$0xff] }
 0x36c   : > { %7704 = vmatprep.subr.bf16.mxu1 %v9167_v46  ;;  %v1384_v46 = vrot.slane %v10644_v16, %v10053_v2  ;;  %v8944_v31 = vcombine.low %v994_v5, %v1010_v7  ;;  %v898_v49 = vld [vmem:[%s9632_s29 + $0x1368] sm:$0xff] }
 0x36d   : > { %7662 = vmatpush2.bf16.msra.mxu0 %v8654_v14  ;;  %v8945_v14 = vcombine.high %v994_v5, %v1010_v7  ;;  %v914_v60 = vld [vmem:[%s9632_s29 + $0x13e8] sm:$0xff] }
 0x36e   : > { %7663 = vmatprep.subr.bf16.mxu0 %v8623_v19  ;;  %v466_v19 = vld [vmem:[%s9632_s29 + $0x5e8] sm:$0xff] }
 0x36f   : > { %7705 = vmatpush2.bf16.msra.mxu1 %v9166_v48  ;;  %v450_v48 = vld [vmem:[%s9632_s29 + $0x568] sm:$0xff] }
 0x370   : > { %7706 = vmatprep.subr.bf16.mxu1 %v9135_v20  ;;  %v8401_v33 = vcombine.high %v450_v48, %v466_v19  ;;  %v882_v5 = vld [vmem:[%s9632_s29 + $0x12e8] sm:$0xff] }
 0x371   : > { %7664 = vmatpush2.bf16.msra.mxu0 %v8622_v25 }
 0x372   : > { %7665 = vmatprep.subr.bf16.mxu0 %v8591_v42  ;;  %v8432_v42 = vcombine.low %v482_v29, %v498_v4  ;;  %v370_v29 = vld [vmem:[%s9632_s29 + $0x2e8] sm:$0xff] }
 0x373   : > { %7707 = vmatpush2.bf16.msra.mxu1 %v9134_v28  ;;  %v10753_v28 = vld [vmem:[%s11082_s0 + $0x8] ss:$16 sps:$4 sm:$0xff]  }
 0x374   : > { %7708 = vmatprep.subr.bf16.mxu1 %v9103_v30  ;;  %v866_v4 = vld [vmem:[%s9632_s29 + $0x1268] sm:$0xff] }
 0x375   : > { %7666 = vmatpush2.bf16.msra.mxu0 %v8590_v36 }
 0x376   : > { %7667 = vmatprep.subr.bf16.mxu0 %v8559_v18  ;;  %v418_v18 = vld [vmem:[%s9632_s29 + $0x468] sm:$0xff] }
 0x377   : > { %7709 = vmatpush2.bf16.msra.mxu1 %v9102_v37  ;;  %v8913_v37 = vcombine.high %v962_v21, %v978_v23 }
 0x378   : > { %7710 = vmatprep.subr.bf16.mxu1 %v9071_v39  ;;  %v434_v39 = vld [vmem:[%s9632_s29 + $0x4e8] sm:$0xff] }
 0x379   : > { %7668 = vmatpush2.bf16.msra.mxu0 %v8558_v56  ;;  %v8369_v43 = vcombine.high %v418_v18, %v434_v39  ;;  %v8368_v62 = vcombine.low %v418_v18, %v434_v39  ;;  %v1282_v18 = vld [vmem:[%s9632_s29 + $0x1f68] sm:$0xff] }
 0x37a   : > { %7669 = vmatprep.subr.bf16.mxu0 %v8527_v63  ;;  %v8400_v63 = vcombine.low %v450_v48, %v466_v19  ;;  %v850_v48 = vld [vmem:[%s9632_s29 + $0x11e8] sm:$0xff] }
 0x37b   : > { %7711 = vmatpush2.bf16.msra.mxu1 %v9070_v47  ;;  %v1298_v39 = vld [vmem:[%s9632_s29 + $0x1fe8] sm:$0xff] }
 0x37c   : > { %7712 = vmatprep.subr.bf16.mxu1 %v9039_v59 }
 0x37d   : > { %7670 = vmatpush2.bf16.msra.mxu0 %v8526_v53  ;;  %v8881_v53 = vcombine.high %v930_v41, %v946_v15 }
 0x37e   : > { %7671 = vmatprep.subr.bf16.mxu0 %v8495_v57  ;;  %v402_v57 = vld [vmem:[%s9632_s29 + $0x3e8] sm:$0xff] }
 0x37f   : > { %7713 = vmatpush2.bf16.msra.mxu1 %v9038_v54  ;;  %v386_v54 = vld [vmem:[%s9632_s29 + $0x368] sm:$0xff] }
 0x380   : > { %7714 = vmatprep.subr.bf16.mxu1 %v9007_v58  ;;  %v8336_v7 = vcombine.low %v386_v54, %v402_v57 }
 0x381   : > { %7672 = vmatpush2.bf16.msra.mxu0 %v8494_v17  ;;  %v8880_v17 = vcombine.low %v930_v41, %v946_v15 }
 0x382   : > { %7727 = vmatprep.subr.bf16.mxu0 %v8465_v1  ;;  %v8849_v1 = vcombine.high %v898_v49, %v914_v60 }
 0x383   : > { %7715 = vmatpush2.bf16.msra.mxu1 %v9006_v0  ;;  %v8337_v0 = vcombine.high %v386_v54, %v402_v57  ;;  %v722_v54 = vld [vmem:[%s9632_s29 + $0xde8] sm:$0xff] }
 0x384   : > { %7770 = vmatprep.subr.bf16.mxu1 %v8977_v3  ;;  %v7417_v20 = vpop.f32.mrf.mxu0  ;;  %7674 = vmatmul.mubr.bf16.vlgmr.msra.gmra.mxu0 %v10745_v38  ;;  %v354_v3 = vld [vmem:[%s9632_s29 + $0x268] sm:$0xff] }
 0x385   : > { %v7418_v24 = vadd.f32 %v7417_v20, %v1384_v46  ;;  %7728 = vmatpush1.bf16.msra.mxu0 %v8464_v8  ;;  %7759 = vmatprep.mubr.bf16.mxu0 %v10665_v10  ;;  %v8305_v8 = vcombine.high %v354_v3, %v370_v29  ;;  %v8304_v19 = vcombine.low %v354_v3, %v370_v29  ;;  %v1218_v57 = vld [vmem:[%s9632_s29 + $0x1d68] sm:$0xff] }
 0x386   : > { %v7460_v25 = vpop.f32.mrf.mxu1  ;;  %7717 = vmatmul.mubr.bf16.vlgmr.msra.gmra.mxu1 %v10753_v28  ;;  %v7419_v30 = vpop.f32.mrf.mxu0  ;;  %7729 = vmatprep.subr.bf16.mxu0 %v8433_v11  ;;  %v322_v11 = vld [vmem:[%s9632_s29 + $0x168] sm:$0xff]  ;;  %v8816_v20 = vcombine.low %v866_v4, %v882_v5 }
 0x387   : > { %7771 = vmatpush1.bf16.msra.mxu1 %v8976_v9  ;;  %v7461_v34 = vadd.f32 %v7460_v25, %v7418_v24  ;;  %v7420_v35 = vadd.f32 %v7419_v30, %v1388_v13  ;;  %7802 = vmatprep.mubr.bf16.mxu1 %v10673_v55  ;;  %v8817_v9 = vcombine.high %v866_v4, %v882_v5  ;;  %v290_v24 = vld [vmem:[%s9632_s29 + $0x68] sm:$0xff] }
 0x388   : > { %v7462_v36 = vpop.f32.mrf.mxu1  ;;  %7772 = vmatprep.subr.bf16.mxu1 %v8945_v14  ;;  %v7421_v40 = vpop.f32.mrf.mxu0  ;;  %v834_v14 = vld [vmem:[%s9632_s29 + $0x1168] sm:$0xff] }
 0x389   : > { %8003 = vst [vmem:[%s9994_s5 + $0x90] sm:$0xff] %v7461_v34  ;;  %v7463_v45 = vadd.f32 %v7462_v36, %v7420_v35  ;;  %v7422_v56 = vadd.f32 %v7421_v40, %v1384_v46  ;;  %7730 = vmatpush1.bf16.msra.mxu0 %v8432_v42  ;;  %v8848_v46 = vcombine.low %v898_v49, %v914_v60  ;;  %v306_v25 = vld [vmem:[%s9632_s29 + $0xe8] sm:$0xff] }
 0x38a   : > { %v7464_v47 = vpop.f32.mrf.mxu1  ;;  %v7423_v59 = vpop.f32.mrf.mxu0  ;;  %7731 = vmatprep.subr.bf16.mxu0 %v8401_v33  ;;  %v8785_v23 = vcombine.high %v834_v14, %v850_v48  ;;  %v802_v42 = vld [vmem:[%s9632_s29 + $0x1068] sm:$0xff]  ;;  %v8784_v33 = vcombine.low %v834_v14, %v850_v48  ;;  %v8241_v34 = vcombine.high %v290_v24, %v306_v25  ;;  %v8240_v40 = vcombine.low %v290_v24, %v306_v25 }
 0x38b   : > { %7773 = vmatpush1.bf16.msra.mxu1 %v8944_v31  ;;  %8004 = vst [vmem:[%s9994_s5 + $0x98] sm:$0xff] %v7463_v45  ;;  %v7465_v51 = vadd.f32 %v7464_v47, %v7422_v56  ;;  %v7424_v52 = vadd.f32 %v7423_v59, %v1388_v13  ;;  %v338_v13 = vld [vmem:[%s9632_s29 + $0x1e8] sm:$0xff]  ;;  %v9233_v45 = vcombine.high %v1282_v18, %v1298_v39 }
 0x38c   : > { %7774 = vmatprep.subr.bf16.mxu1 %v8913_v37  ;;  %v7466_v58 = vpop.f32.mrf.mxu1  ;;  %v8273_v21 = vcombine.high %v322_v11, %v338_v13  ;;  %v818_v30 = vld [vmem:[%s9632_s29 + $0x10e8] sm:$0xff]  ;;  %v8272_v31 = vcombine.low %v322_v11, %v338_v13 }
 0x38d   : > { %8035 = vst [vmem:[%s9994_s5 + $0x190] sm:$0xff] %v7465_v51  ;;  %v7467_v61 = vadd.f32 %v7466_v58, %v7424_v52  ;;  %7732 = vmatpush1.bf16.msra.mxu0 %v8400_v63  ;;  %v8753_v35 = vcombine.high %v802_v42, %v818_v30  ;;  %v770_v36 = vld [vmem:[%s9632_s29 + $0xf68] sm:$0xff]  ;;  %v8752_v41 = vcombine.low %v802_v42, %v818_v30 }
 0x38e   : > { %7733 = vmatprep.subr.bf16.mxu0 %v8369_v43  ;;  %v786_v37 = vld [vmem:[%s9632_s29 + $0xfe8] sm:$0xff]  ;;  %v9232_v43 = vcombine.low %v1282_v18, %v1298_v39 }
 0x38f   : > { %7775 = vmatpush1.bf16.msra.mxu1 %v8912_v50  ;;  %8036 = vst [vmem:[%s9994_s5 + $0x198] sm:$0xff] %v7467_v61  ;;  %v8721_v15 = vcombine.high %v770_v36, %v786_v37  ;;  %v738_v56 = vld [vmem:[%s9632_s29 + $0xe68] sm:$0xff]  ;;  %v8720_v50 = vcombine.low %v770_v36, %v786_v37 }
 0x390   : > { %7776 = vmatprep.subr.bf16.mxu1 %v8881_v53  ;;  %v754_v47 = vld [vmem:[%s9632_s29 + $0xee8] sm:$0xff] }
 0x391   : > { %7734 = vmatpush1.bf16.msra.mxu0 %v8368_v62  ;;  %v1250_v63 = vld [vmem:[%s9632_s29 + $0x1e68] sm:$0xff]  ;;  %v8689_v51 = vcombine.high %v738_v56, %v754_v47  ;;  %v8688_v49 = vcombine.low %v738_v56, %v754_v47 }
 0x392   : > { %7735 = vmatprep.subr.bf16.mxu0 %v8337_v0  ;;  %v1266_v59 = vld [vmem:[%s9632_s29 + $0x1ee8] sm:$0xff] }
 0x393   : > { %7777 = vmatpush1.bf16.msra.mxu1 %v8880_v17  ;;  %v9201_v52 = vcombine.high %v1250_v63, %v1266_v59  ;;  %v706_v53 = vld [vmem:[%s9632_s29 + $0xd68] sm:$0xff]  ;;  %v9200_v60 = vcombine.low %v1250_v63, %v1266_v59 }
 0x394   : > { %7778 = vmatprep.subr.bf16.mxu1 %v8849_v1  ;;  %v1234_v58 = vld [vmem:[%s9632_s29 + $0x1de8] sm:$0xff]  ;;  %v8657_v61 = vcombine.high %v706_v53, %v722_v54  ;;  %v8656_v29 = vcombine.low %v706_v53, %v722_v54  ;;  %v1043_v53 = vld [vmem:[%s9632_s29 + $0x17f0] sm:$0xff] }
 0x395   : > { %7736 = vmatpush1.bf16.msra.mxu0 %v8336_v7  ;;  %v9169_v62 = vcombine.high %v1218_v57, %v1234_v58  ;;  %v674_v17 = vld [vmem:[%s9632_s29 + $0xc68] sm:$0xff]  ;;  %v9168_v4 = vcombine.low %v1218_v57, %v1234_v58 }
 0x396   : > { %7737 = vmatprep.subr.bf16.mxu0 %v8305_v8  ;;  %v690_v0 = vld [vmem:[%s9632_s29 + $0xce8] sm:$0xff] }
 0x397   : > { %7779 = vmatpush1.bf16.msra.mxu1 %v8848_v46  ;;  %v1186_v1 = vld [vmem:[%s9632_s29 + $0x1c68] sm:$0xff]  ;;  %v8625_v5 = vcombine.high %v674_v17, %v690_v0  ;;  %v8624_v13 = vcombine.low %v674_v17, %v690_v0  ;;  %v1011_v17 = vld [vmem:[%s9632_s29 + $0x16f0] sm:$0xff]  ;;  %v1392_v0 = vrot.slane %v10644_v16, %v10135_v44 }
 0x398   : > { %7780 = vmatprep.subr.bf16.mxu1 %v8817_v9  ;;  %v1202_v3 = vld [vmem:[%s9632_s29 + $0x1ce8] sm:$0xff] }
 0x399   : > { %7738 = vmatpush1.bf16.msra.mxu0 %v8304_v19  ;;  %v9137_v7 = vcombine.high %v1186_v1, %v1202_v3  ;;  %v642_v46 = vld [vmem:[%s9632_s29 + $0xb68] sm:$0xff]  ;;  %v9136_v14 = vcombine.low %v1186_v1, %v1202_v3 }
 0x39a   : > { %7739 = vmatprep.subr.bf16.mxu0 %v8273_v21  ;;  %v658_v8 = vld [vmem:[%s9632_s29 + $0xbe8] sm:$0xff] }
 0x39b   : > { %7781 = vmatpush1.bf16.msra.mxu1 %v8816_v20  ;;  %v1154_v9 = vld [vmem:[%s9632_s29 + $0x1b68] sm:$0xff]  ;;  %v8593_v48 = vcombine.high %v642_v46, %v658_v8  ;;  %v8592_v25 = vcombine.low %v642_v46, %v658_v8  ;;  %v467_v46 = vld [vmem:[%s9632_s29 + $0x5f0] sm:$0xff] }
 0x39c   : > { %7782 = vmatprep.subr.bf16.mxu1 %v8785_v23  ;;  %v1170_v11 = vld [vmem:[%s9632_s29 + $0x1be8] sm:$0xff] }
 0x39d   : > { %7740 = vmatpush1.bf16.msra.mxu0 %v8272_v31  ;;  %v9105_v19 = vcombine.high %v1154_v9, %v1170_v11  ;;  %v610_v20 = vld [vmem:[%s9632_s29 + $0xa68] sm:$0xff]  ;;  %v9104_v42 = vcombine.low %v1154_v9, %v1170_v11  ;;  %v963_v9 = vld [vmem:[%s9632_s29 + $0x1570] sm:$0xff] }
 0x39e   : > { %7741 = vmatprep.subr.bf16.mxu0 %v8241_v34  ;;  %v626_v21 = vld [vmem:[%s9632_s29 + $0xae8] sm:$0xff]  ;;  %v979_v11 = vld [vmem:[%s9632_s29 + $0x15f0] sm:$0xff] }
 0x39f   : > { %7783 = vmatpush1.bf16.msra.mxu1 %v8784_v33  ;;  %v1122_v23 = vld [vmem:[%s9632_s29 + $0x1a68] sm:$0xff]  ;;  %v8561_v30 = vcombine.high %v610_v20, %v626_v21  ;;  %v8560_v37 = vcombine.low %v610_v20, %v626_v21 }
 0x3a0   : > { %7784 = vmatprep.subr.bf16.mxu1 %v8753_v35  ;;  %v1138_v24 = vld [vmem:[%s9632_s29 + $0x1ae8] sm:$0xff] }
 0x3a1   : > { %7742 = vmatpush1.bf16.msra.mxu0 %v8240_v40  ;;  %v9073_v31 = vcombine.high %v1122_v23, %v1138_v24  ;;  %v578_v33 = vld [vmem:[%s9632_s29 + $0x968] sm:$0xff]  ;;  %v9072_v18 = vcombine.low %v1122_v23, %v1138_v24 }
 0x3a2   : > { %7743 = vmatprep.subr.bf16.mxu0 %v8721_v15  ;;  %v594_v34 = vld [vmem:[%s9632_s29 + $0x9e8] sm:$0xff] }
 0x3a3   : > { %7785 = vmatpush1.bf16.msra.mxu1 %v8752_v41  ;;  %v1090_v35 = vld [vmem:[%s9632_s29 + $0x1968] sm:$0xff]  ;;  %v8529_v39 = vcombine.high %v578_v33, %v594_v34  ;;  %v8528_v47 = vcombine.low %v578_v33, %v594_v34  ;;  %v931_v33 = vld [vmem:[%s9632_s29 + $0x1470] sm:$0xff] }
 0x3a4   : > { %7786 = vmatprep.subr.bf16.mxu1 %v9233_v45  ;;  %v1106_v36 = vld [vmem:[%s9632_s29 + $0x19e8] sm:$0xff]  ;;  %v947_v34 = vld [vmem:[%s9632_s29 + $0x14f0] sm:$0xff] }
 0x3a5   : > { %7744 = vmatpush2.bf16.msra.mxu0 %v8720_v50  ;;  %v9041_v40 = vcombine.high %v1090_v35, %v1106_v36  ;;  %v546_v41 = vld [vmem:[%s9632_s29 + $0x868] sm:$0xff]  ;;  %v9040_v63 = vcombine.low %v1090_v35, %v1106_v36 }
 0x3a6   : > { %7745 = vmatprep.subr.bf16.mxu0 %v8689_v51  ;;  %v562_v15 = vld [vmem:[%s9632_s29 + $0x8e8] sm:$0xff]  ;;  %v531_v51 = vld [vmem:[%s9632_s29 + $0x7f0] sm:$0xff] }
 0x3a7   : > { %7787 = vmatpush2.bf16.msra.mxu1 %v9232_v43  ;;  %v1058_v45 = vld [vmem:[%s9632_s29 + $0x1868] sm:$0xff]  ;;  %v8497_v59 = vcombine.high %v546_v41, %v562_v15  ;;  %v515_v43 = vld [vmem:[%s9632_s29 + $0x770] sm:$0xff]  ;;  %v8496_v54 = vcombine.low %v546_v41, %v562_v15 }
 0x3a8   : > { %7788 = vmatprep.subr.bf16.mxu1 %v9201_v52  ;;  %v1074_v56 = vld [vmem:[%s9632_s29 + $0x18e8] sm:$0xff]  ;;  %v1027_v52 = vld [vmem:[%s9632_s29 + $0x1770] sm:$0xff]  ;;  %v8467_v58 = vcombine.high %v515_v43, %v531_v51  ;;  %v8466_v1 = vcombine.low %v515_v43, %v531_v51  ;;  %v8882_v51 = vcombine.low %v931_v33, %v947_v34 }
 0x3a9   : > { %7746 = vmatpush2.bf16.msra.mxu0 %v8688_v49  ;;  %v9009_v50 = vcombine.high %v1058_v45, %v1074_v56  ;;  %v9008_v57 = vcombine.low %v1058_v45, %v1074_v56  ;;  %v8979_v49 = vcombine.high %v1027_v52, %v1043_v53  ;;  %v8978_v3 = vcombine.low %v1027_v52, %v1043_v53  ;;  %v387_v45 = vld [vmem:[%s9632_s29 + $0x370] sm:$0xff] }
 0x3aa   : > { %7747 = vmatprep.subr.bf16.mxu0 %v8657_v61  ;;  %v499_v61 = vld [vmem:[%s9632_s29 + $0x6f0] sm:$0xff] }
 0x3ab   : > { %7789 = vmatpush2.bf16.msra.mxu1 %v9200_v60  ;;  %v483_v60 = vld [vmem:[%s9632_s29 + $0x670] sm:$0xff] }
 0x3ac   : > { %7790 = vmatprep.subr.bf16.mxu1 %v9169_v62  ;;  %v995_v62 = vld [vmem:[%s9632_s29 + $0x1670] sm:$0xff] }
 0x3ad   : > { %7748 = vmatpush2.bf16.msra.mxu0 %v8656_v29  ;;  %v8435_v29 = vcombine.high %v483_v60, %v499_v61  ;;  %v403_v56 = vld [vmem:[%s9632_s29 + $0x3f0] sm:$0xff] }
 0x3ae   : > { %7749 = vmatprep.subr.bf16.mxu0 %v8625_v5  ;;  %v8947_v5 = vcombine.high %v995_v62, %v1011_v17  ;;  %v8339_v52 = vcombine.high %v387_v45, %v403_v56 }
 0x3af   : > { %7791 = vmatpush2.bf16.msra.mxu1 %v9168_v4  ;;  %v1396_v4 = vrot.slane %v10644_v16, %v10138_v12 }
 0x3b0   : > { %7792 = vmatprep.subr.bf16.mxu1 %v9137_v7  ;;  %v451_v7 = vld [vmem:[%s9632_s29 + $0x570] sm:$0xff] }
 0x3b1   : > { %7750 = vmatpush2.bf16.msra.mxu0 %v8624_v13  ;;  %v8403_v20 = vcombine.high %v451_v7, %v467_v46 }
 0x3b2   : > { %7751 = vmatprep.subr.bf16.mxu0 %v8593_v48  ;;  %v8434_v48 = vcombine.low %v483_v60, %v499_v61  ;;  %v8338_v60 = vcombine.low %v387_v45, %v403_v56 }
 0x3b3   : > { %7793 = vmatpush2.bf16.msra.mxu1 %v9136_v14 }
 0x3b4   : > { %7794 = vmatprep.subr.bf16.mxu1 %v9105_v19  ;;  %v8946_v19 = vcombine.low %v995_v62, %v1011_v17 }
 0x3b5   : > { %7752 = vmatpush2.bf16.msra.mxu0 %v8592_v25  ;;  %v8915_v25 = vcombine.high %v963_v9, %v979_v11 }
 0x3b6   : > { %7753 = vmatprep.subr.bf16.mxu0 %v8561_v30  ;;  %v435_v30 = vld [vmem:[%s9632_s29 + $0x4f0] sm:$0xff] }
 0x3b7   : > { %7795 = vmatpush2.bf16.msra.mxu1 %v9104_v42  ;;  %v419_v42 = vld [vmem:[%s9632_s29 + $0x470] sm:$0xff] }
 0x3b8   : > { %7796 = vmatprep.subr.bf16.mxu1 %v9073_v31  ;;  %v8370_v43 = vcombine.low %v419_v42, %v435_v30 }
 0x3b9   : > { %7754 = vmatpush2.bf16.msra.mxu0 %v8560_v37 }
 0x3ba   : > { %7755 = vmatprep.subr.bf16.mxu0 %v8529_v39 }
 0x3bb   : > { %7797 = vmatpush2.bf16.msra.mxu1 %v9072_v18  ;;  %v8402_v18 = vcombine.low %v451_v7, %v467_v46 }
 0x3bc   : > { %7798 = vmatprep.subr.bf16.mxu1 %v9041_v40  ;;  %v8371_v40 = vcombine.high %v419_v42, %v435_v30 }
 0x3bd   : > { %7756 = vmatpush2.bf16.msra.mxu0 %v8528_v47 }
 0x3be   : > { %7757 = vmatprep.subr.bf16.mxu0 %v8497_v59  ;;  %v915_v59 = vld [vmem:[%s9632_s29 + $0x13f0] sm:$0xff] }
 0x3bf   : > { %7799 = vmatpush2.bf16.msra.mxu1 %v9040_v63  ;;  %v899_v63 = vld [vmem:[%s9632_s29 + $0x1370] sm:$0xff] }
 0x3c0   : > { %7800 = vmatprep.subr.bf16.mxu1 %v9009_v50  ;;  %v8851_v53 = vcombine.high %v899_v63, %v915_v59  ;;  %v8850_v61 = vcombine.low %v899_v63, %v915_v59  ;;  %v675_v59 = vld [vmem:[%s9632_s29 + $0xc70] sm:$0xff] }
 0x3c1   : > { %7758 = vmatpush2.bf16.msra.mxu0 %v8496_v54  ;;  %v355_v54 = vld [vmem:[%s9632_s29 + $0x270] sm:$0xff] }
 0x3c2   : > { %7813 = vmatprep.subr.bf16.mxu0 %v8467_v58  ;;  %v867_v58 = vld [vmem:[%s9632_s29 + $0x1270] sm:$0xff] }
 0x3c3   : > { %7801 = vmatpush2.bf16.msra.mxu1 %v9008_v57  ;;  %v371_v57 = vld [vmem:[%s9632_s29 + $0x2f0] sm:$0xff] }
 0x3c4   : > { %7856 = vmatprep.subr.bf16.mxu1 %v8979_v49  ;;  %v7503_v8 = vpop.f32.mrf.mxu0  ;;  %7760 = vmatmul.mubr.bf16.vlgmr.msra.gmra.mxu0 %v10745_v38  ;;  %v883_v49 = vld [vmem:[%s9632_s29 + $0x12f0] sm:$0xff]  ;;  %v8307_v62 = vcombine.high %v355_v54, %v371_v57 }
 0x3c5   : > { %v7504_v13 = vadd.f32 %v7503_v8, %v1392_v0  ;;  %7814 = vmatpush1.bf16.msra.mxu0 %v8466_v1  ;;  %7845 = vmatprep.mubr.bf16.mxu0 %v10665_v10  ;;  %v8914_v10 = vcombine.low %v963_v9, %v979_v11  ;;  %v8819_v17 = vcombine.high %v867_v58, %v883_v49  ;;  %v339_v1 = vld [vmem:[%s9632_s29 + $0x1f0] sm:$0xff] }
 0x3c6   : > { %v7546_v14 = vpop.f32.mrf.mxu1  ;;  %7803 = vmatmul.mubr.bf16.vlgmr.msra.gmra.mxu1 %v10753_v28  ;;  %v7505_v16 = vpop.f32.mrf.mxu0  ;;  %7815 = vmatprep.subr.bf16.mxu0 %v8435_v29  ;;  %v851_v29 = vld [vmem:[%s9632_s29 + $0x11f0] sm:$0xff] }
 0x3c7   : > { %7857 = vmatpush1.bf16.msra.mxu1 %v8978_v3  ;;  %v7547_v21 = vadd.f32 %v7546_v14, %v7504_v13  ;;  %v7506_v23 = vadd.f32 %v7505_v16, %v1396_v4  ;;  %7888 = vmatprep.mubr.bf16.mxu1 %v10673_v55  ;;  %v8883_v55 = vcombine.high %v931_v33, %v947_v34  ;;  %v835_v3 = vld [vmem:[%s9632_s29 + $0x1170] sm:$0xff] }
 0x3c8   : > { %v7548_v24 = vpop.f32.mrf.mxu1  ;;  %7858 = vmatprep.subr.bf16.mxu1 %v8947_v5  ;;  %v7507_v31 = vpop.f32.mrf.mxu0  ;;  %v8818_v5 = vcombine.low %v867_v58, %v883_v49  ;;  %v8787_v46 = vcombine.high %v835_v3, %v851_v29  ;;  %v291_v8 = vld [vmem:[%s9632_s29 + $0x70] sm:$0xff] }
 0x3c9   : > { %8005 = vst [vmem:[%s9994_s5 + $0xa0] sm:$0xff] %v7547_v21  ;;  %v7549_v35 = vadd.f32 %v7548_v24, %v7506_v23  ;;  %v7508_v36 = vadd.f32 %v7507_v31, %v1392_v0  ;;  %7816 = vmatpush1.bf16.msra.mxu0 %v8434_v48  ;;  %v323_v0 = vld [vmem:[%s9632_s29 + $0x170] sm:$0xff]  ;;  %v8786_v48 = vcombine.low %v835_v3, %v851_v29 }
 0x3ca   : > { %v7550_v37 = vpop.f32.mrf.mxu1  ;;  %v7509_v39 = vpop.f32.mrf.mxu0  ;;  %7817 = vmatprep.subr.bf16.mxu0 %v8403_v20  ;;  %v8275_v7 = vcombine.high %v323_v0, %v339_v1  ;;  %v307_v9 = vld [vmem:[%s9632_s29 + $0xf0] sm:$0xff]  ;;  %v8274_v14 = vcombine.low %v323_v0, %v339_v1 }
 0x3cb   : > { %7859 = vmatpush1.bf16.msra.mxu1 %v8946_v19  ;;  %8006 = vst [vmem:[%s9994_s5 + $0xa8] sm:$0xff] %v7549_v35  ;;  %v7551_v41 = vadd.f32 %v7550_v37, %v7508_v36  ;;  %v7510_v15 = vadd.f32 %v7509_v39, %v1396_v4  ;;  %v8306_v4 = vcombine.low %v355_v54, %v371_v57  ;;  %v803_v11 = vld [vmem:[%s9632_s29 + $0x1070] sm:$0xff] }
 0x3cc   : > { %7860 = vmatprep.subr.bf16.mxu1 %v8915_v25  ;;  %v7552_v47 = vpop.f32.mrf.mxu1  ;;  %v819_v13 = vld [vmem:[%s9632_s29 + $0x10f0] sm:$0xff]  ;;  %v8243_v16 = vcombine.high %v291_v8, %v307_v9  ;;  %v8242_v25 = vcombine.low %v291_v8, %v307_v9 }
 0x3cd   : > { %8037 = vst [vmem:[%s9994_s5 + $0x1a0] sm:$0xff] %v7551_v41  ;;  %v7553_v50 = vadd.f32 %v7552_v47, %v7510_v15  ;;  %7818 = vmatpush1.bf16.msra.mxu0 %v8402_v18  ;;  %v8755_v19 = vcombine.high %v803_v11, %v819_v13  ;;  %v771_v20 = vld [vmem:[%s9632_s29 + $0xf70] sm:$0xff]  ;;  %v8754_v42 = vcombine.low %v803_v11, %v819_v13 }
 0x3ce   : > { %7819 = vmatprep.subr.bf16.mxu0 %v8371_v40  ;;  %v787_v21 = vld [vmem:[%s9632_s29 + $0xff0] sm:$0xff] }
 0x3cf   : > { %7861 = vmatpush1.bf16.msra.mxu1 %v8914_v10  ;;  %8038 = vst [vmem:[%s9994_s5 + $0x1a8] sm:$0xff] %v7553_v50  ;;  %v1283_v23 = vld [vmem:[%s9632_s29 + $0x1f70] sm:$0xff]  ;;  %v8723_v30 = vcombine.high %v771_v20, %v787_v21  ;;  %v8722_v37 = vcombine.low %v771_v20, %v787_v21 }
 0x3d0   : > { %7862 = vmatprep.subr.bf16.mxu1 %v8883_v55  ;;  %v1299_v24 = vld [vmem:[%s9632_s29 + $0x1ff0] sm:$0xff] }
 0x3d1   : > { %7820 = vmatpush1.bf16.msra.mxu0 %v8370_v43  ;;  %v9235_v31 = vcombine.high %v1283_v23, %v1299_v24  ;;  %v739_v33 = vld [vmem:[%s9632_s29 + $0xe70] sm:$0xff]  ;;  %v9234_v18 = vcombine.low %v1283_v23, %v1299_v24 }
 0x3d2   : > { %7821 = vmatprep.subr.bf16.mxu0 %v8339_v52  ;;  %v755_v34 = vld [vmem:[%s9632_s29 + $0xef0] sm:$0xff] }
 0x3d3   : > { %7863 = vmatpush1.bf16.msra.mxu1 %v8882_v51  ;;  %v1251_v35 = vld [vmem:[%s9632_s29 + $0x1e70] sm:$0xff]  ;;  %v8691_v39 = vcombine.high %v739_v33, %v755_v34  ;;  %v8690_v45 = vcombine.low %v739_v33, %v755_v34 }
 0x3d4   : > { %7864 = vmatprep.subr.bf16.mxu1 %v8851_v53  ;;  %v1267_v36 = vld [vmem:[%s9632_s29 + $0x1ef0] sm:$0xff] }
 0x3d5   : > { %7822 = vmatpush1.bf16.msra.mxu0 %v8338_v60  ;;  %v9203_v10 = vcombine.high %v1251_v35, %v1267_v36  ;;  %v707_v40 = vld [vmem:[%s9632_s29 + $0xd70] sm:$0xff]  ;;  %v9202_v56 = vcombine.low %v1251_v35, %v1267_v36  ;;  %v516_v35 = vld [vmem:[%s9632_s29 + $0x778] sm:$0xff] }
 0x3d6   : > { %7823 = vmatprep.subr.bf16.mxu0 %v8307_v62  ;;  %v723_v41 = vld [vmem:[%s9632_s29 + $0xdf0] sm:$0xff]  ;;  %v532_v36 = vld [vmem:[%s9632_s29 + $0x7f8] sm:$0xff] }
 0x3d7   : > { %7865 = vmatpush1.bf16.msra.mxu1 %v8850_v61  ;;  %v1219_v15 = vld [vmem:[%s9632_s29 + $0x1d70] sm:$0xff]  ;;  %v8659_v47 = vcombine.high %v707_v40, %v723_v41  ;;  %v8658_v52 = vcombine.low %v707_v40, %v723_v41  ;;  %v8469_v40 = vcombine.high %v516_v35, %v532_v36 }
 0x3d8   : > { %7866 = vmatprep.subr.bf16.mxu1 %v8819_v17  ;;  %v1235_v55 = vld [vmem:[%s9632_s29 + $0x1df0] sm:$0xff] }
 0x3d9   : > { %7824 = vmatpush1.bf16.msra.mxu0 %v8306_v4  ;;  %v9171_v63 = vcombine.high %v1219_v15, %v1235_v55  ;;  %v691_v50 = vld [vmem:[%s9632_s29 + $0xcf0] sm:$0xff]  ;;  %v9170_v53 = vcombine.low %v1219_v15, %v1235_v55  ;;  %v484_v15 = vld [vmem:[%s9632_s29 + $0x678] sm:$0xff] }
 0x3da   : > { %7825 = vmatprep.subr.bf16.mxu0 %v8275_v7  ;;  %v1187_v43 = vld [vmem:[%s9632_s29 + $0x1c70] sm:$0xff]  ;;  %v8627_v54 = vcombine.high %v675_v59, %v691_v50  ;;  %v8626_v62 = vcombine.low %v675_v59, %v691_v50  ;;  %v500_v55 = vld [vmem:[%s9632_s29 + $0x6f8] sm:$0xff]  ;;  %v8468_v59 = vcombine.low %v516_v35, %v532_v36 }
 0x3db   : > { %7867 = vmatpush1.bf16.msra.mxu1 %v8818_v5  ;;  %v1203_v51 = vld [vmem:[%s9632_s29 + $0x1cf0] sm:$0xff] }
 0x3dc   : > { %7868 = vmatprep.subr.bf16.mxu1 %v8787_v46  ;;  %v9139_v57 = vcombine.high %v1187_v43, %v1203_v51  ;;  %v643_v58 = vld [vmem:[%s9632_s29 + $0xb70] sm:$0xff]  ;;  %v9138_v17 = vcombine.low %v1187_v43, %v1203_v51  ;;  %v8437_v43 = vcombine.high %v484_v15, %v500_v55 }
 0x3dd   : > { %7826 = vmatpush1.bf16.msra.mxu0 %v8274_v14  ;;  %v659_v49 = vld [vmem:[%s9632_s29 + $0xbf0] sm:$0xff] }
 0x3de   : > { %7827 = vmatprep.subr.bf16.mxu0 %v8243_v16  ;;  %v1155_v60 = vld [vmem:[%s9632_s29 + $0x1b70] sm:$0xff]  ;;  %v8595_v0 = vcombine.high %v643_v58, %v659_v49  ;;  %v8594_v7 = vcombine.low %v643_v58, %v659_v49  ;;  %v964_v58 = vld [vmem:[%s9632_s29 + $0x1578] sm:$0xff] }
 0x3df   : > { %7869 = vmatpush1.bf16.msra.mxu1 %v8786_v48  ;;  %v1171_v61 = vld [vmem:[%s9632_s29 + $0x1bf0] sm:$0xff]  ;;  %v980_v49 = vld [vmem:[%s9632_s29 + $0x15f8] sm:$0xff] }
 0x3e0   : > { %7870 = vmatprep.subr.bf16.mxu1 %v8755_v19  ;;  %v9107_v1 = vcombine.high %v1155_v60, %v1171_v61  ;;  %v611_v3 = vld [vmem:[%s9632_s29 + $0xa70] sm:$0xff]  ;;  %v9106_v46 = vcombine.low %v1155_v60, %v1171_v61 }
 0x3e1   : > { %7828 = vmatpush1.bf16.msra.mxu0 %v8242_v25  ;;  %v627_v29 = vld [vmem:[%s9632_s29 + $0xaf0] sm:$0xff] }
 0x3e2   : > { %7829 = vmatprep.subr.bf16.mxu0 %v8723_v30  ;;  %v1123_v4 = vld [vmem:[%s9632_s29 + $0x1a70] sm:$0xff]  ;;  %v8563_v8 = vcombine.high %v611_v3, %v627_v29  ;;  %v8562_v16 = vcombine.low %v611_v3, %v627_v29 }
 0x3e3   : > { %7871 = vmatpush1.bf16.msra.mxu1 %v8754_v42  ;;  %v1139_v5 = vld [vmem:[%s9632_s29 + $0x1af0] sm:$0xff] }
 0x3e4   : > { %7872 = vmatprep.subr.bf16.mxu1 %v9235_v31  ;;  %v9075_v9 = vcombine.high %v1123_v4, %v1139_v5  ;;  %v579_v11 = vld [vmem:[%s9632_s29 + $0x970] sm:$0xff]  ;;  %v9074_v19 = vcombine.low %v1123_v4, %v1139_v5  ;;  %v8917_v4 = vcombine.high %v964_v58, %v980_v49  ;;  %v420_v5 = vld [vmem:[%s9632_s29 + $0x478] sm:$0xff] }
 0x3e5   : > { %7830 = vmatpush2.bf16.msra.mxu0 %v8722_v37  ;;  %v595_v13 = vld [vmem:[%s9632_s29 + $0x9f0] sm:$0xff]  ;;  %v1028_v37 = vld [vmem:[%s9632_s29 + $0x1778] sm:$0xff] }
 0x3e6   : > { %7831 = vmatprep.subr.bf16.mxu0 %v8691_v39  ;;  %v1091_v14 = vld [vmem:[%s9632_s29 + $0x1970] sm:$0xff]  ;;  %v8531_v20 = vcombine.high %v579_v11, %v595_v13  ;;  %v8530_v30 = vcombine.low %v579_v11, %v595_v13  ;;  %v9349_v11 = vld [vmem:[%s11082_s0 + $0xc] ss:$16 sps:$4 sm:$0xff]  }
 0x3e7   : > { %7873 = vmatpush2.bf16.msra.mxu1 %v9234_v18  ;;  %v1107_v48 = vld [vmem:[%s9632_s29 + $0x19f0] sm:$0xff]  ;;  %v1044_v18 = vld [vmem:[%s9632_s29 + $0x17f8] sm:$0xff] }
 0x3e8   : > { %7874 = vmatprep.subr.bf16.mxu1 %v9203_v10  ;;  %v9043_v21 = vcombine.high %v1091_v14, %v1107_v48  ;;  %v547_v23 = vld [vmem:[%s9632_s29 + $0x870] sm:$0xff]  ;;  %v9042_v31 = vcombine.low %v1091_v14, %v1107_v48  ;;  %v8981_v41 = vcombine.high %v1028_v37, %v1044_v18  ;;  %v8980_v50 = vcombine.low %v1028_v37, %v1044_v18 }
 0x3e9   : > { %7832 = vmatpush2.bf16.msra.mxu0 %v8690_v45  ;;  %v563_v24 = vld [vmem:[%s9632_s29 + $0x8f0] sm:$0xff]  ;;  %v996_v45 = vld [vmem:[%s9632_s29 + $0x1678] sm:$0xff] }
 0x3ea   : > { %7833 = vmatprep.subr.bf16.mxu0 %v8659_v47  ;;  %v1059_v25 = vld [vmem:[%s9632_s29 + $0x1870] sm:$0xff]  ;;  %v8499_v33 = vcombine.high %v547_v23, %v563_v24  ;;  %v8498_v39 = vcombine.low %v547_v23, %v563_v24 }
 0x3eb   : > { %7875 = vmatpush2.bf16.msra.mxu1 %v9202_v56  ;;  %v1075_v42 = vld [vmem:[%s9632_s29 + $0x18f0] sm:$0xff]  ;;  %v1012_v56 = vld [vmem:[%s9632_s29 + $0x16f8] sm:$0xff] }
 0x3ec   : > { %7876 = vmatprep.subr.bf16.mxu1 %v9171_v63  ;;  %v9011_v34 = vcombine.high %v1059_v25, %v1075_v42  ;;  %v9010_v10 = vcombine.low %v1059_v25, %v1075_v42  ;;  %v9347_v47 = vld [vmem:[%s9640_s30 + $0x10] sm:$0xff]  ;;  %v388_v42 = vld [vmem:[%s9632_s29 + $0x378] sm:$0xff] }
 0x3ed   : > { %7834 = vmatpush2.bf16.msra.mxu0 %v8658_v52  ;;  %v1400_v63 = vrot.slane %v9347_v47, %v10227_v22  ;;  %v1404_v51 = vrot.slane %v9347_v47, %v10230_v26  ;;  %v8949_v52 = vcombine.high %v996_v45, %v1012_v56 }
 0x3ee   : > { %7835 = vmatprep.subr.bf16.mxu0 %v8627_v54  ;;  %v468_v54 = vld [vmem:[%s9632_s29 + $0x5f8] sm:$0xff] }
 0x3ef   : > { %7877 = vmatpush2.bf16.msra.mxu1 %v9170_v53  ;;  %v452_v53 = vld [vmem:[%s9632_s29 + $0x578] sm:$0xff] }
 0x3f0   : > { %7878 = vmatprep.subr.bf16.mxu1 %v9139_v57 }
 0x3f1   : > { %7836 = vmatpush2.bf16.msra.mxu0 %v8626_v62  ;;  %v8436_v62 = vcombine.low %v484_v15, %v500_v55  ;;  %v884_v15 = vld [vmem:[%s9632_s29 + $0x12f8] sm:$0xff] }
 0x3f2   : > { %7837 = vmatprep.subr.bf16.mxu0 %v8595_v0  ;;  %v8948_v0 = vcombine.low %v996_v45, %v1012_v56 }
 0x3f3   : > { %7879 = vmatpush2.bf16.msra.mxu1 %v9138_v17 }
 0x3f4   : > { %7880 = vmatprep.subr.bf16.mxu1 %v9107_v1  ;;  %v8405_v1 = vcombine.high %v452_v53, %v468_v54 }
 0x3f5   : > { %7838 = vmatpush2.bf16.msra.mxu0 %v8594_v7  ;;  %v436_v7 = vld [vmem:[%s9632_s29 + $0x4f8] sm:$0xff] }
 0x3f6   : > { %7839 = vmatprep.subr.bf16.mxu0 %v8563_v8  ;;  %v932_v8 = vld [vmem:[%s9632_s29 + $0x1478] sm:$0xff]  ;;  %v8372_v36 = vcombine.low %v420_v5, %v436_v7 }
 0x3f7   : > { %7881 = vmatpush2.bf16.msra.mxu1 %v9106_v46 }
 0x3f8   : > { %7882 = vmatprep.subr.bf16.mxu1 %v9075_v9  ;;  %v948_v9 = vld [vmem:[%s9632_s29 + $0x14f8] sm:$0xff] }
 0x3f9   : > { %7840 = vmatpush2.bf16.msra.mxu0 %v8562_v16  ;;  %v8404_v16 = vcombine.low %v452_v53, %v468_v54  ;;  %v8885_v25 = vcombine.high %v932_v8, %v948_v9  ;;  %v8884_v37 = vcombine.low %v932_v8, %v948_v9  ;;  %v756_v8 = vld [vmem:[%s9632_s29 + $0xef8] sm:$0xff] }
 0x3fa   : > { %7841 = vmatprep.subr.bf16.mxu0 %v8531_v20  ;;  %v8916_v20 = vcombine.low %v964_v58, %v980_v49  ;;  %v308_v58 = vld [vmem:[%s9632_s29 + $0xf8] sm:$0xff] }
 0x3fb   : > { %7883 = vmatpush2.bf16.msra.mxu1 %v9074_v19  ;;  %v804_v49 = vld [vmem:[%s9632_s29 + $0x1078] sm:$0xff] }
 0x3fc   : > { %7884 = vmatprep.subr.bf16.mxu1 %v9043_v21  ;;  %v8373_v21 = vcombine.high %v420_v5, %v436_v7  ;;  %v1252_v9 = vld [vmem:[%s9632_s29 + $0x1e78] sm:$0xff] }
 0x3fd   : > { %7842 = vmatpush2.bf16.msra.mxu0 %v8530_v30  ;;  %v404_v30 = vld [vmem:[%s9632_s29 + $0x3f8] sm:$0xff] }
 0x3fe   : > { %7843 = vmatprep.subr.bf16.mxu0 %v8499_v33  ;;  %v900_v33 = vld [vmem:[%s9632_s29 + $0x1378] sm:$0xff]  ;;  %v8341_v18 = vcombine.high %v388_v42, %v404_v30  ;;  %v8340_v55 = vcombine.low %v388_v42, %v404_v30 }
 0x3ff   : > { %7885 = vmatpush2.bf16.msra.mxu1 %v9042_v31 }
 0x400   : > { %7886 = vmatprep.subr.bf16.mxu1 %v9011_v34  ;;  %v916_v34 = vld [vmem:[%s9632_s29 + $0x13f8] sm:$0xff] }
 0x401   : > { %7844 = vmatpush2.bf16.msra.mxu0 %v8498_v39  ;;  %v8853_v39 = vcombine.high %v900_v33, %v916_v34  ;;  %v8852_v45 = vcombine.low %v900_v33, %v916_v34  ;;  %v692_v33 = vld [vmem:[%s9632_s29 + $0xcf8] sm:$0xff] }
 0x402   : > { %7899 = vmatprep.subr.bf16.mxu0 %v8469_v40  ;;  %v372_v40 = vld [vmem:[%s9632_s29 + $0x2f8] sm:$0xff] }
 0x403   : > { %7887 = vmatpush2.bf16.msra.mxu1 %v9010_v10  ;;  %v356_v10 = vld [vmem:[%s9632_s29 + $0x278] sm:$0xff] }
 0x404   : > { %7942 = vmatprep.subr.bf16.mxu1 %v8981_v41  ;;  %v7589_v57 = vpop.f32.mrf.mxu0  ;;  %7846 = vmatmul.mubr.bf16.vlgmr.msra.gmra.mxu0 %v10745_v38  ;;  %v868_v41 = vld [vmem:[%s9632_s29 + $0x1278] sm:$0xff]  ;;  %v8309_v56 = vcombine.high %v356_v10, %v372_v40 }
 0x405   : > { %v7590_v60 = vadd.f32 %v7589_v57, %v1400_v63  ;;  %7900 = vmatpush1.bf16.msra.mxu0 %v8468_v59  ;;  %v8821_v47 = vcombine.high %v868_v41, %v884_v15  ;;  %v340_v59 = vld [vmem:[%s9632_s29 + $0x1f8] sm:$0xff] }
 0x406   : > { %v7632_v61 = vpop.f32.mrf.mxu1  ;;  %7889 = vmatmul.mubr.bf16.vlgmr.msra.gmra.mxu1 %v10753_v28  ;;  %v7591_v17 = vpop.f32.mrf.mxu0  ;;  %7901 = vmatprep.subr.bf16.mxu0 %v8437_v43  ;;  %v9348_v28 = vld [vmem:[%s11082_s0 + $0x4] ss:$16 sps:$4 sm:$0xff]   ;;  %v852_v43 = vld [vmem:[%s9632_s29 + $0x11f8] sm:$0xff] }
 0x407   : > { %7943 = vmatpush1.bf16.msra.mxu1 %v8980_v50  ;;  %v7633_v3 = vadd.f32 %v7632_v61, %v7590_v60  ;;  %v7592_v38 = vadd.f32 %v7591_v17, %v1404_v51  ;;  %7931 = vmatprep.mubr.bf16.mxu0 %v9348_v28  ;;  %v836_v50 = vld [vmem:[%s9632_s29 + $0x1178] sm:$0xff] }
 0x408   : > { %v7634_v29 = vpop.f32.mrf.mxu1  ;;  %7944 = vmatprep.subr.bf16.mxu1 %v8949_v52  ;;  %v7593_v46 = vpop.f32.mrf.mxu0  ;;  %7974 = vmatprep.mubr.bf16.mxu1 %v9349_v11  ;;  %v8820_v52 = vcombine.low %v868_v41, %v884_v15  ;;  %v8789_v54 = vcombine.high %v836_v50, %v852_v43  ;;  %v292_v57 = vld [vmem:[%s9632_s29 + $0x78] sm:$0xff] }
 0x409   : > { %8007 = vst [vmem:[%s9994_s5 + $0xb0] sm:$0xff] %v7633_v3  ;;  %v7635_v13 = vadd.f32 %v7634_v29, %v7592_v38  ;;  %v7594_v14 = vadd.f32 %v7593_v46, %v1400_v63  ;;  %7902 = vmatpush1.bf16.msra.mxu0 %v8436_v62  ;;  %v324_v63 = vld [vmem:[%s9632_s29 + $0x178] sm:$0xff]  ;;  %v8788_v62 = vcombine.low %v836_v50, %v852_v43 }
 0x40a   : > { %v7636_v48 = vpop.f32.mrf.mxu1  ;;  %v7595_v19 = vpop.f32.mrf.mxu0  ;;  %7903 = vmatprep.subr.bf16.mxu0 %v8405_v1  ;;  %v8277_v53 = vcombine.high %v324_v63, %v340_v59  ;;  %v820_v60 = vld [vmem:[%s9632_s29 + $0x10f8] sm:$0xff]  ;;  %v8276_v61 = vcombine.low %v324_v63, %v340_v59  ;;  %v8245_v17 = vcombine.high %v292_v57, %v308_v58 }
 0x40b   : > { %7945 = vmatpush1.bf16.msra.mxu1 %v8948_v0  ;;  %8008 = vst [vmem:[%s9994_s5 + $0xb8] sm:$0xff] %v7635_v13  ;;  %v7637_v23 = vadd.f32 %v7636_v48, %v7594_v14  ;;  %v7596_v24 = vadd.f32 %v7595_v19, %v1404_v51  ;;  %v8308_v51 = vcombine.low %v356_v10, %v372_v40  ;;  %v772_v1 = vld [vmem:[%s9632_s29 + $0xf78] sm:$0xff] }
 0x40c   : > { %7946 = vmatprep.subr.bf16.mxu1 %v8917_v4  ;;  %v7638_v31 = vpop.f32.mrf.mxu1  ;;  %v8757_v0 = vcombine.high %v804_v49, %v820_v60  ;;  %v788_v3 = vld [vmem:[%s9632_s29 + $0xff8] sm:$0xff]  ;;  %v8244_v4 = vcombine.low %v292_v57, %v308_v58  ;;  %v8756_v5 = vcombine.low %v804_v49, %v820_v60 }
 0x40d   : > { %8039 = vst [vmem:[%s9994_s5 + $0x1b0] sm:$0xff] %v7637_v23  ;;  %v7639_v35 = vadd.f32 %v7638_v31, %v7596_v24  ;;  %7904 = vmatpush1.bf16.msra.mxu0 %v8404_v16  ;;  %v1284_v38 = vld [vmem:[%s9632_s29 + $0x1f78] sm:$0xff]  ;;  %v8725_v7 = vcombine.high %v772_v1, %v788_v3  ;;  %v8724_v13 = vcombine.low %v772_v1, %v788_v3 }
 0x40e   : > { %7905 = vmatprep.subr.bf16.mxu0 %v8373_v21  ;;  %v1300_v29 = vld [vmem:[%s9632_s29 + $0x1ff8] sm:$0xff] }
 0x40f   : > { %7947 = vmatpush1.bf16.msra.mxu1 %v8916_v20  ;;  %8040 = vst [vmem:[%s9994_s5 + $0x1b8] sm:$0xff] %v7639_v35  ;;  %v9237_v28 = vcombine.high %v1284_v38, %v1300_v29  ;;  %v740_v46 = vld [vmem:[%s9632_s29 + $0xe78] sm:$0xff]  ;;  %v9236_v14 = vcombine.low %v1284_v38, %v1300_v29 }
 0x410   : > { %7948 = vmatprep.subr.bf16.mxu1 %v8885_v25  ;;  %v1268_v11 = vld [vmem:[%s9632_s29 + $0x1ef8] sm:$0xff]  ;;  %v8693_v48 = vcombine.high %v740_v46, %v756_v8  ;;  %v8692_v24 = vcombine.low %v740_v46, %v756_v8 }
 0x411   : > { %7906 = vmatpush1.bf16.msra.mxu0 %v8372_v36  ;;  %v9205_v16 = vcombine.high %v1252_v9, %v1268_v11  ;;  %v708_v19 = vld [vmem:[%s9632_s29 + $0xd78] sm:$0xff]  ;;  %v9204_v25 = vcombine.low %v1252_v9, %v1268_v11 }
 0x412   : > { %7907 = vmatprep.subr.bf16.mxu0 %v8341_v18  ;;  %v724_v20 = vld [vmem:[%s9632_s29 + $0xdf8] sm:$0xff] }
 0x413   : > { %7949 = vmatpush1.bf16.msra.mxu1 %v8884_v37  ;;  %v1220_v21 = vld [vmem:[%s9632_s29 + $0x1d78] sm:$0xff]  ;;  %v8661_v42 = vcombine.high %v708_v19, %v724_v20  ;;  %v8660_v36 = vcombine.low %v708_v19, %v724_v20 }
 0x414   : > { %7950 = vmatprep.subr.bf16.mxu1 %v8853_v39  ;;  %v1236_v23 = vld [vmem:[%s9632_s29 + $0x1df8] sm:$0xff] }
 0x415   : > { %7908 = vmatpush1.bf16.msra.mxu0 %v8340_v55  ;;  %v9173_v30 = vcombine.high %v1220_v21, %v1236_v23  ;;  %v676_v31 = vld [vmem:[%s9632_s29 + $0xc78] sm:$0xff]  ;;  %v9172_v37 = vcombine.low %v1220_v21, %v1236_v23 }
 0x416   : > { %7909 = vmatprep.subr.bf16.mxu0 %v8309_v56  ;;  %v1188_v34 = vld [vmem:[%s9632_s29 + $0x1c78] sm:$0xff]  ;;  %v8629_v18 = vcombine.high %v676_v31, %v692_v33  ;;  %v8628_v55 = vcombine.low %v676_v31, %v692_v33 }
 0x417   : > { %7951 = vmatpush1.bf16.msra.mxu1 %v8852_v45  ;;  %v1204_v35 = vld [vmem:[%s9632_s29 + $0x1cf8] sm:$0xff] }
 0x418   : > { %7952 = vmatprep.subr.bf16.mxu1 %v8821_v47  ;;  %v9141_v39 = vcombine.high %v1188_v34, %v1204_v35  ;;  %v644_v10 = vld [vmem:[%s9632_s29 + $0xb78] sm:$0xff]  ;;  %v9140_v45 = vcombine.low %v1188_v34, %v1204_v35 }
 0x419   : > { %7910 = vmatpush1.bf16.msra.mxu0 %v8308_v51  ;;  %v660_v40 = vld [vmem:[%s9632_s29 + $0xbf8] sm:$0xff] }
 0x41a   : > { %7911 = vmatprep.subr.bf16.mxu0 %v8277_v53  ;;  %v1156_v41 = vld [vmem:[%s9632_s29 + $0x1b78] sm:$0xff]  ;;  %v8597_v56 = vcombine.high %v644_v10, %v660_v40  ;;  %v8596_v51 = vcombine.low %v644_v10, %v660_v40 }
 0x41b   : > { %7953 = vmatpush1.bf16.msra.mxu1 %v8820_v52  ;;  %v1172_v15 = vld [vmem:[%s9632_s29 + $0x1bf8] sm:$0xff] }
 0x41c   : > { %7954 = vmatprep.subr.bf16.mxu1 %v8789_v54  ;;  %v9109_v47 = vcombine.high %v1156_v41, %v1172_v15  ;;  %v612_v63 = vld [vmem:[%s9632_s29 + $0xa78] sm:$0xff]  ;;  %v9108_v52 = vcombine.low %v1156_v41, %v1172_v15 }
 0x41d   : > { %7912 = vmatpush1.bf16.msra.mxu0 %v8276_v61  ;;  %v628_v59 = vld [vmem:[%s9632_s29 + $0xaf8] sm:$0xff] }
 0x41e   : > { %7913 = vmatprep.subr.bf16.mxu0 %v8245_v17  ;;  %v1124_v50 = vld [vmem:[%s9632_s29 + $0x1a78] sm:$0xff]  ;;  %v8565_v53 = vcombine.high %v612_v63, %v628_v59  ;;  %v8564_v61 = vcombine.low %v612_v63, %v628_v59 }
 0x41f   : > { %7955 = vmatpush1.bf16.msra.mxu1 %v8788_v62  ;;  %v1140_v43 = vld [vmem:[%s9632_s29 + $0x1af8] sm:$0xff] }
 0x420   : > { %7956 = vmatprep.subr.bf16.mxu1 %v8757_v0  ;;  %v9077_v54 = vcombine.high %v1124_v50, %v1140_v43  ;;  %v580_v57 = vld [vmem:[%s9632_s29 + $0x978] sm:$0xff]  ;;  %v9076_v62 = vcombine.low %v1124_v50, %v1140_v43 }
 0x421   : > { %7914 = vmatpush1.bf16.msra.mxu0 %v8244_v4  ;;  %v596_v58 = vld [vmem:[%s9632_s29 + $0x9f8] sm:$0xff] }
 0x422   : > { %7915 = vmatprep.subr.bf16.mxu0 %v8725_v7  ;;  %v1092_v49 = vld [vmem:[%s9632_s29 + $0x1978] sm:$0xff]  ;;  %v8533_v17 = vcombine.high %v580_v57, %v596_v58  ;;  %v8532_v4 = vcombine.low %v580_v57, %v596_v58 }
 0x423   : > { %7957 = vmatpush1.bf16.msra.mxu1 %v8756_v5  ;;  %v1108_v60 = vld [vmem:[%s9632_s29 + $0x19f8] sm:$0xff] }
 0x424   : > { %7958 = vmatprep.subr.bf16.mxu1 %v9237_v28  ;;  %v9045_v0 = vcombine.high %v1092_v49, %v1108_v60  ;;  %v548_v1 = vld [vmem:[%s9632_s29 + $0x878] sm:$0xff]  ;;  %v9044_v5 = vcombine.low %v1092_v49, %v1108_v60 }
 0x425   : > { %7916 = vmatpush2.bf16.msra.mxu0 %v8724_v13  ;;  %v564_v3 = vld [vmem:[%s9632_s29 + $0x8f8] sm:$0xff] }
 0x426   : > { %7917 = vmatprep.subr.bf16.mxu0 %v8693_v48  ;;  %v1060_v38 = vld [vmem:[%s9632_s29 + $0x1878] sm:$0xff]  ;;  %v8501_v7 = vcombine.high %v548_v1, %v564_v3  ;;  %v8500_v46 = vcombine.low %v548_v1, %v564_v3  ;;  %v9350_v48 = vld [vmem:[%s11082_s0] ss:$16 sps:$4 sm:$0xff]  }
 0x427   : > { %7959 = vmatpush2.bf16.msra.mxu1 %v9236_v14  ;;  %v1076_v29 = vld [vmem:[%s9632_s29 + $0x18f8] sm:$0xff] }
 0x428   : > { %7960 = vmatprep.subr.bf16.mxu1 %v9205_v16  ;;  %v9013_v28 = vcombine.high %v1060_v38, %v1076_v29  ;;  %v9012_v8 = vcombine.low %v1060_v38, %v1076_v29  ;;  %v10970_v9 = vld [vmem:[%s9640_s30 + $0x18] sm:$0xff] }
 0x429   : > { %7918 = vmatpush2.bf16.msra.mxu0 %v8692_v24  ;;  %v1408_v11 = vrot.slane %v10970_v9, %v9953_v27  ;;  %v1412_v13 = vrot.slane %v10970_v9, %v9959_v32  ;;  %v9351_v20 = vld [vmem:[%s11082_s0 + $0x8] ss:$16 sps:$4 sm:$0xff]  }
 0x42a   : > { %7919 = vmatprep.subr.bf16.mxu0 %v8661_v42 }
 0x42b   : > { %7961 = vmatpush2.bf16.msra.mxu1 %v9204_v25 }
 0x42c   : > { %7962 = vmatprep.subr.bf16.mxu1 %v9173_v30 }
 0x42d   : > { %7920 = vmatpush2.bf16.msra.mxu0 %v8660_v36 }
 0x42e   : > { %7921 = vmatprep.subr.bf16.mxu0 %v8629_v18  ;;  %v1420_v18 = vrot.slane %v10970_v9, %v10056_v6 }
 0x42f   : > { %7963 = vmatpush2.bf16.msra.mxu1 %v9172_v37  ;;  %v1416_v37 = vrot.slane %v10970_v9, %v10053_v2 }
 0x430   : > { %7964 = vmatprep.subr.bf16.mxu1 %v9141_v39 }
 0x431   : > { %7922 = vmatpush2.bf16.msra.mxu0 %v8628_v55 }
 0x432   : > { %7923 = vmatprep.subr.bf16.mxu0 %v8597_v56 }
 0x433   : > { %7965 = vmatpush2.bf16.msra.mxu1 %v9140_v45 }
 0x434   : > { %7966 = vmatprep.subr.bf16.mxu1 %v9109_v47 }
 0x435   : > { %7924 = vmatpush2.bf16.msra.mxu0 %v8596_v51 }
 0x436   : > { %7925 = vmatprep.subr.bf16.mxu0 %v8565_v53  ;;  %v1428_v53 = vrot.slane %v10970_v9, %v10138_v12 }
 0x437   : > { %7967 = vmatpush2.bf16.msra.mxu1 %v9108_v52  ;;  %v1424_v52 = vrot.slane %v10970_v9, %v10135_v44 }
 0x438   : > { %7968 = vmatprep.subr.bf16.mxu1 %v9077_v54 }
 0x439   : > { %7926 = vmatpush2.bf16.msra.mxu0 %v8564_v61 }
 0x43a   : > { %7927 = vmatprep.subr.bf16.mxu0 %v8533_v17 }
 0x43b   : > { %7969 = vmatpush2.bf16.msra.mxu1 %v9076_v62 }
 0x43c   : > { %7970 = vmatprep.subr.bf16.mxu1 %v9045_v0 }
 0x43d   : > { %7928 = vmatpush2.bf16.msra.mxu0 %v8532_v4 }
 0x43e   : > { %7929 = vmatprep.subr.bf16.mxu0 %v8501_v7  ;;  %v1436_v7 = vrot.slane %v10970_v9, %v10230_v26 }
 0x43f   : > { %7971 = vmatpush2.bf16.msra.mxu1 %v9044_v5  ;;  %v1432_v5 = vrot.slane %v10970_v9, %v10227_v22 }
 0x440   : > { %7972 = vmatprep.subr.bf16.mxu1 %v9013_v28 }
 0x441   : > { %7930 = vmatpush2.bf16.msra.mxu0 %v8500_v46 }
 0x443   : > { %7973 = vmatpush2.bf16.msra.mxu1 %v9012_v8 }
 0x444   : > { %v7675_v14 = vpop.f32.mrf.mxu0  ;;  %7932 = vmatmul.mubr.bf16.vlgmr.msra.gmra.mxu0 %v9350_v48 }
 0x445   : > { %v7676_v16 = vadd.f32 %v7675_v14, %v1408_v11 }
 0x446   : > { %v7718_v19 = vpop.f32.mrf.mxu1  ;;  %7975 = vmatmul.mubr.bf16.vlgmr.msra.gmra.mxu1 %v9351_v20  ;;  %v7677_v27 = vpop.f32.mrf.mxu0 }
 0x447   : > { %v7719_v21 = vadd.f32 %v7718_v19, %v7676_v16  ;;  %v7678_v23 = vadd.f32 %v7677_v27, %v1412_v13 }
 0x448   : > { %v7720_v32 = vpop.f32.mrf.mxu1  ;;  %v7679_v24 = vpop.f32.mrf.mxu0 }
 0x449   : > { %8009 = vst [vmem:[%s9994_s5 + $0xc0] sm:$0xff] %v7719_v21  ;;  %v7721_v25 = vadd.f32 %v7720_v32, %v7678_v23  ;;  %v7680_v42 = vadd.f32 %v7679_v24, %v1408_v11 }
 0x44a   : > { %v7722_v30 = vpop.f32.mrf.mxu1  ;;  %v7681_v31 = vpop.f32.mrf.mxu0 }
 0x44b   : > { %8010 = vst [vmem:[%s9994_s5 + $0xc8] sm:$0xff] %v7721_v25  ;;  %v7723_v33 = vadd.f32 %v7722_v30, %v7680_v42  ;;  %v7682_v34 = vadd.f32 %v7681_v31, %v1412_v13 }
 0x44c   : > { %v7724_v35 = vpop.f32.mrf.mxu1 }
 0x44d   : > { %8041 = vst [vmem:[%s9994_s5 + $0x1c0] sm:$0xff] %v7723_v33  ;;  %v7725_v36 = vadd.f32 %v7724_v35, %v7682_v34 }
 0x44f   : > { %8042 = vst [vmem:[%s9994_s5 + $0x1c8] sm:$0xff] %v7725_v36 }
 0x484   : > { %v7761_v39 = vpop.f32.mrf.mxu0 }
 0x485   : > { %v7762_v10 = vadd.f32 %v7761_v39, %v1416_v37 }
 0x486   : > { %v7804_v40 = vpop.f32.mrf.mxu1  ;;  %v7763_v41 = vpop.f32.mrf.mxu0 }
 0x487   : > { %v7805_v15 = vadd.f32 %v7804_v40, %v7762_v10  ;;  %v7764_v55 = vadd.f32 %v7763_v41, %v1420_v18 }
 0x488   : > { %v7806_v45 = vpop.f32.mrf.mxu1  ;;  %v7765_v56 = vpop.f32.mrf.mxu0 }
 0x489   : > { %8011 = vst [vmem:[%s9994_s5 + $0xd0] sm:$0xff] %v7805_v15  ;;  %v7807_v47 = vadd.f32 %v7806_v45, %v7764_v55  ;;  %v7766_v63 = vadd.f32 %v7765_v56, %v1416_v37 }
 0x48a   : > { %v7808_v59 = vpop.f32.mrf.mxu1  ;;  %v7767_v50 = vpop.f32.mrf.mxu0 }
 0x48b   : > { %8012 = vst [vmem:[%s9994_s5 + $0xd8] sm:$0xff] %v7807_v47  ;;  %v7809_v2 = vadd.f32 %v7808_v59, %v7766_v63  ;;  %v7768_v43 = vadd.f32 %v7767_v50, %v1420_v18 }
 0x48c   : > { %v7810_v6 = vpop.f32.mrf.mxu1 }
 0x48d   : > { %8043 = vst [vmem:[%s9994_s5 + $0x1d0] sm:$0xff] %v7809_v2  ;;  %v7811_v51 = vadd.f32 %v7810_v6, %v7768_v43 }
 0x48f   : > { %8044 = vst [vmem:[%s9994_s5 + $0x1d8] sm:$0xff] %v7811_v51 }
 0x4c4   : > { %v7847_v54 = vpop.f32.mrf.mxu0 }
 0x4c5   : > { %v7848_v57 = vadd.f32 %v7847_v54, %v1424_v52 }
 0x4c6   : > { %v7890_v58 = vpop.f32.mrf.mxu1  ;;  %v7849_v49 = vpop.f32.mrf.mxu0 }
 0x4c7   : > { %v7891_v60 = vadd.f32 %v7890_v58, %v7848_v57  ;;  %v7850_v61 = vadd.f32 %v7849_v49, %v1428_v53 }
 0x4c8   : > { %v7892_v62 = vpop.f32.mrf.mxu1  ;;  %v7851_v17 = vpop.f32.mrf.mxu0 }
 0x4c9   : > { %8013 = vst [vmem:[%s9994_s5 + $0xe0] sm:$0xff] %v7891_v60  ;;  %v7893_v0 = vadd.f32 %v7892_v62, %v7850_v61  ;;  %v7852_v1 = vadd.f32 %v7851_v17, %v1424_v52 }
 0x4ca   : > { %v7894_v3 = vpop.f32.mrf.mxu1  ;;  %v7853_v38 = vpop.f32.mrf.mxu0 }
 0x4cb   : > { %8014 = vst [vmem:[%s9994_s5 + $0xe8] sm:$0xff] %v7893_v0  ;;  %v7895_v44 = vadd.f32 %v7894_v3, %v7852_v1  ;;  %v7854_v29 = vadd.f32 %v7853_v38, %v1428_v53 }
 0x4cc   : > { %v7896_v12 = vpop.f32.mrf.mxu1 }
 0x4cd   : > { %8045 = vst [vmem:[%s9994_s5 + $0x1e0] sm:$0xff] %v7895_v44  ;;  %v7897_v4 = vadd.f32 %v7896_v12, %v7854_v29 }
 0x4cf   : > { %8046 = vst [vmem:[%s9994_s5 + $0x1e8] sm:$0xff] %v7897_v4 }
 0x504   : > { %v7933_v28 = vpop.f32.mrf.mxu0 }
 0x505   : > { %v7934_v46 = vadd.f32 %v7933_v28, %v1432_v5 }
 0x506   : > { %v7976_v8 = vpop.f32.mrf.mxu1  ;;  %v7935_v11 = vpop.f32.mrf.mxu0 }
 0x507   : > { %v7977_v13 = vadd.f32 %v7976_v8, %v7934_v46  ;;  %v7936_v14 = vadd.f32 %v7935_v11, %v1436_v7 }
 0x508   : > { %v7978_v48 = vpop.f32.mrf.mxu1  ;;  %v7937_v16 = vpop.f32.mrf.mxu0 }
 0x509   : > { %8015 = vst [vmem:[%s9994_s5 + $0xf0] sm:$0xff] %v7977_v13  ;;  %v7979_v19 = vadd.f32 %v7978_v48, %v7936_v14  ;;  %v7938_v20 = vadd.f32 %v7937_v16, %v1432_v5 }
 0x50a   : > { %v7980_v27 = vpop.f32.mrf.mxu1  ;;  %v7939_v21 = vpop.f32.mrf.mxu0 }
 0x50b   : > { %8016 = vst [vmem:[%s9994_s5 + $0xf8] sm:$0xff] %v7979_v19  ;;  %v7981_v22 = vadd.f32 %v7980_v27, %v7938_v20  ;;  %v7940_v23 = vadd.f32 %v7939_v21, %v1436_v7  ;;  %8056 = sbr.rel (!%p9572_p9) target bundleno = 1324 (0x52c), region = 44 }
 0x50c   : > { %v7982_v26 = vpop.f32.mrf.mxu1 }
 0x50d   : > { %8047 = vst [vmem:[%s9994_s5 + $0x1f0] sm:$0xff] %v7981_v22  ;;  %v7983_v9 = vadd.f32 %v7982_v26, %v7940_v23 }
 0x50f   : > { %8048 = vst [vmem:[%s9994_s5 + $0x1f8] sm:$0xff] %v7983_v9 }
 0x510   : > { %s11102_s21 = smov (!%p8060_p8, %s8059_s21), 32 }
 0x511   : > { %s11017_s6 = sshll.u32 %s11102_s21, 8 }
 0x512   : > { %s8064_s8 = ssub.s32 8192, %s11017_s6 }
 0x513   : > { %8065 = vsyncadd %s8050_s18, %s8064_s8  ;;  %p9241_p9 = scmp.ne.s32.totalorder %s11017_s6, 0  ;;  %s9250_s25 = sshll.u32 %s9484_s15, 12 }
 0x514   : > { %s11027_s23 = scalar_lea.hbm %s11085_s3, %s9250_s25  ;;  %s9243_s1 = sshll.u32 %s11102_s21, 3 }
 0x515   : > { %s8073_s9 = sshll.u32 %s9994_s5, 4  ;;  %s9498_s4 = smov [#allocation7]   ;;  %s11031_s9 = int_to_ptr.vmem [resolvable:$true] %s8073_s9 }
 0x516   : > { %s9408_s24 = scalar_lea.vmem %s11031_s9, %s11017_s6  ;;  %s9412_s29 = sshll.u32 %s9498_s4, 4  ;;  %s9413_s29 = int_to_ptr.vmem [resolvable:$false] %s9412_s29 }
 0x517   : > { %p9409_p13 = scmp.ne.s32.totalorder %s11031_s9, %s9408_s24  ;;  %s9414_s15 = scalar_lea.vmem %s9413_s29, 16384 }
 0x518   : > { %p9415_p2 = scmp.lt.s32.totalorder %s11031_s9, %s9413_s29  ;;  %p9416_p3 = scmp.lt.s32.totalorder %s9414_s15, %s9408_s24 }
 0x519   : > { %p9410_p1 = pnand %p9409_p13, %p9241_p9 }
 0x51a   : > { %p9417_p5 = por %p9416_p3, %p9415_p2 }
 0x51b   : > { %p9411_p12 = pneg %p9410_p1 }
 0x51d   : > { %p9418_p4 = pnand %p9417_p5, %p9411_p12 }
 0x51f   : > { %9421 = shalt.err (!%p9418_p4)
}
 0x520   : > { %s9422_s5 = scalar_lea.hbm %s11027_s23, %s11017_s6  ;;  %s9426_s11 = scalar_lea.hbm %s11085_s3, 24064 }
 0x521   : > { %p9423_p0 = scmp.ne.s32.totalorder %s11027_s23, %s9422_s5  ;;  %p9427_p10 = scmp.lt.s32.totalorder %s11027_s23, %s11085_s3 }
 0x522   : > { %p9428_p8 = scmp.lt.s32.totalorder %s9426_s11, %s9422_s5 }
 0x523   : > { %p9424_p6 = pnand %p9423_p0, %p9241_p9 }
 0x524   : > { %p9429_p13 = por %p9428_p8, %p9427_p10 }
 0x525   : > { %p9425_p7 = pneg %p9424_p6 }
 0x527   : > { %p9430_p1 = pnand %p9429_p13, %p9425_p7 }
 0x529   : > { %9433 = shalt.err (!%p9430_p1)
}
 0x52a   : > { %s9499_s25 = smov 4096   ;;  %s9500_s10 = smov 12032  }
 0x52b   : > { %8079 = dma.vmem_to_hbm [thread:$0]  (%p9241_p9), %s11031_s9, %s11017_s6, %s11027_s23, %s8050_s18, %s9499_s25, %s9500_s10, %s9243_s1  }
 0x52c PF: > { %p9270_p12 = scmp.ge.s32.totalorder %s9492_s17, 2  ;;  %s8088_s22 = sand.u32 1, %s9472_s12  }
 0x52d   : > { %s8089_s24 = scalar_lea.sflag [#allocation4], %s8088_s22 }
 0x52e   : > { %p9266_p2 = pnand %p9270_p12, %p9579_p11 }
 0x530   : > { %p9267_p3 = pneg %p9266_p2 }
 0x532   : > { %9467 = dma.done.wait (%p9267_p3), %s8089_s24, 8192  }
 0x533   : > { %9469 = vsyncadd (%p9267_p3), %s8089_s24, 4294959104  ;;  %s22_s17 = sadd.s32 1, %s9492_s17   ;;  %s11094_s12 = smov %s9476_s13 }
 0x534   : > { %p19_p5 = scmp.ge.s32.totalorder %s22_s17, 5   ;;  %s11095_s13 = smov %s9480_s14 }
 0x535   : > { %s11096_s14 = smov %s9577_s26  ;;  %s11097_s15 = smov %s9488_s16 }
 0x536   : > { %s11098_s16 = smov %s11100_s20  ;;  %21 = sbr.rel (!%p19_p5) target bundleno = 10 (0xa), region = 93 }
 0x53b   :  { %8094 = vsyncpa [#allocation3], 1 }
 0x53c   :  { %8096 = vsyncpa [#allocation3 + $0x1], 1 }
 0x53d   :  { %8097 = vsyncpa [#allocation6], 1 }
 0x53e   :  { %8099 = vsyncpa [#allocation6 + $0x1], 1 }
 0x53f   :  { %8100 = vsyncpa [#allocation4], 1 }
 0x540   :  { %8102 = vsyncpa [#allocation4 + $0x1], 1 }

</bundles_post_ra>
